<compile_context>
chip_gen: v6e
topology: v6e:2x2x1
jax: 0.10.0
libtpu: 0.0.40
codegen_flags: <defaults>
</compile_context>

<pallas_src>
import math
import functools

import jax
import jax.numpy as jnp
from jax import lax
from jax.experimental import pallas as pl
from jax.experimental.pallas import tpu as pltpu

TWO_PI = 2.0 * math.pi
HALF_PI = 0.5 * math.pi

_LANES = 512            # lane-dense slab width (multiple of 128)
_MAX_BLOCK_ROWS = 512   # 512 x 512 f32 = 1 MiB / block; 2x(in+out) ~ 4 MiB


def _round_up(v, m):
    return ((v + m - 1) // m) * m


def _row_pack(dtype):
    # Sublane packing of the I/O dtype: f32 -> 8, bf16/f16 -> 16, int8/fp8 -> 32.
    return max(8, 32 // jnp.dtype(dtype).itemsize)


def _periodic_kernel(a_ref, p_ref, c_ref, x_ref, o_ref, *,
                     n_nodes, block_rows, chunk_rows):
    """One (block_rows, _LANES) tile: out = sum_i c_i * sin(a_i*x + p_i).

    a_ref, p_ref, c_ref: (n_nodes,) float32 in SMEM.
    The block is swept in (chunk_rows, _LANES) sub-chunks; each chunk keeps
    x + two accumulators + one term temp live (<~40 vregs at chunk_rows=16).
    """
    # Hoist SMEM scalar reads: loop-invariant across chunks.
    a = [a_ref[i] for i in range(n_nodes)]
    p = [p_ref[i] for i in range(n_nodes)]
    c = [c_ref[i] for i in range(n_nodes)]

    n_chunks = block_rows // chunk_rows

    def chunk_body(j, carry):
        r = pl.multiple_of(j * chunk_rows, chunk_rows)
        xc = x_ref[pl.ds(r, chunk_rows), :].astype(jnp.float32)
        # Dual accumulators (even nodes -> acc0, odd -> acc1) break the
        # 10-deep serial VALU add dependence.
        acc0 = c[0] * jnp.sin(a[0] * xc + p[0])
        acc1 = c[1] * jnp.sin(a[1] * xc + p[1]) if n_nodes > 1 else None
        for i in range(2, n_nodes):            # n_nodes is small: unroll
            term = c[i] * jnp.sin(a[i] * xc + p[i])
            if i % 2 == 0:
                acc0 = acc0 + term
            else:
                acc1 = acc1 + term
        out = acc0 if acc1 is None else acc0 + acc1
        o_ref[pl.ds(r, chunk_rows), :] = out.astype(o_ref.dtype)
        return carry

    if n_chunks == 1:
        chunk_body(0, 0)
    elif n_chunks <= 4:
        # Full unroll: gives the LLO scheduler cross-chunk visibility.
        for j in range(n_chunks):
            chunk_body(j, 0)
    else:
        # Partial unroll: interleave EUP work of adjacent chunks without
        # blowing the vreg budget.
        lax.fori_loop(0, n_chunks, chunk_body, 0, unroll=2)


def periodic_nn_activation_conditioned(x, fc1_weight, fc1_bias, conditional_params):
    """JAX/Pallas forward matching PeriodicNNActivationConditioned.forward.

    x:                  arbitrary-shaped float array (output has same shape/dtype).
    fc1_weight:         (n_nodes, 1)  -- nn.Linear(1, n_nodes).weight
    fc1_bias:           (n_nodes,)    -- nn.Linear(1, n_nodes).bias
    conditional_params: [fc2_weight (1, n_nodes) or (1, 1, n_nodes),
                         frequencies (n_nodes,) or (1, n_nodes)]
    """
    fc2_weight, frequencies = conditional_params
    if fc2_weight.ndim == 3:
        fc2_weight = fc2_weight[0]
    if frequencies.ndim == 2:
        frequencies = frequencies[0]

    n_nodes = fc1_weight.shape[0]
    w1 = fc1_weight[:, 0].astype(jnp.float32)       # (N,)
    b1 = fc1_bias.astype(jnp.float32)               # (N,)
    f = frequencies.astype(jnp.float32)             # (N,)

    # Fold constants: sin(2*pi*f*(w1*x + b1)) -> sin(a*x + p); cos = sin(+pi/2).
    a = TWO_PI * f * w1                                              # (N,)
    phase = (jnp.arange(n_nodes) % 2).astype(jnp.float32) * HALF_PI  # 0 / pi/2
    p = TWO_PI * f * b1 + phase                                      # (N,)
    c = fc2_weight[0].astype(jnp.float32)                            # (N,)

    orig_shape = x.shape
    orig_dtype = x.dtype
    flat = x.reshape(-1)
    m = flat.shape[0]

    # Tiling: lane-dense (rows, _LANES) slab. Chunk/block rows respect the
    # dtype sublane pack; block_rows targets >= 4 grid steps (>= 2 per v7x
    # TensorCore) while staying within every generation's VMEM budget.
    pack = _row_pack(orig_dtype)
    rows = -(-m // _LANES)

    chunk_rows = max(16, pack)
    if rows <= chunk_rows:
        block_rows = max(pack, _round_up(rows, pack))
        chunk_rows = block_rows
    else:
        target = -(-rows // 4)
        block_rows = max(chunk_rows,
                         min(_MAX_BLOCK_ROWS, _round_up(target, chunk_rows)))

    rows_pad = _round_up(rows, block_rows)
    total = rows_pad * _LANES

    if total == m:
        x2d = flat.reshape(rows_pad, _LANES)          # no pad copy needed
    else:
        x2d = jnp.pad(flat, (0, total - m)).reshape(rows_pad, _LANES)

    smem_spec = pl.BlockSpec(memory_space=pltpu.MemorySpace.SMEM)
    itemsize = jnp.dtype(orig_dtype).itemsize
    cost = pl.CostEstimate(
        flops=4 * m * n_nodes,
        transcendentals=m * n_nodes,
        bytes_accessed=2 * m * itemsize,
    )

    out2d = pl.pallas_call(
        functools.partial(_periodic_kernel, n_nodes=n_nodes,
                          block_rows=block_rows, chunk_rows=chunk_rows),
        out_shape=jax.ShapeDtypeStruct((rows_pad, _LANES), orig_dtype),
        grid=(rows_pad // block_rows,),
        in_specs=[
            smem_spec,  # a  (folded slope)
            smem_spec,  # p  (folded phase, +pi/2 on odd nodes)
            smem_spec,  # c  (fc2 row)
            pl.BlockSpec((block_rows, _LANES), lambda i: (i, 0)),
        ],
        out_specs=pl.BlockSpec((block_rows, _LANES), lambda i: (i, 0)),
        compiler_params=pltpu.CompilerParams(dimension_semantics=("parallel",)),
        cost_estimate=cost,
    )(a, p, c, x2d)

    out_flat = out2d.reshape(-1)
    if total != m:
        out_flat = out_flat[:m]
    return out_flat.reshape(orig_shape).astype(orig_dtype)


def _reference(x, fc1_weight, fc1_bias, conditional_params):
    """Pure-JAX reference mirroring the PyTorch forward."""
    fc2_weight, frequencies = conditional_params
    if fc2_weight.ndim == 3:
        fc2_weight = fc2_weight[0]
    if frequencies.ndim == 2:
        frequencies = frequencies[0]
    h = x[..., None] * fc1_weight[:, 0] + fc1_bias            # (..., N)
    arg = TWO_PI * frequencies * h
    n = fc1_weight.shape[0]
    even = (jnp.arange(n) % 2) == 0
    act = jnp.where(even, jnp.sin(arg), jnp.cos(arg))          # (..., N)
    return (act @ fc2_weight.T)[..., 0]                        # squeeze(-1)


if __name__ == "__main__":
    n_nodes = 10  # module default
    key = jax.random.PRNGKey(0)
    k1, k2, k3, k4, k5 = jax.random.split(key, 5)

    # Deterministic synthetic parameters (shapes from __init__ /
    # get_conditional_params_shapes): fc1 is Linear(1, n_nodes);
    # conditional params are [(1, n_nodes), (n_nodes,)].
    fc1_weight = jax.random.uniform(k1, (n_nodes, 1), minval=-1.0, maxval=1.0)
    fc1_bias = jax.random.uniform(k2, (n_nodes,), minval=-1.0, maxval=1.0)
    fc2_weight = jax.random.normal(k3, (1, n_nodes)) / math.sqrt(n_nodes)
    frequencies = jax.random.uniform(k4, (n_nodes,), minval=0.5, maxval=2.0)

    # Small input; forward works on arbitrary shapes.
    x = jax.random.normal(k5, (2, 4, 16, 16), dtype=jnp.float32)

    fwd = jax.jit(periodic_nn_activation_conditioned)
    out = fwd(x, fc1_weight, fc1_bias, [fc2_weight, frequencies])
    out = jax.block_until_ready(out)

    ref = _reference(x, fc1_weight, fc1_bias, [fc2_weight, frequencies])
    assert out.shape == x.shape and out.dtype == x.dtype
    assert jnp.allclose(out, ref, atol=2e-5, rtol=2e-5), "mismatch vs reference"
    print("KERNEL_OK")
</pallas_src>

<mosaic_0001>
module attributes {stable_mosaic.version = 11 : i64} {
  func.func @_periodic_kernel(%arg0: i32, %arg1: memref<10xf32, #tpu.memory_space<smem>>, %arg2: memref<10xf32, #tpu.memory_space<smem>>, %arg3: memref<10xf32, #tpu.memory_space<smem>>, %arg4: memref<8x512xf32, #tpu.memory_space<vmem>>, %arg5: memref<8x512xf32, #tpu.memory_space<vmem>>) attributes {dimension_semantics = [#tpu.dimension_semantics<parallel>], iteration_bounds = array<i64: 1>, scalar_prefetch = 0 : i64, scratch_operands = 0 : i64, tpu.core_type = #tpu.core_type<tc>, window_params = [{transform_indices = @transform_0, window_bounds = array<i64: 10>}, {transform_indices = @transform_1, window_bounds = array<i64: 10>}, {transform_indices = @transform_2, window_bounds = array<i64: 10>}, {transform_indices = @transform_3, window_bounds = array<i64: 8, 512>}, {transform_indices = @transform_4, window_bounds = array<i64: 8, 512>}]} {
    %c0 = arith.constant 0 : index
    %0 = memref.load %arg1[%c0] : memref<10xf32, #tpu.memory_space<smem>>
    %c1 = arith.constant 1 : index
    %1 = memref.load %arg1[%c1] : memref<10xf32, #tpu.memory_space<smem>>
    %c2 = arith.constant 2 : index
    %2 = memref.load %arg1[%c2] : memref<10xf32, #tpu.memory_space<smem>>
    %c3 = arith.constant 3 : index
    %3 = memref.load %arg1[%c3] : memref<10xf32, #tpu.memory_space<smem>>
    %c4 = arith.constant 4 : index
    %4 = memref.load %arg1[%c4] : memref<10xf32, #tpu.memory_space<smem>>
    %c5 = arith.constant 5 : index
    %5 = memref.load %arg1[%c5] : memref<10xf32, #tpu.memory_space<smem>>
    %c6 = arith.constant 6 : index
    %6 = memref.load %arg1[%c6] : memref<10xf32, #tpu.memory_space<smem>>
    %c7 = arith.constant 7 : index
    %7 = memref.load %arg1[%c7] : memref<10xf32, #tpu.memory_space<smem>>
    %c8 = arith.constant 8 : index
    %8 = memref.load %arg1[%c8] : memref<10xf32, #tpu.memory_space<smem>>
    %c9 = arith.constant 9 : index
    %9 = memref.load %arg1[%c9] : memref<10xf32, #tpu.memory_space<smem>>
    %c0_0 = arith.constant 0 : index
    %10 = memref.load %arg2[%c0_0] : memref<10xf32, #tpu.memory_space<smem>>
    %c1_1 = arith.constant 1 : index
    %11 = memref.load %arg2[%c1_1] : memref<10xf32, #tpu.memory_space<smem>>
    %c2_2 = arith.constant 2 : index
    %12 = memref.load %arg2[%c2_2] : memref<10xf32, #tpu.memory_space<smem>>
    %c3_3 = arith.constant 3 : index
    %13 = memref.load %arg2[%c3_3] : memref<10xf32, #tpu.memory_space<smem>>
    %c4_4 = arith.constant 4 : index
    %14 = memref.load %arg2[%c4_4] : memref<10xf32, #tpu.memory_space<smem>>
    %c5_5 = arith.constant 5 : index
    %15 = memref.load %arg2[%c5_5] : memref<10xf32, #tpu.memory_space<smem>>
    %c6_6 = arith.constant 6 : index
    %16 = memref.load %arg2[%c6_6] : memref<10xf32, #tpu.memory_space<smem>>
    %c7_7 = arith.constant 7 : index
    %17 = memref.load %arg2[%c7_7] : memref<10xf32, #tpu.memory_space<smem>>
    %c8_8 = arith.constant 8 : index
    %18 = memref.load %arg2[%c8_8] : memref<10xf32, #tpu.memory_space<smem>>
    %c9_9 = arith.constant 9 : index
    %19 = memref.load %arg2[%c9_9] : memref<10xf32, #tpu.memory_space<smem>>
    %c0_10 = arith.constant 0 : index
    %20 = memref.load %arg3[%c0_10] : memref<10xf32, #tpu.memory_space<smem>>
    %c1_11 = arith.constant 1 : index
    %21 = memref.load %arg3[%c1_11] : memref<10xf32, #tpu.memory_space<smem>>
    %c2_12 = arith.constant 2 : index
    %22 = memref.load %arg3[%c2_12] : memref<10xf32, #tpu.memory_space<smem>>
    %c3_13 = arith.constant 3 : index
    %23 = memref.load %arg3[%c3_13] : memref<10xf32, #tpu.memory_space<smem>>
    %c4_14 = arith.constant 4 : index
    %24 = memref.load %arg3[%c4_14] : memref<10xf32, #tpu.memory_space<smem>>
    %c5_15 = arith.constant 5 : index
    %25 = memref.load %arg3[%c5_15] : memref<10xf32, #tpu.memory_space<smem>>
    %c6_16 = arith.constant 6 : index
    %26 = memref.load %arg3[%c6_16] : memref<10xf32, #tpu.memory_space<smem>>
    %c7_17 = arith.constant 7 : index
    %27 = memref.load %arg3[%c7_17] : memref<10xf32, #tpu.memory_space<smem>>
    %c8_18 = arith.constant 8 : index
    %28 = memref.load %arg3[%c8_18] : memref<10xf32, #tpu.memory_space<smem>>
    %c9_19 = arith.constant 9 : index
    %29 = memref.load %arg3[%c9_19] : memref<10xf32, #tpu.memory_space<smem>>
    %c0_i32 = arith.constant 0 : i32
    %30 = tpu.assume_multiple %c0_i32, 8 : i32
    %31 = arith.index_cast %30 : i32 to index
    %c0_20 = arith.constant 0 : index
    %32 = vector.load %arg4[%31, %c0_20] : memref<8x512xf32, #tpu.memory_space<vmem>>, vector<8x512xf32>
    %33 = vector.broadcast %0 : f32 to vector<8x512xf32>
    %34 = arith.mulf %33, %32 : vector<8x512xf32>
    %35 = vector.broadcast %10 : f32 to vector<8x512xf32>
    %36 = arith.addf %34, %35 : vector<8x512xf32>
    %37 = math.sin %36 : vector<8x512xf32>
    %38 = vector.broadcast %20 : f32 to vector<8x512xf32>
    %39 = arith.mulf %38, %37 : vector<8x512xf32>
    %40 = vector.broadcast %1 : f32 to vector<8x512xf32>
    %41 = arith.mulf %40, %32 : vector<8x512xf32>
    %42 = vector.broadcast %11 : f32 to vector<8x512xf32>
    %43 = arith.addf %41, %42 : vector<8x512xf32>
    %44 = math.sin %43 : vector<8x512xf32>
    %45 = vector.broadcast %21 : f32 to vector<8x512xf32>
    %46 = arith.mulf %45, %44 : vector<8x512xf32>
    %47 = vector.broadcast %2 : f32 to vector<8x512xf32>
    %48 = arith.mulf %47, %32 : vector<8x512xf32>
    %49 = vector.broadcast %12 : f32 to vector<8x512xf32>
    %50 = arith.addf %48, %49 : vector<8x512xf32>
    %51 = math.sin %50 : vector<8x512xf32>
    %52 = vector.broadcast %22 : f32 to vector<8x512xf32>
    %53 = arith.mulf %52, %51 : vector<8x512xf32>
    %54 = arith.addf %39, %53 : vector<8x512xf32>
    %55 = vector.broadcast %3 : f32 to vector<8x512xf32>
    %56 = arith.mulf %55, %32 : vector<8x512xf32>
    %57 = vector.broadcast %13 : f32 to vector<8x512xf32>
    %58 = arith.addf %56, %57 : vector<8x512xf32>
    %59 = math.sin %58 : vector<8x512xf32>
    %60 = vector.broadcast %23 : f32 to vector<8x512xf32>
    %61 = arith.mulf %60, %59 : vector<8x512xf32>
    %62 = arith.addf %46, %61 : vector<8x512xf32>
    %63 = vector.broadcast %4 : f32 to vector<8x512xf32>
    %64 = arith.mulf %63, %32 : vector<8x512xf32>
    %65 = vector.broadcast %14 : f32 to vector<8x512xf32>
    %66 = arith.addf %64, %65 : vector<8x512xf32>
    %67 = math.sin %66 : vector<8x512xf32>
    %68 = vector.broadcast %24 : f32 to vector<8x512xf32>
    %69 = arith.mulf %68, %67 : vector<8x512xf32>
    %70 = arith.addf %54, %69 : vector<8x512xf32>
    %71 = vector.broadcast %5 : f32 to vector<8x512xf32>
    %72 = arith.mulf %71, %32 : vector<8x512xf32>
    %73 = vector.broadcast %15 : f32 to vector<8x512xf32>
    %74 = arith.addf %72, %73 : vector<8x512xf32>
    %75 = math.sin %74 : vector<8x512xf32>
    %76 = vector.broadcast %25 : f32 to vector<8x512xf32>
    %77 = arith.mulf %76, %75 : vector<8x512xf32>
    %78 = arith.addf %62, %77 : vector<8x512xf32>
    %79 = vector.broadcast %6 : f32 to vector<8x512xf32>
    %80 = arith.mulf %79, %32 : vector<8x512xf32>
    %81 = vector.broadcast %16 : f32 to vector<8x512xf32>
    %82 = arith.addf %80, %81 : vector<8x512xf32>
    %83 = math.sin %82 : vector<8x512xf32>
    %84 = vector.broadcast %26 : f32 to vector<8x512xf32>
    %85 = arith.mulf %84, %83 : vector<8x512xf32>
    %86 = arith.addf %70, %85 : vector<8x512xf32>
    %87 = vector.broadcast %7 : f32 to vector<8x512xf32>
    %88 = arith.mulf %87, %32 : vector<8x512xf32>
    %89 = vector.broadcast %17 : f32 to vector<8x512xf32>
    %90 = arith.addf %88, %89 : vector<8x512xf32>
    %91 = math.sin %90 : vector<8x512xf32>
    %92 = vector.broadcast %27 : f32 to vector<8x512xf32>
    %93 = arith.mulf %92, %91 : vector<8x512xf32>
    %94 = arith.addf %78, %93 : vector<8x512xf32>
    %95 = vector.broadcast %8 : f32 to vector<8x512xf32>
    %96 = arith.mulf %95, %32 : vector<8x512xf32>
    %97 = vector.broadcast %18 : f32 to vector<8x512xf32>
    %98 = arith.addf %96, %97 : vector<8x512xf32>
    %99 = math.sin %98 : vector<8x512xf32>
    %100 = vector.broadcast %28 : f32 to vector<8x512xf32>
    %101 = arith.mulf %100, %99 : vector<8x512xf32>
    %102 = arith.addf %86, %101 : vector<8x512xf32>
    %103 = vector.broadcast %9 : f32 to vector<8x512xf32>
    %104 = arith.mulf %103, %32 : vector<8x512xf32>
    %105 = vector.broadcast %19 : f32 to vector<8x512xf32>
    %106 = arith.addf %104, %105 : vector<8x512xf32>
    %107 = math.sin %106 : vector<8x512xf32>
    %108 = vector.broadcast %29 : f32 to vector<8x512xf32>
    %109 = arith.mulf %108, %107 : vector<8x512xf32>
    %110 = arith.addf %94, %109 : vector<8x512xf32>
    %111 = arith.addf %102, %110 : vector<8x512xf32>
    %112 = arith.index_cast %30 : i32 to index
    %c0_21 = arith.constant 0 : index
    %113 = vector.load %arg5[%112, %c0_21] : memref<8x512xf32, #tpu.memory_space<vmem>>, vector<8x512xf32>
    tpu.vector_store %arg5[%112, %c0_21], %111 {strides = array<i32>} : memref<8x512xf32, #tpu.memory_space<vmem>>, vector<8x512xf32>,
    return
  }
  func.func @transform_0(%arg0: i32) -> i32 {
    %c0_i32 = arith.constant 0 : i32
    %c0_i32_0 = arith.constant 0 : i32
    return %c0_i32 : i32
  }
  func.func @transform_1(%arg0: i32) -> i32 {
    %c0_i32 = arith.constant 0 : i32
    %c0_i32_0 = arith.constant 0 : i32
    return %c0_i32 : i32
  }
  func.func @transform_2(%arg0: i32) -> i32 {
    %c0_i32 = arith.constant 0 : i32
    %c0_i32_0 = arith.constant 0 : i32
    return %c0_i32 : i32
  }
  func.func @transform_3(%arg0: i32) -> (i32, i32) {
    %c0_i32 = arith.constant 0 : i32
    %c0_i32_0 = arith.constant 0 : i32
    return %arg0, %c0_i32 : i32, i32
  }
  func.func @transform_4(%arg0: i32) -> (i32, i32) {
    %c0_i32 = arith.constant 0 : i32
    %c0_i32_0 = arith.constant 0 : i32
    return %arg0, %c0_i32 : i32, i32
  }
}

</mosaic_0001>

<bundles_post_ra>
// kernel: periodic_nn_activation_conditioned.1
= control target key start
LH: loop header
LB: loop body
LE: loop exit
PB: predicated region body
PF: predicated region fallthrough
CT: control target
= control target key end

     0   :  { %9 = vsyncpa [#allocation3], 0  ;;  %s10681_s0 = inlined_call_operand.vmem [shape: f32[10], index: 0, kind: input, shape index: {}]   ;;  %s10682_s1 = inlined_call_operand.vmem [shape: f32[10], index: 1, kind: input, shape index: {}]   ;;  %s10683_s2 = inlined_call_operand.vmem [shape: f32[10], index: 2, kind: input, shape index: {}]   ;;  %s10684_s3 = inlined_call_operand.vmem [shape: f32[8,512], index: 3, kind: input, shape index: {}]   ;;  %s10685_s4 = inlined_call_operand.vmem [shape: f32[8,512], index: 4, kind: output, shape index: {}]  }
   0x1   :  { %10 = vsyncpa [#allocation5], 0  ;;  %s27_s17 = sshll.u32 %s10682_s1, 4  ;;  %s17_s20 = sshll.u32 %s10681_s0, 4  ;;  %s28_s17 = int_to_ptr.vmem [resolvable:$true] %s27_s17  ;;  %s18_s20 = int_to_ptr.vmem [resolvable:$true] %s17_s20 }
   0x2   :  { %s4980_s21 = scalar_lea.vmem %s28_s17, 16  ;;  %p4985_p1 = scmp.lt.s32.totalorder %s28_s17, %s28_s17 }
   0x3   :  { %p4981_p0 = scmp.ne.s32.totalorder %s28_s17, %s4980_s21  ;;  %p4986_p2 = scmp.lt.s32.totalorder %s4980_s21, %s4980_s21 }
   0x5   :  { %p4987_p3 = por %p4986_p2, %p4985_p1 }
   0x7   :  { %p4988_p4 = pnand %p4987_p3, %p4981_p0 }
   0x9   :  { %4991 = shalt.err (!%p4988_p4)
}
   0xa   :  { %s5020_s22 = smov [#allocation4]   ;;  %s4992_s23 = scalar_lea.vmem %s18_s20, 16 }
   0xb   :  { %30 = dma.vmem_to_smem %s28_s17, 16, %s5020_s22, [#allocation5]  }
   0xc   :  { %p4993_p5 = scmp.ne.s32.totalorder %s18_s20, %s4992_s23  ;;  %p4997_p6 = scmp.lt.s32.totalorder %s18_s20, %s18_s20 }
   0xd   :  { %p4998_p7 = scmp.lt.s32.totalorder %s4992_s23, %s4992_s23 }
   0xf   :  { %p4999_p8 = por %p4998_p7, %p4997_p6 }
  0x11   :  { %p5000_p9 = pnand %p4999_p8, %p4993_p5 }
  0x13   :  { %5003 = shalt.err (!%p5000_p9)
}
  0x14   :  { %s5021_s1 = smov [#allocation2]   ;;  %s37_s25 = sshll.u32 %s10683_s2, 4  ;;  %s38_s25 = int_to_ptr.vmem [resolvable:$true] %s37_s25 }
  0x15   :  { %20 = dma.vmem_to_smem %s18_s20, 16, %s5021_s1, [#allocation3]  }
  0x16   :  { %s5004_s26 = scalar_lea.vmem %s38_s25, 16  ;;  %p5009_p11 = scmp.lt.s32.totalorder %s38_s25, %s38_s25 }
  0x17   :  { %p5005_p10 = scmp.ne.s32.totalorder %s38_s25, %s5004_s26  ;;  %p5010_p12 = scmp.lt.s32.totalorder %s5004_s26, %s5004_s26 }
  0x19   :  { %p5011_p13 = por %p5010_p12, %p5009_p11 }
  0x1b   :  { %p5012_p0 = pnand %p5011_p13, %p5005_p10 }
  0x1d   :  { %5015 = shalt.err (!%p5012_p0)
}
  0x1e   :  { %s5022_s27 = smov [#allocation6]  }
  0x1f   :  { %40 = dma.vmem_to_smem %s38_s25, 16, %s5022_s27, [#allocation5]  }
  0x20   :  { %5016 = dma.done.wait [#allocation3], 16  }
  0x21   :  { %5017 = vsyncadd [#allocation3], 4294967280 }
  0x22   :  { %5018 = dma.done.wait [#allocation5], 32  }
  0x23   :  { %5019 = vsyncadd [#allocation5], 4294967264 }
  0x24   :  { %52 = sfence }
  0x25   :  { %s53_s28 = sld [smem:[#allocation2]]  ;;  %v5066_v0 = vld [vmem:[%s10684_s3] sm:$0xff]  ;;  %v5081_v6 = vld [vmem:[%s10684_s3 + $0x8] sm:$0xff]  ;;  %v10699_v20 = vmov 2102212464   ;;  %v5106_v34 = vld [vmem:[%s10684_s3 + $0x10] sm:$0xff] }
  0x26   :  { %s63_s29 = sld [smem:[#allocation4]]  ;;  %v10697_v22 = vmov 920167782   ;;  %v10702_v27 = vmov 683565275  }
  0x27   :  { %v10693_v29 = vmov 2475754826   ;;  %v10688_v31 = vmov 2131351028   ;;  %v10695_v38 = vmov 1326507024  }
  0x28   :  { %s4448_s11 = sld [smem:[#allocation2 + $0x1]] }
  0x29   :  { %s4457_s12 = sld [smem:[#allocation4 + $0x1]] }
  0x2a   :  { %s5620_s13 = sld [smem:[#allocation2 + $0x2]] }
  0x2b   :  { %v5068_v1 = vstv %s53_s28  ;;  %s5645_s14 = sld [smem:[#allocation4 + $0x2]] }
  0x2c   :  { %v91_v2 = vmul.f32 %v5068_v1, %v5066_v0  ;;  %v5072_v3 = vstv %s63_s29  ;;  %v92_v7 = vmul.f32 %v5068_v1, %v5081_v6  ;;  %v93_v42 = vmul.f32 %v5068_v1, %v5106_v34  ;;  %s5750_s15 = sld [smem:[#allocation6]] }
  0x2d   :  { %s6294_s22 = sld [smem:[#allocation2 + $0x3]] }
  0x2e   :  { %v5075_v4 = vadd.f32 %v5072_v3, %v91_v2  ;;  %v5086_v9 = vadd.f32 %v5072_v3, %v92_v7  ;;  %v5124_v50 = vadd.f32 %v5072_v3, %v93_v42  ;;  %s6316_s23 = sld [smem:[#allocation4 + $0x3]] }
  0x2f   :  { %s6476_s24 = sld [smem:[#allocation6 + $0x1]] }
  0x30   :  { %v103_v5 = vand.u32 2139095040, %v5075_v4  ;;  %v207_v12 = vand.u32 2139095040, %v5086_v9  ;;  %v100_v19 = vand.u32 2147483647, %v5075_v4  ;;  %v204_v55 = vand.u32 2147483647, %v5086_v9 }
  0x31   :  { %s6734_s25 = sld [smem:[#allocation2 + $0x4]] }
  0x32   :  { %v104_v8 = vshrl.u32 %v103_v5, 23  ;;  %v208_v13 = vshrl.u32 %v207_v12, 23  ;;  %v107_v24 = vand.u32 8388607, %v100_v19  ;;  %v211_v12 = vand.u32 8388607, %v204_v55 }
  0x33   :  { %s6903_s26 = sld [smem:[#allocation4 + $0x4]] }
  0x34   :  { %v4475_v10 = vadd.s32 4294967169, %v104_v8  ;;  %v4479_v15 = vadd.s32 4294967169, %v208_v13  ;;  %v108_v43 = vor.u32 8388608, %v107_v24  ;;  %s6991_s27 = sld [smem:[#allocation6 + $0x2]] }
  0x35   :  { %s7578_s7 = sld [smem:[#allocation2 + $0x5]] }
  0x36   :  { %v110_v11 = vadd.s32 1, %v4475_v10  ;;  %v214_v17 = vadd.s32 1, %v4479_v15  ;;  %v5133_v54 = vshll.u32 %v108_v43, 8  ;;  %v5191_v43 = vld [vmem:[%s10684_s3 + $0x18] sm:$0xff]  ;;  %s7593_s8 = sld [smem:[#allocation4 + $0x5]] }
  0x37   :  { %s8837_s21 = sld [smem:[#allocation2 + $0x7]] }
  0x38   :  { %vm111_vm0 = vcmp.gt.s32.totalorder %v110_v11, 0  ;;  %vm215_vm1 = vcmp.gt.s32.totalorder %v214_v17, 0  ;;  %s9860_s6 = sld [smem:[#allocation6 + $0x7]] }
  0x39   :  { %v112_v14 = vsel %vm111_vm0, %v110_v11, 0  ;;  %v216_v26 = vsel %vm215_vm1, %v214_v17, 0 }
  0x3a   :  { %v114_v16 = vand.u32 31, %v112_v14  ;;  %v5097_v25 = vshrl.u32 %v112_v14, 5  ;;  %v218_v41 = vand.u32 31, %v216_v26  ;;  %v5140_v59 = vshrl.u32 %v216_v26, 5 }
  0x3c   :  { %v5089_v18 = vsub.s32 32, %v114_v16  ;;  %v126_v21 = vshll.u32 %v10699_v20, %v114_v16  ;;  %v117_v28 = vshll.u32 %v10702_v27, %v114_v16  ;;  %v120_v30 = vshll.u32 %v10693_v29, %v114_v16 }
  0x3d   :  { %v123_v32 = vshll.u32 %v10688_v31, %v114_v16  ;;  %v129_v33 = vshll.u32 %v10697_v22, %v114_v16  ;;  %vm135_vm2 = vcmp.lt.s32.totalorder %v5097_v25, 4  ;;  %vm132_vm3 = vcmp.lt.s32.totalorder %v5097_v25, 1 }
  0x3e   :  { %v127_v23 = vshrl.u32 %v10697_v22, %v5089_v18  ;;  %v118_v35 = vshrl.u32 %v10693_v29, %v5089_v18  ;;  %v121_v36 = vshrl.u32 %v10688_v31, %v5089_v18  ;;  %v124_v37 = vshrl.u32 %v10699_v20, %v5089_v18 }
  0x3f   :  { %v130_v39 = vshrl.u32 %v10695_v38, %v5089_v18  ;;  %vm134_vm4 = vcmp.lt.s32.totalorder %v5097_v25, 3  ;;  %v219_v49 = vsub.s32 32, %v218_v41  ;;  %vm133_vm5 = vcmp.lt.s32.totalorder %v5097_v25, 2 }
  0x40   :  { %v128_v40 = vor.u32 %v127_v23, %v126_v21  ;;  %v119_v44 = vor.u32 %v118_v35, %v117_v28  ;;  %v122_v45 = vor.u32 %v121_v36, %v120_v30  ;;  %v125_v46 = vor.u32 %v124_v37, %v123_v32 }
  0x41   :  { %v131_v47 = vor.u32 %v130_v39, %v129_v33  ;;  %v230_v56 = vshll.u32 %v10699_v20, %v218_v41  ;;  %v231_v57 = vshrl.u32 %v10697_v22, %v219_v49  ;;  %v233_v60 = vshll.u32 %v10697_v22, %v218_v41 }
  0x42   :  { %v141_v48 = vsel %vm135_vm2, %v128_v40, 920167782  ;;  %v140_v51 = vsel %vm132_vm3, %v119_v44, %v122_v45  ;;  %v144_v58 = vsel %vm132_vm3, %v122_v45, %v125_v46  ;;  %v234_v61 = vshrl.u32 %v10695_v38, %v219_v49 }
  0x43   :  { %v142_v52 = vsel %vm134_vm4, %v125_v46, %v141_v48  ;;  %v145_v53 = vsel %vm135_vm2, %v131_v47, 1326507024  ;;  %v221_v2 = vshll.u32 %v10702_v27, %v218_v41  ;;  %v222_v5 = vshrl.u32 %v10693_v29, %v219_v49 }
  0x44   :  { %v143_v62 = vsel %vm133_vm5, %v140_v51, %v142_v52  ;;  %v146_v63 = vsel %vm134_vm4, %v128_v40, %v145_v53  ;;  %v224_v7 = vshll.u32 %v10693_v29, %v218_v41  ;;  %v225_v8 = vshrl.u32 %v10688_v31, %v219_v49 }
  0x45   :  { %v227_v10 = vshll.u32 %v10688_v31, %v218_v41  ;;  %v228_v11 = vshrl.u32 %v10699_v20, %v219_v49  ;;  %v232_v13 = vor.u32 %v231_v57, %v230_v56  ;;  %v235_v14 = vor.u32 %v234_v61, %v233_v60 }
  0x46   :  { %vm239_vm6 = vcmp.lt.s32.totalorder %v5140_v59, 4  ;;  %v147_v15 = vsel %vm133_vm5, %v144_v58, %v146_v63  ;;  %v5160_v16 = vmul.u32.u64.low %v5133_v54, %v143_v62  ;;  %v5161_v17 = vmul.u32.u64.high %v5133_v54, %v143_v62, %v5160_v16 }
  0x47   :  { %v311_v21 = vand.u32 2139095040, %v5124_v50  ;;  %v223_v23 = vor.u32 %v222_v5, %v221_v2  ;;  %v226_v24 = vor.u32 %v225_v8, %v224_v7  ;;  %v229_v26 = vor.u32 %v228_v11, %v227_v10 }
  0x48   :  { %v212_v28 = vor.u32 8388608, %v211_v12  ;;  %vm236_vm7 = vcmp.lt.s32.totalorder %v5140_v59, 1  ;;  %vm238_vm8 = vcmp.lt.s32.totalorder %v5140_v59, 3  ;;  %v245_v30 = vsel %vm239_vm6, %v232_v13, 920167782 }
  0x49   :  { %v116_v32 = vshrl.u32 %v10702_v27, %v5089_v18  ;;  %v5172_v33 = vmul.u32.u64.low %v5133_v54, %v147_v15  ;;  %v5173_v35 = vmul.u32.u64.high %v5133_v54, %v147_v15, %v5172_v33  ;;  %v249_v36 = vsel %vm239_vm6, %v235_v14, 1326507024 }
  0x4a   :  { %v137_v37 = vsel %vm135_vm2, %v125_v46, 2102212464  ;;  %v312_v39 = vshrl.u32 %v311_v21, 23  ;;  %vm237_vm9 = vcmp.lt.s32.totalorder %v5140_v59, 2  ;;  %v244_v40 = vsel %vm236_vm7, %v223_v23, %v226_v24 }
  0x4b   :  { %v246_v41 = vsel %vm238_vm8, %v229_v26, %v245_v30  ;;  %v248_v18 = vsel %vm236_vm7, %v226_v24, %v229_v26  ;;  %v250_v42 = vsel %vm238_vm8, %v232_v13, %v249_v36  ;;  %v136_v46 = vsel %vm132_vm3, %v116_v32, %v119_v44 }
  0x4c   :  { %v138_v47 = vsel %vm134_vm4, %v122_v45, %v137_v37  ;;  %v252_v48 = vshll.u32 %v212_v28, 8  ;;  %v247_v51 = vsel %vm237_vm9, %v244_v40, %v246_v41  ;;  %v4483_v52 = vadd.s32 4294967169, %v312_v39 }
  0x4d   :  { %v251_v53 = vsel %vm237_vm9, %v248_v18, %v250_v42  ;;  %v94_v56 = vmul.f32 %v5068_v1, %v5191_v43  ;;  %v139_v57 = vsel %vm133_vm5, %v136_v46, %v138_v47  ;;  %v158_v58 = vadd.s32 1, %v5161_v17 }
  0x4e   :  { %vm157_vm10 = vc.u32 %v5173_v35, %v5160_v16  ;;  %v5208_v44 = vmul.u32.u64.low %v252_v48, %v247_v51  ;;  %v5209_v45 = vmul.u32.u64.high %v252_v48, %v247_v51, %v5208_v44  ;;  %v220_v60 = vshrl.u32 %v10702_v27, %v219_v49 }
  0x4f   :  { %v5213_v61 = vmul.u32.u64.low %v252_v48, %v251_v53  ;;  %v5214_v62 = vmul.u32.u64.high %v252_v48, %v251_v53, %v5213_v61  ;;  %v318_v63 = vadd.s32 1, %v4483_v52  ;;  %v155_v1 = vmul.u32 %v5133_v54, %v139_v57 }
  0x50   :  { %v241_v25 = vsel %vm239_vm6, %v229_v26, 2102212464  ;;  %v5220_v2 = vadd.f32 %v5072_v3, %v94_v56  ;;  %v159_v5 = vsel %vm157_vm10, %v158_v58, %v5161_v17  ;;  %v240_v7 = vsel %vm236_vm7, %v220_v60, %v223_v23 }
  0x51   :  { %v242_v49 = vsel %vm238_vm8, %v226_v24, %v241_v25  ;;  %vm319_vm11 = vcmp.gt.s32.totalorder %v318_v63, 0  ;;  %v160_v8 = vadd.s32 %v159_v5, %v155_v1  ;;  %v262_v11 = vadd.s32 1, %v5209_v45 }
  0x52   :  { %v415_v10 = vand.u32 2139095040, %v5220_v2  ;;  %v243_v54 = vsel %vm237_vm9, %v240_v7, %v242_v49  ;;  %v320_v3 = vsel %vm319_vm11, %v318_v63, 0  ;;  %vm261_vm12 = vc.u32 %v5214_v62, %v5208_v44 }
  0x53   :  { %v161_v12 = vadd.s32 536870912, %v160_v8  ;;  %v259_v13 = vmul.u32 %v252_v48, %v243_v54  ;;  %v322_v14 = vand.u32 31, %v320_v3  ;;  %v263_v17 = vsel %vm261_vm12, %v262_v11, %v5209_v45 }
  0x54   :  { %v416_v15 = vshrl.u32 %v415_v10, 23  ;;  %v5236_v59 = vstv %s4448_s11  ;;  %v10687_v39 = vand.u32 2147483647, %v5124_v50  ;;  %v5244_v40 = vshrl.u32 %v320_v3, 5  ;;  %s7736_s11 = sld [smem:[#allocation6 + $0x3]] }
  0x55   :  { %v5234_v21 = vshrl.u32 %v161_v12, 30  ;;  %v264_v23 = vadd.s32 %v263_v17, %v259_v13  ;;  %v323_v24 = vsub.s32 32, %v322_v14  ;;  %v522_v30 = vmul.f32 %v5236_v59, %v5066_v0 }
  0x56   :  { %v4487_v26 = vadd.s32 4294967169, %v416_v15  ;;  %v337_v33 = vshll.u32 %v10697_v22, %v322_v14  ;;  %v334_v41 = vshll.u32 %v10699_v20, %v322_v14  ;;  %v325_v42 = vshll.u32 %v10702_v27, %v322_v14 }
  0x57   :  { %v163_v28 = vshll.u32 %v5234_v21, 30  ;;  %v265_v32 = vadd.s32 536870912, %v264_v23  ;;  %v338_v36 = vshrl.u32 %v10695_v38, %v323_v24  ;;  %v335_v18 = vshrl.u32 %v10697_v22, %v323_v24 }
  0x58   :  { %v422_v37 = vadd.s32 1, %v4487_v26  ;;  %v328_v46 = vshll.u32 %v10693_v29, %v322_v14  ;;  %v5250_v47 = vstv %s4457_s12  ;;  %v329_v51 = vshrl.u32 %v10688_v31, %v323_v24  ;;  %s8165_s12 = sld [smem:[#allocation2 + $0x6]] }
  0x59   :  { %v5252_v48 = vsub.s32 %v160_v8, %v163_v28  ;;  %v331_v52 = vshll.u32 %v10688_v31, %v322_v14  ;;  %v332_v53 = vshrl.u32 %v10699_v20, %v323_v24  ;;  %v5257_v56 = vshrl.u32 %v265_v32, 30 }
  0x5a   :  { %v326_v57 = vshrl.u32 %v10693_v29, %v323_v24  ;;  %v339_v58 = vor.u32 %v338_v36, %v337_v33  ;;  %vm423_vm13 = vcmp.gt.s32.totalorder %v422_v37, 0  ;;  %v315_v45 = vand.u32 8388607, %v10687_v39 }
  0x5b   :  { %v336_v60 = vor.u32 %v335_v18, %v334_v41  ;;  %vm343_vm14 = vcmp.lt.s32.totalorder %v5244_v40, 4  ;;  %v5264_v61 = vadd.f32 %v5250_v47, %v522_v30  ;;  %vm340_vm15 = vcmp.lt.s32.totalorder %v5244_v40, 1 }
  0x5c   :  { %v166_v63 = vsub.s32 0, %v5252_v48  ;;  %v330_v1 = vor.u32 %v329_v51, %v328_v46  ;;  %v333_v25 = vor.u32 %v332_v53, %v331_v52  ;;  %v424_v5 = vsel %vm423_vm13, %v422_v37, 0 }
  0x5d   :  { %v267_v7 = vshll.u32 %v5257_v56, 30  ;;  %v327_v49 = vor.u32 %v326_v57, %v325_v42  ;;  %vm342_vm0 = vcmp.lt.s32.totalorder %v5244_v40, 3  ;;  %v353_v8 = vsel %vm343_vm14, %v339_v58, 1326507024 }
  0x5e   :  { %v316_v10 = vor.u32 8388608, %v315_v45  ;;  %v349_v54 = vsel %vm343_vm14, %v336_v60, 920167782  ;;  %v534_v11 = vand.u32 2139095040, %v5264_v61  ;;  %v426_v3 = vand.u32 31, %v424_v5 }
  0x5f   :  { %vm341_vm1 = vcmp.lt.s32.totalorder %v5244_v40, 2  ;;  %v352_v12 = vsel %vm340_vm15, %v330_v1, %v333_v25  ;;  %v354_v13 = vsel %vm342_vm0, %v336_v60, %v353_v8  ;;  %v4476_v14 = vmin.u32 %v166_v63, %v5252_v48 }
  0x60   :  { %v5281_v15 = vsub.s32 %v264_v23, %v267_v7  ;;  %v348_v17 = vsel %vm340_vm15, %v327_v49, %v330_v1  ;;  %v350_v26 = vsel %vm342_vm0, %v333_v25, %v349_v54  ;;  %v324_v28 = vshrl.u32 %v10702_v27, %v323_v24 }
  0x61   :  { %v5288_v30 = vshll.u32 %v316_v10, 8  ;;  %v535_v32 = vshrl.u32 %v534_v11, 23  ;;  %v355_v33 = vsel %vm341_vm1, %v352_v12, %v354_v13  ;;  %v5292_v36 = vsub.s32 32, %v426_v3 }
  0x62   :  { %v351_v23 = vsel %vm341_vm1, %v348_v17, %v350_v26  ;;  %v168_v37 = vclz %v4476_v14  ;;  %v270_v41 = vsub.s32 0, %v5281_v15  ;;  %v345_v18 = vsel %vm343_vm14, %v333_v25, 2102212464 }
  0x63   :  { %v10686_v42 = vand.u32 2147483647, %v5220_v2  ;;  %v344_v24 = vsel %vm340_vm15, %v324_v28, %v327_v49  ;;  %v5303_v46 = vmul.u32.u64.low %v5288_v30, %v355_v33  ;;  %v5304_v51 = vmul.u32.u64.high %v5288_v30, %v355_v33, %v5303_v46 }
  0x64   :  { %v4491_v52 = vadd.s32 4294967169, %v535_v32  ;;  %v5307_v53 = vmul.u32.u64.low %v5288_v30, %v351_v23  ;;  %v5308_v57 = vmul.u32.u64.high %v5288_v30, %v351_v23, %v5307_v53  ;;  %v438_v58 = vshll.u32 %v10699_v20, %v426_v3 }
  0x65   :  { %v439_v45 = vshrl.u32 %v10697_v22, %v5292_v36  ;;  %v346_v60 = vsel %vm342_vm0, %v330_v1, %v345_v18  ;;  %v5316_v63 = vshrl.u32 %v424_v5, 5  ;;  %v441_v25 = vshll.u32 %v10697_v22, %v426_v3 }
  0x66   :  { %v442_v7 = vshrl.u32 %v10695_v38, %v5292_v36  ;;  %v4480_v49 = vmin.u32 %v270_v41, %v5281_v15  ;;  %v429_v8 = vshll.u32 %v10702_v27, %v426_v3  ;;  %v430_v10 = vshrl.u32 %v10693_v29, %v5292_v36 }
  0x67   :  { %v432_v54 = vshll.u32 %v10693_v29, %v426_v3  ;;  %v433_v11 = vshrl.u32 %v10688_v31, %v5292_v36  ;;  %v435_v1 = vshll.u32 %v10688_v31, %v426_v3  ;;  %v436_v5 = vshrl.u32 %v10699_v20, %v5292_v36 }
  0x68   :  { %v541_v12 = vadd.s32 1, %v4491_v52  ;;  %v440_v13 = vor.u32 %v439_v45, %v438_v58  ;;  %v419_v14 = vand.u32 8388607, %v10686_v42  ;;  %v443_v17 = vor.u32 %v442_v7, %v441_v25 }
  0x69   :  { %vm447_vm2 = vcmp.lt.s32.totalorder %v5316_v63, 4  ;;  %v4477_v26 = vadd.s32 4294967294, %v168_v37  ;;  %v272_v28 = vclz %v4480_v49  ;;  %v347_v32 = vsel %vm341_vm1, %v344_v24, %v346_v60 }
  0x6a   :  { %v431_v33 = vor.u32 %v430_v10, %v429_v8  ;;  %v434_v23 = vor.u32 %v433_v11, %v432_v54  ;;  %v437_v41 = vor.u32 %v436_v5, %v435_v1  ;;  %vm542_vm3 = vcmp.gt.s32.totalorder %v541_v12, 0 }
  0x6b   :  { %v366_v3 = vadd.s32 1, %v5308_v57  ;;  %vm444_vm4 = vcmp.lt.s32.totalorder %v5316_v63, 1  ;;  %vm446_vm5 = vcmp.lt.s32.totalorder %v5316_v63, 3  ;;  %v453_v18 = vsel %vm447_vm2, %v440_v13, 920167782 }
  0x6c   :  { %vm365_vm6 = vc.u32 %v5304_v51, %v5307_v53  ;;  %v420_v37 = vor.u32 8388608, %v419_v14  ;;  %v457_v40 = vsel %vm447_vm2, %v443_v17, 1326507024  ;;  %vm4478_vm7 = vcmp.lt.s32.totalorder %v4477_v26, 0 }
  0x6d   :  { %v523_v24 = vmul.f32 %v5236_v59, %v5081_v6  ;;  %v543_v46 = vsel %vm542_vm3, %v541_v12, 0  ;;  %v363_v52 = vmul.u32 %v5288_v30, %v347_v32  ;;  %vm445_vm8 = vcmp.lt.s32.totalorder %v5316_v63, 2 }
  0x6e   :  { %v452_v58 = vsel %vm444_vm4, %v431_v33, %v434_v23  ;;  %v454_v45 = vsel %vm446_vm5, %v437_v41, %v453_v18  ;;  %v4481_v60 = vadd.s32 4294967294, %v272_v28  ;;  %v367_v25 = vsel %vm365_vm6, %v366_v3, %v5308_v57 }
  0x6f   :  { %v456_v7 = vsel %vm444_vm4, %v434_v23, %v437_v41  ;;  %v458_v6 = vsel %vm446_vm5, %v440_v13, %v457_v40  ;;  %v5358_v49 = vsel %vm4478_vm7, 0, %v4477_v26  ;;  %v5360_v30 = vshll.u32 %v420_v37, 8 }
  0x70   :  { %v545_v8 = vand.u32 31, %v543_v46  ;;  %v455_v10 = vsel %vm445_vm8, %v452_v58, %v454_v45  ;;  %v524_v54 = vmul.f32 %v5236_v59, %v5106_v34  ;;  %v5366_v11 = vadd.s32 %v367_v25, %v363_v52 }
  0x71   :  { %v459_v57 = vsel %vm445_vm8, %v456_v7, %v458_v6  ;;  %v176_v1 = vsub.s32 4294967266, %v5358_v49  ;;  %vm4482_vm9 = vcmp.lt.s32.totalorder %v4481_v60, 0  ;;  %v5372_v5 = vadd.f32 %v5250_v47, %v523_v24 }
  0x72   :  { %v428_v12 = vshrl.u32 %v10702_v27, %v5292_v36  ;;  %v5377_v13 = vmul.u32.u64.low %v5360_v30, %v455_v10  ;;  %v5378_v14 = vmul.u32.u64.high %v5360_v30, %v455_v10, %v5377_v13  ;;  %v5381_v34 = vsub.s32 32, %v545_v8 }
  0x73   :  { %v449_v17 = vsel %vm447_vm2, %v437_v41, 2102212464  ;;  %v5386_v26 = vmul.u32.u64.low %v5360_v30, %v459_v57  ;;  %v5387_v28 = vmul.u32.u64.high %v5360_v30, %v459_v57, %v5386_v26  ;;  %v5390_v32 = vadd.f32 %v5250_v47, %v524_v54 }
  0x74   :  { %v156_v36 = vadd.s32 %v5160_v16, %v5173_v35  ;;  %v172_v3 = vsub.s32 32, %v5358_v49  ;;  %v260_v18 = vadd.s32 %v5208_v44, %v5214_v62  ;;  %v369_v37 = vadd.s32 536870912, %v5366_v11 }
  0x75   :  { %10845 = vst [vmem:[#allocation9_spill] sm:$0xff] %v5390_v32  ;;  %v173_v41 = vshll.u32 %v5252_v48, %v5358_v49  ;;  %v177_v40 = vadd.s32 127, %v176_v1  ;;  %v5400_v24 = vsel %vm4482_vm9, 0, %v4481_v60  ;;  %v10690_v52 = vand.u32 2147483647, %v5264_v61 }
  0x76   :  { %v448_v58 = vsel %vm444_vm4, %v428_v12, %v431_v33  ;;  %v450_v16 = vsel %vm446_vm5, %v434_v23, %v449_v17  ;;  %v557_v35 = vshll.u32 %v10699_v20, %v545_v8  ;;  %v558_v44 = vshrl.u32 %v10697_v22, %v5381_v34 }
  0x77   :  { %v5410_v62 = vshrl.u32 %v543_v46, 5  ;;  %v560_v48 = vshll.u32 %v10697_v22, %v545_v8  ;;  %v561_v45 = vshrl.u32 %v10695_v38, %v5381_v34  ;;  %v638_v60 = vand.u32 2139095040, %v5372_v5 }
  0x78   :  { %v280_v25 = vsub.s32 4294967266, %v5400_v24  ;;  %v5417_v33 = vshrl.u32 %v369_v37, 30  ;;  %v548_v23 = vshll.u32 %v10702_v27, %v545_v8  ;;  %v551_v7 = vshll.u32 %v10693_v29, %v545_v8 }
  0x79   :  { %v549_v6 = vshrl.u32 %v10693_v29, %v5381_v34  ;;  %v552_v46 = vshrl.u32 %v10688_v31, %v5381_v34  ;;  %v554_v49 = vshll.u32 %v10688_v31, %v545_v8  ;;  %v555_v10 = vshrl.u32 %v10699_v20, %v5381_v34 }
  0x7a   :  { %v451_v54 = vsel %vm445_vm8, %v448_v58, %v450_v16  ;;  %v470_v57 = vadd.s32 1, %v5378_v14  ;;  %v538_v1 = vand.u32 8388607, %v10690_v52  ;;  %v559_v12 = vor.u32 %v558_v44, %v557_v35 }
  0x7b   :  { %vm469_vm10 = vc.u32 %v5387_v28, %v5377_v13  ;;  %v562_v17 = vor.u32 %v561_v45, %v560_v48  ;;  %vm566_vm11 = vcmp.lt.s32.totalorder %v5410_v62, 4  ;;  %v639_v26 = vshrl.u32 %v638_v60, 23 }
  0x7c   :  { %v174_v8 = vshrl.u32 %v156_v36, %v172_v3  ;;  %v178_v37 = vshll.u32 %v177_v40, 23  ;;  %v276_v42 = vsub.s32 32, %v5400_v24  ;;  %v281_v39 = vadd.s32 127, %v280_v25 }
  0x7d   :  { %v467_v63 = vmul.u32 %v5360_v30, %v451_v54  ;;  %v550_v58 = vor.u32 %v549_v6, %v548_v23  ;;  %v553_v16 = vor.u32 %v552_v46, %v551_v7  ;;  %v556_v31 = vor.u32 %v555_v10, %v554_v49 }
  0x7e   :  { %v471_v52 = vsel %vm469_vm10, %v470_v57, %v5378_v14  ;;  %vm563_vm12 = vcmp.lt.s32.totalorder %v5410_v62, 1  ;;  %vm565_vm13 = vcmp.lt.s32.totalorder %v5410_v62, 3  ;;  %v572_v35 = vsel %vm566_vm11, %v559_v12, 920167782 }
  0x7f   :  { %v371_v36 = vshll.u32 %v5417_v33, 30  ;;  %v539_v3 = vor.u32 8388608, %v538_v1  ;;  %v576_v40 = vsel %vm566_vm11, %v562_v17, 1326507024  ;;  %v4495_v44 = vadd.s32 4294967169, %v639_v26 }
  0x80   :  { %v175_v30 = vor.u32 %v174_v8, %v173_v41  ;;  %v179_v48 = vor.u32 4788187, %v178_v37  ;;  %v186_v45 = vsub.s32 4, %v5234_v21  ;;  %v277_v14 = vshll.u32 %v5281_v15, %v5400_v24 }
  0x81   :  { %v472_v60 = vadd.s32 %v471_v52, %v467_v63  ;;  %vm564_vm14 = vcmp.lt.s32.totalorder %v5410_v62, 2  ;;  %v571_v25 = vsel %vm563_vm12, %v550_v58, %v553_v16  ;;  %v573_v23 = vsel %vm565_vm13, %v556_v31, %v572_v35 }
  0x82   :  { %v278_v7 = vshrl.u32 %v260_v18, %v276_v42  ;;  %v282_v6 = vshll.u32 %v281_v39, 23  ;;  %v575_v41 = vsel %vm563_vm12, %v553_v16, %v556_v31  ;;  %v577_v46 = vsel %vm565_vm13, %v559_v12, %v576_v40 }
  0x83   :  { %v5459_v49 = vsub.s32 %v5366_v11, %v371_v36  ;;  %v5461_v15 = vshll.u32 %v539_v3, 8  ;;  %v645_v24 = vadd.s32 1, %v4495_v44  ;;  %vm102_vm15 = vcmp.lt.s32.totalorder %v5075_v4, 0 }
  0x84   :  { %v574_v52 = vsel %vm564_vm14, %v571_v25, %v573_v23  ;;  %v742_v42 = vand.u32 2139095040, %v5390_v32  ;;  %v180_v39 = vand.u32 2147483647, %v179_v48  ;;  %v182_v18 = vcvt.s32.f32 %v175_v30 }
  0x85   :  { %v473_v10 = vadd.s32 536870912, %v472_v60  ;;  %v578_v54 = vsel %vm564_vm14, %v575_v41, %v577_v46  ;;  %v187_v11 = vsel %vm102_vm15, %v186_v45, %v5234_v21  ;;  %v279_v57 = vor.u32 %v278_v7, %v277_v14 }
  0x86   :  { %v283_v1 = vor.u32 4788187, %v282_v6  ;;  %v374_v12 = vsub.s32 0, %v5459_v49  ;;  %v5474_v17 = vmul.u32.u64.low %v5461_v15, %v574_v52  ;;  %v5475_v26 = vmul.u32.u64.high %v5461_v15, %v574_v52, %v5474_v17 }
  0x87   :  { %vm646_vm0 = vcmp.gt.s32.totalorder %v645_v24, 0  ;;  %v547_v8 = vshrl.u32 %v10702_v27, %v5381_v34  ;;  %v5481_v37 = vmul.u32.u64.low %v5461_v15, %v578_v54  ;;  %v5482_v63 = vmul.u32.u64.high %v5461_v15, %v578_v54, %v5481_v37 }
  0x88   :  { %v743_v35 = vshrl.u32 %v742_v42, 23  ;;  %v183_v36 = vmul.f32 %v182_v18, %v180_v39  ;;  %v5484_v21 = vshrl.u32 %v473_v10, 30  ;;  %v568_v3 = vsel %vm566_vm11, %v556_v31, 2102212464 }
  0x89   :  { %vm5490_vm1 = vcmp.le.f32.partialorder %v100_v19, 0.7853982  ;;  %v647_v44 = vsel %vm646_vm0, %v645_v24, 0  ;;  %v286_v30 = vcvt.s32.f32 %v279_v57  ;;  %v4484_v48 = vmin.u32 %v374_v12, %v5459_v49 }
  0x8a   :  { %v189_v34 = vsel %vm5490_vm1, 0, %v187_v11  ;;  %v284_v45 = vand.u32 2147483647, %v283_v1  ;;  %v567_v14 = vsel %vm563_vm12, %v547_v8, %v550_v58  ;;  %v569_v31 = vsel %vm565_vm13, %v553_v16, %v568_v3 }
  0x8b   :  { %v4499_v25 = vadd.s32 4294967169, %v743_v35  ;;  %v184_v23 = vxor.u32 2147483648, %v183_v36  ;;  %v475_v19 = vshll.u32 %v5484_v21, 30  ;;  %v649_v7 = vand.u32 31, %v647_v44 }
  0x8c   :  { %v193_v6 = vadd.s32 3, %v189_v34  ;;  %v525_v41 = vmul.f32 %v5236_v59, %v5191_v43  ;;  %v290_v46 = vsub.s32 4, %v5257_v56  ;;  %v376_v24 = vclz %v4484_v48 }
  0x8d   :  { %v570_v52 = vsel %vm564_vm14, %v567_v14, %v569_v31  ;;  %v589_v58 = vadd.s32 1, %v5475_v26  ;;  %v287_v42 = vmul.f32 %v286_v30, %v284_v45  ;;  %vm588_vm2 = vc.u32 %v5482_v63, %v5474_v17 }
  0x8e   :  { %v749_v16 = vadd.s32 1, %v4499_v25  ;;  %v185_v39 = vsel %vm102_vm15, %v184_v23, %v183_v36  ;;  %v5512_v18 = vsub.s32 %v472_v60, %v475_v19  ;;  %v5514_v10 = vsub.s32 32, %v649_v7 }
  0x8f   :  { %vm206_vm3 = vcmp.lt.s32.totalorder %v5086_v9, 0  ;;  %v5518_v43 = vadd.f32 %v5250_v47, %v525_v41  ;;  %v586_v59 = vmul.u32 %v5461_v15, %v570_v52  ;;  %v5521_v62 = vand.u32 3, %v193_v6 }
  0x90   :  { %v5526_v54 = vsel %vm206_vm3, %v290_v46, %v5257_v56  ;;  %v4485_v11 = vadd.s32 4294967294, %v376_v24  ;;  %v590_v60 = vsel %vm588_vm2, %v589_v58, %v5475_v26  ;;  %v188_v57 = vsel %vm5490_vm1, %v5075_v4, %v185_v39 }
  0x91   :  { %10848 = vst [vmem:[#allocation10_spill] sm:$0xff] %v5518_v43  ;;  %vm5534_vm4 = vcmp.le.f32.partialorder %v204_v55, 0.7853982  ;;  %v288_v15 = vxor.u32 2147483648, %v287_v42  ;;  %v364_v1 = vadd.s32 %v5307_v53, %v5304_v51  ;;  %vm750_vm5 = vcmp.gt.s32.totalorder %v749_v16, 0 }
  0x92   :  { %v478_v56 = vsub.s32 0, %v5512_v18  ;;  %v10691_v12 = vand.u32 2147483647, %v5372_v5  ;;  %v661_v26 = vshll.u32 %v10699_v20, %v649_v7  ;;  %v662_v8 = vshrl.u32 %v10697_v22, %v5514_v10 }
  0x93   :  { %vm310_vm6 = vcmp.lt.s32.totalorder %v5124_v50, 0  ;;  %v5546_v55 = vadd.s32 %v590_v60, %v586_v59  ;;  %v5548_v37 = vshrl.u32 %v647_v44, 5  ;;  %v664_v35 = vshll.u32 %v10697_v22, %v649_v7 }
  0x94   :  { %v665_v51 = vshrl.u32 %v10695_v38, %v5514_v10  ;;  %vm4486_vm7 = vcmp.lt.s32.totalorder %v4485_v11, 0  ;;  %v652_v53 = vshll.u32 %v10702_v27, %v649_v7  ;;  %v655_v36 = vshll.u32 %v10693_v29, %v649_v7 }
  0x95   :  { %v751_v3 = vsel %vm750_vm5, %v749_v16, 0  ;;  %v653_v40 = vshrl.u32 %v10693_v29, %v5514_v10  ;;  %v10851_v34 = vmov 2131351028   ;;  %v659_v48 = vshrl.u32 %v10699_v20, %v5514_v10 }
  0x96   :  { %v656_v30 = vshrl.u32 %v10851_v34, %v5514_v10  ;;  %v658_v44 = vshll.u32 %v10851_v34, %v649_v7  ;;  %4804 = vcosq.f32 %v188_v57  ;;  %v4488_v45 = vmin.u32 %v478_v56, %v5512_v18 }
  0x97   :  { %v642_v14 = vand.u32 8388607, %v10691_v12  ;;  %v663_v31 = vor.u32 %v662_v8, %v661_v26  ;;  %v592_v25 = vadd.s32 536870912, %v5546_v55  ;;  %v666_v23 = vor.u32 %v665_v51, %v664_v35 }
  0x98   :  { %vm670_vm8 = vcmp.lt.s32.totalorder %v5548_v37, 4  ;;  %v753_v19 = vand.u32 31, %v751_v3  ;;  %4806 = vsinq.f32 %v188_v57  ;;  %v289_v7 = vsel %vm206_vm3, %v288_v15, %v287_v42 }
  0x99   :  { %v5570_v6 = vsel %vm4486_vm7, 0, %v4485_v11  ;;  %v394_v41 = vsub.s32 4, %v5417_v33  ;;  %v5574_v24 = vor.u32 %v653_v40, %v652_v53  ;;  %v5576_v52 = vor.u32 %v656_v30, %v655_v36 }
  0x9a   :  { %v380_v46 = vsub.s32 32, %v5570_v6  ;;  %v660_v58 = vor.u32 %v659_v48, %v658_v44  ;;  %v480_v16 = vclz %v4488_v45  ;;  %vm667_vm9 = vcmp.lt.s32.totalorder %v5548_v37, 1 }
  0x9b   :  { %vm669_vm10 = vcmp.lt.s32.totalorder %v5548_v37, 3  ;;  %v676_v42 = vsel %vm670_vm8, %v663_v31, 920167782  ;;  %v5582_v39 = vshrl.u32 %v592_v25, 30  ;;  %v643_v59 = vor.u32 8388608, %v642_v14 }
  0x9c   :  { %v680_v11 = vsel %vm670_vm8, %v666_v23, 1326507024  ;;  %v5586_v60 = vsub.s32 32, %v753_v19  ;;  %v5591_v57 = vsel %vm5534_vm4, %v5086_v9, %v289_v7  ;;  %v381_v15 = vshll.u32 %v5459_v49, %v5570_v6 }
  0x9d   :  { %v384_v56 = vsub.s32 4294967266, %v5570_v6  ;;  %v5599_v26 = vsel %vm310_vm6, %v394_v41, %v5417_v33  ;;  %v382_v8 = vshrl.u32 %v364_v1, %v380_v46  ;;  %vm668_vm11 = vcmp.lt.s32.totalorder %v5548_v37, 2 }
  0x9e   :  { %v675_v35 = vsel %vm667_vm9, %v5574_v24, %v5576_v52  ;;  %v677_v51 = vsel %vm669_vm10, %v660_v58, %v676_v42  ;;  %v4489_v53 = vadd.s32 4294967294, %v480_v16  ;;  %v679_v49 = vsel %vm667_vm9, %v5576_v52, %v660_v58 }
  0x9f   :  { %v681_v33 = vsel %vm669_vm10, %v663_v31, %v680_v11  ;;  %v10692_v1 = vand.u32 2147483647, %v5390_v32  ;;  %v594_v36 = vshll.u32 %v5582_v39, 30  ;;  %v5615_v40 = vshll.u32 %v643_v59, 8 }
  0xa0   :  { %v765_v30 = vshll.u32 %v10699_v20, %v753_v19  ;;  %v766_v44 = vshrl.u32 %v10697_v22, %v5586_v60  ;;  %v678_v48 = vsel %vm668_vm11, %v675_v35, %v677_v51  ;;  %v5624_v45 = vshrl.u32 %v751_v3, 5 }
  0xa1   :  { %v768_v14 = vshll.u32 %v10697_v22, %v753_v19  ;;  %v769_v31 = vshrl.u32 %v10695_v38, %v5586_v60  ;;  %v682_v25 = vsel %vm668_vm11, %v679_v49, %v681_v33  ;;  %v756_v23 = vshll.u32 %v10702_v27, %v753_v19 }
  0xa2   :  { %v759_v7 = vshll.u32 %v10693_v29, %v753_v19  ;;  %v846_v6 = vand.u32 2139095040, %v5518_v43  ;;  %v757_v41 = vshrl.u32 %v10693_v29, %v5586_v60  ;;  %v760_v3 = vshrl.u32 %v10851_v34, %v5586_v60 }
  0xa3   :  { %v762_v46 = vshll.u32 %v10851_v34, %v753_v19  ;;  %v763_v16 = vshrl.u32 %v10699_v20, %v5586_v60  ;;  %v5641_v42 = vpop.eup %4804  ;;  %v385_v59 = vadd.s32 127, %v384_v56  ;;  %vm4490_vm12 = vcmp.lt.s32.totalorder %v4489_v53, 0 }
  0xa4   :  { %v746_v11 = vand.u32 8388607, %v10692_v1  ;;  %v767_v35 = vor.u32 %v766_v44, %v765_v30  ;;  %v5648_v51 = vmul.u32.u64.low %v5615_v40, %v678_v48  ;;  %v5649_v49 = vmul.u32.u64.high %v5615_v40, %v678_v48, %v5648_v51 }
  0xa5   :  { %v770_v33 = vor.u32 %v769_v31, %v768_v14  ;;  %vm774_vm13 = vcmp.lt.s32.totalorder %v5624_v45, 4  ;;  %v5653_v19 = vpop.eup %4806  ;;  %v651_v56 = vshrl.u32 %v10702_v27, %v5514_v10  ;;  %v847_v30 = vshrl.u32 %v846_v6, 23 }
  0xa6   :  { %v5658_v12 = vmul.u32.u64.low %v5615_v40, %v682_v25  ;;  %v5659_v1 = vmul.u32.u64.high %v5615_v40, %v682_v25, %v5658_v12  ;;  %v5662_v44 = vsub.s32 %v5546_v55, %v594_v36  ;;  %v5664_v48 = vor.u32 %v757_v41, %v756_v23 }
  0xa7   :  { %v5666_v29 = vor.u32 %v760_v3, %v759_v7  ;;  %v764_v14 = vor.u32 %v763_v16, %v762_v46  ;;  %v672_v31 = vsel %vm670_vm8, %v660_v58, 2102212464  ;;  %vm771_vm14 = vcmp.lt.s32.totalorder %v5624_v45, 1 }
  0xa8   :  { %vm773_vm15 = vcmp.lt.s32.totalorder %v5624_v45, 3  ;;  %v780_v10 = vsel %vm774_vm13, %v767_v35, 920167782  ;;  %v386_v12 = vshll.u32 %v385_v59, 23  ;;  %v747_v25 = vor.u32 8388608, %v746_v11 }
  0xa9   :  { %v784_v55 = vsel %vm774_vm13, %v770_v33, 1326507024  ;;  %v5677_v36 = vstv %s5620_s13  ;;  %v383_v23 = vor.u32 %v382_v8, %v381_v15  ;;  %v5680_v7 = vsel %vm4490_vm12, 0, %v4489_v53  ;;  %s8228_s13 = sld [smem:[#allocation4 + $0x6]] }
  0xaa   :  { %v671_v58 = vsel %vm667_vm9, %v651_v56, %v5574_v24  ;;  %v4503_v6 = vadd.s32 4294967169, %v847_v30  ;;  %v673_v41 = vsel %vm669_vm10, %v5576_v52, %v672_v31  ;;  %vm772_vm0 = vcmp.lt.s32.totalorder %v5624_v45, 2 }
  0xab   :  { %v779_v3 = vsel %vm771_vm14, %v5664_v48, %v5666_v29  ;;  %v781_v15 = vsel %vm773_vm15, %v764_v14, %v780_v10  ;;  %v597_v8 = vsub.s32 0, %v5662_v44  ;;  %v783_v24 = vsel %vm771_vm14, %v5666_v29, %v764_v14 }
  0xac   :  { %v785_v53 = vsel %vm773_vm15, %v767_v35, %v784_v55  ;;  %v953_v52 = vmul.f32 %v5677_v36, %v5066_v0  ;;  %4808 = vcosq.f32 %v5591_v57  ;;  %v387_v46 = vor.u32 4788187, %v386_v12 }
  0xad   :  { %v5704_v16 = vshll.u32 %v747_v25, 8  ;;  %v5707_v59 = vstv %s5645_s14  ;;  %4810 = vsinq.f32 %v5591_v57  ;;  %v674_v11 = vsel %vm668_vm11, %v671_v58, %v673_v41  ;;  %s8236_s14 = sld [smem:[#allocation6 + $0x4]] }
  0xae   :  { %v782_v33 = vsel %vm772_vm0, %v779_v3, %v781_v15  ;;  %v853_v56 = vadd.s32 1, %v4503_v6  ;;  %v468_v35 = vadd.s32 %v5377_v13, %v5387_v28  ;;  %v488_v0 = vsub.s32 4294967266, %v5680_v7 }
  0xaf   :  { %v693_v30 = vadd.s32 1, %v5649_v49  ;;  %v786_v31 = vsel %vm772_vm0, %v783_v24, %v785_v53  ;;  %v390_v10 = vcvt.s32.f32 %v383_v23  ;;  %v4492_v57 = vmin.u32 %v597_v8, %v5662_v44 }
  0xb0   :  { %vm692_vm1 = vc.u32 %v5659_v1, %v5648_v51  ;;  %v5724_v37 = vadd.f32 %v5707_v59, %v953_v52  ;;  %v388_v12 = vand.u32 2147483647, %v387_v46  ;;  %v690_v25 = vmul.u32 %v5615_v40, %v674_v11 }
  0xb1   :  { %v5728_v13 = vmul.u32.u64.low %v5704_v16, %v782_v33  ;;  %v5729_v28 = vmul.u32.u64.high %v5704_v16, %v782_v33, %v5728_v13  ;;  %v755_v55 = vshrl.u32 %v10702_v27, %v5586_v60  ;;  %vm854_vm2 = vcmp.gt.s32.totalorder %v853_v56, 0 }
  0xb2   :  { %10852 = vst [vmem:[#allocation11_spill] sm:$0xff] %v5724_v37  ;;  %v5735_v23 = vmul.u32.u64.low %v5704_v16, %v786_v31  ;;  %v5736_v58 = vmul.u32.u64.high %v5704_v16, %v786_v31, %v5735_v23  ;;  %v484_v6 = vsub.s32 32, %v5680_v7  ;;  %v489_v41 = vadd.s32 127, %v488_v0 }
  0xb3   :  { %v694_v3 = vsel %vm692_vm1, %v693_v30, %v5649_v49  ;;  %v776_v40 = vsel %vm774_vm13, %v764_v14, 2102212464  ;;  %vm199_vm3 = vcmp.eq.s32.totalorder %v5521_v62, 2  ;;  %v10853_v15 = vand.u32 2147483647, %v5124_v50 }
  0xb4   :  { %v599_v60 = vclz %v4492_v57  ;;  %v965_v24 = vand.u32 2139095040, %v5724_v37  ;;  %v200_v53 = vxor.u32 2147483648, %v5641_v42  ;;  %v293_v49 = vsel %vm5534_vm4, 0, %v5526_v54 }
  0xb5   :  { %vm5745_vm5 = vcmp.le.f32.partialorder %v10853_v15, 0.7853982  ;;  %v855_v52 = vsel %vm854_vm2, %v853_v56, 0  ;;  %v197_v46 = vxor.u32 2147483648, %v5653_v19  ;;  %v5760_v11 = vadd.s32 %v694_v3, %v690_v25 }
  0xb6   :  { %v397_v14 = vsel %vm5745_vm5, 0, %v5599_v26  ;;  %v775_v33 = vsel %vm771_vm14, %v755_v55, %v5664_v48  ;;  %v777_v0 = vsel %vm773_vm15, %v5666_v29, %v776_v40  ;;  %v391_v30 = vmul.f32 %v390_v10, %v388_v12 }
  0xb7   :  { %v485_v54 = vshll.u32 %v5512_v18, %v5680_v7  ;;  %v486_v47 = vshrl.u32 %v468_v35, %v484_v6  ;;  %v490_v31 = vshll.u32 %v489_v41, 23  ;;  %vm196_vm4 = vcmp.eq.s32.totalorder %v5521_v62, 0 }
  0xb8   :  { %v4493_v26 = vadd.s32 4294967294, %v599_v60  ;;  %v857_v56 = vand.u32 31, %v855_v52  ;;  %v966_v57 = vshrl.u32 %v965_v24, 23  ;;  %v297_v25 = vadd.s32 3, %v293_v49 }
  0xb9   :  { %v401_v23 = vadd.s32 3, %v397_v14  ;;  %v778_v48 = vsel %vm772_vm0, %v775_v33, %v777_v0  ;;  %v797_v55 = vadd.s32 1, %v5729_v28  ;;  %v5774_v3 = vpop.eup %4808  ;;  %vm195_vm7 = vcmp.lt.s32.totalorder %v5521_v62, 2 }
  0xba   :  { %v201_v29 = vsel %vm199_vm3, %v200_v53, %v5653_v19  ;;  %v696_v18 = vadd.s32 536870912, %v5760_v11  ;;  %vm796_vm8 = vc.u32 %v5736_v58, %v5728_v13  ;;  %v5783_v7 = vpop.eup %4810  ;;  %v198_v45 = vsel %vm196_vm4, %v5641_v42, %v197_v46 }
  0xbb   :  { %v392_v35 = vxor.u32 2147483648, %v391_v30  ;;  %v487_v10 = vor.u32 %v486_v47, %v485_v54  ;;  %v491_v12 = vor.u32 4788187, %v490_v31  ;;  %vm4494_vm9 = vcmp.lt.s32.totalorder %v4493_v26, 0 }
  0xbc   :  { %v794_v6 = vmul.u32 %v5704_v16, %v778_v48  ;;  %v5787_v41 = vsub.s32 32, %v857_v56  ;;  %v4507_v40 = vadd.s32 4294967169, %v966_v57  ;;  %v5789_v15 = vand.u32 3, %v297_v25 }
  0xbd   :  { %v5791_v19 = vand.u32 3, %v401_v23  ;;  %v5794_v60 = vstv %s5750_s15  ;;  %v798_v24 = vsel %vm796_vm8, %v797_v55, %v5729_v28  ;;  %v5799_v42 = vsel %vm195_vm7, %v198_v45, %v201_v29 }
  0xbe   :  { %v301_v53 = vxor.u32 2147483648, %v5783_v7  ;;  %v304_v49 = vxor.u32 2147483648, %v5774_v3  ;;  %v5803_v16 = vshrl.u32 %v696_v18, 30  ;;  %v393_v14 = vsel %vm310_vm6, %v392_v35, %v391_v30 }
  0xbf   :  { %v492_v46 = vand.u32 2147483647, %v491_v12  ;;  %v494_v33 = vcvt.s32.f32 %v487_v10  ;;  %v5807_v0 = vsel %vm4494_vm9, 0, %v4493_v26  ;;  %v5809_v54 = vadd.s32 %v798_v24, %v794_v6 }
  0xc0   :  { %v869_v28 = vshll.u32 %v10699_v20, %v857_v56  ;;  %v870_v62 = vshrl.u32 %v10697_v22, %v5787_v41  ;;  %v972_v47 = vadd.s32 1, %v4507_v40  ;;  %v10701_v31 = vand.u32 2147483647, %v5518_v43 }
  0xc1   :  { %v5815_v57 = vshrl.u32 %v855_v52, 5  ;;  %v872_v25 = vshll.u32 %v10697_v22, %v857_v56  ;;  %v873_v30 = vshrl.u32 %v10695_v38, %v5787_v41  ;;  %vm300_vm6 = vcmp.eq.s32.totalorder %v5789_v15, 0 }
  0xc2   :  { %vm303_vm10 = vcmp.eq.s32.totalorder %v5789_v15, 2  ;;  %v607_v26 = vsub.s32 4294967266, %v5807_v0  ;;  %v698_v23 = vshll.u32 %v5803_v16, 30  ;;  %v860_v48 = vshll.u32 %v10702_v27, %v857_v56 }
  0xc3   :  { %v10856_v55 = vmov 2475754826   ;;  %v864_v18 = vshrl.u32 %v10851_v34, %v5787_v41  ;;  %v866_v45 = vshll.u32 %v10851_v34, %v857_v56  ;;  %v867_v35 = vshrl.u32 %v10699_v20, %v5787_v41 }
  0xc4   :  { %v863_v29 = vshll.u32 %v10856_v55, %v857_v56  ;;  %v861_v52 = vshrl.u32 %v10856_v55, %v5787_v41  ;;  %vm414_vm11 = vcmp.lt.s32.totalorder %v5220_v2, 0  ;;  %v587_v10 = vadd.s32 %v5474_v17, %v5482_v63  ;;  %v5847_v17 = vld [vmem:[%s10684_s3 + $0x8] sm:$0xff] }
  0xc5   :  { %v800_v12 = vadd.s32 536870912, %v5809_v54  ;;  %v871_v6 = vor.u32 %v870_v62, %v869_v28  ;;  %vm973_vm12 = vcmp.gt.s32.totalorder %v972_v47, 0  ;;  %v495_v40 = vmul.f32 %v494_v33, %v492_v46  ;;  %10857 = vst [vmem:[#allocation12_spill] sm:$0xff] %v5847_v17 }
  0xc6   :  { %v850_v24 = vand.u32 8388607, %v10701_v31  ;;  %v874_v38 = vor.u32 %v873_v30, %v872_v25  ;;  %vm878_vm13 = vcmp.lt.s32.totalorder %v5815_v57, 4  ;;  %v603_v56 = vsub.s32 32, %v5807_v0 }
  0xc7   :  { %v608_v22 = vadd.s32 127, %v607_v26  ;;  %v5842_v20 = vsub.s32 %v5760_v11, %v698_v23  ;;  %v954_v63 = vmul.f32 %v5847_v17, %v5677_v36  ;;  %v862_v46 = vor.u32 %v861_v52, %v860_v48 }
  0xc8   :  { %v865_v33 = vor.u32 %v864_v18, %v863_v29  ;;  %v868_v28 = vor.u32 %v867_v35, %v866_v45  ;;  %v974_v62 = vsel %vm973_vm12, %v972_v47, 0  ;;  %v5851_v25 = vshrl.u32 %v800_v12, 30  ;;  %v6027_v35 = vld [vmem:[%s10684_s3 + $0x10] sm:$0xff] }
  0xc9   :  { %vm875_vm14 = vcmp.lt.s32.totalorder %v5815_v57, 1  ;;  %vm877_vm15 = vcmp.lt.s32.totalorder %v5815_v57, 3  ;;  %v884_v11 = vsel %vm878_vm13, %v871_v6, 920167782  ;;  %v396_v30 = vsel %vm5745_vm5, %v5124_v50, %v393_v14 }
  0xca   :  { %10858 = vst [vmem:[#allocation13_spill] sm:$0xff] %v5851_v25  ;;  %v496_v26 = vxor.u32 2147483648, %v495_v40  ;;  %v851_v23 = vor.u32 8388608, %v850_v24  ;;  %v888_v48 = vsel %vm878_vm13, %v874_v38, 1326507024  ;;  %v604_v47 = vshll.u32 %v5662_v44, %v5807_v0 }
  0xcb   :  { %v605_v29 = vshrl.u32 %v587_v10, %v603_v56  ;;  %v609_v52 = vshll.u32 %v608_v22, 23  ;;  %v976_v18 = vand.u32 31, %v974_v62  ;;  %vm299_vm0 = vcmp.lt.s32.totalorder %v5789_v15, 2 }
  0xcc   :  { %v10859_v45 = vand.u32 2147483647, %v5220_v2  ;;  %v701_v8 = vsub.s32 0, %v5842_v20  ;;  %vm876_vm2 = vcmp.lt.s32.totalorder %v5815_v57, 2  ;;  %v883_v38 = vsel %vm875_vm14, %v862_v46, %v865_v33 }
  0xcd   :  { %v885_v44 = vsel %vm877_vm15, %v868_v28, %v884_v11  ;;  %v802_v22 = vshll.u32 %v5851_v25, 30  ;;  %v887_v14 = vsel %vm875_vm14, %v865_v33, %v868_v28  ;;  %v889_v0 = vsel %vm877_vm15, %v871_v6, %v888_v48 }
  0xce   :  { %vm5867_vm1 = vcmp.le.f32.partialorder %v10859_v45, 0.7853982  ;;  %v5883_v10 = vadd.f32 %v5707_v59, %v954_v63  ;;  %v302_v12 = vsel %vm300_vm6, %v5774_v3, %v301_v53  ;;  %v305_v24 = vsel %vm303_vm10, %v304_v49, %v5783_v7 }
  0xcf   :  { %v859_v56 = vshrl.u32 %v10702_v27, %v5787_v41  ;;  %v5897_v11 = vshll.u32 %v851_v23, 8  ;;  %4812 = vcosq.f32 %v396_v30  ;;  %v498_v6 = vsub.s32 4, %v5484_v21 }
  0xd0   :  { %10862 = vst [vmem:[#allocation14_spill] sm:$0xff] %v5883_v10  ;;  %v886_v63 = vsel %vm876_vm2, %v883_v38, %v885_v44  ;;  %v5902_v48 = vsub.s32 32, %v976_v18  ;;  %4814 = vsinq.f32 %v396_v30  ;;  %v497_v3 = vsel %vm414_vm11, %v496_v26, %v495_v40 }
  0xd1   :  { %v606_v53 = vor.u32 %v605_v29, %v604_v47  ;;  %v890_v7 = vsel %vm876_vm2, %v887_v14, %v889_v0  ;;  %v610_v49 = vor.u32 4788187, %v609_v52  ;;  %v4496_v41 = vmin.u32 %v701_v8, %v5842_v20 }
  0xd2   :  { %v5910_v23 = vsub.s32 %v5809_v54, %v802_v22  ;;  %v1069_v45 = vand.u32 2139095040, %v5883_v10  ;;  %v879_v38 = vsel %vm875_vm14, %v859_v56, %v862_v46  ;;  %v880_v30 = vsel %vm878_vm13, %v868_v28, 2102212464 }
  0xd3   :  { %v5918_v40 = vmul.u32.u64.low %v5897_v11, %v886_v63  ;;  %v5919_v26 = vmul.u32.u64.high %v5897_v11, %v886_v63, %v5918_v40  ;;  %v5923_v47 = vmul.u32.u64.low %v5897_v11, %v890_v7  ;;  %v5924_v29 = vmul.u32.u64.high %v5897_v11, %v890_v7, %v5923_v47 }
  0xd4   :  { %v10863_v52 = vmov 2102212464   ;;  %v10864_v8 = vmov 920167782   ;;  %v5930_v46 = vshrl.u32 %v974_v62, 5  ;;  %v881_v56 = vsel %vm877_vm15, %v865_v33, %v880_v30 }
  0xd5   :  { %v988_v54 = vshll.u32 %v10863_v52, %v976_v18  ;;  %v989_v44 = vshrl.u32 %v10864_v8, %v5902_v48  ;;  %v991_v28 = vshll.u32 %v10864_v8, %v976_v18  ;;  %v10865_v14 = vmov 1326507024  }
  0xd6   :  { %v992_v0 = vshrl.u32 %v10865_v14, %v5902_v48  ;;  %v979_v63 = vshll.u32 %v10702_v27, %v976_v18  ;;  %v982_v7 = vshll.u32 %v10856_v55, %v976_v18  ;;  %v1070_v47 = vshrl.u32 %v1069_v45, 23 }
  0xd7   :  { %vm192_vm3 = vweird.f32 %v5075_v4  ;;  %vm296_vm5 = vweird.f32 %v5086_v9  ;;  %v980_v62 = vshrl.u32 %v10856_v55, %v5902_v48  ;;  %v983_v31 = vshrl.u32 %v10851_v34, %v5902_v48 }
  0xd8   :  { %v985_v22 = vshll.u32 %v10851_v34, %v976_v18  ;;  %v986_v33 = vshrl.u32 %v10863_v52, %v5902_v48  ;;  %v306_v30 = vsel %vm299_vm0, %v302_v12, %v305_v24  ;;  %v5953_v45 = vsel %vm414_vm11, %v498_v6, %v5484_v21 }
  0xd9   :  { %v5958_v27 = vsel %vm5867_vm1, %v5220_v2, %v497_v3  ;;  %v990_v17 = vor.u32 %v989_v44, %v988_v54  ;;  %v805_v43 = vsub.s32 0, %v5910_v23  ;;  %v10866_v18 = vand.u32 2147483647, %v5724_v37 }
  0xda   :  { %v993_v32 = vor.u32 %v992_v0, %v991_v28  ;;  %vm997_vm4 = vcmp.lt.s32.totalorder %v5930_v46, 4  ;;  %v611_v15 = vand.u32 2147483647, %v610_v49  ;;  %v613_v12 = vcvt.s32.f32 %v606_v53 }
  0xdb   :  { %v969_v25 = vand.u32 8388607, %v10866_v18  ;;  %v703_v24 = vclz %v4496_v41  ;;  %v882_v21 = vsel %vm876_vm2, %v879_v38, %v881_v56  ;;  %vm533_vm7 = vcmp.lt.s32.totalorder %v5264_v61, 0 }
  0xdc   :  { %v5967_v6 = vor.u32 %v980_v62, %v979_v63  ;;  %v5969_v3 = vor.u32 %v983_v31, %v982_v7  ;;  %v987_v54 = vor.u32 %v986_v33, %v985_v22  ;;  %v4511_v44 = vadd.s32 4294967169, %v1070_v47  ;;  %v4813_v49 = vpop.eup %4812 }
  0xdd   :  { %v901_v37 = vadd.s32 1, %v5919_v26  ;;  %vm994_vm8 = vcmp.lt.s32.totalorder %v5930_v46, 1  ;;  %vm996_vm9 = vcmp.lt.s32.totalorder %v5930_v46, 3  ;;  %v1003_v53 = vsel %vm997_vm4, %v990_v17, 920167782  ;;  %v4815_v38 = vpop.eup %4814 }
  0xde   :  { %v4500_v57 = vmin.u32 %v805_v43, %v5910_v23  ;;  %vm900_vm6 = vc.u32 %v5924_v29, %v5918_v40  ;;  %v970_v41 = vor.u32 8388608, %v969_v25  ;;  %v1007_v31 = vsel %vm997_vm4, %v993_v32, 1326507024 }
  0xdf   :  { %4816 = vcosq.f32 %v5958_v27  ;;  %v614_v22 = vmul.f32 %v613_v12, %v611_v15  ;;  %v617_v28 = vsub.s32 4, %v5582_v39  ;;  %v898_v0 = vmul.u32 %v5897_v11, %v882_v21 }
  0xe0   :  { %vm995_vm10 = vcmp.lt.s32.totalorder %v5930_v46, 2  ;;  %v1002_v43 = vsel %vm994_vm8, %v5967_v6, %v5969_v3  ;;  %v1004_v25 = vsel %vm996_vm9, %v987_v54, %v1003_v53  ;;  %v1076_v56 = vadd.s32 1, %v4511_v44 }
  0xe1   :  { %v10867_v32 = vand.u32 2147483647, %v5264_v61  ;;  %v4497_v7 = vadd.s32 4294967294, %v703_v24  ;;  %v902_v11 = vsel %vm900_vm6, %v901_v37, %v5919_v26  ;;  %v1006_v47 = vsel %vm994_vm8, %v5969_v3, %v987_v54 }
  0xe2   :  { %v1008_v62 = vsel %vm996_vm9, %v990_v17, %v1007_v31  ;;  %vm404_vm12 = vcmp.eq.s32.totalorder %v5791_v19, 0  ;;  %vm407_vm13 = vcmp.eq.s32.totalorder %v5791_v19, 2  ;;  %v807_v33 = vclz %v4500_v57 }
  0xe3   :  { %vm5993_vm11 = vcmp.le.f32.partialorder %v10867_v32, 0.7853982  ;;  %v6005_v18 = vshll.u32 %v970_v41, 8  ;;  %v203_v15 = vsel %vm192_vm3, nan, %v5799_v42  ;;  %v307_v37 = vsel %vm296_vm5, nan, %v306_v30 }
  0xe4   :  { %v501_v26 = vsel %vm5867_vm1, 0, %v5953_v45  ;;  %v1005_v17 = vsel %vm995_vm10, %v1002_v43, %v1004_v25  ;;  %v408_v12 = vxor.u32 2147483648, %v4813_v49  ;;  %v6017_v24 = vadd.s32 %v902_v11, %v898_v0 }
  0xe5   :  { %v1009_v21 = vsel %vm995_vm10, %v1006_v47, %v1008_v62  ;;  %vm1077_vm14 = vcmp.gt.s32.totalorder %v1076_v56, 0  ;;  %v405_v44 = vxor.u32 2147483648, %v4815_v38  ;;  %v615_v4 = vxor.u32 2147483648, %v614_v22 }
  0xe6   :  { %v618_v9 = vsel %vm533_vm7, %v617_v28, %v5582_v39  ;;  %vm4498_vm15 = vcmp.lt.s32.totalorder %v4497_v7, 0  ;;  %v4501_v42 = vadd.s32 4294967294, %v807_v33  ;;  %v955_v30 = vmul.f32 %v6027_v35, %v5677_v36 }
  0xe7   :  { %v6032_v45 = vmul.u32.u64.low %v6005_v18, %v1005_v17  ;;  %v6033_v53 = vmul.u32.u64.high %v6005_v18, %v1005_v17, %v6032_v45  ;;  %v10870_v57 = vmov 683565275   ;;  %v1078_v28 = vsel %vm1077_vm14, %v1076_v56, 0 }
  0xe8   :  { %v978_v41 = vshrl.u32 %v10870_v57, %v5902_v48  ;;  %v6039_v39 = vmul.u32.u64.low %v6005_v18, %v1009_v21  ;;  %v6040_v31 = vmul.u32.u64.high %v6005_v18, %v1009_v21, %v6039_v39  ;;  %vm403_vm0 = vcmp.lt.s32.totalorder %v5791_v19, 2 }
  0xe9   :  { %v505_v0 = vadd.s32 3, %v501_v26  ;;  %v904_v43 = vadd.s32 536870912, %v6017_v24  ;;  %v999_v25 = vsel %vm997_vm4, %v987_v54, 2102212464  ;;  %v409_v32 = vsel %vm407_vm13, %v408_v12, %v4815_v38 }
  0xea   :  { %v6049_v11 = vmul.f32 %v5794_v60, %v203_v15  ;;  %v6052_v48 = vmul.f32 %v5794_v60, %v307_v37  ;;  %v616_v56 = vsel %vm533_vm7, %v615_v4, %v614_v22  ;;  %v406_v47 = vsel %vm404_vm12, %v4813_v49, %v405_v44 }
  0xeb   :  { %v620_v62 = vsel %vm5993_vm11, 0, %v618_v9  ;;  %v6061_v54 = vsel %vm4498_vm15, 0, %v4497_v7  ;;  %v1080_v33 = vand.u32 31, %v1078_v28  ;;  %vm4502_vm1 = vcmp.lt.s32.totalorder %v4501_v42, 0 }
  0xec   :  { %10871 = vst [vmem:[#allocation15_spill] sm:$0xff] %v6049_v11  ;;  %10872 = vst [vmem:[#allocation16_spill] sm:$0xff] %v6052_v48  ;;  %v6064_v38 = vadd.f32 %v5707_v59, %v955_v30  ;;  %v998_v15 = vsel %vm994_vm8, %v978_v41, %v5967_v6  ;;  %v1000_v22 = vsel %vm996_vm9, %v5969_v3, %v999_v25  ;;  %v6072_v49 = vpop.eup %4816  ;;  %4818 = vsinq.f32 %v5958_v27 }
  0xed   :  { %v6075_v37 = vand.u32 3, %v505_v0  ;;  %v619_v7 = vsel %vm5993_vm11, %v5264_v61, %v616_v56  ;;  %v6080_v26 = vshrl.u32 %v904_v43, 30  ;;  %v6084_v17 = vsel %vm403_vm0, %v406_v47, %v409_v32 }
  0xee   :  { %10873 = vst [vmem:[#allocation17_spill] sm:$0xff] %v6064_v38  ;;  %v6086_v6 = vadd.s32 3, %v620_v62  ;;  %v691_v3 = vadd.s32 %v5648_v51, %v5659_v1  ;;  %v711_v12 = vsub.s32 4294967266, %v6061_v54  ;;  %v6091_v27 = vsel %vm4502_vm1, 0, %v4501_v42 }
  0xef   :  { %v1001_v21 = vsel %vm995_vm10, %v998_v15, %v1000_v22  ;;  %v1020_v63 = vadd.s32 1, %v6033_v53  ;;  %v6096_v44 = vsub.s32 32, %v1080_v33  ;;  %4820 = vcosq.f32 %v619_v7 }
  0xf0   :  { %vm1019_vm2 = vc.u32 %v6040_v31, %v6032_v45  ;;  %v1173_v4 = vand.u32 2139095040, %v6064_v38  ;;  %4822 = vsinq.f32 %v619_v7  ;;  %v707_v1 = vsub.s32 32, %v6061_v54 }
  0xf1   :  { %v721_v51 = vsub.s32 4, %v5803_v16  ;;  %v906_v46 = vshll.u32 %v6080_v26, 30  ;;  %v6107_v42 = vadd.s32 127, %v711_v12  ;;  %v815_v30 = vsub.s32 4294967266, %v6091_v27 }
  0xf2   :  { %v1017_v41 = vmul.u32 %v6005_v18, %v1001_v21  ;;  %v1021_v39 = vsel %vm1019_vm2, %v1020_v63, %v6033_v53  ;;  %v10713_v0 = vand.u32 2147483647, %v5883_v10  ;;  %v1092_v43 = vshll.u32 %v10863_v52, %v1080_v33 }
  0xf3   :  { %v1093_v25 = vshrl.u32 %v10864_v8, %v6096_v44  ;;  %vm637_vm3 = vcmp.lt.s32.totalorder %v5372_v5, 0  ;;  %v6117_v32 = vshrl.u32 %v1078_v28, 5  ;;  %v1095_v56 = vshll.u32 %v10864_v8, %v1080_v33 }
  0xf4   :  { %v1096_v47 = vshrl.u32 %v10865_v14, %v6096_v44  ;;  %v1174_v62 = vshrl.u32 %v1173_v4, 23  ;;  %v6123_v18 = vsub.s32 %v6017_v24, %v906_v46  ;;  %v1083_v53 = vshll.u32 %v10870_v57, %v1080_v33 }
  0xf5   :  { %v1086_v15 = vshll.u32 %v10856_v55, %v1080_v33  ;;  %v1089_v22 = vshll.u32 %v10851_v34, %v1080_v33  ;;  %v6128_v7 = vadd.s32 %v1021_v39, %v1017_v41  ;;  %v1084_v28 = vshrl.u32 %v10856_v55, %v6096_v44 }
  0xf6   :  { %v1087_v12 = vshrl.u32 %v10851_v34, %v6096_v44  ;;  %v1090_v21 = vshrl.u32 %v10863_v52, %v6096_v44  ;;  %vm508_vm5 = vcmp.eq.s32.totalorder %v6075_v37, 0  ;;  %vm511_vm4 = vcmp.eq.s32.totalorder %v6075_v37, 2 }
  0xf7   :  { %v709_v24 = vshrl.u32 %v691_v3, %v707_v1  ;;  %v795_v63 = vadd.s32 %v5728_v13, %v5736_v58  ;;  %v811_v33 = vsub.s32 32, %v6091_v27  ;;  %v1094_v4 = vor.u32 %v1093_v25, %v1092_v43 }
  0xf8   :  { %v1073_v46 = vand.u32 8388607, %v10713_v0  ;;  %v1097_v41 = vor.u32 %v1096_v47, %v1095_v56  ;;  %vm1101_vm7 = vcmp.lt.s32.totalorder %v6117_v32, 4  ;;  %v4515_v39 = vadd.s32 4294967169, %v1174_v62 }
  0xf9   :  { %v713_v19 = vshll.u32 %v6107_v42, 23  ;;  %v812_v9 = vshll.u32 %v5910_v23, %v6091_v27  ;;  %v816_v48 = vadd.s32 127, %v815_v30  ;;  %v909_v3 = vsub.s32 0, %v6123_v18  ;;  %v4819_v1 = vpop.eup %4818  ;;  %v6163_v23 = vld [vmem:[%s10684_s3 + $0x18] sm:$0xff] }
  0xfa   :  { %v10874_v13 = vand.u32 2147483647, %v5372_v5  ;;  %v1023_v43 = vadd.s32 536870912, %v6128_v7  ;;  %v6155_v25 = vor.u32 %v1084_v28, %v1083_v53  ;;  %v6157_v56 = vor.u32 %v1087_v12, %v1086_v15  ;;  %10877 = vst [vmem:[#allocation18_spill] sm:$0xff] %v6163_v23 }
  0xfb   :  { %v1091_v42 = vor.u32 %v1090_v21, %v1089_v22  ;;  %vm400_vm9 = vweird.f32 %v5124_v50  ;;  %v956_v27 = vmul.f32 %v6163_v23, %v5677_v36  ;;  %vm1098_vm6 = vcmp.lt.s32.totalorder %v6117_v32, 1 }
  0xfc   :  { %vm6150_vm8 = vcmp.le.f32.partialorder %v10874_v13, 0.7853982  ;;  %vm1100_vm10 = vcmp.lt.s32.totalorder %v6117_v32, 3  ;;  %v1107_v30 = vsel %vm1101_vm7, %v1094_v4, 920167782  ;;  %v813_v47 = vshrl.u32 %v795_v63, %v811_v33  ;;  %v6173_v22 = vpop.eup %4820 }
  0xfd   :  { %v1074_v62 = vor.u32 8388608, %v1073_v46  ;;  %v1111_v53 = vsel %vm1101_vm7, %v1097_v41, 1326507024  ;;  %v1180_v15 = vadd.s32 1, %v4515_v39  ;;  %vm507_vm11 = vcmp.lt.s32.totalorder %v6075_v37, 2  ;;  %v4823_v13 = vpop.eup %4822 }
  0xfe   :  { %v509_v28 = vxor.u32 2147483648, %v4819_v1  ;;  %v722_v36 = vsel %vm637_vm3, %v721_v51, %v5803_v16  ;;  %v817_v12 = vshll.u32 %v816_v48, 23  ;;  %v4504_v21 = vmin.u32 %v909_v3, %v6123_v18 }
  0xff   :  { %v6180_v0 = vshrl.u32 %v1023_v43, 30  ;;  %vm1099_vm12 = vcmp.lt.s32.totalorder %v6117_v32, 2  ;;  %v1106_v63 = vsel %vm1098_vm6, %v6155_v25, %v6157_v56  ;;  %v1108_v33 = vsel %vm1100_vm10, %v1091_v42, %v1107_v30 }
 0x100   :  { %v10878_v46 = vshll.u32 %v5842_v20, %v6061_v54  ;;  %v6193_v48 = vadd.f32 %v5707_v59, %v956_v27  ;;  %v1110_v51 = vsel %vm1098_vm6, %v6157_v56, %v1091_v42  ;;  %v1112_v41 = vsel %vm1100_vm10, %v1094_v4, %v1111_v53 }
 0x101   :  { %vm504_vm13 = vweird.f32 %v5220_v2  ;;  %v714_v39 = vor.u32 4788187, %v713_v19  ;;  %v814_v3 = vor.u32 %v813_v47, %v812_v9  ;;  %v6201_v43 = vshll.u32 %v1074_v62, 8 }
 0x102   :  { %v710_v16 = vor.u32 %v709_v24, %v10878_v46  ;;  %vm1181_vm14 = vcmp.gt.s32.totalorder %v1180_v15, 0  ;;  %v6204_v20 = vand.u32 3, %v6086_v6  ;;  %v818_v54 = vor.u32 4788187, %v817_v12 }
 0x103   :  { %v911_v59 = vclz %v4504_v21  ;;  %v1109_v24 = vsel %vm1099_vm12, %v1106_v63, %v1108_v33  ;;  %v510_v27 = vsel %vm508_vm5, %v6072_v49, %v509_v28  ;;  %v10879_v4 = vxor.u32 2147483648, %v6072_v49 }
 0x104   :  { %v1025_v9 = vshll.u32 %v6180_v0, 30  ;;  %v1113_v6 = vsel %vm1099_vm12, %v1110_v51, %v1112_v41  ;;  %v717_v30 = vcvt.s32.f32 %v710_v16  ;;  %v724_v47 = vsel %vm6150_vm8, 0, %v722_v36 }
 0x105   :  { %v513_v19 = vsel %vm511_vm4, %v10879_v4, %v4819_v1  ;;  %v1182_v62 = vsel %vm1181_vm14, %v1180_v15, 0  ;;  %v1277_v53 = vand.u32 2139095040, %v6193_v48  ;;  %v715_v12 = vand.u32 2147483647, %v714_v39 }
 0x106   :  { %v821_v21 = vcvt.s32.f32 %v814_v3  ;;  %v6222_v28 = vmul.u32.u64.low %v6201_v43, %v1109_v24  ;;  %v6223_v49 = vmul.u32.u64.high %v6201_v43, %v1109_v24, %v6222_v28  ;;  %v819_v1 = vand.u32 2147483647, %v818_v54 }
 0x107   :  { %v4505_v63 = vadd.s32 4294967294, %v911_v59  ;;  %v6227_v33 = vmul.u32.u64.low %v6201_v43, %v1113_v6  ;;  %v6228_v46 = vmul.u32.u64.high %v6201_v43, %v1113_v6, %v6227_v33  ;;  %v411_v36 = vsel %vm400_vm9, nan, %v6084_v17 }
 0x108   :  { %v6234_v15 = vsub.s32 %v6128_v7, %v1025_v9  ;;  %v1082_v16 = vshrl.u32 %v10870_v57, %v6096_v44  ;;  %v1184_v51 = vand.u32 31, %v1182_v62  ;;  %v631_v41 = vxor.u32 2147483648, %v6173_v22  ;;  %v10881_v44 = vld [vmem:[#allocation9_spill] sm:$0xff] }
 0x109   :  { %v728_v39 = vadd.s32 3, %v724_v47  ;;  %v1103_v3 = vsel %vm1101_vm7, %v1091_v42, 2102212464  ;;  %v1278_v54 = vshrl.u32 %v1277_v53, 23  ;;  %v514_v59 = vsel %vm507_vm11, %v510_v27, %v513_v19 }
 0x10a   :  { %v628_v24 = vxor.u32 2147483648, %v4823_v13  ;;  %vm630_vm15 = vcmp.eq.s32.totalorder %v6204_v20, 2  ;;  %v718_v50 = vmul.f32 %v717_v30, %v715_v12  ;;  %v6245_v17 = vmul.f32 %v5794_v60, %v411_v36 }
 0x10b   :  { %vm627_vm0 = vcmp.eq.s32.totalorder %v6204_v20, 0  ;;  %vm741_vm1 = vcmp.lt.s32.totalorder %v10881_v44, 0  ;;  %v822_v7 = vmul.f32 %v821_v21, %v819_v1  ;;  %vm4506_vm2 = vcmp.lt.s32.totalorder %v4505_v63, 0 }
 0x10c   :  { %10880 = vst [vmem:[#allocation19_spill] sm:$0xff] %v6245_v17  ;;  %v1028_v4 = vsub.s32 0, %v6234_v15  ;;  %v1102_v37 = vsel %vm1098_vm6, %v1082_v16, %v6155_v25  ;;  %v1104_v42 = vsel %vm1100_vm10, %v6157_v56, %v1103_v3  ;;  %v6256_v27 = vsub.s32 32, %v1184_v51  ;;  %v10882_v25 = vld [vmem:[#allocation13_spill] sm:$0xff] }
 0x10d   :  { %v6260_v19 = vsel %vm504_vm13, nan, %v514_v59  ;;  %v6262_v9 = vsel %vm630_vm15, %v631_v41, %v4823_v13  ;;  %v6264_v6 = vand.u32 3, %v728_v39  ;;  %v4519_v30 = vadd.s32 4294967169, %v1278_v54 }
 0x10e   :  { %v6267_v47 = vsel %vm627_vm0, %v6173_v22, %v628_v24  ;;  %v719_v53 = vxor.u32 2147483648, %v718_v50  ;;  %v825_v12 = vsub.s32 4, %v10882_v25  ;;  %v1124_v21 = vadd.s32 1, %v6223_v49 }
 0x10f   :  { %v10883_v56 = vand.u32 2147483647, %v10881_v44  ;;  %v823_v2 = vxor.u32 2147483648, %v822_v7  ;;  %v6278_v13 = vsel %vm4506_vm2, 0, %v4505_v63  ;;  %v1105_v33 = vsel %vm1099_vm12, %v1102_v37, %v1104_v42 }
 0x110   :  { %vm1123_vm4 = vc.u32 %v6228_v46, %v6222_v28  ;;  %v4508_v22 = vmin.u32 %v1028_v4, %v6234_v15  ;;  %v10714_v36 = vand.u32 2147483647, %v6064_v38  ;;  %v1196_v16 = vshll.u32 %v10863_v52, %v1184_v51 }
 0x111   :  { %vm6273_vm5 = vcmp.le.f32.partialorder %v10883_v56, 0.7853982  ;;  %v1197_v41 = vshrl.u32 %v10864_v8, %v6256_v27  ;;  %v6289_v39 = vshrl.u32 %v1182_v62, 5  ;;  %v1199_v63 = vshll.u32 %v10864_v8, %v1184_v51 }
 0x112   :  { %v1200_v32 = vshrl.u32 %v10865_v14, %v6256_v27  ;;  %v1284_v3 = vadd.s32 1, %v4519_v30  ;;  %v1121_v54 = vmul.u32 %v6201_v43, %v1105_v33  ;;  %v1125_v59 = vsel %vm1123_vm4, %v1124_v21, %v6223_v49 }
 0x113   :  { %v1187_v24 = vshll.u32 %v10870_v57, %v1184_v51  ;;  %v1190_v4 = vshll.u32 %v10856_v55, %v1184_v51  ;;  %v1188_v62 = vshrl.u32 %v10856_v55, %v6256_v27  ;;  %v1191_v37 = vshrl.u32 %v10851_v34, %v6256_v27 }
 0x114   :  { %v1193_v42 = vshll.u32 %v10851_v34, %v1184_v51  ;;  %v1194_v30 = vshrl.u32 %v10863_v52, %v6256_v27  ;;  %v6310_v43 = vsel %vm741_vm1, %v825_v12, %v10882_v25  ;;  %v919_v49 = vsub.s32 4294967266, %v6278_v13 }
 0x115   :  { %v1177_v21 = vand.u32 8388607, %v10714_v36  ;;  %v1198_v56 = vor.u32 %v1197_v41, %v1196_v16  ;;  %v1030_v33 = vclz %v4508_v22  ;;  %v1201_v17 = vor.u32 %v1200_v32, %v1199_v63 }
 0x116   :  { %vm1205_vm7 = vcmp.lt.s32.totalorder %v6289_v39, 4  ;;  %vm1285_vm9 = vcmp.gt.s32.totalorder %v1284_v3, 0  ;;  %v720_v51 = vsel %vm637_vm3, %v719_v53, %v718_v50  ;;  %v824_v25 = vsel %vm741_vm1, %v823_v2, %v822_v7 }
 0x117   :  { %v899_v12 = vadd.s32 %v5918_v40, %v5924_v29  ;;  %v6324_v11 = vadd.s32 %v1125_v59, %v1121_v54  ;;  %v915_v22 = vsub.s32 32, %v6278_v13  ;;  %v1189_v16 = vor.u32 %v1188_v62, %v1187_v24 }
 0x118   :  { %v1192_v41 = vor.u32 %v1191_v37, %v1190_v4  ;;  %v1195_v63 = vor.u32 %v1194_v30, %v1193_v42  ;;  %vm1202_vm6 = vcmp.lt.s32.totalorder %v6289_v39, 1  ;;  %vm1204_vm10 = vcmp.lt.s32.totalorder %v6289_v39, 3 }
 0x119   :  { %v1211_v50 = vsel %vm1205_vm7, %v1198_v56, 920167782  ;;  %v1286_v53 = vsel %vm1285_vm9, %v1284_v3, 0  ;;  %v920_v7 = vadd.s32 127, %v919_v49  ;;  %v4509_v2 = vadd.s32 4294967294, %v1030_v33 }
 0x11a   :  { %v1178_v32 = vor.u32 8388608, %v1177_v21  ;;  %v1215_v40 = vsel %vm1205_vm7, %v1201_v17, 1326507024  ;;  %v723_v29 = vsel %vm6150_vm8, %v5372_v5, %v720_v51  ;;  %v6339_v54 = vsel %vm6273_vm5, %v10881_v44, %v824_v25  ;;  %v6361_v21 = vld [vmem:[%s10684_s3] sm:$0xff] }
 0x11b   :  { %v1127_v59 = vadd.s32 536870912, %v6324_v11  ;;  %v6343_v24 = vstv %s6294_s22  ;;  %vm1203_vm3 = vcmp.lt.s32.totalorder %v6289_v39, 2  ;;  %v1210_v3 = vsel %vm1202_vm6, %v1189_v16, %v1192_v41  ;;  %10886 = vst [vmem:[#allocation13_spill] sm:$0xff] %v6361_v21  ;;  %s8863_s22 = sld [smem:[#allocation4 + $0x7]] }
 0x11c   :  { %v1212_v17 = vsel %vm1204_vm10, %v1195_v63, %v1211_v50  ;;  %v1288_v58 = vand.u32 31, %v1286_v53  ;;  %v916_v4 = vshll.u32 %v6123_v18, %v6278_v13  ;;  %v917_v62 = vshrl.u32 %v899_v12, %v915_v22 }
 0x11d   :  { %v1214_v37 = vsel %vm1202_vm6, %v1192_v41, %v1195_v63  ;;  %v1216_v42 = vsel %vm1204_vm10, %v1198_v56, %v1215_v40  ;;  %v921_v30 = vshll.u32 %v920_v7, 23  ;;  %vm4510_vm8 = vcmp.lt.s32.totalorder %v4509_v2, 0 }
 0x11e   :  { %v6356_v49 = vshll.u32 %v1178_v32, 8  ;;  %v1388_v33 = vmul.f32 %v6361_v21, %v6343_v24  ;;  %4824 = vcosq.f32 %v723_v29  ;;  %v1213_v13 = vsel %vm1203_vm3, %v1210_v3, %v1212_v17 }
 0x11f   :  { %v6371_v56 = vstv %s6316_s23  ;;  %4826 = vsinq.f32 %v723_v29  ;;  %v6373_v51 = vshrl.u32 %v1127_v59, 30  ;;  %v1217_v25 = vsel %vm1203_vm3, %v1214_v37, %v1216_v42  ;;  %s8881_s23 = sld [smem:[#allocation6 + $0x5]] }
 0x120   :  { %v6377_v12 = vsub.s32 32, %v1288_v58  ;;  %4828 = vcosq.f32 %v6339_v54  ;;  %v6380_v22 = vor.u32 %v917_v62, %v916_v4  ;;  %v6382_v50 = vsel %vm4510_vm8, 0, %v4509_v2 }
 0x121   :  { %10887 = vst [vmem:[#allocation20_spill] sm:$0xff] %v6373_v51  ;;  %v1186_v7 = vshrl.u32 %v10870_v57, %v6256_v27  ;;  %v6386_v32 = vor.u32 4788187, %v921_v30  ;;  %v6389_v40 = vmul.u32.u64.low %v6356_v49, %v1213_v13  ;;  %v6390_v29 = vmul.u32.u64.high %v6356_v49, %v1213_v13, %v6389_v40 }
 0x122   :  { %v6394_v59 = vadd.f32 %v6371_v56, %v1388_v33  ;;  %v1207_v3 = vsel %vm1205_vm7, %v1195_v63, 2102212464  ;;  %v6399_v17 = vmul.u32.u64.low %v6356_v49, %v1217_v25  ;;  %v6400_v2 = vmul.u32.u64.high %v6356_v49, %v1217_v25, %v6399_v17 }
 0x123   :  { %v1038_v27 = vsub.s32 4294967266, %v6382_v50  ;;  %v1129_v62 = vshll.u32 %v6373_v51, 30  ;;  %v1300_v37 = vshll.u32 %v10863_v52, %v1288_v58  ;;  %v1301_v42 = vshrl.u32 %v10864_v8, %v6377_v12 }
 0x124   :  { %10888 = vst [vmem:[#allocation21_spill] sm:$0xff] %v6394_v59  ;;  %v1206_v30 = vsel %vm1202_vm6, %v1186_v7, %v1189_v16  ;;  %v6410_v33 = vshrl.u32 %v1286_v53, 5  ;;  %v1303_v63 = vshll.u32 %v10864_v8, %v1288_v58  ;;  %v1304_v13 = vshrl.u32 %v10865_v14, %v6377_v12 }
 0x125   :  { %v1208_v25 = vsel %vm1204_vm10, %v1192_v41, %v1207_v3  ;;  %v1291_v17 = vshll.u32 %v10870_v57, %v1288_v58  ;;  %v1294_v36 = vshll.u32 %v10856_v55, %v1288_v58  ;;  %v1400_v18 = vand.u32 2139095040, %v6394_v59 }
 0x126   :  { %v1292_v4 = vshrl.u32 %v10856_v55, %v6377_v12  ;;  %v1295_v16 = vshrl.u32 %v10851_v34, %v6377_v12  ;;  %v1297_v53 = vshll.u32 %v10851_v34, %v1288_v58  ;;  %v1298_v7 = vshrl.u32 %v10863_v52, %v6377_v12 }
 0x127   :  { %v925_v21 = vcvt.s32.f32 %v6380_v22  ;;  %v1018_v41 = vadd.s32 %v6032_v45, %v6040_v31  ;;  %v6431_v3 = vsub.s32 %v6324_v11, %v1129_v62  ;;  %v1302_v38 = vor.u32 %v1301_v42, %v1300_v37 }
 0x128   :  { %vm626_vm11 = vcmp.lt.s32.totalorder %v6204_v20, 2  ;;  %v1034_v23 = vsub.s32 32, %v6382_v50  ;;  %v10889_v51 = vand.u32 2147483647, %v6193_v48  ;;  %v1305_v58 = vor.u32 %v1304_v13, %v1303_v63 }
 0x129   :  { %vm1309_vm12 = vcmp.lt.s32.totalorder %v6410_v33, 4  ;;  %v1039_v10 = vadd.s32 127, %v1038_v27  ;;  %v1209_v22 = vsel %vm1203_vm3, %v1206_v30, %v1208_v25  ;;  %v1228_v45 = vadd.s32 1, %v6390_v29 }
 0x12a   :  { %v1281_v44 = vand.u32 8388607, %v10889_v51  ;;  %v1401_v31 = vshrl.u32 %v1400_v18, 23  ;;  %vm1227_vm13 = vc.u32 %v6400_v2, %v6389_v40  ;;  %v6443_v11 = vor.u32 %v1292_v4, %v1291_v17 }
 0x12b   :  { %v6445_v62 = vor.u32 %v1295_v16, %v1294_v36  ;;  %v1299_v37 = vor.u32 %v1298_v7, %v1297_v53  ;;  %v6447_v42 = vpop.eup %4824  ;;  %v1132_v51 = vsub.s32 0, %v6431_v3  ;;  %vm1306_vm14 = vcmp.lt.s32.totalorder %v6410_v33, 1 }
 0x12c   :  { %vm1308_vm15 = vcmp.lt.s32.totalorder %v6410_v33, 3  ;;  %v1315_v39 = vsel %vm1309_vm12, %v1302_v38, 920167782  ;;  %v6454_v18 = vpop.eup %4826  ;;  %vm623_vm0 = vweird.f32 %v5264_v61  ;;  %v923_v4 = vand.u32 2147483647, %v6386_v32 }
 0x12d   :  { %v1225_v36 = vmul.u32 %v6356_v49, %v1209_v22  ;;  %v1282_v27 = vor.u32 8388608, %v1281_v44  ;;  %v1319_v30 = vsel %vm1309_vm12, %v1305_v58, 1326507024  ;;  %v6461_v63 = vpop.eup %4828  ;;  %v1035_v13 = vshll.u32 %v6234_v15, %v6382_v50  ;;  %v10891_v50 = vld [vmem:[#allocation10_spill] sm:$0xff] }
 0x12e   :  { %v1036_v25 = vshrl.u32 %v1018_v41, %v1034_v23  ;;  %v1229_v17 = vsel %vm1227_vm13, %v1228_v45, %v6390_v29  ;;  %v4523_v16 = vadd.s32 4294967169, %v1401_v31  ;;  %v1040_v53 = vshll.u32 %v1039_v10, 23 }
 0x12f   :  { %vm1307_vm1 = vcmp.lt.s32.totalorder %v6410_v33, 2  ;;  %v1314_v44 = vsel %vm1306_vm14, %v6443_v11, %v6445_v62  ;;  %v1316_v49 = vsel %vm1308_vm15, %v1299_v37, %v1315_v39  ;;  %v10890_v23 = vsel %vm6273_vm5, 0, %v6310_v43 }
 0x130   :  { %v832_v15 = vadd.s32 3, %v10890_v23  ;;  %v10892_v32 = vand.u32 2147483647, %v10891_v50  ;;  %v4512_v29 = vmin.u32 %v1132_v51, %v6431_v3  ;;  %v1318_v7 = vsel %vm1306_vm14, %v6445_v62, %v1299_v37 }
 0x131   :  { %v1320_v41 = vsel %vm1308_vm15, %v1302_v38, %v1319_v30  ;;  %4830 = vsinq.f32 %v6339_v54  ;;  %v929_v1 = vsub.s32 4, %v6080_v26  ;;  %v6496_v43 = vadd.s32 %v1229_v17, %v1225_v36 }
 0x132   :  { %vm6484_vm2 = vcmp.le.f32.partialorder %v10892_v32, 0.7853982  ;;  %v6498_v58 = vshll.u32 %v1282_v27, 8  ;;  %v6502_v22 = vmul.f32 %v5794_v60, %v6260_v19  ;;  %vm845_vm5 = vcmp.lt.s32.totalorder %v10891_v50, 0 }
 0x133   :  { %v1317_v45 = vsel %vm1307_vm1, %v1314_v44, %v1316_v49  ;;  %v1407_v31 = vadd.s32 1, %v4523_v16  ;;  %v926_v51 = vmul.f32 %v925_v21, %v923_v4  ;;  %v1037_v38 = vor.u32 %v1036_v25, %v1035_v13 }
 0x134   :  { %10895 = vst [vmem:[#allocation10_spill] sm:$0xff] %v6502_v22  ;;  %v1041_v39 = vor.u32 4788187, %v1040_v53  ;;  %v1321_v54 = vsel %vm1307_vm1, %v1318_v7, %v1320_v41  ;;  %v633_v36 = vsel %vm626_vm11, %v6267_v47, %v6262_v9  ;;  %vm731_vm4 = vcmp.eq.s32.totalorder %v6264_v6, 0  ;;  %v10898_v41 = vld [vmem:[#allocation11_spill] sm:$0xff] }
 0x135   :  { %v6514_v60 = vand.u32 3, %v832_v15  ;;  %v1134_v19 = vclz %v4512_v29  ;;  %vm730_vm7 = vcmp.lt.s32.totalorder %v6264_v6, 2  ;;  %v930_v21 = vsel %vm845_vm5, %v929_v1, %v6080_v26 }
 0x136   :  { %v1231_v4 = vadd.s32 536870912, %v6496_v43  ;;  %v6522_v27 = vmul.u32.u64.low %v6498_v58, %v1317_v45  ;;  %v6523_v30 = vmul.u32.u64.high %v6498_v58, %v1317_v45, %v6522_v27  ;;  %v1290_v20 = vshrl.u32 %v10870_v57, %v6377_v12 }
 0x137   :  { %v6529_v9 = vmul.u32.u64.low %v6498_v58, %v1321_v54  ;;  %v6530_v47 = vmul.u32.u64.high %v6498_v58, %v1321_v54, %v6529_v9  ;;  %vm1408_vm9 = vcmp.gt.s32.totalorder %v1407_v31, 0  ;;  %v927_v13 = vxor.u32 2147483648, %v926_v51 }
 0x138   :  { %v1042_v25 = vand.u32 2147483647, %v1041_v39  ;;  %v1044_v17 = vcvt.s32.f32 %v1037_v38  ;;  %v1311_v26 = vsel %vm1309_vm12, %v1299_v37, 2102212464  ;;  %v634_v16 = vsel %vm623_vm0, nan, %v633_v36  ;;  %v10899_v39 = vld [vmem:[#allocation12_spill] sm:$0xff] }
 0x139   :  { %v735_v53 = vxor.u32 2147483648, %v6447_v42  ;;  %v6538_v44 = vstv %s6476_s24  ;;  %v4513_v49 = vadd.s32 4294967294, %v1134_v19  ;;  %v732_v12 = vxor.u32 2147483648, %v6454_v18  ;;  %s9304_s24 = sld [smem:[#allocation6 + $0x6]] }
 0x13a   :  { %10896 = vst [vmem:[#allocation22_spill] sm:$0xff] %v6538_v44  ;;  %vm734_vm6 = vcmp.eq.s32.totalorder %v6264_v6, 2  ;;  %v932_v23 = vsel %vm6484_vm2, 0, %v930_v21  ;;  %v1409_v15 = vsel %vm1408_vm9, %v1407_v31, 0  ;;  %vm838_vm10 = vcmp.eq.s32.totalorder %v6514_v60, 2 }
 0x13b   :  { %v6545_v32 = vshrl.u32 %v1231_v4, 30  ;;  %v1310_v61 = vsel %vm1306_vm14, %v1290_v20, %v6443_v11  ;;  %v1312_v37 = vsel %vm1308_vm15, %v6445_v62, %v1311_v26  ;;  %v928_v29 = vsel %vm845_vm5, %v927_v13, %v926_v51 }
 0x13c   :  { %v6556_v7 = vmul.f32 %v6538_v44, %v634_v16  ;;  %vm964_vm3 = vcmp.lt.s32.totalorder %v10898_v41, 0  ;;  %v1045_v1 = vmul.f32 %v1044_v17, %v1042_v25  ;;  %v736_v45 = vsel %vm734_vm6, %v735_v53, %v6454_v18 }
 0x13d   :  { %v936_v31 = vadd.s32 3, %v932_v23  ;;  %vm4514_vm8 = vcmp.lt.s32.totalorder %v4513_v49, 0  ;;  %v1411_v38 = vand.u32 31, %v1409_v15  ;;  %v733_v11 = vsel %vm731_vm4, %v6447_v42, %v732_v12 }
 0x13e   :  { %10897 = vst [vmem:[#allocation23_spill] sm:$0xff] %v6556_v7  ;;  %v1313_v62 = vsel %vm1307_vm1, %v1310_v61, %v1312_v37  ;;  %v1332_v51 = vadd.s32 1, %v6523_v30  ;;  %v1389_v54 = vmul.f32 %v10899_v39, %v6343_v24  ;;  %v6568_v36 = vpop.eup %4830  ;;  %v839_v19 = vxor.u32 2147483648, %v6461_v63 }
 0x13f   :  { %v931_v18 = vsel %vm6484_vm2, %v10891_v50, %v928_v29  ;;  %v1233_v21 = vshll.u32 %v6545_v32, 30  ;;  %vm1331_vm11 = vc.u32 %v6530_v47, %v6522_v27  ;;  %v10900_v33 = vand.u32 2147483647, %v10898_v41 }
 0x140   :  { %v1046_v4 = vxor.u32 2147483648, %v1045_v1  ;;  %v1048_v20 = vsub.s32 4, %v6180_v0  ;;  %v6584_v9 = vsel %vm4514_vm8, 0, %v4513_v49  ;;  %v6588_v10 = vsel %vm730_vm7, %v733_v11, %v736_v45 }
 0x141   :  { %vm6579_vm12 = vcmp.le.f32.partialorder %v10900_v33, 0.7853982  ;;  %v6590_v13 = vand.u32 3, %v936_v31  ;;  %v1329_v25 = vmul.u32 %v6498_v58, %v1313_v62  ;;  %v6593_v17 = vsub.s32 32, %v1411_v38 }
 0x142   :  { %4832 = vcosq.f32 %v931_v18  ;;  %v1333_v16 = vsel %vm1331_vm11, %v1332_v51, %v6523_v30  ;;  %v6598_v53 = vadd.f32 %v6371_v56, %v1389_v54  ;;  %v6603_v6 = vsel %vm838_vm10, %v839_v19, %v6568_v36 }
 0x143   :  { %4834 = vsinq.f32 %v931_v18  ;;  %v1142_v49 = vsub.s32 4294967266, %v6584_v9  ;;  %v6607_v58 = vsub.s32 %v6496_v43, %v1233_v21  ;;  %v1047_v12 = vsel %vm964_vm3, %v1046_v4, %v1045_v1 }
 0x144   :  { %10903 = vst [vmem:[#allocation11_spill] sm:$0xff] %v6598_v53  ;;  %v6614_v30 = vsel %vm964_vm3, %v1048_v20, %v6180_v0  ;;  %v1122_v23 = vadd.s32 %v6222_v28, %v6228_v46  ;;  %v1138_v61 = vsub.s32 32, %v6584_v9  ;;  %v6619_v37 = vadd.s32 %v1333_v16, %v1329_v25 }
 0x145   :  { %v10724_v29 = vand.u32 2147483647, %v6394_v59  ;;  %v1423_v43 = vshll.u32 %v10863_v52, %v1411_v38  ;;  %v1424_v45 = vshrl.u32 %v10864_v8, %v6593_v17  ;;  %v6625_v1 = vshrl.u32 %v1409_v15, 5 }
 0x146   :  { %v1426_v31 = vshll.u32 %v10864_v8, %v1411_v38  ;;  %v1427_v0 = vshrl.u32 %v10865_v14, %v6593_v17  ;;  %v1504_v28 = vand.u32 2139095040, %v6598_v53  ;;  %vm835_vm13 = vcmp.eq.s32.totalorder %v6514_v60, 0 }
 0x147   :  { %v1143_v46 = vadd.s32 127, %v1142_v49  ;;  %v1236_v11 = vsub.s32 0, %v6607_v58  ;;  %v1414_v62 = vshll.u32 %v10870_v57, %v1411_v38  ;;  %v1417_v51 = vshll.u32 %v10856_v55, %v1411_v38 }
 0x148   :  { %vm727_vm14 = vweird.f32 %v5372_v5  ;;  %v1415_v15 = vshrl.u32 %v10856_v55, %v6593_v17  ;;  %v1418_v39 = vshrl.u32 %v10851_v34, %v6593_v17  ;;  %v1420_v54 = vshll.u32 %v10851_v34, %v1411_v38 }
 0x149   :  { %v1421_v19 = vshrl.u32 %v10863_v52, %v6593_v17  ;;  %v1051_v18 = vsel %vm6579_vm12, 0, %v6614_v30  ;;  %v1335_v21 = vadd.s32 536870912, %v6619_v37  ;;  %v1390_v33 = vmul.f32 %v6027_v35, %v6343_v24 }
 0x14a   :  { %v1425_v4 = vor.u32 %v1424_v45, %v1423_v43  ;;  %vm834_vm15 = vcmp.lt.s32.totalorder %v6514_v60, 2  ;;  %v1404_v20 = vand.u32 8388607, %v10724_v29  ;;  %v1428_v25 = vor.u32 %v1427_v0, %v1426_v31  ;;  %v10904_v43 = vld [vmem:[#allocation14_spill] sm:$0xff]  ;;  %v10905_v0 = vld [vmem:[#allocation9_spill] sm:$0xff] }
 0x14b   :  { %vm1432_vm0 = vcmp.lt.s32.totalorder %v6625_v1, 4  ;;  %v1505_v38 = vshrl.u32 %v1504_v28, 23  ;;  %v1050_v16 = vsel %vm6579_vm12, %v10898_v41, %v1047_v12  ;;  %v1139_v49 = vshll.u32 %v6431_v3, %v6584_v9 }
 0x14c   :  { %v1140_v30 = vshrl.u32 %v1122_v23, %v1138_v61  ;;  %v4516_v35 = vmin.u32 %v1236_v11, %v6607_v58  ;;  %vm1068_vm1 = vcmp.lt.s32.totalorder %v10904_v43, 0  ;;  %v1144_v45 = vshll.u32 %v1143_v46, 23  ;;  %v10907_v11 = vld [vmem:[#allocation20_spill] sm:$0xff] }
 0x14d   :  { %v6660_v26 = vor.u32 %v1415_v15, %v1414_v62  ;;  %v6662_v29 = vor.u32 %v1418_v39, %v1417_v51  ;;  %v1422_v31 = vor.u32 %v1421_v19, %v1420_v54  ;;  %vm831_vm2 = vweird.f32 %v10905_v0 }
 0x14e   :  { %v6665_v28 = vshrl.u32 %v1335_v21, 30  ;;  %vm1429_vm5 = vcmp.lt.s32.totalorder %v6625_v1, 1  ;;  %vm1431_vm4 = vcmp.lt.s32.totalorder %v6625_v1, 3  ;;  %v1438_v3 = vsel %vm1432_vm0, %v1425_v4, 920167782 }
 0x14f   :  { %v6672_v42 = vadd.f32 %v6371_v56, %v1390_v33  ;;  %v1405_v9 = vor.u32 8388608, %v1404_v20  ;;  %v1442_v12 = vsel %vm1432_vm0, %v1428_v25, 1326507024  ;;  %v4527_v23 = vadd.s32 4294967169, %v1505_v38  ;;  %v6676_v61 = vpop.eup %4832 }
 0x150   :  { %4836 = vcosq.f32 %v1050_v16  ;;  %v1141_v46 = vor.u32 %v1140_v30, %v1139_v49  ;;  %v1152_v62 = vsub.s32 4, %v10907_v11  ;;  %v1238_v51 = vclz %v4516_v35  ;;  %v4835_v15 = vpop.eup %4834 }
 0x151   :  { %10906 = vst [vmem:[#allocation12_spill] sm:$0xff] %v6672_v42  ;;  %v1145_v39 = vor.u32 4788187, %v1144_v45  ;;  %vm1430_vm7 = vcmp.lt.s32.totalorder %v6625_v1, 2  ;;  %v1437_v54 = vsel %vm1429_vm5, %v6660_v26, %v6662_v29  ;;  %v1439_v19 = vsel %vm1431_vm4, %v1422_v31, %v1438_v3 }
 0x152   :  { %4838 = vsinq.f32 %v1050_v16  ;;  %v1337_v21 = vshll.u32 %v6665_v28, 30  ;;  %v1441_v33 = vsel %vm1429_vm5, %v6662_v29, %v1422_v31  ;;  %v1443_v20 = vsel %vm1431_vm4, %v1425_v4, %v1442_v12 }
 0x153   :  { %v10908_v25 = vxor.u32 2147483648, %v6568_v36  ;;  %v6697_v49 = vshll.u32 %v1405_v9, 8  ;;  %v1511_v30 = vadd.s32 1, %v4527_v23  ;;  %v1608_v16 = vand.u32 2139095040, %v6672_v42 }
 0x154   :  { %v738_v35 = vsel %vm727_vm14, nan, %v6588_v10  ;;  %v10909_v45 = vand.u32 2147483647, %v10904_v43  ;;  %v4517_v36 = vadd.s32 4294967294, %v1238_v51  ;;  %v1440_v4 = vsel %vm1430_vm7, %v1437_v54, %v1439_v19 }
 0x155   :  { %v837_v38 = vsel %vm835_vm13, %v6461_v63, %v10908_v25  ;;  %v1055_v63 = vadd.s32 3, %v1051_v18  ;;  %v1146_v9 = vand.u32 2147483647, %v1145_v39  ;;  %v1148_v12 = vcvt.s32.f32 %v1141_v46 }
 0x156   :  { %vm6705_vm9 = vcmp.le.f32.partialorder %v10909_v45, 0.7853982  ;;  %v1444_v23 = vsel %vm1430_vm7, %v1441_v33, %v1443_v20  ;;  %v841_v5 = vsel %vm834_vm15, %v837_v38, %v6603_v6  ;;  %vm939_vm6 = vcmp.eq.s32.totalorder %v6590_v13, 0 }
 0x157   :  { %v1153_v10 = vsel %vm1068_vm1, %v1152_v62, %v10907_v11  ;;  %v6721_v51 = vsub.s32 %v6619_v37, %v1337_v21  ;;  %v6724_v18 = vmul.u32.u64.low %v6697_v49, %v1440_v4  ;;  %v6725_v39 = vmul.u32.u64.high %v6697_v49, %v1440_v4, %v6724_v18 }
 0x158   :  { %vm1512_vm10 = vcmp.gt.s32.totalorder %v1511_v30, 0  ;;  %v1609_v46 = vshrl.u32 %v1608_v16, 23  ;;  %vm4518_vm3 = vcmp.lt.s32.totalorder %v4517_v36, 0  ;;  %v1413_v60 = vshrl.u32 %v10870_v57, %v6593_v17 }
 0x159   :  { %v6731_v6 = vmul.u32.u64.low %v6697_v49, %v1444_v23  ;;  %v6732_v54 = vmul.u32.u64.high %v6697_v49, %v1444_v23, %v6731_v6  ;;  %v842_v37 = vsel %vm831_vm2, nan, %v841_v5  ;;  %v6738_v11 = vand.u32 3, %v1055_v63 }
 0x15a   :  { %v1149_v62 = vmul.f32 %v1148_v12, %v1146_v9  ;;  %v1434_v19 = vsel %vm1432_vm0, %v1422_v31, 2102212464  ;;  %v940_v21 = vxor.u32 2147483648, %v4835_v15  ;;  %v943_v33 = vxor.u32 2147483648, %v6676_v61 }
 0x15b   :  { %v1155_v17 = vsel %vm6705_vm9, 0, %v1153_v10  ;;  %v1513_v20 = vsel %vm1512_vm10, %v1511_v30, 0  ;;  %vm942_vm8 = vcmp.eq.s32.totalorder %v6590_v13, 2  ;;  %v6746_v25 = vsel %vm4518_vm3, 0, %v4517_v36 }
 0x15c   :  { %v1340_v0 = vsub.s32 0, %v6721_v51  ;;  %v4531_v38 = vadd.s32 4294967169, %v1609_v46  ;;  %v6750_v16 = vmul.f32 %v6538_v44, %v738_v35  ;;  %v6753_v45 = vmul.f32 %v6538_v44, %v842_v37 }
 0x15d   :  { %v1433_v31 = vsel %vm1429_vm5, %v1413_v60, %v6660_v26  ;;  %v1435_v30 = vsel %vm1431_vm4, %v6662_v29, %v1434_v19  ;;  %v4837_v4 = vpop.eup %4836  ;;  %vm1061_vm11 = vcmp.eq.s32.totalorder %v6738_v11, 2  ;;  %v1150_v36 = vxor.u32 2147483648, %v1149_v62  ;;  %v10914_v29 = vld [vmem:[#allocation18_spill] sm:$0xff] }
 0x15e   :  { %10912 = vst [vmem:[#allocation14_spill] sm:$0xff] %v6750_v16  ;;  %10913 = vst [vmem:[#allocation9_spill] sm:$0xff] %v6753_v45  ;;  %v1159_v63 = vadd.s32 3, %v1155_v17  ;;  %v1515_v9 = vand.u32 31, %v1513_v20  ;;  %v6765_v35 = vsel %vm939_vm6, %v6676_v61, %v940_v21  ;;  %v6769_v12 = vsel %vm942_vm8, %v943_v33, %v4835_v15  ;;  %v10917_v45 = vld [vmem:[#allocation17_spill] sm:$0xff] }
 0x15f   :  { %vm1058_vm12 = vcmp.eq.s32.totalorder %v6738_v11, 0  ;;  %v1246_v26 = vsub.s32 4294967266, %v6746_v25  ;;  %v1391_v23 = vmul.f32 %v10914_v29, %v6343_v24  ;;  %v4839_v5 = vpop.eup %4838  ;;  %v4520_v10 = vmin.u32 %v1340_v0, %v6721_v51 }
 0x160   :  { %v1436_v46 = vsel %vm1430_vm7, %v1433_v31, %v1435_v30  ;;  %v1455_v61 = vadd.s32 1, %v6725_v39  ;;  %v1615_v60 = vadd.s32 1, %v4531_v38  ;;  %v1062_v6 = vxor.u32 2147483648, %v4837_v4 }
 0x161   :  { %v1226_v15 = vadd.s32 %v6389_v40, %v6400_v2  ;;  %v1242_v37 = vsub.s32 32, %v6746_v25  ;;  %vm1454_vm13 = vc.u32 %v6732_v54, %v6724_v18  ;;  %v1151_v24 = vsel %vm1068_vm1, %v1150_v36, %v1149_v62 }
 0x162   :  { %v6786_v19 = vand.u32 3, %v1159_v63  ;;  %v6788_v21 = vsub.s32 32, %v1515_v9  ;;  %v6791_v1 = vstv %s6734_s25  ;;  %v1059_v33 = vxor.u32 2147483648, %v4839_v5  ;;  %s9422_s25 = sld [smem:[#allocation2 + $0x8]] }
 0x163   :  { %v1247_v17 = vadd.s32 127, %v1246_v26  ;;  %v6794_v0 = vadd.f32 %v6371_v56, %v1391_v23  ;;  %v1452_v40 = vmul.u32 %v6697_v49, %v1436_v46  ;;  %v1342_v2 = vclz %v4520_v10 }
 0x164   :  { %v1456_v38 = vsel %vm1454_vm13, %v1455_v61, %v6725_v39  ;;  %v10725_v31 = vand.u32 2147483647, %v6598_v53  ;;  %vm1616_vm14 = vcmp.gt.s32.totalorder %v1615_v60, 0  ;;  %v6801_v62 = vsel %vm1061_vm11, %v1062_v6, %v4839_v5 }
 0x165   :  { %10915 = vst [vmem:[#allocation20_spill] sm:$0xff] %v6794_v0  ;;  %v1154_v30 = vsel %vm6705_vm9, %v10904_v43, %v1151_v24  ;;  %v1243_v56 = vshll.u32 %v6607_v58, %v6746_v25  ;;  %v1244_v36 = vshrl.u32 %v1226_v15, %v1242_v37  ;;  %v1527_v49 = vshll.u32 %v10863_v52, %v1515_v9 }
 0x166   :  { %v1528_v39 = vshrl.u32 %v10864_v8, %v6788_v21  ;;  %v1530_v63 = vshll.u32 %v10864_v8, %v1515_v9  ;;  %v1531_v26 = vshrl.u32 %v10865_v14, %v6788_v21  ;;  %v1248_v29 = vshll.u32 %v1247_v17, 23 }
 0x167   :  { %v6814_v23 = vadd.s32 %v1456_v38, %v1452_v40  ;;  %v6816_v5 = vshrl.u32 %v1513_v20, 5  ;;  %v1617_v3 = vsel %vm1616_vm14, %v1615_v60, 0  ;;  %v4521_v10 = vadd.s32 4294967294, %v1342_v2 }
 0x168   :  { %v1508_v58 = vand.u32 8388607, %v10725_v31  ;;  %v1518_v25 = vshll.u32 %v10870_v57, %v1515_v9  ;;  %v1521_v46 = vshll.u32 %v10856_v55, %v1515_v9  ;;  %v1519_v61 = vshrl.u32 %v10856_v55, %v6788_v21 }
 0x169   :  { %v1522_v6 = vshrl.u32 %v10851_v34, %v6788_v21  ;;  %v1524_v15 = vshll.u32 %v10851_v34, %v1515_v9  ;;  %v1525_v20 = vshrl.u32 %v10863_v52, %v6788_v21  ;;  %v6831_v60 = vsel %vm1058_vm12, %v4837_v4, %v1059_v33 }
 0x16a   :  { %v1529_v37 = vor.u32 %v1528_v39, %v1527_v49  ;;  %v1532_v24 = vor.u32 %v1531_v26, %v1530_v63  ;;  %v1619_v17 = vand.u32 31, %v1617_v3  ;;  %v6833_v40 = vor.u32 %v1244_v36, %v1243_v56 }
 0x16b   :  { %v1458_v38 = vadd.s32 536870912, %v6814_v23  ;;  %vm1536_vm15 = vcmp.lt.s32.totalorder %v6816_v5, 4  ;;  %4840 = vcosq.f32 %v1154_v30  ;;  %v6838_v9 = vor.u32 4788187, %v1248_v29 }
 0x16c   :  { %vm4522_vm0 = vcmp.lt.s32.totalorder %v4521_v10, 0  ;;  %v1509_v31 = vor.u32 8388608, %v1508_v58  ;;  %v6840_v22 = vor.u32 %v1519_v61, %v1518_v25  ;;  %v6842_v4 = vor.u32 %v1522_v6, %v1521_v46 }
 0x16d   :  { %v1526_v33 = vor.u32 %v1525_v20, %v1524_v15  ;;  %vm1533_vm1 = vcmp.lt.s32.totalorder %v6816_v5, 1  ;;  %vm1535_vm2 = vcmp.lt.s32.totalorder %v6816_v5, 3  ;;  %v1542_v56 = vsel %vm1536_vm15, %v1529_v37, 920167782 }
 0x16e   :  { %v1546_v36 = vsel %vm1536_vm15, %v1532_v24, 1326507024  ;;  %v6850_v49 = vsub.s32 32, %v1619_v17  ;;  %4842 = vsinq.f32 %v1154_v30  ;;  %v1252_v39 = vcvt.s32.f32 %v6833_v40 }
 0x16f   :  { %v6855_v63 = vadd.s32 %v6522_v27, %v6530_v47  ;;  %v6857_v26 = vshrl.u32 %v1458_v38, 30  ;;  %v1250_v29 = vand.u32 2147483647, %v6838_v9  ;;  %v6860_v58 = vsel %vm4522_vm0, 0, %v4521_v10 }
 0x170   :  { %vm1534_vm5 = vcmp.lt.s32.totalorder %v6816_v5, 2  ;;  %v1541_v30 = vsel %vm1533_vm1, %v6840_v22, %v6842_v4  ;;  %v1543_v46 = vsel %vm1535_vm2, %v1526_v33, %v1542_v56  ;;  %v1545_v27 = vsel %vm1533_vm1, %v6842_v4, %v1526_v33 }
 0x171   :  { %v1547_v47 = vsel %vm1535_vm2, %v1529_v37, %v1546_v36  ;;  %v6875_v10 = vshll.u32 %v1509_v31, 8  ;;  %v1631_v61 = vshll.u32 %v10863_v52, %v1619_v17  ;;  %v1632_v6 = vshrl.u32 %v10864_v8, %v6850_v49 }
 0x172   :  { %v1712_v15 = vand.u32 2139095040, %v6794_v0  ;;  %v1460_v20 = vshll.u32 %v6857_v26, 30  ;;  %v6882_v24 = vshrl.u32 %v1617_v3, 5  ;;  %v1634_v40 = vshll.u32 %v10864_v8, %v1619_v17 }
 0x173   :  { %v1635_v38 = vshrl.u32 %v10865_v14, %v6850_v49  ;;  %v1544_v31 = vsel %vm1534_vm5, %v1541_v30, %v1543_v46  ;;  %v1548_v37 = vsel %vm1534_vm5, %v1545_v27, %v1547_v47  ;;  %v1622_v9 = vshll.u32 %v10870_v57, %v1619_v17 }
 0x174   :  { %v1625_v56 = vshll.u32 %v10856_v55, %v1619_v17  ;;  %v1623_v36 = vshrl.u32 %v10856_v55, %v6850_v49  ;;  %v1626_v3 = vshrl.u32 %v10851_v34, %v6850_v49  ;;  %v1628_v2 = vshll.u32 %v10851_v34, %v1619_v17 }
 0x175   :  { %v1629_v25 = vshrl.u32 %v10863_v52, %v6850_v49  ;;  %v1350_v30 = vsub.s32 4294967266, %v6860_v58  ;;  %v10916_v46 = vand.u32 2147483647, %v6672_v42  ;;  %v1633_v47 = vor.u32 %v1632_v6, %v1631_v61 }
 0x176   :  { %v1713_v44 = vshrl.u32 %v1712_v15, 23  ;;  %vm1172_vm4 = vcmp.lt.s32.totalorder %v10917_v45, 0  ;;  %v6907_v16 = vsub.s32 %v6814_v23, %v1460_v20  ;;  %v1517_v17 = vshrl.u32 %v10870_v57, %v6788_v21 }
 0x177   :  { %v1612_v27 = vand.u32 8388607, %v10916_v46  ;;  %v1636_v7 = vor.u32 %v1635_v38, %v1634_v40  ;;  %vm1640_vm7 = vcmp.lt.s32.totalorder %v6882_v24, 4  ;;  %v1538_v23 = vsel %vm1536_vm15, %v1526_v33, 2102212464 }
 0x178   :  { %v6913_v53 = vmul.u32.u64.low %v6875_v10, %v1548_v37  ;;  %v6914_v59 = vmul.u32.u64.high %v6875_v10, %v1548_v37, %v6913_v53  ;;  %v6917_v61 = vmul.u32.u64.low %v6875_v10, %v1544_v31  ;;  %v6918_v6 = vmul.u32.u64.high %v6875_v10, %v1544_v31, %v6917_v61  ;;  %v6921_v15 = vpop.eup %4840 }
 0x179   :  { %v6925_v20 = vor.u32 %v1623_v36, %v1622_v9  ;;  %v6927_v21 = vor.u32 %v1626_v3, %v1625_v56  ;;  %v1630_v40 = vor.u32 %v1629_v25, %v1628_v2  ;;  %vm1637_vm9 = vcmp.lt.s32.totalorder %v6882_v24, 1  ;;  %v10921_v3 = vld [vmem:[#allocation13_spill] sm:$0xff] }
 0x17a   :  { %vm1639_vm6 = vcmp.lt.s32.totalorder %v6882_v24, 3  ;;  %v1646_v53 = vsel %vm1640_vm7, %v1633_v47, 920167782  ;;  %v4535_v38 = vadd.s32 4294967169, %v1713_v44  ;;  %vm1057_vm10 = vcmp.lt.s32.totalorder %v6738_v11, 2 }
 0x17b   :  { %v1346_v31 = vsub.s32 32, %v6860_v58  ;;  %v1351_v37 = vadd.s32 127, %v1350_v30  ;;  %v1613_v46 = vor.u32 8388608, %v1612_v27  ;;  %v1650_v33 = vsel %vm1640_vm7, %v1636_v7, 1326507024  ;;  %v4843_v9 = vpop.eup %4842 }
 0x17c   :  { %vm1162_vm3 = vcmp.eq.s32.totalorder %v6786_v19, 0  ;;  %vm1165_vm8 = vcmp.eq.s32.totalorder %v6786_v19, 2  ;;  %v1253_v2 = vmul.f32 %v1252_v39, %v1250_v29  ;;  %v1347_v25 = vshll.u32 %v6721_v51, %v6860_v58 }
 0x17d   :  { %v1463_v44 = vsub.s32 0, %v6907_v16  ;;  %v1537_v56 = vsel %vm1533_vm1, %v1517_v17, %v6840_v22  ;;  %v10918_v36 = vand.u32 2147483647, %v10917_v45  ;;  %v1539_v39 = vsel %vm1535_vm2, %v6842_v4, %v1538_v23 }
 0x17e   :  { %vm1638_vm12 = vcmp.lt.s32.totalorder %v6882_v24, 2  ;;  %v1645_v51 = vsel %vm1637_vm9, %v6925_v20, %v6927_v21  ;;  %v1647_v22 = vsel %vm1639_vm6, %v1630_v40, %v1646_v53  ;;  %vm938_vm13 = vcmp.lt.s32.totalorder %v6590_v13, 2 }
 0x17f   :  { %vm6947_vm11 = vcmp.le.f32.partialorder %v10918_v36, 0.7853982  ;;  %v1649_v29 = vsel %vm1637_vm9, %v6927_v21, %v1630_v40  ;;  %v1651_v58 = vsel %vm1639_vm6, %v1633_v47, %v1650_v33  ;;  %v1719_v4 = vadd.s32 1, %v4535_v38 }
 0x180   :  { %v1823_v30 = vmul.f32 %v10921_v3, %v6791_v1  ;;  %vm1054_vm14 = vweird.f32 %v10898_v41  ;;  %vm1161_vm15 = vcmp.lt.s32.totalorder %v6786_v19, 2  ;;  %v1348_v27 = vshrl.u32 %v6855_v63, %v1346_v31 }
 0x181   :  { %v1352_v17 = vshll.u32 %v1351_v37, 23  ;;  %v6972_v23 = vshll.u32 %v1613_v46, 8  ;;  %v6975_v53 = vstv %s6903_s26  ;;  %v1163_v36 = vxor.u32 2147483648, %v4843_v9  ;;  %s9450_s26 = sld [smem:[#allocation4 + $0x8]] }
 0x182   :  { %v1166_v42 = vxor.u32 2147483648, %v6921_v15  ;;  %v10922_v47 = vsub.s32 4, %v6545_v32  ;;  %v1648_v33 = vsel %vm1638_vm12, %v1645_v51, %v1647_v22  ;;  %v4524_v3 = vmin.u32 %v1463_v44, %v6907_v16 }
 0x183   :  { %v1540_v63 = vsel %vm1534_vm5, %v1537_v56, %v1539_v39  ;;  %v1559_v31 = vadd.s32 1, %v6918_v6  ;;  %v1652_v37 = vsel %vm1638_vm12, %v1649_v29, %v1651_v58  ;;  %vm935_vm0 = vweird.f32 %v10891_v50 }
 0x184   :  { %v1257_v38 = vsel %vm1172_vm4, %v10922_v47, %v6545_v32  ;;  %v1254_v46 = vxor.u32 2147483648, %v1253_v2  ;;  %vm1558_vm1 = vc.u32 %v6914_v59, %v6917_v61  ;;  %vm1720_vm2 = vcmp.gt.s32.totalorder %v1719_v4, 0 }
 0x185   :  { %v6997_v32 = vadd.f32 %v6975_v53, %v1823_v30  ;;  %v1349_v44 = vor.u32 %v1348_v27, %v1347_v25  ;;  %v1353_v5 = vor.u32 4788187, %v1352_v17  ;;  %vm1158_vm5 = vweird.f32 %v10904_v43 }
 0x186   :  { %v7000_v56 = vmul.u32.u64.low %v6972_v23, %v1648_v33  ;;  %v7001_v39 = vmul.u32.u64.high %v6972_v23, %v1648_v33, %v7000_v56  ;;  %v1556_v51 = vmul.u32 %v6875_v10, %v1540_v63  ;;  %v1621_v22 = vshrl.u32 %v10870_v57, %v6850_v49 }
 0x187   :  { %10923 = vst [vmem:[#allocation18_spill] sm:$0xff] %v6997_v32  ;;  %v7009_v29 = vmul.u32.u64.low %v6972_v23, %v1652_v37  ;;  %v7010_v58 = vmul.u32.u64.high %v6972_v23, %v1652_v37, %v7009_v29  ;;  %v1465_v30 = vclz %v4524_v3  ;;  %v1560_v25 = vsel %vm1558_vm1, %v1559_v31, %v6918_v6 }
 0x188   :  { %v1642_v27 = vsel %vm1640_vm7, %v1630_v40, 2102212464  ;;  %v1721_v17 = vsel %vm1720_vm2, %v1719_v4, 0  ;;  %v1064_v47 = vsel %vm1057_vm10, %v6831_v60, %v6801_v62  ;;  %v1255_v10 = vsel %vm1172_vm4, %v1254_v46, %v1253_v2 }
 0x189   :  { %v1259_v49 = vsel %vm6947_vm11, 0, %v1257_v38  ;;  %v1835_v33 = vand.u32 2139095040, %v6997_v32  ;;  %v1164_v6 = vsel %vm1162_vm3, %v6921_v15, %v1163_v36  ;;  %v1167_v40 = vsel %vm1165_vm8, %v1166_v42, %v4843_v9 }
 0x18a   :  { %v1354_v4 = vand.u32 2147483647, %v1353_v5  ;;  %v1356_v3 = vcvt.s32.f32 %v1349_v44  ;;  %v7029_v11 = vadd.s32 %v1560_v25, %v1556_v51  ;;  %v1641_v62 = vsel %vm1637_vm9, %v1621_v22, %v6925_v20 }
 0x18b   :  { %v1643_v60 = vsel %vm1639_vm6, %v6927_v21, %v1642_v27  ;;  %v1723_v2 = vand.u32 31, %v1721_v17  ;;  %v945_v15 = vsel %vm938_vm13, %v6765_v35, %v6769_v12  ;;  %v1258_v42 = vsel %vm6947_vm11, %v10917_v45, %v1255_v10 }
 0x18c   :  { %v1263_v9 = vadd.s32 3, %v1259_v49  ;;  %v4525_v36 = vadd.s32 4294967294, %v1465_v30  ;;  %v1065_v38 = vsel %vm1054_vm14, nan, %v1064_v47  ;;  %v1168_v20 = vsel %vm1161_vm15, %v1164_v6, %v1167_v40 }
 0x18d   :  { %v7049_v63 = vstv %s6991_s27  ;;  %v1836_v21 = vshrl.u32 %v1835_v33, 23  ;;  %v10924_v31 = vand.u32 2147483647, %v6193_v48  ;;  %v1357_v35 = vmul.f32 %v1356_v3, %v1354_v4 }
 0x18e   :  { %v1360_v12 = vsub.s32 4, %v6665_v28  ;;  %v1644_v7 = vsel %vm1638_vm12, %v1641_v62, %v1643_v60  ;;  %v1663_v41 = vadd.s32 1, %v7001_v39  ;;  %4844 = vcosq.f32 %v1258_v42 }
 0x18f   :  { %vm7053_vm4 = vcmp.le.f32.partialorder %v10924_v31, 0.7853982  ;;  %v1562_v19 = vadd.s32 536870912, %v7029_v11  ;;  %vm1662_vm7 = vc.u32 %v7010_v58, %v7000_v56  ;;  %v7064_v37 = vsub.s32 32, %v1723_v2 }
 0x190   :  { %v7068_v46 = vsel %vm935_vm0, nan, %v945_v15  ;;  %v7070_v44 = vand.u32 3, %v1263_v9  ;;  %vm1276_vm9 = vcmp.lt.s32.totalorder %v6193_v48, 0  ;;  %vm4526_vm6 = vcmp.lt.s32.totalorder %v4525_v36, 0 }
 0x191   :  { %10927 = vst [vmem:[#allocation17_spill] sm:$0xff] %v7068_v46  ;;  %4846 = vsinq.f32 %v1258_v42  ;;  %v7074_v24 = vmul.f32 %v7049_v63, %v1065_v38  ;;  %v1660_v5 = vmul.u32 %v6972_v23, %v1644_v7  ;;  %v4539_v51 = vadd.s32 4294967169, %v1836_v21 }
 0x192   :  { %v1169_v22 = vsel %vm1158_vm5, nan, %v1168_v20  ;;  %v1358_v29 = vxor.u32 2147483648, %v1357_v35  ;;  %v1361_v50 = vsel %vm1276_vm9, %v1360_v12, %v6665_v28  ;;  %v1664_v30 = vsel %vm1662_vm7, %v1663_v41, %v7001_v39 }
 0x193   :  { %v7083_v25 = vsel %vm4526_vm6, 0, %v4525_v36  ;;  %v7085_v27 = vshrl.u32 %v1562_v19, 30  ;;  %v1735_v47 = vshll.u32 %v10863_v52, %v1723_v2  ;;  %v1736_v23 = vshrl.u32 %v10864_v8, %v7064_v37 }
 0x194   :  { %v10733_v10 = vand.u32 2147483647, %v6794_v0  ;;  %v7091_v43 = vshrl.u32 %v1721_v17, 5  ;;  %v1738_v49 = vshll.u32 %v10864_v8, %v1723_v2  ;;  %v1739_v28 = vshrl.u32 %v10865_v14, %v7064_v37 }
 0x195   :  { %v7096_v33 = vadd.s32 %v1664_v30, %v1660_v5  ;;  %v1726_v39 = vshll.u32 %v10870_v57, %v1723_v2  ;;  %v1729_v6 = vshll.u32 %v10856_v55, %v1723_v2  ;;  %v1842_v40 = vadd.s32 1, %v4539_v51 }
 0x196   :  { %v1727_v4 = vshrl.u32 %v10856_v55, %v7064_v37  ;;  %v1730_v3 = vshrl.u32 %v10851_v34, %v7064_v37  ;;  %v1732_v17 = vshll.u32 %v10851_v34, %v1723_v2  ;;  %v1733_v62 = vshrl.u32 %v10863_v52, %v7064_v37  ;;  %v7120_v2 = vld [vmem:[%s10684_s3 + $0x8] sm:$0xff] }
 0x197   :  { %v1359_v60 = vsel %vm1276_vm9, %v1358_v29, %v1357_v35  ;;  %v1363_v15 = vsel %vm7053_vm4, 0, %v1361_v50  ;;  %v1453_v42 = vadd.s32 %v6724_v18, %v6732_v54  ;;  %v1737_v9 = vor.u32 %v1736_v23, %v1735_v47  ;;  %10928 = vst [vmem:[#allocation13_spill] sm:$0xff] %v7120_v2 }
 0x198   :  { %vm1269_vm10 = vcmp.eq.s32.totalorder %v7070_v44, 2  ;;  %v1716_v36 = vand.u32 8388607, %v10733_v10  ;;  %v1740_v38 = vor.u32 %v1739_v28, %v1738_v49  ;;  %vm1744_vm3 = vcmp.lt.s32.totalorder %v7091_v43, 4 }
 0x199   :  { %v1824_v20 = vmul.f32 %v7120_v2, %v6791_v1  ;;  %v1469_v21 = vsub.s32 32, %v7083_v25  ;;  %v1473_v18 = vsub.s32 4294967266, %v7083_v25  ;;  %v1564_v54 = vshll.u32 %v7085_v27, 30 }
 0x19a   :  { %vm1843_vm8 = vcmp.gt.s32.totalorder %v1842_v40, 0  ;;  %v1666_v31 = vadd.s32 536870912, %v7096_v33  ;;  %v1728_v35 = vor.u32 %v1727_v4, %v1726_v39  ;;  %v1731_v12 = vor.u32 %v1730_v3, %v1729_v6 }
 0x19b   :  { %v1734_v7 = vor.u32 %v1733_v62, %v1732_v17  ;;  %v1362_v41 = vsel %vm7053_vm4, %v6193_v48, %v1359_v60  ;;  %vm1741_vm11 = vcmp.lt.s32.totalorder %v7091_v43, 1  ;;  %vm1743_vm12 = vcmp.lt.s32.totalorder %v7091_v43, 3  ;;  %v7135_v5 = vpop.eup %4844 }
 0x19c   :  { %v1750_v19 = vsel %vm1744_vm3, %v1737_v9, 920167782  ;;  %v1717_v51 = vor.u32 8388608, %v1716_v36  ;;  %v1754_v29 = vsel %vm1744_vm3, %v1740_v38, 1326507024  ;;  %v7140_v50 = vadd.f32 %v6975_v53, %v1824_v20 }
 0x19d   :  { %v1844_v30 = vsel %vm1843_vm8, %v1842_v40, 0  ;;  %v1470_v13 = vshll.u32 %v6907_v16, %v7083_v25  ;;  %v1471_v47 = vshrl.u32 %v1453_v42, %v1469_v21  ;;  %v1474_v23 = vadd.s32 127, %v1473_v18 }
 0x19e   :  { %10929 = vst [vmem:[#allocation24_spill] sm:$0xff] %v7140_v50  ;;  %v7145_v49 = vsub.s32 %v7029_v11, %v1564_v54  ;;  %v7147_v28 = vpop.eup %4846  ;;  %v7149_v39 = vshrl.u32 %v1666_v31, 30  ;;  %vm1742_vm13 = vcmp.lt.s32.totalorder %v7091_v43, 2  ;;  %v1749_v6 = vsel %vm1741_vm11, %v1728_v35, %v1731_v12 }
 0x19f   :  { %v1751_v40 = vsel %vm1743_vm12, %v1734_v7, %v1750_v19  ;;  %v1270_v4 = vxor.u32 2147483648, %v7135_v5  ;;  %v1753_v16 = vsel %vm1741_vm11, %v1731_v12, %v1734_v7  ;;  %v1755_v11 = vsel %vm1743_vm12, %v1737_v9, %v1754_v29 }
 0x1a0   :  { %10930 = vst [vmem:[#allocation25_spill] sm:$0xff] %v7149_v39  ;;  %v1846_v25 = vand.u32 31, %v1844_v30  ;;  %v7161_v3 = vadd.s32 3, %v1363_v15  ;;  %v7164_v17 = vmul.f32 %v7049_v63, %v1169_v22  ;;  %v7166_v62 = vshll.u32 %v1717_v51, 8 }
 0x1a1   :  { %v1939_v60 = vand.u32 2139095040, %v7140_v50  ;;  %4848 = vcosq.f32 %v1362_v41  ;;  %v1475_v36 = vshll.u32 %v1474_v23, 23  ;;  %v1752_v38 = vsel %vm1742_vm13, %v1749_v6, %v1751_v40 }
 0x1a2   :  { %v7172_v20 = vor.u32 %v1471_v47, %v1470_v13  ;;  %v1567_v9 = vsub.s32 0, %v7145_v49  ;;  %v1668_v15 = vshll.u32 %v7149_v39, 30  ;;  %v1756_v22 = vsel %vm1742_vm13, %v1753_v16, %v1755_v11 }
 0x1a3   :  { %v7181_v21 = vsel %vm1269_vm10, %v1270_v4, %v7147_v28  ;;  %4850 = vsinq.f32 %v1362_v41  ;;  %v7184_v54 = vsub.s32 32, %v1846_v25  ;;  %v1725_v31 = vshrl.u32 %v10870_v57, %v7064_v37 }
 0x1a4   :  { %v7189_v19 = vmul.u32.u64.low %v7166_v62, %v1752_v38  ;;  %v7190_v51 = vmul.u32.u64.high %v7166_v62, %v1752_v38, %v7189_v19  ;;  %v1940_v29 = vshrl.u32 %v1939_v60, 23  ;;  %vm1266_vm14 = vcmp.eq.s32.totalorder %v7070_v44, 0 }
 0x1a5   :  { %v1476_v13 = vor.u32 4788187, %v1475_v36  ;;  %v1746_v47 = vsel %vm1744_vm3, %v1734_v7, 2102212464  ;;  %v7197_v41 = vmul.u32.u64.low %v7166_v62, %v1756_v22  ;;  %v7198_v23 = vmul.u32.u64.high %v7166_v62, %v1756_v22, %v7197_v41  ;;  %v10931_v36 = vld [vmem:[#allocation21_spill] sm:$0xff] }
 0x1a6   :  { %v1479_v6 = vcvt.s32.f32 %v7172_v20  ;;  %v4528_v37 = vmin.u32 %v1567_v9, %v7145_v49  ;;  %v7203_v40 = vsub.s32 %v7096_v33, %v1668_v15  ;;  %v1858_v16 = vshll.u32 %v10863_v52, %v1846_v25 }
 0x1a7   :  { %v1859_v11 = vshrl.u32 %v10864_v8, %v7184_v54  ;;  %v1861_v7 = vshll.u32 %v10864_v8, %v1846_v25  ;;  %v1862_v60 = vshrl.u32 %v10865_v14, %v7184_v54  ;;  %vm1399_vm15 = vcmp.lt.s32.totalorder %v10931_v36, 0 }
 0x1a8   :  { %v1745_v38 = vsel %vm1741_vm11, %v1725_v31, %v1728_v35  ;;  %v1747_v33 = vsel %vm1743_vm12, %v1731_v12, %v1746_v47  ;;  %v7217_v20 = vshrl.u32 %v1844_v30, 5  ;;  %v4543_v9 = vadd.s32 4294967169, %v1940_v29  ;;  %v7229_v35 = vld [vmem:[%s10684_s3 + $0x10] sm:$0xff] }
 0x1a9   :  { %v1849_v15 = vshll.u32 %v10870_v57, %v1846_v25  ;;  %v1850_v22 = vshrl.u32 %v10856_v55, %v7184_v54  ;;  %v1852_v41 = vshll.u32 %v10856_v55, %v1846_v25  ;;  %v1853_v10 = vshrl.u32 %v10851_v34, %v7184_v54  ;;  %10932 = vst [vmem:[#allocation21_spill] sm:$0xff] %v7229_v35 }
 0x1aa   :  { %v1671_v18 = vsub.s32 0, %v7203_v40  ;;  %v1825_v12 = vmul.f32 %v7229_v35, %v6791_v1  ;;  %v1855_v30 = vshll.u32 %v10851_v34, %v1846_v25  ;;  %v1856_v31 = vshrl.u32 %v10863_v52, %v7184_v54 }
 0x1ab   :  { %vm1265_vm0 = vcmp.lt.s32.totalorder %v7070_v44, 2  ;;  %v1477_v29 = vand.u32 2147483647, %v1476_v13  ;;  %v1748_v47 = vsel %vm1742_vm13, %v1745_v38, %v1747_v33  ;;  %v1860_v42 = vor.u32 %v1859_v11, %v1858_v16 }
 0x1ac   :  { %v1863_v4 = vor.u32 %v1862_v60, %v1861_v7  ;;  %v1767_v46 = vadd.s32 1, %v7190_v51  ;;  %v10933_v0 = vand.u32 2147483647, %v6997_v32  ;;  %vm1867_vm1 = vcmp.lt.s32.totalorder %v7217_v20, 4 }
 0x1ad   :  { %v1946_v35 = vadd.s32 1, %v4543_v9  ;;  %v1569_v25 = vclz %v4528_v37  ;;  %vm1766_vm2 = vc.u32 %v7198_v23, %v7189_v19  ;;  %v7245_v39 = vor.u32 %v1850_v22, %v1849_v15 }
 0x1ae   :  { %v1839_v2 = vand.u32 8388607, %v10933_v0  ;;  %v7247_v13 = vor.u32 %v1853_v10, %v1852_v41  ;;  %v7249_v43 = vpop.eup %4848  ;;  %vm1262_vm5 = vweird.f32 %v10917_v45  ;;  %v4532_v16 = vmin.u32 %v1671_v18, %v7203_v40 }
 0x1af   :  { %v7254_v11 = vadd.f32 %v6975_v53, %v1825_v12  ;;  %v1857_v0 = vor.u32 %v1856_v31, %v1855_v30  ;;  %vm1864_vm4 = vcmp.lt.s32.totalorder %v7217_v20, 1  ;;  %v1764_v37 = vmul.u32 %v7166_v62, %v1748_v47  ;;  %v10937_v12 = vld [vmem:[#allocation15_spill] sm:$0xff]  ;;  %v10939_v31 = vld [vmem:[#allocation16_spill] sm:$0xff] }
 0x1b0   :  { %vm1866_vm7 = vcmp.lt.s32.totalorder %v7217_v20, 3  ;;  %v1873_v10 = vsel %vm1867_vm1, %v1860_v42, 920167782  ;;  %v1877_v7 = vsel %vm1867_vm1, %v1863_v4, 1326507024  ;;  %v7263_v60 = vpop.eup %4850  ;;  %v10935_v18 = vxor.u32 2147483648, %v7147_v28 }
 0x1b1   :  { %10934 = vst [vmem:[#allocation26_spill] sm:$0xff] %v7254_v11  ;;  %v1768_v33 = vsel %vm1766_vm2, %v1767_v46, %v7190_v51  ;;  %v1840_v9 = vor.u32 8388608, %v1839_v2  ;;  %vm1947_vm9 = vcmp.gt.s32.totalorder %v1946_v35, 0  ;;  %v1480_v62 = vmul.f32 %v1479_v6, %v1477_v29 }
 0x1b2   :  { %v1268_v38 = vsel %vm1266_vm14, %v7135_v5, %v10935_v18  ;;  %v10936_v15 = vsub.s32 4, %v6857_v26  ;;  %vm1865_vm6 = vcmp.lt.s32.totalorder %v7217_v20, 2  ;;  %v1872_v28 = vsel %vm1864_vm4, %v7245_v39, %v7247_v13 }
 0x1b3   :  { %v1874_v5 = vsel %vm1866_vm7, %v1857_v0, %v1873_v10  ;;  %v1876_v46 = vsel %vm1864_vm4, %v7247_v13, %v1857_v0  ;;  %v1878_v2 = vsel %vm1866_vm7, %v1860_v42, %v1877_v7  ;;  %v2043_v51 = vand.u32 2139095040, %v7254_v11 }
 0x1b4   :  { %v1484_v22 = vsel %vm1399_vm15, %v10936_v15, %v6857_v26  ;;  %v4529_v26 = vadd.s32 4294967294, %v1569_v25  ;;  %v1673_v6 = vclz %v4532_v16  ;;  %v7289_v4 = vadd.s32 %v1768_v33, %v1764_v37 }
 0x1b5   :  { %v1948_v41 = vsel %vm1947_vm9, %v1946_v35, 0  ;;  %v7293_v30 = vadd.f32 %v7074_v24, %v10937_v12  ;;  %v7297_v29 = vadd.f32 %v7164_v17, %v10939_v31  ;;  %v10941_v47 = vand.u32 2147483647, %v10931_v36 }
 0x1b6   :  { %v7305_v42 = vshll.u32 %v1840_v9, 8  ;;  %v7308_v25 = vand.u32 3, %v7161_v3  ;;  %v1481_v35 = vxor.u32 2147483648, %v1480_v62  ;;  %v1875_v24 = vsel %vm1865_vm6, %v1872_v28, %v1874_v5 }
 0x1b7   :  { %10938 = vst [vmem:[#allocation15_spill] sm:$0xff] %v7293_v30  ;;  %10940 = vst [vmem:[#allocation16_spill] sm:$0xff] %v7297_v29  ;;  %vm7301_vm10 = vcmp.le.f32.partialorder %v10941_v47, 0.7853982  ;;  %v1879_v16 = vsel %vm1865_vm6, %v1876_v46, %v1878_v2  ;;  %v1272_v17 = vsel %vm1265_vm0, %v1268_v38, %v7181_v21  ;;  %v1950_v7 = vand.u32 31, %v1948_v41  ;;  %v7659_v30 = vld [vmem:[%s10684_s3] sm:$0xff] }
 0x1b8   :  { %v1486_v37 = vsel %vm7301_vm10, 0, %v1484_v22  ;;  %v2044_v18 = vshrl.u32 %v2043_v51, 23  ;;  %v1374_v33 = vxor.u32 2147483648, %v7249_v43  ;;  %vm4530_vm3 = vcmp.lt.s32.totalorder %v4529_v26, 0  ;;  %10961 = vst [vmem:[#allocation29_spill] sm:$0xff] %v7659_v30 }
 0x1b9   :  { %v4533_v3 = vadd.s32 4294967294, %v1673_v6  ;;  %v1770_v9 = vadd.s32 536870912, %v7289_v4  ;;  %v7322_v15 = vmul.u32.u64.low %v7305_v42, %v1879_v16  ;;  %v7323_v28 = vmul.u32.u64.high %v7305_v42, %v1879_v16, %v7322_v15 }
 0x1ba   :  { %v7326_v5 = vmul.u32.u64.low %v7305_v42, %v1875_v24  ;;  %v7327_v46 = vmul.u32.u64.high %v7305_v42, %v1875_v24, %v7326_v5  ;;  %v7332_v44 = vsel %vm1262_vm5, nan, %v1272_v17  ;;  %vm1373_vm8 = vcmp.eq.s32.totalorder %v7308_v25, 2 }
 0x1bb   :  { %v1482_v21 = vsel %vm1399_vm15, %v1481_v35, %v1480_v62  ;;  %v1848_v38 = vshrl.u32 %v10870_v57, %v7184_v54  ;;  %v7339_v22 = vsel %vm4530_vm3, 0, %v4529_v26  ;;  %v1869_v2 = vsel %vm1867_vm1, %v1857_v0, 2102212464 }
 0x1bc   :  { %v7343_v51 = vsub.s32 32, %v1950_v7  ;;  %v4547_v6 = vadd.s32 4294967169, %v2044_v18  ;;  %v7346_v12 = vadd.s32 3, %v1486_v37  ;;  %v1557_v31 = vadd.s32 %v6917_v61, %v6914_v59 }
 0x1bd   :  { %vm4534_vm11 = vcmp.lt.s32.totalorder %v4533_v3, 0  ;;  %v7351_v62 = vsel %vm1373_vm8, %v1374_v33, %v7263_v60  ;;  %v7356_v54 = vsel %vm7301_vm10, %v10931_v36, %v1482_v21  ;;  %v7359_v26 = vshrl.u32 %v1770_v9, 30 }
 0x1be   :  { %v1577_v47 = vsub.s32 4294967266, %v7339_v22  ;;  %v7364_v35 = vadd.s32 %v7000_v56, %v7010_v58  ;;  %v1868_v59 = vsel %vm1864_vm4, %v1848_v38, %v7245_v39  ;;  %v1870_v61 = vsel %vm1866_vm7, %v7247_v13, %v1869_v2  ;;  %v10944_v2 = vld [vmem:[#allocation11_spill] sm:$0xff] }
 0x1bf   :  { %v7372_v10 = vsel %vm4534_vm11, 0, %v4533_v3  ;;  %v1965_v24 = vshll.u32 %v10864_v8, %v1950_v7  ;;  %v1966_v16 = vshrl.u32 %v10865_v14, %v7343_v51  ;;  %v2050_v17 = vadd.s32 1, %v4547_v6 }
 0x1c0   :  { %v10740_v37 = vand.u32 2147483647, %v7140_v50  ;;  %v7378_v56 = vshrl.u32 %v1948_v41, 5  ;;  %v1962_v58 = vshll.u32 %v10863_v52, %v1950_v7  ;;  %v1963_v39 = vshrl.u32 %v10864_v8, %v7343_v51 }
 0x1c1   :  { %vm1370_vm12 = vcmp.eq.s32.totalorder %v7308_v25, 0  ;;  %v1772_v13 = vshll.u32 %v7359_v26, 30  ;;  %v1871_v18 = vsel %vm1865_vm6, %v1868_v59, %v1870_v61  ;;  %vm1889_vm13 = vc.u32 %v7323_v28, %v7326_v5 }
 0x1c2   :  { %v1890_v33 = vadd.s32 1, %v7327_v46  ;;  %v1956_v41 = vshll.u32 %v10856_v55, %v1950_v7  ;;  %v1957_v3 = vshrl.u32 %v10851_v34, %v7343_v51  ;;  %v1959_v9 = vshll.u32 %v10851_v34, %v1950_v7 }
 0x1c3   :  { %v1960_v15 = vshrl.u32 %v10863_v52, %v7343_v51  ;;  %v1953_v21 = vshll.u32 %v10870_v57, %v1950_v7  ;;  %v1954_v20 = vshrl.u32 %v10856_v55, %v7343_v51  ;;  %v1967_v38 = vor.u32 %v1966_v16, %v1965_v24 }
 0x1c4   :  { %vm2051_vm14 = vcmp.gt.s32.totalorder %v2050_v17, 0  ;;  %vm1503_vm15 = vcmp.lt.s32.totalorder %v10944_v2, 0  ;;  %v1887_v6 = vmul.u32 %v7305_v42, %v1871_v18  ;;  %v1943_v59 = vand.u32 8388607, %v10740_v37 }
 0x1c5   :  { %v1964_v61 = vor.u32 %v1963_v39, %v1962_v58  ;;  %vm1971_vm0 = vcmp.lt.s32.totalorder %v7378_v56, 4  ;;  %v1573_v0 = vsub.s32 32, %v7339_v22  ;;  %v1578_v45 = vadd.s32 127, %v1577_v47 }
 0x1c6   :  { %v1681_v7 = vsub.s32 4294967266, %v7372_v10  ;;  %v1891_v24 = vsel %vm1889_vm13, %v1890_v33, %v7327_v46  ;;  %v7411_v16 = vsub.s32 %v7289_v4, %v1772_v13  ;;  %v7413_v42 = vor.u32 %v1957_v3, %v1956_v41  ;;  %v7430_v41 = vld [vmem:[%s10684_s3 + $0x18] sm:$0xff] }
 0x1c7   :  { %v1961_v18 = vor.u32 %v1960_v15, %v1959_v9  ;;  %v2052_v37 = vsel %vm2051_vm14, %v2050_v17, 0  ;;  %v7415_v58 = vor.u32 %v1954_v20, %v1953_v21  ;;  %vm1968_vm1 = vcmp.lt.s32.totalorder %v7378_v56, 1  ;;  %10945 = vst [vmem:[#allocation11_spill] sm:$0xff] %v7430_v41 }
 0x1c8   :  { %vm1970_vm2 = vcmp.lt.s32.totalorder %v7378_v56, 3  ;;  %v1981_v47 = vsel %vm1971_vm0, %v1967_v38, 1326507024  ;;  %v1574_v39 = vshll.u32 %v7145_v49, %v7339_v22  ;;  %v7423_v46 = vadd.s32 %v1891_v24, %v1887_v6 }
 0x1c9   :  { %v1944_v4 = vor.u32 8388608, %v1943_v59  ;;  %v1977_v13 = vsel %vm1971_vm0, %v1964_v61, 920167782  ;;  %v1575_v33 = vshrl.u32 %v1557_v31, %v1573_v0  ;;  %v1579_v17 = vshll.u32 %v1578_v45, 23 }
 0x1ca   :  { %v1826_v3 = vmul.f32 %v7430_v41, %v6791_v1  ;;  %v2054_v9 = vand.u32 31, %v2052_v37  ;;  %v1677_v15 = vsub.s32 32, %v7372_v10  ;;  %vm1969_vm5 = vcmp.lt.s32.totalorder %v7378_v56, 2 }
 0x1cb   :  { %v1980_v49 = vsel %vm1968_vm1, %v7413_v42, %v1961_v18  ;;  %v1982_v22 = vsel %vm1970_vm2, %v1964_v61, %v1981_v47  ;;  %v1682_v45 = vadd.s32 127, %v1681_v7  ;;  %v1775_v31 = vsub.s32 0, %v7411_v16 }
 0x1cc   :  { %v1976_v1 = vsel %vm1968_vm1, %v7415_v58, %v7413_v42  ;;  %v1978_v0 = vsel %vm1970_vm2, %v1961_v18, %v1977_v13  ;;  %v10946_v21 = vxor.u32 2147483648, %v7263_v60  ;;  %4852 = vcosq.f32 %v7356_v54 }
 0x1cd   :  { %v1893_v38 = vadd.s32 536870912, %v7423_v46  ;;  %v7457_v6 = vshll.u32 %v1944_v4, 8  ;;  %4854 = vsinq.f32 %v7356_v54  ;;  %v10947_v59 = vsub.s32 4, %v7085_v27 }
 0x1ce   :  { %v7453_v20 = vsel %vm1370_vm12, %v7249_v43, %v10946_v21  ;;  %v1983_v60 = vsel %vm1969_vm5, %v1980_v49, %v1982_v22  ;;  %v7469_v43 = vsub.s32 32, %v2054_v9  ;;  %v1576_v7 = vor.u32 %v1575_v33, %v1574_v39 }
 0x1cf   :  { %v7465_v61 = vsel %vm1503_vm15, %v10947_v59, %v7085_v27  ;;  %v1580_v24 = vor.u32 4788187, %v1579_v17  ;;  %v7472_v47 = vadd.f32 %v6975_v53, %v1826_v3  ;;  %v1979_v54 = vsel %vm1969_vm5, %v1976_v1, %v1978_v0 }
 0x1d0   :  { %v1678_v4 = vshll.u32 %v7203_v40, %v7372_v10  ;;  %v1679_v13 = vshrl.u32 %v7364_v35, %v1677_v15  ;;  %v1683_v27 = vshll.u32 %v1682_v45, 23  ;;  %v7480_v21 = vmin.u32 %v1775_v31, %v7411_v16 }
 0x1d1   :  { %10948 = vst [vmem:[#allocation27_spill] sm:$0xff] %v7472_v47  ;;  %v7482_v49 = vshrl.u32 %v1893_v38, 30  ;;  %v7485_v39 = vmul.u32.u64.low %v7457_v6, %v1983_v60  ;;  %v7486_v33 = vmul.u32.u64.high %v7457_v6, %v1983_v60, %v7485_v39  ;;  %v2066_v40 = vshll.u32 %v10863_v52, %v2054_v9 }
 0x1d2   :  { %v7490_v17 = vmul.u32.u64.low %v7457_v6, %v1979_v54  ;;  %v7491_v3 = vmul.u32.u64.high %v7457_v6, %v1979_v54, %v7490_v17  ;;  %v2067_v35 = vshrl.u32 %v10864_v8, %v7469_v43  ;;  %v1952_v10 = vshrl.u32 %v10870_v57, %v7343_v51 }
 0x1d3   :  { %10949 = vst [vmem:[#allocation28_spill] sm:$0xff] %v7482_v49  ;;  %v7499_v15 = vshrl.u32 %v2052_v37, 5  ;;  %v2069_v22 = vshll.u32 %v10864_v8, %v2054_v9  ;;  %v2070_v45 = vshrl.u32 %v10865_v14, %v7469_v43  ;;  %vm1369_vm4 = vcmp.lt.s32.totalorder %v7308_v25, 2 }
 0x1d4   :  { %v1973_v31 = vsel %vm1971_vm0, %v1961_v18, 2102212464  ;;  %v2057_v1 = vshll.u32 %v10870_v57, %v2054_v9  ;;  %v2060_v0 = vshll.u32 %v10856_v55, %v2054_v9  ;;  %v2147_v38 = vand.u32 2139095040, %v7472_v47 }
 0x1d5   :  { %v2058_v51 = vshrl.u32 %v10856_v55, %v7469_v43  ;;  %v2061_v37 = vshrl.u32 %v10851_v34, %v7469_v43  ;;  %v2063_v59 = vshll.u32 %v10851_v34, %v2054_v9  ;;  %v2064_v60 = vshrl.u32 %v10863_v52, %v7469_v43 }
 0x1d6   :  { %v1581_v54 = vand.u32 2147483647, %v1580_v24  ;;  %v1583_v39 = vcvt.s32.f32 %v1576_v7  ;;  %v1895_v18 = vshll.u32 %v7482_v49, 30  ;;  %v2068_v53 = vor.u32 %v2067_v35, %v2066_v40 }
 0x1d7   :  { %vm1366_vm7 = vweird.f32 %v6193_v48  ;;  %v10950_v29 = vand.u32 2147483647, %v10944_v2  ;;  %v1680_v41 = vor.u32 %v1679_v13, %v1678_v4  ;;  %v10953_v50 = vand.u32 2147483647, %v7254_v11  ;;  %v10955_v48 = vld [vmem:[#allocation19_spill] sm:$0xff] }
 0x1d8   :  { %v2071_v32 = vor.u32 %v2070_v45, %v2069_v22  ;;  %vm2075_vm6 = vcmp.lt.s32.totalorder %v7499_v15, 4  ;;  %v1684_v24 = vor.u32 4788187, %v1683_v27  ;;  %v1972_v7 = vsel %vm1968_vm1, %v1952_v10, %v7415_v58 }
 0x1d9   :  { %vm7521_vm9 = vcmp.le.f32.partialorder %v10950_v29, 0.7853982  ;;  %v2047_v9 = vand.u32 8388607, %v10953_v50  ;;  %v1974_v40 = vsel %vm1970_vm2, %v7413_v42, %v1973_v31  ;;  %v2148_v29 = vshrl.u32 %v2147_v38, 23  ;;  %v7539_v13 = vpop.eup %4852 }
 0x1da   :  { %v1777_v35 = vclz %v7480_v21  ;;  %v7535_v49 = vor.u32 %v2058_v51, %v2057_v1  ;;  %v7537_v4 = vor.u32 %v2061_v37, %v2060_v0  ;;  %v2065_v50 = vor.u32 %v2064_v60, %v2063_v59  ;;  %v7548_v58 = vpop.eup %4854 }
 0x1db   :  { %v7542_v27 = vsub.s32 %v7423_v46, %v1895_v18  ;;  %vm2072_vm10 = vcmp.lt.s32.totalorder %v7499_v15, 1  ;;  %vm2074_vm3 = vcmp.lt.s32.totalorder %v7499_v15, 3  ;;  %v2081_v42 = vsel %vm2075_vm6, %v2068_v53, 920167782  ;;  %v10954_v18 = vld [vmem:[#allocation12_spill] sm:$0xff] }
 0x1dc   :  { %v1975_v21 = vsel %vm1969_vm5, %v1972_v7, %v1974_v40  ;;  %v1994_v10 = vadd.s32 1, %v7491_v3  ;;  %v2048_v22 = vor.u32 8388608, %v2047_v9  ;;  %v2085_v45 = vsel %vm2075_vm6, %v2071_v32, 1326507024 }
 0x1dd   :  { %v1584_v46 = vmul.f32 %v1583_v39, %v1581_v54  ;;  %v1687_v31 = vcvt.s32.f32 %v1680_v41  ;;  %vm1993_vm8 = vc.u32 %v7486_v33, %v7490_v17  ;;  %v4551_v1 = vadd.s32 4294967169, %v2148_v29 }
 0x1de   :  { %v1685_v0 = vand.u32 2147483647, %v1684_v24  ;;  %vm2073_vm11 = vcmp.lt.s32.totalorder %v7499_v15, 2  ;;  %v2080_v56 = vsel %vm2072_vm10, %v7535_v49, %v7537_v4  ;;  %v2082_v38 = vsel %vm2074_vm3, %v2065_v50, %v2081_v42 }
 0x1df   :  { %v1898_v51 = vsub.s32 0, %v7542_v27  ;;  %v1991_v32 = vmul.u32 %v7457_v6, %v1975_v21  ;;  %v2084_v41 = vsel %vm2072_vm10, %v7537_v4, %v2065_v50  ;;  %v2086_v37 = vsel %vm2074_vm3, %v2068_v53, %v2085_v45 }
 0x1e0   :  { %v1376_v59 = vsel %vm1369_vm4, %v7453_v20, %v7351_v62  ;;  %v4537_v60 = vadd.s32 4294967294, %v1777_v35  ;;  %v1995_v54 = vsel %vm1993_vm8, %v1994_v10, %v7491_v3  ;;  %v7576_v39 = vshll.u32 %v2048_v22, 8 }
 0x1e1   :  { %v1590_v6 = vsel %vm7521_vm9, 0, %v7465_v61  ;;  %vm1607_vm12 = vcmp.lt.s32.totalorder %v10954_v18, 0  ;;  %v2083_v53 = vsel %vm2073_vm11, %v2080_v56, %v2082_v38  ;;  %v2154_v9 = vadd.s32 1, %v4551_v1 }
 0x1e2   :  { %v1381_v25 = vmul.f32 %v7049_v63, %v7332_v44  ;;  %v7589_v62 = vand.u32 3, %v7346_v12  ;;  %v1688_v20 = vmul.f32 %v1687_v31, %v1685_v0  ;;  %v2087_v3 = vsel %vm2073_vm11, %v2084_v41, %v2086_v37 }
 0x1e3   :  { %v1377_v61 = vsel %vm1366_vm7, nan, %v1376_v59  ;;  %v1585_v24 = vxor.u32 2147483648, %v1584_v46  ;;  %v4540_v7 = vmin.u32 %v1898_v51, %v7542_v27  ;;  %v1996_v40 = vadd.s32 %v1995_v54, %v1991_v32 }
 0x1e4   :  { %v1594_v29 = vadd.s32 3, %v1590_v6  ;;  %vm4538_vm13 = vcmp.lt.s32.totalorder %v4537_v60, 0  ;;  %v7599_v44 = vmul.u32.u64.low %v7576_v39, %v2083_v53  ;;  %v7600_v35 = vmul.u32.u64.high %v7576_v39, %v2083_v53, %v7599_v44 }
 0x1e5   :  { %v2056_v12 = vshrl.u32 %v10870_v57, %v7469_v43  ;;  %v7606_v42 = vmul.u32.u64.low %v7576_v39, %v2087_v3  ;;  %v7607_v21 = vmul.u32.u64.high %v7576_v39, %v2087_v3, %v7606_v42  ;;  %vm2155_vm14 = vcmp.gt.s32.totalorder %v2154_v9, 0 }
 0x1e6   :  { %v7610_v10 = vadd.f32 %v1381_v25, %v10955_v48  ;;  %v10957_v22 = vand.u32 2147483647, %v10954_v18  ;;  %v1689_v31 = vxor.u32 2147483648, %v1688_v20  ;;  %v2077_v1 = vsel %vm2075_vm6, %v2065_v50, 2102212464 }
 0x1e7   :  { %v1586_v43 = vsel %vm1503_vm15, %v1585_v24, %v1584_v46  ;;  %v7622_v0 = vsel %vm4538_vm13, 0, %v4537_v60  ;;  %v1900_v56 = vclz %v4540_v7  ;;  %v1997_v38 = vadd.s32 536870912, %v1996_v40 }
 0x1e8   :  { %10956 = vst [vmem:[#allocation12_spill] sm:$0xff] %v7610_v10  ;;  %vm7614_vm0 = vcmp.le.f32.partialorder %v10957_v22, 0.7853982  ;;  %v7625_v51 = vmul.f32 %v7049_v63, %v1377_v61  ;;  %vm1493_vm1 = vcmp.eq.s32.totalorder %v7589_v62, 0  ;;  %vm1496_vm2 = vcmp.eq.s32.totalorder %v7589_v62, 2  ;;  %v10962_v61 = vld [vmem:[#allocation25_spill] sm:$0xff] }
 0x1e9   :  { %v2156_v32 = vsel %vm2155_vm14, %v2154_v9, 0  ;;  %v7629_v41 = vand.u32 3, %v1594_v29  ;;  %v2076_v50 = vsel %vm2072_vm10, %v2056_v12, %v7535_v49  ;;  %v2078_v46 = vsel %vm2074_vm3, %v7537_v4, %v2077_v1 }
 0x1ea   :  { %10960 = vst [vmem:[#allocation19_spill] sm:$0xff] %v7625_v51  ;;  %v7638_v37 = vstv %s7578_s7  ;;  %v1497_v63 = vxor.u32 2147483648, %v7539_v13  ;;  %v1589_v59 = vsel %vm7521_vm9, %v10944_v2, %v1586_v43  ;;  %v1690_v60 = vsel %vm1607_vm12, %v1689_v31, %v1688_v20  ;;  %s9927_s7 = sld [smem:[#allocation2 + $0x9]] }
 0x1eb   :  { %v1785_v54 = vsub.s32 4294967266, %v7622_v0  ;;  %v4541_v6 = vadd.s32 4294967294, %v1900_v56  ;;  %v7647_v53 = vshrl.u32 %v1997_v38, 30  ;;  %v2158_v49 = vand.u32 31, %v2156_v32 }
 0x1ec   :  { %v7650_v9 = vstv %s7593_s8  ;;  %v1494_v4 = vxor.u32 2147483648, %v7548_v58  ;;  %v2079_v25 = vsel %vm2073_vm11, %v2076_v50, %v2078_v46  ;;  %v2098_v3 = vadd.s32 1, %v7600_v35  ;;  %s9941_s8 = sld [smem:[#allocation4 + $0x9]] }
 0x1ed   :  { %v2258_v20 = vmul.f32 %v7659_v30, %v7638_v37  ;;  %4856 = vcosq.f32 %v1589_v59  ;;  %v1691_v24 = vsub.s32 4, %v10962_v61  ;;  %v1765_v7 = vadd.s32 %v7189_v19, %v7198_v23 }
 0x1ee   :  { %vm2097_vm15 = vc.u32 %v7607_v21, %v7599_v44  ;;  %v7671_v15 = vsel %vm7614_vm0, %v10954_v18, %v1690_v60  ;;  %v1781_v29 = vsub.s32 32, %v7622_v0  ;;  %v1786_v12 = vadd.s32 127, %v1785_v54 }
 0x1ef   :  { %v7675_v42 = vadd.f32 %v7650_v9, %v2258_v20  ;;  %vm4542_vm5 = vcmp.lt.s32.totalorder %v4541_v6, 0  ;;  %v1999_v48 = vshll.u32 %v7647_v53, 30  ;;  %v2095_v22 = vmul.u32 %v7576_v39, %v2079_v25 }
 0x1f0   :  { %v7679_v19 = vsub.s32 32, %v2158_v49  ;;  %v7684_v23 = vsel %vm1493_vm1, %v7539_v13, %v1494_v4  ;;  %v7689_v31 = vsel %vm1496_vm2, %v1497_v63, %v7548_v58  ;;  %4858 = vsinq.f32 %v1589_v59 }
 0x1f1   :  { %10963 = vst [vmem:[#allocation25_spill] sm:$0xff] %v7675_v42  ;;  %v2099_v1 = vsel %vm2097_vm15, %v2098_v3, %v7600_v35  ;;  %v7695_v43 = vsel %vm1607_vm12, %v1691_v24, %v10962_v61  ;;  %4860 = vcosq.f32 %v7671_v15  ;;  %v10748_v39 = vand.u32 2147483647, %v7472_v47 }
 0x1f2   :  { %v2270_v13 = vand.u32 2139095040, %v7675_v42  ;;  %v1782_v56 = vshll.u32 %v7411_v16, %v7622_v0  ;;  %v1783_v38 = vshrl.u32 %v1765_v7, %v1781_v29  ;;  %v1787_v58 = vshll.u32 %v1786_v12, 23 }
 0x1f3   :  { %v7702_v50 = vsel %vm4542_vm5, 0, %v4541_v6  ;;  %v7704_v46 = vsub.s32 %v1996_v40, %v1999_v48  ;;  %v7706_v35 = vadd.s32 %v2099_v1, %v2095_v22  ;;  %v2170_v63 = vshll.u32 %v10863_v52, %v2158_v49  ;;  %v10964_v22 = vld [vmem:[#allocation13_spill] sm:$0xff] }
 0x1f4   :  { %v2171_v59 = vshrl.u32 %v10864_v8, %v7679_v19  ;;  %v7711_v60 = vshrl.u32 %v2156_v32, 5  ;;  %v2173_v54 = vshll.u32 %v10864_v8, %v2158_v49  ;;  %v2174_v16 = vshrl.u32 %v10865_v14, %v7679_v19 }
 0x1f5   :  { %v2271_v0 = vshrl.u32 %v2270_v13, 23  ;;  %v1908_v6 = vsub.s32 4294967266, %v7702_v50  ;;  %v2151_v40 = vand.u32 8388607, %v10748_v39  ;;  %v2161_v4 = vshll.u32 %v10870_v57, %v2158_v49 }
 0x1f6   :  { %v2164_v25 = vshll.u32 %v10856_v55, %v2158_v49  ;;  %vm1492_vm4 = vcmp.lt.s32.totalorder %v7589_v62, 2  ;;  %v2162_v32 = vshrl.u32 %v10856_v55, %v7679_v19  ;;  %v2165_v3 = vshrl.u32 %v10851_v34, %v7679_v19 }
 0x1f7   :  { %v2167_v20 = vshll.u32 %v10851_v34, %v2158_v49  ;;  %v2168_v61 = vshrl.u32 %v10863_v52, %v7679_v19  ;;  %v1888_v24 = vadd.s32 %v7326_v5, %v7323_v28  ;;  %v2002_v7 = vsub.s32 0, %v7704_v46 }
 0x1f8   :  { %v2101_v29 = vadd.s32 536870912, %v7706_v35  ;;  %v2172_v12 = vor.u32 %v2171_v59, %v2170_v63  ;;  %v2175_v48 = vor.u32 %v2174_v16, %v2173_v54  ;;  %vm2179_vm7 = vcmp.lt.s32.totalorder %v7711_v60, 4 }
 0x1f9   :  { %v2259_v1 = vmul.f32 %v10964_v22, %v7638_v37  ;;  %v4555_v13 = vadd.s32 4294967169, %v2271_v0  ;;  %v1784_v49 = vor.u32 %v1783_v38, %v1782_v56  ;;  %v1788_v39 = vor.u32 4788187, %v1787_v58 }
 0x1fa   :  { %v1904_v51 = vsub.s32 32, %v7702_v50  ;;  %v1909_v10 = vadd.s32 127, %v1908_v6  ;;  %v7739_v28 = vpop.eup %4856  ;;  %v2152_v5 = vor.u32 8388608, %v2151_v40  ;;  %v7741_v47 = vor.u32 %v2162_v32, %v2161_v4  ;;  %v10966_v4 = vld [vmem:[#allocation20_spill] sm:$0xff] }
 0x1fb   :  { %v7743_v63 = vor.u32 %v2165_v3, %v2164_v25  ;;  %v2169_v59 = vor.u32 %v2168_v61, %v2167_v20  ;;  %vm1489_vm9 = vweird.f32 %v10931_v36  ;;  %v4544_v54 = vmin.u32 %v2002_v7, %v7704_v46 }
 0x1fc   :  { %vm2176_vm6 = vcmp.lt.s32.totalorder %v7711_v60, 1  ;;  %vm2178_vm10 = vcmp.lt.s32.totalorder %v7711_v60, 3  ;;  %v2185_v56 = vsel %vm2179_vm7, %v2172_v12, 920167782  ;;  %v7751_v38 = vshrl.u32 %v2101_v29, 30 }
 0x1fd   :  { %v2189_v58 = vsel %vm2179_vm7, %v2175_v48, 1326507024  ;;  %v7756_v16 = vadd.f32 %v7650_v9, %v2259_v1  ;;  %v2277_v0 = vadd.s32 1, %v4555_v13  ;;  %v4859_v6 = vpop.eup %4858  ;;  %vm1600_vm3 = vcmp.eq.s32.totalorder %v7629_v41, 2 }
 0x1fe   :  { %10965 = vst [vmem:[#allocation13_spill] sm:$0xff] %v7751_v38  ;;  %v1694_v40 = vsel %vm7614_vm0, 0, %v7695_v43  ;;  %vm1711_vm8 = vcmp.lt.s32.totalorder %v10966_v4, 0  ;;  %v1789_v25 = vand.u32 2147483647, %v1788_v39  ;;  %v1791_v32 = vcvt.s32.f32 %v1784_v49  ;;  %v7765_v20 = vpop.eup %4860 }
 0x1ff   :  { %v1905_v3 = vshll.u32 %v7542_v27, %v7702_v50  ;;  %vm1597_vm11 = vcmp.eq.s32.totalorder %v7629_v41, 0  ;;  %v1906_v61 = vshrl.u32 %v1888_v24, %v1904_v51  ;;  %vm2177_vm12 = vcmp.lt.s32.totalorder %v7711_v60, 2 }
 0x200   :  { %v2184_v45 = vsel %vm2176_vm6, %v7741_v47, %v7743_v63  ;;  %v2186_v43 = vsel %vm2178_vm10, %v2169_v59, %v2185_v56  ;;  %v1910_v39 = vshll.u32 %v1909_v10, 23  ;;  %v2004_v7 = vclz %v4544_v54 }
 0x201   :  { %v2188_v27 = vsel %vm2176_vm6, %v7743_v63, %v2169_v59  ;;  %v2190_v50 = vsel %vm2178_vm10, %v2172_v12, %v2189_v58  ;;  %v2103_v51 = vshll.u32 %v7751_v38, 30  ;;  %v7781_v24 = vshll.u32 %v2152_v5, 8 }
 0x202   :  { %vm2278_vm13 = vcmp.gt.s32.totalorder %v2277_v0, 0  ;;  %v2374_v29 = vand.u32 2139095040, %v7756_v16  ;;  %v1499_v10 = vsel %vm1492_vm4, %v7684_v23, %v7689_v31  ;;  %v1698_v48 = vadd.s32 3, %v1694_v40 }
 0x203   :  { %v10967_v22 = vand.u32 2147483647, %v10966_v4  ;;  %v7795_v12 = vstv %s7736_s11  ;;  %v2187_v13 = vsel %vm2177_vm12, %v2184_v45, %v2186_v43  ;;  %v1601_v49 = vxor.u32 2147483648, %v7739_v28  ;;  %s10392_s11 = sld [smem:[#allocation6 + $0x9]] }
 0x204   :  { %10970 = vst [vmem:[#allocation30_spill] sm:$0xff] %v7795_v12  ;;  %v1792_v5 = vmul.f32 %v1791_v32, %v1789_v25  ;;  %v1795_v54 = vsub.s32 4, %v7359_v26  ;;  %v2191_v62 = vsel %vm2177_vm12, %v2188_v27, %v2190_v50  ;;  %v1907_v23 = vor.u32 %v1906_v61, %v1905_v3 }
 0x205   :  { %vm7790_vm14 = vcmp.le.f32.partialorder %v10967_v22, 0.7853982  ;;  %v1911_v31 = vor.u32 4788187, %v1910_v39  ;;  %v4545_v56 = vadd.s32 4294967294, %v2004_v7  ;;  %v2279_v58 = vsel %vm2278_vm13, %v2277_v0, 0 }
 0x206   :  { %v7804_v40 = vsub.s32 %v7706_v35, %v2103_v51  ;;  %v7807_v22 = vmul.u32.u64.low %v7781_v24, %v2187_v13  ;;  %v7808_v30 = vmul.u32.u64.high %v7781_v24, %v2187_v13, %v7807_v22  ;;  %v2375_v45 = vshrl.u32 %v2374_v29, 23 }
 0x207   :  { %v1598_v43 = vxor.u32 2147483648, %v4859_v6  ;;  %v2160_v25 = vshrl.u32 %v10870_v57, %v7679_v19  ;;  %v7814_v32 = vmul.u32.u64.low %v7781_v24, %v2191_v62  ;;  %v7815_v27 = vmul.u32.u64.high %v7781_v24, %v2191_v62, %v7814_v32 }
 0x208   :  { %10971 = vst [vmem:[#allocation31_spill] sm:$0xff] %v7807_v22  ;;  %v7819_v0 = vsel %vm1489_vm9, nan, %v1499_v10  ;;  %v7824_v35 = vsel %vm1711_vm8, %v1795_v54, %v7359_v26  ;;  %v2181_v3 = vsel %vm2179_vm7, %v2169_v59, 2102212464  ;;  %v2281_v61 = vand.u32 31, %v2279_v58  ;;  %v10973_v54 = vld [vmem:[#allocation28_spill] sm:$0xff] }
 0x209   :  { %10972 = vst [vmem:[#allocation32_spill] sm:$0xff] %v7815_v27  ;;  %v1793_v39 = vxor.u32 2147483648, %v1792_v5  ;;  %v1912_v7 = vand.u32 2147483647, %v1911_v31  ;;  %v1914_v19 = vcvt.s32.f32 %v1907_v23  ;;  %vm4546_vm0 = vcmp.lt.s32.totalorder %v4545_v56, 0  ;;  %v10974_v23 = vld [vmem:[#allocation18_spill] sm:$0xff] }
 0x20a   :  { %v7830_v50 = vsel %vm1600_vm3, %v1601_v49, %v4859_v6  ;;  %v7832_v36 = vand.u32 3, %v1698_v48  ;;  %v2106_v51 = vsub.s32 0, %v7804_v40  ;;  %v4559_v29 = vadd.s32 4294967169, %v2375_v45 }
 0x20b   :  { %v7838_v26 = vsel %vm1597_vm11, %v7739_v28, %v1598_v43  ;;  %4862 = vsinq.f32 %v7671_v15  ;;  %v2180_v59 = vsel %vm2176_vm6, %v2160_v25, %v7741_v47  ;;  %v2182_v6 = vsel %vm2178_vm10, %v7743_v63, %v2181_v3 }
 0x20c   :  { %v2007_v13 = vsel %vm4546_vm0, 0, %v4545_v56  ;;  %v7851_v49 = vsub.s32 32, %v2281_v61  ;;  %v1794_v15 = vsel %vm1711_vm8, %v1793_v39, %v1792_v5  ;;  %v1915_v28 = vmul.f32 %v1914_v19, %v1912_v7 }
 0x20d   :  { %v1992_v47 = vadd.s32 %v7490_v17, %v7486_v33  ;;  %vm1834_vm1 = vcmp.lt.s32.totalorder %v10974_v23, 0  ;;  %v4548_v63 = vmin.u32 %v2106_v51, %v7804_v40  ;;  %v2183_v31 = vsel %vm2177_vm12, %v2180_v59, %v2182_v6 }
 0x20e   :  { %v2202_v56 = vadd.s32 1, %v7808_v30  ;;  %v2381_v45 = vadd.s32 1, %v4559_v29  ;;  %v2008_v43 = vsub.s32 32, %v2007_v13  ;;  %v2012_v25 = vsub.s32 4294967266, %v2007_v13 }
 0x20f   :  { %vm2201_vm2 = vc.u32 %v7815_v27, %v7807_v22  ;;  %v2293_v5 = vshll.u32 %v10863_v52, %v2281_v61  ;;  %v2294_v33 = vshrl.u32 %v10864_v8, %v7851_v49  ;;  %v2296_v17 = vshll.u32 %v10864_v8, %v2281_v61 }
 0x210   :  { %v2297_v32 = vshrl.u32 %v10865_v14, %v7851_v49  ;;  %vm2382_vm15 = vcmp.gt.s32.totalorder %v2381_v45, 0  ;;  %v2199_v60 = vmul.u32 %v7781_v24, %v2183_v31  ;;  %v10758_v3 = vand.u32 2147483647, %v7675_v42 }
 0x211   :  { %v7873_v39 = vshrl.u32 %v2279_v58, 5  ;;  %v2383_v7 = vsel %vm2382_vm15, %v2381_v45, 0  ;;  %v2108_v19 = vclz %v4548_v63  ;;  %v2203_v51 = vsel %vm2201_vm2, %v2202_v56, %v7808_v30 }
 0x212   :  { %v2284_v29 = vshll.u32 %v10870_v57, %v2281_v61  ;;  %v2287_v59 = vshll.u32 %v10856_v55, %v2281_v61  ;;  %v2285_v6 = vshrl.u32 %v10856_v55, %v7851_v49  ;;  %v2288_v48 = vshrl.u32 %v10851_v34, %v7851_v49 }
 0x213   :  { %v2290_v24 = vshll.u32 %v10851_v34, %v2281_v61  ;;  %v2291_v58 = vshrl.u32 %v10863_v52, %v7851_v49  ;;  %v1916_v31 = vxor.u32 2147483648, %v1915_v28  ;;  %v2295_v45 = vor.u32 %v2294_v33, %v2293_v5 }
 0x214   :  { %v2298_v63 = vor.u32 %v2297_v32, %v2296_v17  ;;  %v2385_v10 = vand.u32 31, %v2383_v7  ;;  %v2009_v30 = vshll.u32 %v7704_v46, %v2007_v13  ;;  %v2010_v56 = vshrl.u32 %v1992_v47, %v2008_v43 }
 0x215   :  { %v2274_v62 = vand.u32 8388607, %v10758_v3  ;;  %vm2302_vm5 = vcmp.lt.s32.totalorder %v7873_v39, 4  ;;  %v1797_v22 = vsel %vm7790_vm14, %v10966_v4, %v1794_v15  ;;  %v2013_v61 = vadd.s32 127, %v2012_v25 }
 0x216   :  { %v4549_v27 = vadd.s32 4294967294, %v2108_v19  ;;  %v7892_v38 = vadd.s32 %v2203_v51, %v2199_v60  ;;  %v7894_v11 = vor.u32 %v2285_v6, %v2284_v29  ;;  %v7896_v5 = vor.u32 %v2288_v48, %v2287_v59  ;;  %v10978_v19 = vld [vmem:[#allocation21_spill] sm:$0xff] }
 0x217   :  { %v2292_v33 = vor.u32 %v2291_v58, %v2290_v24  ;;  %vm2299_vm4 = vcmp.lt.s32.totalorder %v7873_v39, 1  ;;  %vm2301_vm7 = vcmp.lt.s32.totalorder %v7873_v39, 3  ;;  %v2308_v13 = vsel %vm2302_vm5, %v2295_v45, 920167782 }
 0x218   :  { %v7899_v46 = vpop.eup %4862  ;;  %v2312_v15 = vsel %vm2302_vm5, %v2298_v63, 1326507024  ;;  %v7906_v47 = vsub.s32 32, %v2385_v10  ;;  %4864 = vcosq.f32 %v1797_v22  ;;  %v1917_v48 = vsel %vm1834_vm1, %v1916_v31, %v1915_v28 }
 0x219   :  { %v7910_v43 = vor.u32 %v2010_v56, %v2009_v30  ;;  %v2275_v25 = vor.u32 8388608, %v2274_v62  ;;  %v10975_v17 = vand.u32 2147483647, %v10974_v23  ;;  %v2014_v60 = vshll.u32 %v2013_v61, 23 }
 0x21a   :  { %vm4550_vm6 = vcmp.lt.s32.totalorder %v4549_v27, 0  ;;  %v2260_v51 = vmul.f32 %v10978_v19, %v7638_v37  ;;  %vm2300_vm10 = vcmp.lt.s32.totalorder %v7873_v39, 2  ;;  %v2307_v28 = vsel %vm2299_vm4, %v7894_v11, %v7896_v5 }
 0x21b   :  { %vm7914_vm9 = vcmp.le.f32.partialorder %v10975_v17, 0.7853982  ;;  %v2309_v62 = vsel %vm2301_vm7, %v2292_v33, %v2308_v13  ;;  %v2311_v29 = vsel %vm2299_vm4, %v7896_v5, %v2292_v33  ;;  %v2313_v59 = vsel %vm2301_vm7, %v2295_v45, %v2312_v15 }
 0x21c   :  { %v2205_v6 = vadd.s32 536870912, %v7892_v38  ;;  %v2397_v58 = vshll.u32 %v10863_v52, %v2385_v10  ;;  %v2398_v31 = vshrl.u32 %v10864_v8, %v7906_v47  ;;  %v7937_v63 = vshll.u32 %v2275_v25, 8 }
 0x21d   :  { %v7939_v30 = vshrl.u32 %v2383_v7, 5  ;;  %v2400_v56 = vshll.u32 %v10864_v8, %v2385_v10  ;;  %v2401_v61 = vshrl.u32 %v10865_v14, %v7906_v47  ;;  %v2310_v45 = vsel %vm2300_vm10, %v2307_v28, %v2309_v62 }
 0x21e   :  { %v2314_v13 = vsel %vm2300_vm10, %v2311_v29, %v2313_v59  ;;  %v2388_v15 = vshll.u32 %v10870_v57, %v2385_v10  ;;  %v2391_v17 = vshll.u32 %v10856_v55, %v2385_v10  ;;  %v2389_v25 = vshrl.u32 %v10856_v55, %v7906_v47 }
 0x21f   :  { %v2392_v7 = vshrl.u32 %v10851_v34, %v7906_v47  ;;  %v2394_v19 = vshll.u32 %v10851_v34, %v2385_v10  ;;  %v2395_v3 = vshrl.u32 %v10863_v52, %v7906_v47  ;;  %v2015_v24 = vor.u32 4788187, %v2014_v60 }
 0x220   :  { %v7958_v28 = vadd.f32 %v7650_v9, %v2260_v51  ;;  %v10980_v62 = vand.u32 2147483647, %v7756_v16  ;;  %v2399_v59 = vor.u32 %v2398_v31, %v2397_v58  ;;  %v2402_v55 = vor.u32 %v2401_v61, %v2400_v56 }
 0x221   :  { %v7963_v4 = vmul.u32.u64.low %v7937_v63, %v2310_v45  ;;  %v7964_v42 = vmul.u32.u64.high %v7937_v63, %v2310_v45, %v7963_v4  ;;  %vm2406_vm3 = vcmp.lt.s32.totalorder %v7939_v30, 4  ;;  %v7969_v10 = vsel %vm4550_vm6, 0, %v4549_v27 }
 0x222   :  { %10979 = vst [vmem:[#allocation28_spill] sm:$0xff] %v7958_v28  ;;  %v2378_v29 = vand.u32 8388607, %v10980_v62  ;;  %v2283_v60 = vshrl.u32 %v10870_v57, %v7851_v49  ;;  %v7974_v51 = vmul.u32.u64.low %v7937_v63, %v2314_v13  ;;  %v7975_v34 = vmul.u32.u64.high %v7937_v63, %v2314_v13, %v7974_v51 }
 0x223   :  { %v7977_v62 = vshrl.u32 %v2205_v6, 30  ;;  %v7979_v58 = vor.u32 %v2389_v25, %v2388_v15  ;;  %v7981_v31 = vor.u32 %v2392_v7, %v2391_v17  ;;  %v2396_v45 = vor.u32 %v2395_v3, %v2394_v19 }
 0x224   :  { %v2304_v56 = vsel %vm2302_vm5, %v2292_v33, 2102212464  ;;  %vm2403_vm8 = vcmp.lt.s32.totalorder %v7939_v30, 1  ;;  %vm2405_vm11 = vcmp.lt.s32.totalorder %v7939_v30, 3  ;;  %v2412_v27 = vsel %vm2406_vm3, %v2399_v59, 920167782 }
 0x225   :  { %4866 = vsinq.f32 %v1797_v22  ;;  %v1920_v49 = vsel %vm7914_vm9, %v10974_v23, %v1917_v48  ;;  %v2379_v6 = vor.u32 8388608, %v2378_v29  ;;  %v2416_v61 = vsel %vm2406_vm3, %v2402_v55, 1326507024  ;;  %v7994_v3 = vpop.eup %4864 }
 0x226   :  { %vm1596_vm12 = vcmp.lt.s32.totalorder %v7629_v41, 2  ;;  %vm1704_vm13 = vcmp.eq.s32.totalorder %v7832_v36, 2  ;;  %v2018_v33 = vcvt.s32.f32 %v7910_v43  ;;  %v2116_v13 = vsub.s32 4294967266, %v7969_v10 }
 0x227   :  { %v2303_v22 = vsel %vm2299_vm4, %v2283_v60, %v7894_v11  ;;  %v2478_v48 = vand.u32 2139095040, %v7958_v28  ;;  %vm1701_vm0 = vcmp.eq.s32.totalorder %v7832_v36, 0  ;;  %v2305_v55 = vsel %vm2301_vm7, %v7896_v5, %v2304_v56 }
 0x228   :  { %vm2404_vm2 = vcmp.lt.s32.totalorder %v7939_v30, 2  ;;  %v2411_v43 = vsel %vm2403_vm8, %v7979_v58, %v7981_v31  ;;  %v2413_v15 = vsel %vm2405_vm11, %v2396_v45, %v2412_v27  ;;  %v2016_v17 = vand.u32 2147483647, %v2015_v24  ;;  %v10988_v30 = vld [vmem:[#allocation23_spill] sm:$0xff] }
 0x229   :  { %v2207_v11 = vshll.u32 %v7977_v62, 30  ;;  %v2415_v25 = vsel %vm2403_vm8, %v7981_v31, %v2396_v45  ;;  %v2417_v5 = vsel %vm2405_vm11, %v2399_v59, %v2416_v61  ;;  %v1702_v7 = vxor.u32 2147483648, %v7899_v46 }
 0x22a   :  { %4868 = vcosq.f32 %v1920_v49  ;;  %v2325_v19 = vadd.s32 1, %v7964_v42  ;;  %v8023_v29 = vshll.u32 %v2379_v6, 8  ;;  %vm1593_vm15 = vweird.f32 %v10944_v2 }
 0x22b   :  { %v2306_v24 = vsel %vm2300_vm10, %v2303_v22, %v2305_v55  ;;  %vm2324_vm5 = vc.u32 %v7975_v34, %v7963_v4  ;;  %v2414_v60 = vsel %vm2404_vm2, %v2411_v43, %v2413_v15  ;;  %v2479_v51 = vshrl.u32 %v2478_v48, 23 }
 0x22c   :  { %v2096_v59 = vadd.s32 %v7599_v44, %v7607_v21  ;;  %v2112_v56 = vsub.s32 32, %v7969_v10  ;;  %v2117_v27 = vadd.s32 127, %v2116_v13  ;;  %v2418_v6 = vsel %vm2404_vm2, %v2415_v25, %v2417_v5 }
 0x22d   :  { %v10981_v39 = vsub.s32 4, %v10973_v54  ;;  %4870 = vsinq.f32 %v1920_v49  ;;  %v2019_v22 = vmul.f32 %v2018_v33, %v2016_v17  ;;  %v8043_v55 = vsub.s32 %v7892_v38, %v2207_v11 }
 0x22e   :  { %v2322_v48 = vmul.u32 %v7937_v63, %v2306_v24  ;;  %v2326_v44 = vsel %vm2324_vm5, %v2325_v19, %v7964_v42  ;;  %v8048_v21 = vmul.u32.u64.low %v8023_v29, %v2414_v60  ;;  %v8049_v13 = vmul.u32.u64.high %v8023_v29, %v2414_v60, %v8048_v21  ;;  %v10984_v60 = vld [vmem:[#allocation24_spill] sm:$0xff] }
 0x22f   :  { %v1919_v61 = vsel %vm1834_vm1, %v10981_v39, %v10973_v54  ;;  %v2387_v43 = vshrl.u32 %v10870_v57, %v7906_v47  ;;  %v8055_v15 = vmul.u32.u64.low %v8023_v29, %v2418_v6  ;;  %v8056_v54 = vmul.u32.u64.high %v8023_v29, %v2418_v6, %v8055_v15 }
 0x230   :  { %v4563_v49 = vadd.s32 4294967169, %v2479_v51  ;;  %vm1697_vm1 = vweird.f32 %v10954_v18  ;;  %v2113_v38 = vshll.u32 %v7804_v40, %v7969_v10  ;;  %v2114_v63 = vshrl.u32 %v2096_v59, %v2112_v56 }
 0x231   :  { %v2118_v42 = vshll.u32 %v2117_v27, 23  ;;  %v2408_v33 = vsel %vm2406_vm3, %v2396_v45, 2102212464  ;;  %vm1700_vm4 = vcmp.lt.s32.totalorder %v7832_v36, 2  ;;  %v1814_v47 = vmul.f32 %v7795_v12, %v7819_v0 }
 0x232   :  { %v1921_v17 = vsel %vm7914_vm9, 0, %v1919_v61  ;;  %v2210_v11 = vsub.s32 0, %v8043_v55  ;;  %v1603_v40 = vsel %vm1596_vm12, %v7838_v26, %v7830_v50  ;;  %v10982_v10 = vxor.u32 2147483648, %v7765_v20  ;;  %v8084_v5 = vpop.eup %4866 }
 0x233   :  { %v10983_v0 = vsel %vm7790_vm14, 0, %v7824_v35  ;;  %v8082_v32 = vadd.s32 %v2326_v44, %v2322_v48  ;;  %v1703_v41 = vsel %vm1701_vm0, %v7765_v20, %v1702_v7  ;;  %v2407_v50 = vsel %vm2403_vm8, %v2387_v43, %v7979_v58 }
 0x234   :  { %v1706_v45 = vsel %vm1704_vm13, %v10982_v10, %v7899_v46  ;;  %v1802_v25 = vadd.s32 3, %v10983_v0  ;;  %v2409_v26 = vsel %vm2405_vm11, %v7981_v31, %v2408_v33  ;;  %v2485_v1 = vadd.s32 1, %v4563_v49 }
 0x235   :  { %v1925_v46 = vadd.s32 3, %v1921_v17  ;;  %v2020_v35 = vxor.u32 2147483648, %v2019_v22  ;;  %v2115_v19 = vor.u32 %v2114_v63, %v2113_v38  ;;  %v2119_v24 = vor.u32 4788187, %v2118_v42 }
 0x236   :  { %v10985_v51 = vand.u32 2147483647, %v10984_v60  ;;  %vm1938_vm7 = vcmp.lt.s32.totalorder %v10984_v60, 0  ;;  %v2022_v20 = vsub.s32 4, %v7647_v53  ;;  %v4552_v58 = vmin.u32 %v2210_v11, %v8043_v55 }
 0x237   :  { %v1604_v31 = vsel %vm1593_vm15, nan, %v1603_v40  ;;  %v2328_v7 = vadd.s32 536870912, %v8082_v32  ;;  %v2410_v56 = vsel %vm2404_vm2, %v2407_v50, %v2409_v26  ;;  %v2429_v27 = vadd.s32 1, %v8049_v13  ;;  %v4869_v6 = vpop.eup %4868  ;;  %v10990_v26 = vld [vmem:[#allocation11_spill] sm:$0xff] }
 0x238   :  { %vm8097_vm14 = vcmp.le.f32.partialorder %v10985_v51, 0.7853982  ;;  %v1707_v39 = vsel %vm1700_vm4, %v1703_v41, %v1706_v45  ;;  %v8112_v61 = vand.u32 3, %v1802_v25  ;;  %vm2428_vm9 = vc.u32 %v8056_v54, %v8048_v21 }
 0x239   :  { %vm2486_vm6 = vcmp.gt.s32.totalorder %v2485_v1, 0  ;;  %v1926_v48 = vand.u32 3, %v1925_v46  ;;  %v2021_v2 = vsel %vm1938_vm7, %v2020_v35, %v2019_v22  ;;  %v2120_v44 = vand.u32 2147483647, %v2119_v24  ;;  %v10991_v35 = vld [vmem:[#allocation26_spill] sm:$0xff] }
 0x23a   :  { %v2122_v43 = vcvt.s32.f32 %v2115_v19  ;;  %v8119_v15 = vadd.f32 %v1814_v47, %v10988_v30  ;;  %v2023_v36 = vsel %vm1938_vm7, %v2022_v20, %v7647_v53  ;;  %v2212_v49 = vclz %v4552_v58  ;;  %v4871_v63 = vpop.eup %4870  ;;  %v10992_v58 = vld [vmem:[#allocation14_spill] sm:$0xff] }
 0x23b   :  { %v2426_v38 = vmul.u32 %v8023_v29, %v2410_v56  ;;  %v1815_v42 = vmul.f32 %v7795_v12, %v1604_v31  ;;  %v8126_v33 = vshrl.u32 %v2328_v7, 30  ;;  %v2430_v17 = vsel %vm2428_vm9, %v2429_v27, %v8049_v13 }
 0x23c   :  { %10989 = vst [vmem:[#allocation18_spill] sm:$0xff] %v8119_v15  ;;  %v2487_v22 = vsel %vm2486_vm6, %v2485_v1, 0  ;;  %v1708_v11 = vsel %vm1697_vm1, nan, %v1707_v39  ;;  %vm1805_vm10 = vcmp.eq.s32.totalorder %v8112_v61, 0  ;;  %vm1808_vm3 = vcmp.eq.s32.totalorder %v8112_v61, 2 }
 0x23d   :  { %v2024_v53 = vsel %vm8097_vm14, %v10984_v60, %v2021_v2  ;;  %vm1931_vm8 = vcmp.eq.s32.totalorder %v1926_v48, 2  ;;  %v1932_v29 = vxor.u32 2147483648, %v4869_v6  ;;  %v2025_v47 = vsel %vm8097_vm14, 0, %v2023_v36 }
 0x23e   :  { %v2123_v40 = vmul.f32 %v2122_v43, %v2120_v44  ;;  %v1929_v10 = vxor.u32 2147483648, %v4871_v63  ;;  %v4553_v13 = vadd.s32 4294967294, %v2212_v49  ;;  %v8138_v45 = vadd.s32 %v2430_v17, %v2426_v38  ;;  %v10998_v43 = vld [vmem:[#allocation13_spill] sm:$0xff] }
 0x23f   :  { %v2489_v18 = vand.u32 31, %v2487_v22  ;;  %v1809_v0 = vxor.u32 2147483648, %v7994_v3  ;;  %vm1928_vm11 = vcmp.eq.s32.totalorder %v1926_v48, 0  ;;  %4872 = vcosq.f32 %v2024_v53 }
 0x240   :  { %v2330_v25 = vshll.u32 %v8126_v33, 30  ;;  %v1806_v41 = vxor.u32 2147483648, %v8084_v5  ;;  %4874 = vsinq.f32 %v2024_v53  ;;  %v2029_v50 = vadd.s32 3, %v2025_v47 }
 0x241   :  { %v2261_v1 = vmul.f32 %v10990_v26, %v7638_v37  ;;  %vm1927_vm12 = vcmp.lt.s32.totalorder %v1926_v48, 2  ;;  %v1933_v46 = vsel %vm1931_vm8, %v1932_v29, %v4871_v63  ;;  %vm2042_vm13 = vcmp.lt.s32.totalorder %v10991_v35, 0 }
 0x242   :  { %v2124_v19 = vxor.u32 2147483648, %v2123_v40  ;;  %v1930_v24 = vsel %vm1928_vm11, %v4869_v6, %v1929_v10  ;;  %vm4554_vm0 = vcmp.lt.s32.totalorder %v4553_v13, 0  ;;  %v2432_v51 = vadd.s32 536870912, %v8138_v45 }
 0x243   :  { %v8148_v59 = vsub.s32 32, %v2489_v18  ;;  %v8151_v20 = vmul.f32 %v7795_v12, %v1708_v11  ;;  %v8154_v31 = vadd.f32 %v1815_v42, %v10992_v58  ;;  %v10994_v37 = vand.u32 2147483647, %v10991_v35 }
 0x244   :  { %v8163_v56 = vsub.s32 %v8082_v32, %v2330_v25  ;;  %v8170_v27 = vsel %vm1805_vm10, %v7994_v3, %v1806_v41  ;;  %v8175_v6 = vsel %vm1808_vm3, %v1809_v0, %v8084_v5  ;;  %v8177_v39 = vand.u32 3, %v2029_v50 }
 0x245   :  { %10993 = vst [vmem:[#allocation21_spill] sm:$0xff] %v8154_v31  ;;  %vm8158_vm2 = vcmp.le.f32.partialorder %v10994_v37, 0.7853982  ;;  %v8180_v2 = vadd.f32 %v7650_v9, %v2261_v1  ;;  %v8183_v32 = vsel %vm1927_vm12, %v1930_v24, %v1933_v46  ;;  %v2125_v44 = vsel %vm2042_vm13, %v2124_v19, %v2123_v40  ;;  %v11002_v24 = vld [vmem:[#allocation32_spill] sm:$0xff] }
 0x246   :  { %v2126_v30 = vsub.s32 4, %v10998_v43  ;;  %v8188_v3 = vsel %vm4554_vm0, 0, %v4553_v13  ;;  %v8190_v36 = vshrl.u32 %v2432_v51, 30  ;;  %v10764_v5 = vand.u32 2147483647, %v7958_v28  ;;  %v11003_v51 = vld [vmem:[#allocation31_spill] sm:$0xff] }
 0x247   :  { %10997 = vst [vmem:[#allocation24_spill] sm:$0xff] %v8180_v2  ;;  %v2501_v49 = vshll.u32 %v10863_v52, %v2489_v18  ;;  %v2502_v9 = vshrl.u32 %v10864_v8, %v8148_v59  ;;  %v2333_v48 = vsub.s32 0, %v8163_v56  ;;  %v8197_v38 = vshrl.u32 %v2487_v22, 5 }
 0x248   :  { %10999 = vst [vmem:[#allocation23_spill] sm:$0xff] %v8190_v36  ;;  %v2504_v63 = vshll.u32 %v10864_v8, %v2489_v18  ;;  %v2505_v42 = vshrl.u32 %v10865_v14, %v8148_v59  ;;  %v2128_v17 = vsel %vm8158_vm2, %v10991_v35, %v2125_v44  ;;  %v2492_v11 = vshll.u32 %v10870_v57, %v2489_v18 }
 0x249   :  { %v11000_v53 = vmov 2475754826   ;;  %v2582_v47 = vand.u32 2139095040, %v8180_v2  ;;  %vm1924_vm15 = vweird.f32 %v10974_v23  ;;  %v11001_v40 = vmov 2131351028  }
 0x24a   :  { %v2495_v29 = vshll.u32 %v11000_v53, %v2489_v18  ;;  %v2493_v22 = vshrl.u32 %v11000_v53, %v8148_v59  ;;  %v2496_v10 = vshrl.u32 %v11001_v40, %v8148_v59  ;;  %v2498_v13 = vshll.u32 %v11001_v40, %v2489_v18 }
 0x24b   :  { %v2499_v0 = vshrl.u32 %v10863_v52, %v8148_v59  ;;  %v8219_v25 = vsel %vm2042_vm13, %v2126_v30, %v10998_v43  ;;  %v2220_v41 = vsub.s32 4294967266, %v8188_v3  ;;  %v2434_v50 = vshll.u32 %v8190_v36, 30 }
 0x24c   :  { %v2503_v26 = vor.u32 %v2502_v9, %v2501_v49  ;;  %vm2032_vm5 = vcmp.eq.s32.totalorder %v8177_v39, 0  ;;  %v4556_v1 = vmin.u32 %v2333_v48, %v8163_v56  ;;  %v2482_v18 = vand.u32 8388607, %v10764_v5  ;;  %v4873_v19 = vpop.eup %4872 }
 0x24d   :  { %v2506_v46 = vor.u32 %v2505_v42, %v2504_v63  ;;  %vm2510_vm1 = vcmp.lt.s32.totalorder %v8197_v38, 4  ;;  %4876 = vcosq.f32 %v2128_v17  ;;  %v2200_v58 = vadd.s32 %v11003_v51, %v11002_v24  ;;  %v4875_v43 = vpop.eup %4874 }
 0x24e   :  { %v2216_v37 = vsub.s32 32, %v8188_v3  ;;  %v8234_v44 = vstv %s8165_s12  ;;  %v8238_v30 = vor.u32 %v2493_v22, %v2492_v11  ;;  %v8240_v49 = vor.u32 %v2496_v10, %v2495_v29 }
 0x24f   :  { %v2500_v9 = vor.u32 %v2499_v0, %v2498_v13  ;;  %v2583_v48 = vshrl.u32 %v2582_v47, 23  ;;  %v8243_v63 = vsub.s32 %v8138_v45, %v2434_v50  ;;  %vm2507_vm4 = vcmp.lt.s32.totalorder %v8197_v38, 1 }
 0x250   :  { %vm2509_vm14 = vcmp.lt.s32.totalorder %v8197_v38, 3  ;;  %v2516_v42 = vsel %vm2510_vm1, %v2503_v26, 920167782  ;;  %v2221_v24 = vadd.s32 127, %v2220_v41  ;;  %v2335_v51 = vclz %v4556_v1 }
 0x251   :  { %v2483_v5 = vor.u32 8388608, %v2482_v18  ;;  %v2520_v11 = vsel %vm2510_vm1, %v2506_v46, 1326507024  ;;  %vm1804_vm7 = vcmp.lt.s32.totalorder %v8112_v61, 2  ;;  %vm2031_vm9 = vcmp.lt.s32.totalorder %v8177_v39, 2 }
 0x252   :  { %v2033_v29 = vxor.u32 2147483648, %v4875_v43  ;;  %v2036_v45 = vxor.u32 2147483648, %v4873_v19  ;;  %4878 = vsinq.f32 %v2128_v17  ;;  %v2217_v47 = vshll.u32 %v8043_v55, %v8188_v3 }
 0x253   :  { %vm2508_vm6 = vcmp.lt.s32.totalorder %v8197_v38, 2  ;;  %v2515_v22 = vsel %vm2507_vm4, %v8238_v30, %v8240_v49  ;;  %v2517_v10 = vsel %vm2509_vm14, %v2500_v9, %v2516_v42  ;;  %v4567_v13 = vadd.s32 4294967169, %v2583_v48 }
 0x254   :  { %v2218_v0 = vshrl.u32 %v2200_v58, %v2216_v37  ;;  %v2437_v41 = vsub.s32 0, %v8243_v63  ;;  %v2519_v55 = vsel %vm2507_vm4, %v8240_v49, %v2500_v9  ;;  %v2521_v3 = vsel %vm2509_vm14, %v2503_v26, %v2520_v11  ;;  %v11004_v26 = vld [vmem:[#allocation29_spill] sm:$0xff] }
 0x255   :  { %vm2028_vm10 = vweird.f32 %v10984_v60  ;;  %vm2035_vm3 = vcmp.eq.s32.totalorder %v8177_v39, 2  ;;  %v2222_v17 = vshll.u32 %v2221_v24, 23  ;;  %v4557_v50 = vadd.s32 4294967294, %v2335_v51 }
 0x256   :  { %v8270_v1 = vshll.u32 %v2483_v5, 8  ;;  %v1935_v18 = vsel %vm1924_vm15, nan, %v8183_v32  ;;  %v2129_v46 = vsel %vm8158_vm2, 0, %v8219_v25  ;;  %v2518_v58 = vsel %vm2508_vm6, %v2515_v22, %v2517_v10 }
 0x257   :  { %v2693_v37 = vmul.f32 %v11004_v26, %v8234_v44  ;;  %v8283_v48 = vstv %s8236_s14  ;;  %v2522_v5 = vsel %vm2508_vm6, %v2519_v55, %v2521_v3  ;;  %v2589_v42 = vadd.s32 1, %v4567_v13 }
 0x258   :  { %11005 = vst [vmem:[#allocation11_spill] sm:$0xff] %v8283_v48  ;;  %v8288_v24 = vstv %s8228_s13  ;;  %v2034_v23 = vsel %vm2032_vm5, %v4873_v19, %v2033_v29  ;;  %v2037_v32 = vsel %vm2035_vm3, %v2036_v45, %v4875_v43  ;;  %v2219_v7 = vor.u32 %v2218_v0, %v2217_v47  ;;  %v11009_v29 = vld [vmem:[#allocation9_spill] sm:$0xff] }
 0x259   :  { %11006 = vst [vmem:[#allocation26_spill] sm:$0xff] %v8288_v24  ;;  %v4560_v25 = vmin.u32 %v2437_v41, %v8243_v63  ;;  %v2223_v51 = vor.u32 4788187, %v2222_v17  ;;  %vm4558_vm8 = vcmp.lt.s32.totalorder %v4557_v50, 0  ;;  %v2491_v10 = vshrl.u32 %v10870_v57, %v8148_v59  ;;  %v11011_v41 = vld [vmem:[#allocation27_spill] sm:$0xff] }
 0x25a   :  { %v8294_v11 = vmul.u32.u64.low %v8270_v1, %v2518_v58  ;;  %v8295_v22 = vmul.u32.u64.high %v8270_v1, %v2518_v58, %v8294_v11  ;;  %v8301_v13 = vmul.u32.u64.low %v8270_v1, %v2522_v5  ;;  %v8302_v55 = vmul.u32.u64.high %v8270_v1, %v2522_v5, %v8301_v13  ;;  %v8307_v43 = vpop.eup %4876 }
 0x25b   :  { %v8305_v19 = vadd.f32 %v8288_v24, %v2693_v37  ;;  %v8311_v45 = vadd.f32 %v8151_v20, %v11009_v29  ;;  %v2133_v47 = vadd.s32 3, %v2129_v46  ;;  %v2512_v0 = vsel %vm2510_vm1, %v2500_v9, 2102212464 }
 0x25c   :  { %11007 = vst [vmem:[#allocation14_spill] sm:$0xff] %v8294_v11  ;;  %vm2590_vm11 = vcmp.gt.s32.totalorder %v2589_v42, 0  ;;  %vm2146_vm12 = vcmp.lt.s32.totalorder %v11011_v41, 0  ;;  %v2249_v59 = vmul.f32 %v8283_v48, %v1935_v18  ;;  %v8317_v3 = vsel %vm4558_vm8, 0, %v4557_v50 }
 0x25d   :  { %11008 = vst [vmem:[#allocation13_spill] sm:$0xff] %v8305_v19  ;;  %11010 = vst [vmem:[#allocation32_spill] sm:$0xff] %v8311_v45  ;;  %v2439_v17 = vclz %v4560_v25  ;;  %v8323_v58 = vsel %vm1804_vm7, %v8170_v27, %v8175_v6  ;;  %v2038_v20 = vsel %vm2031_vm9, %v2034_v23, %v2037_v32  ;;  %v2224_v46 = vand.u32 2147483647, %v2223_v51  ;;  %v11013_v23 = vld [vmem:[#allocation15_spill] sm:$0xff] }
 0x25e   :  { %11012 = vst [vmem:[#allocation31_spill] sm:$0xff] %v8323_v58  ;;  %v2226_v26 = vcvt.s32.f32 %v2219_v7  ;;  %v2511_v9 = vsel %vm2507_vm4, %v2491_v10, %v8238_v30  ;;  %v2513_v50 = vsel %vm2509_vm14, %v8240_v49, %v2512_v0  ;;  %v2591_v18 = vsel %vm2590_vm11, %v2589_v42, 0 }
 0x25f   :  { %v2705_v37 = vand.u32 2139095040, %v8305_v19  ;;  %v8334_v5 = vpop.eup %4878  ;;  %v8336_v61 = vand.u32 3, %v2133_v47  ;;  %v2230_v27 = vsub.s32 4, %v7977_v62  ;;  %v2343_v6 = vsub.s32 4294967266, %v8317_v3 }
 0x260   :  { %v10765_v39 = vand.u32 2147483647, %v8180_v2  ;;  %v8343_v30 = vsel %vm2028_vm10, nan, %v2038_v20  ;;  %v8346_v32 = vadd.f32 %v2249_v59, %v11013_v23  ;;  %v4561_v49 = vadd.s32 4294967294, %v2439_v17 }
 0x261   :  { %v2706_v42 = vshrl.u32 %v2705_v37, 23  ;;  %v8348_v7 = vmul.f32 %v2226_v26, %v2224_v46  ;;  %v2514_v25 = vsel %vm2508_vm6, %v2511_v9, %v2513_v50  ;;  %v2533_v51 = vadd.s32 1, %v8295_v22  ;;  %v8383_v50 = vld [vmem:[%s10684_s3 + $0x8] sm:$0xff] }
 0x262   :  { %11014 = vst [vmem:[#allocation29_spill] sm:$0xff] %v8346_v32  ;;  %v2593_v10 = vand.u32 31, %v2591_v18  ;;  %v2323_v13 = vadd.s32 %v7963_v4, %v7975_v34  ;;  %v2339_v60 = vsub.s32 32, %v8317_v3  ;;  %vm2532_vm13 = vc.u32 %v8302_v55, %v8294_v11  ;;  %11015 = vst [vmem:[#allocation9_spill] sm:$0xff] %v8383_v50 }
 0x263   :  { %v4571_v29 = vadd.s32 4294967169, %v2706_v42  ;;  %v8362_v0 = vsel %vm2146_vm12, %v2230_v27, %v7977_v62  ;;  %v8364_v38 = vadd.s32 127, %v2343_v6  ;;  %v8368_v59 = vand.u32 8388607, %v10765_v39 }
 0x264   :  { %vm4562_vm0 = vcmp.lt.s32.totalorder %v4561_v49, 0  ;;  %v2530_v4 = vmul.u32 %v8270_v1, %v2514_v25  ;;  %v2534_v62 = vsel %vm2532_vm13, %v2533_v51, %v8295_v22  ;;  %v8376_v26 = vsub.s32 32, %v2593_v10 }
 0x265   :  { %v2712_v17 = vadd.s32 1, %v4571_v29  ;;  %v8378_v9 = vshrl.u32 %v2323_v13, %v2339_v60  ;;  %v2694_v1 = vmul.f32 %v8383_v50, %v8234_v44  ;;  %v10767_v37 = vand.u32 2147483647, %v8305_v19 }
 0x266   :  { %v8389_v6 = vsel %vm4562_vm0, 0, %v4561_v49  ;;  %v8392_v42 = vadd.s32 %v2534_v62, %v2530_v4  ;;  %v2596_v25 = vshll.u32 %v10870_v57, %v2593_v10  ;;  %v2599_v51 = vshll.u32 %v11000_v53, %v2593_v10 }
 0x267   :  { %vm2713_vm2 = vcmp.gt.s32.totalorder %v2712_v17, 0  ;;  %v2597_v60 = vshrl.u32 %v11000_v53, %v8376_v26  ;;  %v2600_v29 = vshrl.u32 %v11001_v40, %v8376_v26  ;;  %v2602_v39 = vshll.u32 %v11001_v40, %v2593_v10 }
 0x268   :  { %v2714_v23 = vsel %vm2713_vm2, %v2712_v17, 0  ;;  %v2603_v49 = vshrl.u32 %v10863_v52, %v8376_v26  ;;  %v8404_v17 = vadd.f32 %v8288_v24, %v2694_v1  ;;  %v2709_v4 = vand.u32 8388607, %v10767_v37 }
 0x269   :  { %v2716_v13 = vand.u32 31, %v2714_v23  ;;  %v8409_v47 = vshrl.u32 %v2591_v18, 5  ;;  %v2605_v34 = vshll.u32 %v10863_v52, %v2593_v10  ;;  %v2606_v22 = vshrl.u32 %v10864_v8, %v8376_v26 }
 0x26a   :  { %11016 = vst [vmem:[#allocation15_spill] sm:$0xff] %v8404_v17  ;;  %v2536_v46 = vadd.s32 536870912, %v8392_v42  ;;  %v2715_v12 = vshrl.u32 %v2714_v23, 5  ;;  %v8418_v37 = vor.u32 %v2597_v60, %v2596_v25  ;;  %v8420_v32 = vor.u32 %v2600_v29, %v2599_v51 }
 0x26b   :  { %v2717_v62 = vsub.s32 32, %v2716_v13  ;;  %v2719_v20 = vshll.u32 %v10870_v57, %v2716_v13  ;;  %v2722_v27 = vshll.u32 %v11000_v53, %v2716_v13  ;;  %v2725_v18 = vshll.u32 %v11001_v40, %v2716_v13 }
 0x26c   :  { %v2728_v45 = vshll.u32 %v10863_v52, %v2716_v13  ;;  %v8424_v31 = vor.u32 %v2603_v49, %v2602_v39  ;;  %v2710_v15 = vor.u32 8388608, %v2709_v4  ;;  %v2809_v50 = vand.u32 2139095040, %v8404_v17 }
 0x26d   :  { %v2720_v1 = vshrl.u32 %v11000_v53, %v2717_v62  ;;  %v2723_v58 = vshrl.u32 %v11001_v40, %v2717_v62  ;;  %v2726_v23 = vshrl.u32 %v10863_v52, %v2717_v62  ;;  %v2729_v28 = vshrl.u32 %v10864_v8, %v2717_v62 }
 0x26e   :  { %v2731_v25 = vshll.u32 %v10864_v8, %v2716_v13  ;;  %v2607_v60 = vor.u32 %v2606_v22, %v2605_v34  ;;  %v2608_v51 = vshll.u32 %v10864_v8, %v2593_v10  ;;  %v2732_v29 = vshrl.u32 %v10865_v14, %v2717_v62 }
 0x26f   :  { %v2721_v2 = vor.u32 %v2720_v1, %v2719_v20  ;;  %v2724_v19 = vor.u32 %v2723_v58, %v2722_v27  ;;  %vm2734_vm15 = vcmp.lt.s32.totalorder %v2715_v12, 1  ;;  %v2609_v39 = vshrl.u32 %v10865_v14, %v8376_v26 }
 0x270   :  { %v2727_v49 = vor.u32 %v2726_v23, %v2725_v18  ;;  %v2730_v20 = vor.u32 %v2729_v28, %v2728_v45  ;;  %vm2737_vm5 = vcmp.lt.s32.totalorder %v2715_v12, 4  ;;  %vm2614_vm1 = vcmp.lt.s32.totalorder %v8409_v47, 4 }
 0x271   :  { %v2733_v58 = vor.u32 %v2732_v29, %v2731_v25  ;;  %vm2736_vm4 = vcmp.lt.s32.totalorder %v2715_v12, 3  ;;  %v2810_v27 = vshrl.u32 %v2809_v50, 23  ;;  %v2718_v4 = vshrl.u32 %v10870_v57, %v2717_v62 }
 0x272   :  { %vm2735_vm14 = vcmp.lt.s32.totalorder %v2715_v12, 2  ;;  %v2742_v34 = vsel %vm2734_vm15, %v2721_v2, %v2724_v19  ;;  %v2750_v10 = vshll.u32 %v2710_v15, 8  ;;  %v2739_v22 = vsel %vm2737_vm5, %v2727_v49, 2102212464 }
 0x273   :  { %v2743_v13 = vsel %vm2737_vm5, %v2730_v20, 920167782  ;;  %v2746_v1 = vsel %vm2734_vm15, %v2724_v19, %v2727_v49  ;;  %v2747_v36 = vsel %vm2737_vm5, %v2733_v58, 1326507024  ;;  %v8438_v11 = vshrl.u32 %v2536_v46, 30 }
 0x274   :  { %v2610_v28 = vor.u32 %v2609_v39, %v2608_v51  ;;  %vm2611_vm7 = vcmp.lt.s32.totalorder %v8409_v47, 1  ;;  %v2744_v45 = vsel %vm2736_vm4, %v2727_v49, %v2743_v13  ;;  %vm2613_vm9 = vcmp.lt.s32.totalorder %v8409_v47, 3 }
 0x275   :  { %11017 = vst [vmem:[#allocation33_spill] sm:$0xff] %v8438_v11  ;;  %v2745_v50 = vsel %vm2735_vm14, %v2742_v34, %v2744_v45  ;;  %v2748_v62 = vsel %vm2736_vm4, %v2730_v20, %v2747_v36  ;;  %v4575_v18 = vadd.s32 4294967169, %v2810_v27  ;;  %v2620_v15 = vsel %vm2614_vm1, %v2607_v60, 920167782 }
 0x276   :  { %v2738_v23 = vsel %vm2734_vm15, %v2718_v4, %v2721_v2  ;;  %v2740_v46 = vsel %vm2736_vm4, %v2724_v19, %v2739_v22  ;;  %v2749_v25 = vsel %vm2735_vm14, %v2746_v1, %v2748_v62  ;;  %v11020_v36 = vshll.u32 %v8163_v56, %v8317_v3 }
 0x277   :  { %v8450_v51 = vmul.u32.u64.low %v2750_v10, %v2749_v25  ;;  %v8451_v29 = vmul.u32.u64.high %v2750_v10, %v2749_v25, %v8450_v51  ;;  %v8453_v39 = vmul.u32.u64.low %v2750_v10, %v2745_v50  ;;  %v8454_v49 = vmul.u32.u64.high %v2750_v10, %v2745_v50, %v8453_v39 }
 0x278   :  { %v2342_v20 = vor.u32 %v8378_v9, %v11020_v36  ;;  %v11021_v58 = vshll.u32 %v8364_v38, 23  ;;  %v2447_v2 = vsub.s32 4294967266, %v8389_v6  ;;  %v2816_v19 = vadd.s32 1, %v4575_v18  ;;  %v8479_v38 = vld [vmem:[%s10684_s3 + $0x10] sm:$0xff] }
 0x279   :  { %11018 = vst [vmem:[#allocation34_spill] sm:$0xff] %v8451_v29  ;;  %11019 = vst [vmem:[#allocation35_spill] sm:$0xff] %v8453_v39  ;;  %v2538_v4 = vshll.u32 %v8438_v11, 30  ;;  %vm2612_vm6 = vcmp.lt.s32.totalorder %v8409_v47, 2  ;;  %v2624_v34 = vsel %vm2614_vm1, %v2610_v28, 1326507024  ;;  %v2741_v22 = vsel %vm2735_vm14, %v2738_v23, %v2740_v46 }
 0x27a   :  { %v2346_v27 = vor.u32 4788187, %v11021_v58  ;;  %v2619_v56 = vsel %vm2611_vm7, %v8418_v37, %v8420_v32  ;;  %v2621_v3 = vsel %vm2613_vm9, %v8424_v31, %v2620_v15  ;;  %11022 = vst [vmem:[#allocation36_spill] sm:$0xff] %v8479_v38  ;;  %v2695_v9 = vmul.f32 %v8479_v38, %v8234_v44  ;;  %v11028_v38 = vld [vmem:[#allocation25_spill] sm:$0xff] }
 0x27b   :  { %vm2817_vm10 = vcmp.gt.s32.totalorder %v2816_v19, 0  ;;  %v2595_v12 = vshrl.u32 %v10870_v57, %v8376_v26  ;;  %v11023_v13 = vor.u32 8388608, %v8368_v59  ;;  %vm2759_vm3 = vc.u32 %v8451_v29, %v8453_v39 }
 0x27c   :  { %v2760_v28 = vadd.s32 1, %v8454_v49  ;;  %v2623_v45 = vsel %vm2611_vm7, %v8420_v32, %v8424_v31  ;;  %v2625_v50 = vsel %vm2613_vm9, %v2607_v60, %v2624_v34  ;;  %v2757_v62 = vmul.u32 %v2750_v10, %v2741_v22 }
 0x27d   :  { %v8487_v1 = vshll.u32 %v11023_v13, 8  ;;  %v2818_v18 = vsel %vm2817_vm10, %v2816_v19, 0  ;;  %v8499_v26 = vsub.s32 %v8392_v42, %v2538_v4  ;;  %v2622_v59 = vsel %vm2612_vm6, %v2619_v56, %v2621_v3 }
 0x27e   :  { %v2761_v15 = vsel %vm2759_vm3, %v2760_v28, %v8454_v49  ;;  %v2820_v23 = vand.u32 31, %v2818_v18  ;;  %v2427_v25 = vadd.s32 %v8048_v21, %v8056_v54  ;;  %v2616_v60 = vsel %vm2614_vm1, %v8424_v31, 2102212464 }
 0x27f   :  { %v8511_v10 = vadd.f32 %v8288_v24, %v2695_v9  ;;  %v2347_v42 = vand.u32 2147483647, %v2346_v27  ;;  %v2349_v51 = vcvt.s32.f32 %v2342_v20  ;;  %v2443_v36 = vsub.s32 32, %v8389_v6 }
 0x280   :  { %v2626_v49 = vsel %vm2612_vm6, %v2623_v45, %v2625_v50  ;;  %v8517_v58 = vmul.u32.u64.low %v8487_v1, %v2622_v59  ;;  %v8518_v19 = vmul.u32.u64.high %v8487_v1, %v2622_v59, %v8517_v58  ;;  %v8521_v21 = vadd.s32 %v2761_v15, %v2757_v62 }
 0x281   :  { %11024 = vst [vmem:[#allocation37_spill] sm:$0xff] %v8511_v10  ;;  %v8523_v54 = vsub.s32 32, %v2820_v23  ;;  %v2448_v31 = vadd.s32 127, %v2447_v2  ;;  %v2541_v4 = vsub.s32 0, %v8499_v26  ;;  %v2615_v20 = vsel %vm2611_vm7, %v2595_v12, %v8418_v37 }
 0x282   :  { %v2617_v27 = vsel %vm2613_vm9, %v8420_v32, %v2616_v60  ;;  %v8533_v34 = vmul.u32.u64.low %v8487_v1, %v2626_v49  ;;  %v8534_v22 = vmul.u32.u64.high %v8487_v1, %v2626_v49, %v8533_v34  ;;  %v2913_v3 = vand.u32 2139095040, %v8511_v10 }
 0x283   :  { %v8538_v9 = vshrl.u32 %v2818_v18, 5  ;;  %v2823_v2 = vshll.u32 %v10870_v57, %v2820_v23  ;;  %v2826_v13 = vshll.u32 %v11000_v53, %v2820_v23  ;;  %v2832_v37 = vshll.u32 %v10863_v52, %v2820_v23 }
 0x284   :  { %vm2136_vm8 = vcmp.eq.s32.totalorder %v8336_v61, 0  ;;  %vm2139_vm11 = vcmp.eq.s32.totalorder %v8336_v61, 2  ;;  %v2763_v32 = vadd.s32 536870912, %v8521_v21  ;;  %v2824_v12 = vshrl.u32 %v11000_v53, %v8523_v54 }
 0x285   :  { %v2829_v28 = vshll.u32 %v11001_v40, %v2820_v23  ;;  %v2833_v45 = vshrl.u32 %v10864_v8, %v8523_v54  ;;  %v2827_v50 = vshrl.u32 %v11001_v40, %v8523_v54  ;;  %v2830_v62 = vshrl.u32 %v10863_v52, %v8523_v54 }
 0x286   :  { %v2835_v18 = vshll.u32 %v10864_v8, %v2820_v23  ;;  %v2836_v59 = vshrl.u32 %v10865_v14, %v8523_v54  ;;  %v11025_v15 = vand.u32 2147483647, %v11011_v41  ;;  %v2350_v49 = vmul.f32 %v2349_v51, %v2347_v42 }
 0x287   :  { %v2444_v34 = vshll.u32 %v8243_v63, %v8389_v6  ;;  %v2445_v46 = vshrl.u32 %v2427_v25, %v2443_v36  ;;  %v2834_v56 = vor.u32 %v2833_v45, %v2832_v37  ;;  %vm2269_vm0 = vcmp.lt.s32.totalorder %v11028_v38, 0 }
 0x288   :  { %vm8560_vm13 = vcmp.le.f32.partialorder %v11025_v15, 0.7853982  ;;  %v11029_v39 = vand.u32 2147483647, %v8404_v17  ;;  %v2837_v29 = vor.u32 %v2836_v59, %v2835_v18  ;;  %vm2841_vm2 = vcmp.lt.s32.totalorder %v8538_v9, 4 }
 0x289   :  { %v2914_v11 = vshrl.u32 %v2913_v3, 23  ;;  %v2449_v24 = vshll.u32 %v2448_v31, 23  ;;  %v4564_v15 = vmin.u32 %v2541_v4, %v8499_v26  ;;  %v2618_v42 = vsel %vm2612_vm6, %v2615_v20, %v2617_v27 }
 0x28a   :  { %v2813_v23 = vand.u32 8388607, %v11029_v39  ;;  %v2637_v51 = vadd.s32 1, %v8518_v19  ;;  %vm2135_vm15 = vcmp.lt.s32.totalorder %v8336_v61, 2  ;;  %v8575_v63 = vshrl.u32 %v2763_v32, 30 }
 0x28b   :  { %v8577_v6 = vor.u32 %v2824_v12, %v2823_v2  ;;  %v8579_v25 = vor.u32 %v2827_v50, %v2826_v13  ;;  %v2831_v39 = vor.u32 %v2830_v62, %v2829_v28  ;;  %vm2838_vm5 = vcmp.lt.s32.totalorder %v8538_v9, 1 }
 0x28c   :  { %vm2840_vm1 = vcmp.lt.s32.totalorder %v8538_v9, 3  ;;  %v2847_v36 = vsel %vm2841_vm2, %v2834_v56, 920167782  ;;  %v2851_v47 = vsel %vm2841_vm2, %v2837_v29, 1326507024  ;;  %v2351_v20 = vxor.u32 2147483648, %v2350_v49 }
 0x28d   :  { %v11030_v31 = vand.u32 2147483647, %v11028_v38  ;;  %vm2636_vm14 = vc.u32 %v8534_v22, %v8517_v58  ;;  %v2814_v27 = vor.u32 8388608, %v2813_v23  ;;  %v4579_v3 = vadd.s32 4294967169, %v2914_v11 }
 0x28e   :  { %vm2132_vm7 = vweird.f32 %v10991_v35  ;;  %v2446_v2 = vor.u32 %v2445_v46, %v2444_v34  ;;  %v2450_v13 = vor.u32 4788187, %v2449_v24  ;;  %v2634_v37 = vmul.u32 %v8487_v1, %v2618_v42 }
 0x28f   :  { %vm8589_vm4 = vcmp.le.f32.partialorder %v11030_v31, 0.7853982  ;;  %vm2839_vm9 = vcmp.lt.s32.totalorder %v8538_v9, 2  ;;  %v2846_v29 = vsel %vm2838_vm5, %v8577_v6, %v8579_v25  ;;  %v2848_v32 = vsel %vm2840_vm1, %v2831_v39, %v2847_v36 }
 0x290   :  { %v2850_v11 = vsel %vm2838_vm5, %v8579_v25, %v2831_v39  ;;  %v2852_v46 = vsel %vm2840_vm1, %v2834_v56, %v2851_v47  ;;  %v2543_v24 = vclz %v4564_v15  ;;  %v2638_v1 = vsel %vm2636_vm14, %v2637_v51, %v8518_v19 }
 0x291   :  { %v2765_v12 = vshll.u32 %v8575_v63, 30  ;;  %v2920_v28 = vadd.s32 1, %v4579_v3  ;;  %v11033_v45 = vxor.u32 2147483648, %v8334_v5  ;;  %v11034_v62 = vxor.u32 2147483648, %v8307_v43 }
 0x292   :  { %v2233_v56 = vsel %vm8560_vm13, 0, %v8362_v0  ;;  %v8624_v19 = vshll.u32 %v2814_v27, 8  ;;  %v11035_v59 = vxor.u32 2147483648, %v8348_v7  ;;  %v2849_v23 = vsel %vm2839_vm9, %v2846_v29, %v2848_v32 }
 0x293   :  { %v2138_v50 = vsel %vm2136_vm8, %v8307_v43, %v11033_v45  ;;  %v2141_v18 = vsel %vm2139_vm11, %v11034_v62, %v8334_v5  ;;  %v2853_v43 = vsel %vm2839_vm9, %v2850_v11, %v2852_v46  ;;  %vm2921_vm6 = vcmp.gt.s32.totalorder %v2920_v28, 0 }
 0x294   :  { %v2229_v34 = vsel %vm2146_vm12, %v11035_v59, %v8348_v7  ;;  %v11036_v5 = vsub.s32 4, %v8126_v33  ;;  %v2451_v15 = vand.u32 2147483647, %v2450_v13  ;;  %v2453_v42 = vcvt.s32.f32 %v2446_v2 }
 0x295   :  { %v8640_v51 = vadd.s32 %v2638_v1, %v2634_v37  ;;  %v2352_v7 = vsel %vm2269_vm0, %v2351_v20, %v2350_v49  ;;  %v4565_v36 = vadd.s32 4294967294, %v2543_v24  ;;  %v8645_v47 = vsub.s32 %v8521_v21, %v2765_v12 }
 0x296   :  { %v2354_v0 = vsel %vm2269_vm0, %v11036_v5, %v8126_v33  ;;  %v2922_v31 = vsel %vm2921_vm6, %v2920_v28, 0  ;;  %v8648_v27 = vmul.u32.u64.low %v8624_v19, %v2853_v43  ;;  %v8649_v3 = vmul.u32.u64.high %v8624_v19, %v2853_v43, %v8648_v27 }
 0x297   :  { %v8652_v29 = vmul.u32.u64.low %v8624_v19, %v2849_v23  ;;  %v8653_v32 = vmul.u32.u64.high %v8624_v19, %v2849_v23, %v8652_v29  ;;  %v2142_v33 = vsel %vm2135_vm15, %v2138_v50, %v2141_v18  ;;  %v2232_v49 = vsel %vm8560_vm13, %v11011_v41, %v2229_v34 }
 0x298   :  { %v2356_v21 = vsel %vm8589_vm4, 0, %v2354_v0  ;;  %v2822_v20 = vshrl.u32 %v10870_v57, %v8523_v54  ;;  %vm2373_vm12 = vcmp.lt.s32.totalorder %v7756_v16, 0  ;;  %v2454_v2 = vmul.f32 %v2453_v42, %v2451_v15 }
 0x299   :  { %v2640_v13 = vadd.s32 536870912, %v8640_v51  ;;  %v2843_v37 = vsel %vm2841_vm2, %v2831_v39, 2102212464  ;;  %v2924_v61 = vand.u32 31, %v2922_v31  ;;  %v8671_v11 = vmul.f32 %v8283_v48, %v8343_v30 }
 0x29a   :  { %v2355_v60 = vsel %vm8589_vm4, %v11028_v38, %v2352_v7  ;;  %vm4566_vm10 = vcmp.lt.s32.totalorder %v4565_v36, 0  ;;  %v2768_v54 = vsub.s32 0, %v8645_v47  ;;  %v8679_v46 = vsel %vm2132_vm7, nan, %v2142_v33 }
 0x29b   :  { %4880 = vcosq.f32 %v2232_v49  ;;  %v8681_v24 = vadd.s32 3, %v2233_v56  ;;  %v8683_v39 = vsub.s32 32, %v2924_v61  ;;  %v8685_v1 = vadd.s32 3, %v2356_v21 }
 0x29c   :  { %4882 = vsinq.f32 %v2232_v49  ;;  %v2842_v30 = vsel %vm2838_vm5, %v2822_v20, %v8577_v6  ;;  %v2844_v4 = vsel %vm2840_vm1, %v8579_v25, %v2843_v37  ;;  %v11037_v35 = vand.u32 2147483647, %v7756_v16  ;;  %v11041_v37 = vld [vmem:[#allocation14_spill] sm:$0xff] }
 0x29d   :  { %4884 = vcosq.f32 %v2355_v60  ;;  %v2455_v28 = vxor.u32 2147483648, %v2454_v2  ;;  %v8699_v45 = vsel %vm4566_vm10, 0, %v4565_v36  ;;  %v8701_v50 = vshrl.u32 %v2640_v13, 30 }
 0x29e   :  { %vm8695_vm3 = vcmp.le.f32.partialorder %v11037_v35, 0.7853982  ;;  %v4572_v62 = vmin.u32 %v2768_v54, %v8645_v47  ;;  %v10784_v6 = vand.u32 2147483647, %v8511_v10  ;;  %v2936_v18 = vshll.u32 %v10863_v52, %v2924_v61 }
 0x29f   :  { %11040 = vst [vmem:[#allocation25_spill] sm:$0xff] %v8701_v50  ;;  %v2937_v25 = vshrl.u32 %v10864_v8, %v8683_v39  ;;  %v2845_v56 = vsel %vm2839_vm9, %v2842_v30, %v2844_v4  ;;  %vm2863_vm8 = vc.u32 %v8649_v3, %v8652_v29  ;;  %v2864_v59 = vadd.s32 1, %v8653_v32 }
 0x2a0   :  { %v8713_v34 = vshrl.u32 %v2922_v31, 5  ;;  %v2927_v23 = vshll.u32 %v10870_v57, %v2924_v61  ;;  %v2930_v43 = vshll.u32 %v11000_v53, %v2924_v61  ;;  %v2933_v5 = vshll.u32 %v11001_v40, %v2924_v61 }
 0x2a1   :  { %v2939_v0 = vshll.u32 %v10864_v8, %v2924_v61  ;;  %v2928_v15 = vshrl.u32 %v11000_v53, %v8683_v39  ;;  %v2931_v9 = vshrl.u32 %v11001_v40, %v8683_v39  ;;  %v2934_v42 = vshrl.u32 %v10863_v52, %v8683_v39 }
 0x2a2   :  { %v2940_v7 = vshrl.u32 %v10865_v14, %v8683_v39  ;;  %v2642_v36 = vshll.u32 %v8701_v50, 30  ;;  %v2770_v31 = vclz %v4572_v62  ;;  %v2861_v27 = vmul.u32 %v8624_v19, %v2845_v56  ;;  %v8741_v19 = vld [vmem:[%s10684_s3 + $0x18] sm:$0xff] }
 0x2a3   :  { %v2938_v33 = vor.u32 %v2937_v25, %v2936_v18  ;;  %v2865_v49 = vsel %vm2863_vm8, %v2864_v59, %v8653_v32  ;;  %v2917_v21 = vand.u32 8388607, %v10784_v6  ;;  %vm2945_vm11 = vcmp.lt.s32.totalorder %v8713_v34, 4  ;;  %11042 = vst [vmem:[#allocation14_spill] sm:$0xff] %v8741_v19  ;;  %v11044_v59 = vld [vmem:[#allocation23_spill] sm:$0xff] }
 0x2a4   :  { %v2941_v20 = vor.u32 %v2940_v7, %v2939_v0  ;;  %v2456_v13 = vsel %vm2373_vm12, %v2455_v28, %v2454_v2  ;;  %v2531_v61 = vadd.s32 %v11041_v37, %v8302_v55  ;;  %v2551_v54 = vsub.s32 4294967266, %v8699_v45 }
 0x2a5   :  { %v2696_v32 = vmul.f32 %v8741_v19, %v8234_v44  ;;  %v2547_v30 = vsub.s32 32, %v8699_v45  ;;  %v8746_v4 = vor.u32 %v2928_v15, %v2927_v23  ;;  %v8748_v35 = vor.u32 %v2931_v9, %v2930_v43  ;;  %v11046_v15 = vld [vmem:[#allocation26_spill] sm:$0xff] }
 0x2a6   :  { %v2935_v2 = vor.u32 %v2934_v42, %v2933_v5  ;;  %v8750_v28 = vadd.s32 %v2865_v49, %v2861_v27  ;;  %vm2942_vm13 = vcmp.lt.s32.totalorder %v8713_v34, 1  ;;  %vm2944_vm0 = vcmp.lt.s32.totalorder %v8713_v34, 3 }
 0x2a7   :  { %v2951_v55 = vsel %vm2945_vm11, %v2938_v33, 920167782  ;;  %v8757_v62 = vsub.s32 %v8640_v51, %v2642_v36  ;;  %v4573_v44 = vadd.s32 4294967294, %v2770_v31  ;;  %v2918_v18 = vor.u32 8388608, %v2917_v21 }
 0x2a8   :  { %v2955_v25 = vsel %vm2945_vm11, %v2941_v20, 1326507024  ;;  %v8761_v56 = vpop.eup %4880  ;;  %4886 = vsinq.f32 %v2355_v60  ;;  %v2457_v23 = vsub.s32 4, %v11044_v59  ;;  %v2459_v43 = vsel %vm8695_vm3, %v7756_v16, %v2456_v13 }
 0x2a9   :  { %11043 = vst [vmem:[#allocation38_spill] sm:$0xff] %v8761_v56  ;;  %v2552_v5 = vadd.s32 127, %v2551_v54  ;;  %v8767_v0 = vpop.eup %4882  ;;  %v8770_v51 = vadd.f32 %v11046_v15, %v2696_v32  ;;  %vm2943_vm2 = vcmp.lt.s32.totalorder %v8713_v34, 2  ;;  %v2950_v9 = vsel %vm2942_vm13, %v8746_v4, %v8748_v35 }
 0x2aa   :  { %11045 = vst [vmem:[#allocation23_spill] sm:$0xff] %v8767_v0  ;;  %v2952_v60 = vsel %vm2944_vm0, %v2935_v2, %v2951_v55  ;;  %v8779_v42 = vpop.eup %4884  ;;  %v2548_v7 = vshll.u32 %v8499_v26, %v8699_v45  ;;  %v2867_v36 = vadd.s32 536870912, %v8750_v28  ;;  %v2954_v31 = vsel %vm2942_vm13, %v8748_v35, %v2935_v2 }
 0x2ab   :  { %11047 = vst [vmem:[#allocation26_spill] sm:$0xff] %v8770_v51  ;;  %v2956_v27 = vsel %vm2944_vm0, %v2938_v33, %v2955_v25  ;;  %v2549_v49 = vshrl.u32 %v2531_v61, %v2547_v30  ;;  %v2645_v21 = vsub.s32 0, %v8757_v62  ;;  %vm4574_vm15 = vcmp.lt.s32.totalorder %v4573_v44, 0 }
 0x2ac   :  { %v8790_v20 = vshll.u32 %v2918_v18, 8  ;;  %v8793_v13 = vand.u32 3, %v8681_v24  ;;  %v2251_v26 = vmul.f32 %v8283_v48, %v8679_v46  ;;  %v2553_v45 = vshll.u32 %v2552_v5, 23 }
 0x2ad   :  { %v2953_v37 = vsel %vm2943_vm2, %v2950_v9, %v2952_v60  ;;  %v8800_v54 = vand.u32 3, %v8685_v1  ;;  %4888 = vcosq.f32 %v2459_v43  ;;  %v2957_v33 = vsel %vm2943_vm2, %v2954_v31, %v2956_v27 }
 0x2ae   :  { %11048 = vst [vmem:[#allocation39_spill] sm:$0xff] %v8793_v13  ;;  %v3017_v61 = vand.u32 2139095040, %v8770_v51  ;;  %v2458_v24 = vsel %vm2373_vm12, %v2457_v23, %v11044_v59  ;;  %4890 = vsinq.f32 %v2459_v43  ;;  %v8808_v32 = vsel %vm4574_vm15, 0, %v4573_v44  ;;  %v11050_v44 = vld [vmem:[#allocation16_spill] sm:$0xff] }
 0x2af   :  { %v8810_v46 = vshrl.u32 %v2867_v36, 30  ;;  %v2550_v30 = vor.u32 %v2549_v49, %v2548_v7  ;;  %v4568_v55 = vmin.u32 %v2645_v21, %v8757_v62  ;;  %v2554_v25 = vor.u32 4788187, %v2553_v45  ;;  %v11052_v7 = vld [vmem:[#allocation12_spill] sm:$0xff]  ;;  %v11058_v49 = vld [vmem:[#allocation33_spill] sm:$0xff] }
 0x2b0   :  { %v8814_v1 = vmul.u32.u64.low %v8790_v20, %v2953_v37  ;;  %v8815_v18 = vmul.u32.u64.high %v8790_v20, %v2953_v37, %v8814_v1  ;;  %v2926_v5 = vshrl.u32 %v10870_v57, %v8683_v39  ;;  %v8826_v23 = vadd.f32 %v8671_v11, %v11050_v44  ;;  %v11054_v39 = vld [vmem:[#allocation28_spill] sm:$0xff] }
 0x2b1   :  { %11049 = vst [vmem:[#allocation40_spill] sm:$0xff] %v8810_v46  ;;  %v8821_v15 = vmul.u32.u64.low %v8790_v20, %v2957_v33  ;;  %v8822_v59 = vmul.u32.u64.high %v8790_v20, %v2957_v33, %v8821_v15  ;;  %v2778_v43 = vsub.s32 4294967266, %v8808_v32  ;;  %v2947_v9 = vsel %vm2945_vm11, %v2935_v2, 2102212464 }
 0x2b2   :  { %11051 = vst [vmem:[#allocation16_spill] sm:$0xff] %v8826_v23  ;;  %v3018_v60 = vshrl.u32 %v3017_v61, 23  ;;  %vm2243_vm5 = vcmp.eq.s32.totalorder %v8793_v13, 2  ;;  %v8833_v36 = vadd.f32 %v2251_v26, %v11052_v7  ;;  %vm2477_vm1 = vcmp.lt.s32.totalorder %v11054_v39, 0  ;;  %v11060_v15 = vld [vmem:[#allocation35_spill] sm:$0xff] }
 0x2b3   :  { %v2869_v31 = vshll.u32 %v8810_v46, 30  ;;  %vm2363_vm4 = vcmp.eq.s32.totalorder %v8800_v54, 0  ;;  %v2460_v11 = vsel %vm8695_vm3, 0, %v2458_v24  ;;  %v11055_v27 = vand.u32 2147483647, %v11054_v39  ;;  %v11059_v24 = vld [vmem:[#allocation34_spill] sm:$0xff] }
 0x2b4   :  { %11053 = vst [vmem:[#allocation12_spill] sm:$0xff] %v8833_v36  ;;  %v2561_v21 = vsub.s32 4, %v11058_v49  ;;  %v2647_v26 = vclz %v4568_v55  ;;  %v2555_v45 = vand.u32 2147483647, %v2554_v25  ;;  %v2557_v37 = vcvt.s32.f32 %v2550_v30 }
 0x2b5   :  { %vm8844_vm14 = vcmp.le.f32.partialorder %v11055_v27, 0.7853982  ;;  %v2946_v33 = vsel %vm2942_vm13, %v2926_v5, %v8746_v4  ;;  %v2948_v12 = vsel %vm2944_vm0, %v8748_v35, %v2947_v9  ;;  %v4887_v61 = vpop.eup %4886  ;;  %v2758_v44 = vadd.s32 %v11060_v15, %v11059_v24 }
 0x2b6   :  { %v2774_v7 = vsub.s32 32, %v8808_v32  ;;  %v2779_v27 = vadd.s32 127, %v2778_v43  ;;  %v4583_v6 = vadd.s32 4294967169, %v3018_v60  ;;  %v2244_v55 = vxor.u32 2147483648, %v8761_v56 }
 0x2b7   :  { %vm2366_vm7 = vcmp.eq.s32.totalorder %v8800_v54, 2  ;;  %v2464_v30 = vadd.s32 3, %v2460_v11  ;;  %v8861_v25 = vsub.s32 %v8750_v28, %v2869_v31  ;;  %v2367_v4 = vxor.u32 2147483648, %v8779_v42 }
 0x2b8   :  { %v4569_v35 = vadd.s32 4294967294, %v2647_v26  ;;  %v2949_v5 = vsel %vm2943_vm2, %v2946_v33, %v2948_v12  ;;  %v2968_v9 = vadd.s32 1, %v8815_v18  ;;  %vm2359_vm9 = vweird.f32 %v11028_v38 }
 0x2b9   :  { %v2364_v43 = vxor.u32 2147483648, %v4887_v61  ;;  %v2558_v60 = vmul.f32 %v2557_v37, %v2555_v45  ;;  %v2562_v11 = vsel %vm2477_vm1, %v2561_v21, %v11058_v49  ;;  %vm2967_vm6 = vc.u32 %v8822_v59, %v8814_v1 }
 0x2ba   :  { %v2775_v28 = vshll.u32 %v8645_v47, %v8808_v32  ;;  %v2776_v31 = vshrl.u32 %v2758_v44, %v2774_v7  ;;  %v2780_v34 = vshll.u32 %v2779_v27, 23  ;;  %v3024_v26 = vadd.s32 1, %v4583_v6  ;;  %v4889_v33 = vpop.eup %4888 }
 0x2bb   :  { %vm2362_vm12 = vcmp.lt.s32.totalorder %v8800_v54, 2  ;;  %v2872_v45 = vsub.s32 0, %v8861_v25  ;;  %v2965_v37 = vmul.u32 %v8790_v20, %v2949_v5  ;;  %v4891_v49 = vpop.eup %4890  ;;  %v2465_v21 = vand.u32 3, %v2464_v30 }
 0x2bc   :  { %vm4570_vm10 = vcmp.lt.s32.totalorder %v4569_v35, 0  ;;  %v2969_v24 = vsel %vm2967_vm6, %v2968_v9, %v8815_v18  ;;  %v8885_v47 = vstv %s8837_s21  ;;  %v8890_v6 = vsel %vm2243_vm5, %v2244_v55, %v8767_v0 }
 0x2bd   :  { %11061 = vst [vmem:[#allocation28_spill] sm:$0xff] %v8890_v6  ;;  %v2365_v32 = vsel %vm2363_vm4, %v8779_v42, %v2364_v43  ;;  %v2368_v20 = vsel %vm2366_vm7, %v2367_v4, %v4887_v61  ;;  %v2564_v15 = vsel %vm8844_vm14, 0, %v2562_v11  ;;  %v2559_v44 = vxor.u32 2147483648, %v2558_v60  ;;  %v8907_v42 = vld [vmem:[%s10684_s3] sm:$0xff] }
 0x2be   :  { %v2777_v18 = vor.u32 %v2776_v31, %v2775_v28  ;;  %v2781_v7 = vor.u32 4788187, %v2780_v34  ;;  %vm3025_vm3 = vcmp.gt.s32.totalorder %v3024_v26, 0  ;;  %v8899_v27 = vsel %vm4570_vm10, 0, %v4569_v35  ;;  %11062 = vst [vmem:[#allocation33_spill] sm:$0xff] %v8907_v42 }
 0x2bf   :  { %v4576_v55 = vmin.u32 %v2872_v45, %v8861_v25  ;;  %v8902_v30 = vadd.s32 %v2969_v24, %v2965_v37  ;;  %v3128_v61 = vmul.f32 %v8907_v42, %v8885_v47  ;;  %v2369_v4 = vsel %vm2362_vm12, %v2365_v32, %v2368_v20 }
 0x2c0   :  { %vm2467_vm8 = vcmp.eq.s32.totalorder %v2465_v21, 0  ;;  %vm2470_vm11 = vcmp.eq.s32.totalorder %v2465_v21, 2  ;;  %v8914_v35 = vstv %s8863_s22  ;;  %v2468_v5 = vxor.u32 2147483648, %v4891_v49 }
 0x2c1   :  { %v2471_v9 = vxor.u32 2147483648, %v4889_v33  ;;  %v2568_v43 = vadd.s32 3, %v2564_v15  ;;  %v3026_v11 = vsel %vm3025_vm3, %v3024_v26, 0  ;;  %v2560_v28 = vsel %vm2477_vm1, %v2559_v44, %v2558_v60 }
 0x2c2   :  { %v2655_v31 = vsub.s32 4294967266, %v8899_v27  ;;  %v2782_v34 = vand.u32 2147483647, %v2781_v7  ;;  %v2784_v45 = vcvt.s32.f32 %v2777_v18  ;;  %v2874_v37 = vclz %v4576_v55 }
 0x2c3   :  { %v2971_v54 = vadd.s32 536870912, %v8902_v30  ;;  %v8922_v32 = vadd.f32 %v8914_v35, %v3128_v61  ;;  %v2370_v20 = vsel %vm2359_vm9, nan, %v2369_v4  ;;  %vm2466_vm13 = vcmp.lt.s32.totalorder %v2465_v21, 2 }
 0x2c4   :  { %v8927_v26 = vstv %s8881_s23  ;;  %v3028_v15 = vand.u32 31, %v3026_v11  ;;  %v2469_v60 = vsel %vm2467_vm8, %v4889_v33, %v2468_v5  ;;  %v2472_v44 = vsel %vm2470_vm11, %v2471_v9, %v4891_v49  ;;  %v11069_v9 = vld [vmem:[#allocation9_spill] sm:$0xff] }
 0x2c5   :  { %11063 = vst [vmem:[#allocation34_spill] sm:$0xff] %v8922_v32  ;;  %11064 = vst [vmem:[#allocation35_spill] sm:$0xff] %v8927_v26  ;;  %v8931_v18 = vand.u32 3, %v2568_v43  ;;  %v2635_v7 = vadd.s32 %v8517_v58, %v8534_v22  ;;  %v8938_v55 = vsel %vm8844_vm14, %v11054_v39, %v2560_v28  ;;  %v2651_v38 = vsub.s32 32, %v8899_v27  ;;  %v11068_v22 = vld [vmem:[#allocation13_spill] sm:$0xff] }
 0x2c6   :  { %v8941_v61 = vadd.s32 127, %v2655_v31  ;;  %v2785_v4 = vmul.f32 %v2784_v45, %v2782_v34  ;;  %v4577_v12 = vadd.s32 4294967294, %v2874_v37  ;;  %v8943_v24 = vshrl.u32 %v2971_v54, 30 }
 0x2c7   :  { %v11066_v33 = vand.u32 2147483647, %v8770_v51  ;;  %v3140_v5 = vand.u32 2139095040, %v8922_v32  ;;  %v8949_v58 = vmul.f32 %v8927_v26, %v2370_v20  ;;  %vm2704_vm0 = vcmp.lt.s32.totalorder %v11068_v22, 0 }
 0x2c8   :  { %11065 = vst [vmem:[#allocation41_spill] sm:$0xff] %v8943_v24  ;;  %v3029_v2 = vsub.s32 32, %v3028_v15  ;;  %v3129_v43 = vmul.f32 %v11069_v9, %v8885_v47  ;;  %v8955_v28 = vsel %vm2466_vm13, %v2469_v60, %v2472_v44  ;;  %4892 = vcosq.f32 %v8938_v55 }
 0x2c9   :  { %v3021_v49 = vand.u32 8388607, %v11066_v33  ;;  %11067 = vst [vmem:[#allocation42_spill] sm:$0xff] %v8949_v58  ;;  %11070 = vst [vmem:[#allocation13_spill] sm:$0xff] %v8955_v28  ;;  %v3141_v34 = vshrl.u32 %v3140_v5, 23  ;;  %v8961_v37 = vshrl.u32 %v2635_v7, %v2651_v38  ;;  %v2786_v20 = vxor.u32 2147483648, %v2785_v4 }
 0x2ca   :  { %vm4578_vm2 = vcmp.lt.s32.totalorder %v4577_v12, 0  ;;  %v2973_v33 = vshll.u32 %v8943_v24, 30  ;;  %v8965_v60 = vshrl.u32 %v3026_v11, 5  ;;  %v3040_v44 = vshll.u32 %v10863_v52, %v3028_v15 }
 0x2cb   :  { %v3022_v9 = vor.u32 8388608, %v3021_v49  ;;  %v4587_v21 = vadd.s32 4294967169, %v3141_v34  ;;  %v3041_v31 = vshrl.u32 %v10864_v8, %v3029_v2  ;;  %v8970_v5 = vadd.f32 %v8914_v35, %v3129_v43 }
 0x2cc   :  { %v3043_v7 = vshll.u32 %v10864_v8, %v3028_v15  ;;  %v3044_v38 = vshrl.u32 %v10865_v14, %v3029_v2  ;;  %v3031_v48 = vshll.u32 %v10870_v57, %v3028_v15  ;;  %v3032_v49 = vshrl.u32 %v11000_v53, %v3029_v2 }
 0x2cd   :  { %v3147_v45 = vadd.s32 1, %v4587_v21  ;;  %v3034_v11 = vshll.u32 %v11000_v53, %v3028_v15  ;;  %v3035_v34 = vshrl.u32 %v11001_v40, %v3029_v2  ;;  %v8980_v6 = vsub.s32 %v8902_v30, %v2973_v33 }
 0x2ce   :  { %v3037_v43 = vshll.u32 %v11001_v40, %v3028_v15  ;;  %v3038_v41 = vshrl.u32 %v10863_v52, %v3029_v2  ;;  %v8986_v54 = vsel %vm2704_vm0, %v2786_v20, %v2785_v4  ;;  %v8989_v21 = vsel %vm4578_vm2, 0, %v4577_v12 }
 0x2cf   :  { %vm3148_vm15 = vcmp.gt.s32.totalorder %v3147_v45, 0  ;;  %v3042_v36 = vor.u32 %v3041_v31, %v3040_v44  ;;  %v3045_v42 = vor.u32 %v3044_v38, %v3043_v7  ;;  %vm3049_vm5 = vcmp.lt.s32.totalorder %v8965_v60, 4 }
 0x2d0   :  { %v3149_v23 = vsel %vm3148_vm15, %v3147_v45, 0  ;;  %v3244_v30 = vand.u32 2139095040, %v8970_v5  ;;  %v8994_v15 = vshrl.u32 %v10870_v57, %v3029_v2  ;;  %v8996_v33 = vor.u32 %v3032_v49, %v3031_v48 }
 0x2d1   :  { %v3151_v51 = vand.u32 31, %v3149_v23  ;;  %v8998_v24 = vor.u32 %v3035_v34, %v3034_v11  ;;  %v9000_v4 = vshll.u32 %v3022_v9, 8  ;;  %v2976_v12 = vsub.s32 0, %v8980_v6 }
 0x2d2   :  { %v9003_v20 = vor.u32 %v3038_v41, %v3037_v43  ;;  %v11071_v31 = vand.u32 2147483647, %v8922_v32  ;;  %vm3046_vm1 = vcmp.lt.s32.totalorder %v8965_v60, 1  ;;  %vm3047_vm4 = vcmp.lt.s32.totalorder %v8965_v60, 2 }
 0x2d3   :  { %v3152_v44 = vsub.s32 32, %v3151_v51  ;;  %vm3048_vm14 = vcmp.lt.s32.totalorder %v8965_v60, 3  ;;  %v3055_v48 = vsel %vm3049_vm5, %v3042_v36, 920167782  ;;  %v3059_v2 = vsel %vm3049_vm5, %v3045_v42, 1326507024 }
 0x2d4   :  { %v3144_v45 = vand.u32 8388607, %v11071_v31  ;;  %v3154_v9 = vshll.u32 %v10870_v57, %v3151_v51  ;;  %v3157_v41 = vshll.u32 %v11000_v53, %v3151_v51  ;;  %v3245_v7 = vshrl.u32 %v3244_v30, 23 }
 0x2d5   :  { %v9016_v38 = vpop.eup %4892  ;;  %v3150_v49 = vshrl.u32 %v3149_v23, 5  ;;  %v3155_v11 = vshrl.u32 %v11000_v53, %v3152_v44  ;;  %v3158_v34 = vshrl.u32 %v11001_v40, %v3152_v44  ;;  %v3160_v43 = vshll.u32 %v11001_v40, %v3151_v51 }
 0x2d6   :  { %v3054_v31 = vsel %vm3046_vm1, %v8996_v33, %v8998_v24  ;;  %v3056_v42 = vsel %vm3048_vm14, %v9003_v20, %v3055_v48  ;;  %v3145_v32 = vor.u32 8388608, %v3144_v45  ;;  %v3161_v30 = vshrl.u32 %v10863_v52, %v3152_v44 }
 0x2d7   :  { %v3058_v23 = vsel %vm3046_vm1, %v8998_v24, %v9003_v20  ;;  %v3060_v19 = vsel %vm3048_vm14, %v3042_v36, %v3059_v2  ;;  %v3163_v10 = vshll.u32 %v10863_v52, %v3151_v51  ;;  %v3164_v58 = vshrl.u32 %v10864_v8, %v3152_v44 }
 0x2d8   :  { %v3156_v26 = vor.u32 %v3155_v11, %v3154_v9  ;;  %v3159_v56 = vor.u32 %v3158_v34, %v3157_v41  ;;  %v3166_v0 = vshll.u32 %v10864_v8, %v3151_v51  ;;  %v4591_v48 = vadd.s32 4294967169, %v3245_v7 }
 0x2d9   :  { %v11072_v45 = vand.u32 2147483647, %v11068_v22  ;;  %v3162_v50 = vor.u32 %v3161_v30, %v3160_v43  ;;  %v3165_v28 = vor.u32 %v3164_v58, %v3163_v10  ;;  %v3167_v17 = vshrl.u32 %v10865_v14, %v3152_v44 }
 0x2da   :  { %vm3169_vm9 = vcmp.lt.s32.totalorder %v3150_v49, 1  ;;  %v4580_v36 = vmin.u32 %v2976_v12, %v8980_v6  ;;  %v3057_v2 = vsel %vm3047_vm4, %v3054_v31, %v3056_v42  ;;  %v3153_v9 = vshrl.u32 %v10870_v57, %v3152_v44 }
 0x2db   :  { %vm9040_vm7 = vcmp.le.f32.partialorder %v11072_v45, 0.7853982  ;;  %v3185_v51 = vshll.u32 %v3145_v32, 8  ;;  %v3168_v41 = vor.u32 %v3167_v17, %v3166_v0  ;;  %vm3170_vm6 = vcmp.lt.s32.totalorder %v3150_v49, 2 }
 0x2dc   :  { %vm3171_vm12 = vcmp.lt.s32.totalorder %v3150_v49, 3  ;;  %vm3172_vm10 = vcmp.lt.s32.totalorder %v3150_v49, 4  ;;  %v3061_v7 = vsel %vm3047_vm4, %v3058_v23, %v3060_v19  ;;  %v3177_v10 = vsel %vm3169_vm9, %v3156_v26, %v3159_v56 }
 0x2dd   :  { %v3174_v11 = vsel %vm3172_vm10, %v3162_v50, 2102212464  ;;  %v3178_v58 = vsel %vm3172_vm10, %v3165_v28, 920167782  ;;  %v3181_v12 = vsel %vm3169_vm9, %v3159_v56, %v3162_v50  ;;  %v3182_v43 = vsel %vm3172_vm10, %v3168_v41, 1326507024 }
 0x2de   :  { %v3179_v34 = vsel %vm3171_vm12, %v3162_v50, %v3178_v58  ;;  %v3251_v30 = vadd.s32 1, %v4591_v48  ;;  %v3173_v31 = vsel %vm3169_vm9, %v3153_v9, %v3156_v26  ;;  %v3175_v44 = vsel %vm3171_vm12, %v3159_v56, %v3174_v11 }
 0x2df   :  { %v3180_v17 = vsel %vm3170_vm6, %v3177_v10, %v3179_v34  ;;  %v3183_v0 = vsel %vm3171_vm12, %v3165_v28, %v3182_v43  ;;  %v2978_v32 = vclz %v4580_v36  ;;  %v3176_v56 = vsel %vm3170_vm6, %v3173_v31, %v3175_v44 }
 0x2e0   :  { %v3184_v42 = vsel %vm3170_vm6, %v3181_v12, %v3183_v0  ;;  %v9056_v45 = vmul.u32.u64.low %v3185_v51, %v3180_v17  ;;  %v9057_v19 = vmul.u32.u64.high %v3185_v51, %v3180_v17, %v9056_v45  ;;  %vm3252_vm3 = vcmp.gt.s32.totalorder %v3251_v30, 0 }
 0x2e1   :  { %v9061_v23 = vmul.u32.u64.low %v9000_v4, %v3061_v7  ;;  %v9062_v58 = vmul.u32.u64.high %v9000_v4, %v3061_v7, %v9061_v23  ;;  %v9065_v50 = vmul.u32.u64.low %v9000_v4, %v3057_v2  ;;  %v9066_v48 = vmul.u32.u64.high %v9000_v4, %v3057_v2, %v9065_v50 }
 0x2e2   :  { %v9070_v26 = vmul.u32.u64.low %v3185_v51, %v3184_v42  ;;  %v9071_v28 = vmul.u32.u64.high %v3185_v51, %v3184_v42, %v9070_v26  ;;  %4894 = vsinq.f32 %v8938_v55  ;;  %v2788_v36 = vsub.s32 4, %v8575_v63 }
 0x2e3   :  { %v3051_v9 = vsel %vm3049_vm5, %v9003_v20, 2102212464  ;;  %v3253_v41 = vsel %vm3252_vm3, %v3251_v30, 0  ;;  %v11075_v2 = vshll.u32 %v8757_v62, %v8899_v27  ;;  %v11076_v49 = vshll.u32 %v8941_v61, 23  ;;  %v11077_v30 = vld [vmem:[#allocation36_spill] sm:$0xff] }
 0x2e4   :  { %v3195_v10 = vadd.s32 1, %v9057_v19  ;;  %v3255_v55 = vand.u32 31, %v3253_v41  ;;  %v2790_v34 = vsel %vm9040_vm7, %v11068_v22, %v8986_v54  ;;  %v2882_v20 = vsub.s32 4294967266, %v8989_v21 }
 0x2e5   :  { %v9082_v7 = vor.u32 %v8961_v37, %v11075_v2  ;;  %v9086_v11 = vor.u32 4788187, %v11076_v49  ;;  %v4581_v12 = vadd.s32 4294967294, %v2978_v32  ;;  %v3192_v43 = vmul.u32 %v3185_v51, %v3176_v56 }
 0x2e6   :  { %v3050_v62 = vsel %vm3046_vm1, %v8994_v15, %v8996_v33  ;;  %v3052_v27 = vsel %vm3048_vm14, %v8998_v24, %v3051_v9  ;;  %vm3194_vm8 = vc.u32 %v9071_v28, %v9056_v45  ;;  %v10808_v61 = vand.u32 2147483647, %v8970_v5 }
 0x2e7   :  { %v9107_v37 = vsel %vm2704_vm0, %v2788_v36, %v8575_v63  ;;  %v2862_v54 = vadd.s32 %v8652_v29, %v8649_v3  ;;  %v3196_v51 = vsel %vm3194_vm8, %v3195_v10, %v9057_v19  ;;  %v9112_v15 = vsub.s32 32, %v3255_v55 }
 0x2e8   :  { %4896 = vcosq.f32 %v2790_v34  ;;  %v2878_v24 = vsub.s32 32, %v8989_v21  ;;  %v2879_v33 = vshll.u32 %v8861_v25, %v8989_v21  ;;  %v3130_v31 = vmul.f32 %v11077_v30, %v8885_v47 }
 0x2e9   :  { %v2883_v44 = vadd.s32 127, %v2882_v20  ;;  %vm4582_vm11 = vcmp.lt.s32.totalorder %v4581_v12, 0  ;;  %v3053_v63 = vsel %vm3047_vm4, %v3050_v62, %v3052_v27  ;;  %v9121_v17 = vadd.s32 %v3196_v51, %v3192_v43 }
 0x2ea   :  { %vm3071_vm13 = vc.u32 %v9062_v58, %v9065_v50  ;;  %v3072_v3 = vadd.s32 1, %v9066_v48  ;;  %v3248_v29 = vand.u32 8388607, %v10808_v61  ;;  %v3258_v25 = vshll.u32 %v10870_v57, %v3255_v55 }
 0x2eb   :  { %v3259_v21 = vshrl.u32 %v11000_v53, %v9112_v15  ;;  %v3261_v0 = vshll.u32 %v11000_v53, %v3255_v55  ;;  %v3262_v60 = vshrl.u32 %v11001_v40, %v9112_v15  ;;  %v3267_v32 = vshll.u32 %v10863_v52, %v3255_v55 }
 0x2ec   :  { %v9135_v42 = vshrl.u32 %v3253_v41, 5  ;;  %v3264_v19 = vshll.u32 %v11001_v40, %v3255_v55  ;;  %v3265_v23 = vshrl.u32 %v10863_v52, %v9112_v15  ;;  %v3268_v56 = vshrl.u32 %v10864_v8, %v9112_v15 }
 0x2ed   :  { %v3069_v26 = vmul.u32 %v9000_v4, %v3053_v63  ;;  %v3198_v36 = vadd.s32 536870912, %v9121_v17  ;;  %v3270_v9 = vshll.u32 %v10864_v8, %v3255_v55  ;;  %v3271_v2 = vshrl.u32 %v10865_v14, %v9112_v15 }
 0x2ee   :  { %v2880_v49 = vshrl.u32 %v2862_v54, %v2878_v24  ;;  %v2884_v41 = vshll.u32 %v2883_v44, 23  ;;  %v9148_v10 = vsel %vm4582_vm11, 0, %v4581_v12  ;;  %v3073_v20 = vsel %vm3071_vm13, %v3072_v3, %v9066_v48 }
 0x2ef   :  { %v3249_v43 = vor.u32 8388608, %v3248_v29  ;;  %v3260_v62 = vor.u32 %v3259_v21, %v3258_v25  ;;  %v3263_v4 = vor.u32 %v3262_v60, %v3261_v0  ;;  %v3269_v27 = vor.u32 %v3268_v56, %v3267_v32  ;;  %v9154_v51 = vpop.eup %4894 }
 0x2f0   :  { %v3266_v55 = vor.u32 %v3265_v23, %v3264_v19  ;;  %v3272_v30 = vor.u32 %v3271_v2, %v3270_v9  ;;  %vm3273_vm0 = vcmp.lt.s32.totalorder %v9135_v42, 1  ;;  %vm3276_vm2 = vcmp.lt.s32.totalorder %v9135_v42, 4  ;;  %v11079_v19 = vld [vmem:[#allocation24_spill] sm:$0xff] }
 0x2f1   :  { %4898 = vsinq.f32 %v2790_v34  ;;  %v9158_v12 = vadd.s32 %v3073_v20, %v3069_v26  ;;  %v9160_v54 = vshrl.u32 %v3198_v36, 30  ;;  %vm3275_vm15 = vcmp.lt.s32.totalorder %v9135_v42, 3 }
 0x2f2   :  { %v2881_v48 = vor.u32 %v2880_v49, %v2879_v33  ;;  %v2966_v24 = vadd.s32 %v8814_v1, %v8822_v59  ;;  %v2986_v44 = vsub.s32 4294967266, %v9148_v10  ;;  %vm3274_vm5 = vcmp.lt.s32.totalorder %v9135_v42, 2  ;;  %v11085_v42 = vld [vmem:[#allocation25_spill] sm:$0xff] }
 0x2f3   :  { %vm2463_vm1 = vweird.f32 %v7756_v16  ;;  %v9169_v63 = vadd.f32 %v8914_v35, %v3130_v31  ;;  %v3281_v34 = vsel %vm3273_vm0, %v3260_v62, %v3263_v4  ;;  %v3282_v3 = vsel %vm3276_vm2, %v3269_v27, 920167782 }
 0x2f4   :  { %v9175_v29 = vshll.u32 %v3249_v43, 8  ;;  %vm2574_vm4 = vcmp.eq.s32.totalorder %v8931_v18, 2  ;;  %v2885_v1 = vor.u32 4788187, %v2884_v41  ;;  %v3283_v59 = vsel %vm3275_vm15, %v3266_v55, %v3282_v3 }
 0x2f5   :  { %11078 = vst [vmem:[#allocation9_spill] sm:$0xff] %v9169_v63  ;;  %v3285_v33 = vsel %vm3273_vm0, %v3263_v4, %v3266_v55  ;;  %v3286_v31 = vsel %vm3276_vm2, %v3272_v30, 1326507024  ;;  %v9184_v25 = vpop.eup %4896  ;;  %vm2571_vm14 = vcmp.eq.s32.totalorder %v8931_v18, 0  ;;  %v3075_v21 = vadd.s32 536870912, %v9158_v12 }
 0x2f6   :  { %v3200_v0 = vshll.u32 %v9160_v54, 30  ;;  %v3284_v60 = vsel %vm3274_vm5, %v3281_v34, %v3283_v59  ;;  %v3287_v32 = vsel %vm3275_vm15, %v3269_v27, %v3286_v31  ;;  %vm2581_vm9 = vcmp.lt.s32.totalorder %v11079_v19, 0 }
 0x2f7   :  { %v2982_v23 = vsub.s32 32, %v9148_v10  ;;  %v2987_v56 = vadd.s32 127, %v2986_v44  ;;  %v3257_v26 = vshrl.u32 %v10870_v57, %v9112_v15  ;;  %v3278_v36 = vsel %vm3276_vm2, %v3266_v55, 2102212464 }
 0x2f8   :  { %vm2240_vm6 = vcmp.eq.s32.totalorder %v8793_v13, 0  ;;  %v3288_v9 = vsel %vm3274_vm5, %v3285_v33, %v3287_v32  ;;  %v9203_v2 = vmul.u32.u64.low %v9175_v29, %v3284_v60  ;;  %v9204_v49 = vmul.u32.u64.high %v9175_v29, %v3284_v60, %v9203_v2  ;;  %v11083_v60 = vld [vmem:[#allocation15_spill] sm:$0xff] }
 0x2f9   :  { %v3348_v41 = vand.u32 2139095040, %v9169_v63  ;;  %v2886_v20 = vand.u32 2147483647, %v2885_v1  ;;  %v2888_v43 = vcvt.s32.f32 %v2881_v48  ;;  %vm2570_vm12 = vcmp.lt.s32.totalorder %v8931_v18, 2  ;;  %v11099_v18 = vld [vmem:[#allocation21_spill] sm:$0xff] }
 0x2fa   :  { %v9209_v27 = vmul.u32.u64.low %v9175_v29, %v3288_v9  ;;  %v9210_v15 = vmul.u32.u64.high %v9175_v29, %v3288_v9, %v9209_v27  ;;  %v2983_v55 = vshll.u32 %v8980_v6, %v9148_v10  ;;  %v9215_v30 = vshrl.u32 %v3075_v21, 30 }
 0x2fb   :  { %v9218_v44 = vsub.s32 %v9121_v17, %v3200_v0  ;;  %v3349_v34 = vshrl.u32 %v3348_v41, 23  ;;  %v11080_v3 = vand.u32 2147483647, %v11079_v19  ;;  %v2984_v48 = vshrl.u32 %v2966_v24, %v2982_v23 }
 0x2fc   :  { %v2988_v59 = vshll.u32 %v2987_v56, 23  ;;  %v3277_v33 = vsel %vm3273_vm0, %v3257_v26, %v3260_v62  ;;  %v3279_v6 = vsel %vm3275_vm15, %v3263_v4, %v3278_v36  ;;  %v2575_v10 = vxor.u32 2147483648, %v9016_v38  ;;  %v11084_v56 = vld [vmem:[#allocation13_spill] sm:$0xff] }
 0x2fd   :  { %vm9222_vm10 = vcmp.le.f32.partialorder %v11080_v3, 0.7853982  ;;  %v2659_v17 = vand.u32 2147483647, %v9086_v11  ;;  %v2661_v31 = vcvt.s32.f32 %v9082_v7  ;;  %v4595_v21 = vadd.s32 4294967169, %v3349_v34  ;;  %v11087_v3 = vld [vmem:[#allocation40_spill] sm:$0xff] }
 0x2fe   :  { %vm2567_vm3 = vweird.f32 %v11054_v39  ;;  %v2572_v0 = vxor.u32 2147483648, %v9154_v51  ;;  %v2791_v24 = vsel %vm9040_vm7, 0, %v9107_v37  ;;  %vm2808_vm8 = vcmp.lt.s32.totalorder %v11083_v60, 0  ;;  %v9244_v23 = vpop.eup %4898 }
 0x2ff   :  { %v2889_v62 = vmul.f32 %v2888_v43, %v2886_v20  ;;  %v3077_v4 = vshll.u32 %v9215_v30, 30  ;;  %v3203_v32 = vsub.s32 0, %v9218_v44  ;;  %v3280_v11 = vsel %vm3274_vm5, %v3277_v33, %v3279_v6  ;;  %v11088_v6 = vld [vmem:[#allocation23_spill] sm:$0xff] }
 0x300   :  { %v3299_v7 = vadd.s32 1, %v9204_v49  ;;  %v2474_v26 = vsel %vm2463_vm1, nan, %v11084_v56  ;;  %v2985_v46 = vor.u32 %v2984_v48, %v2983_v55  ;;  %v2989_v37 = vor.u32 4788187, %v2988_v59 }
 0x301   :  { %vm3298_vm7 = vc.u32 %v9210_v15, %v9203_v2  ;;  %v2576_v36 = vsel %vm2574_vm4, %v2575_v10, %v9154_v51  ;;  %v2662_v9 = vmul.f32 %v2661_v31, %v2659_v17  ;;  %v11086_v41 = vsub.s32 4, %v11085_v42  ;;  %v11090_v17 = vld [vmem:[#allocation38_spill] sm:$0xff] }
 0x302   :  { %v3355_v43 = vadd.s32 1, %v4595_v21  ;;  %v2573_v16 = vsel %vm2571_vm14, %v9016_v38, %v2572_v0  ;;  %v2795_v27 = vadd.s32 3, %v2791_v24  ;;  %v2890_v55 = vxor.u32 2147483648, %v2889_v62  ;;  %v11092_v38 = vld [vmem:[#allocation35_spill] sm:$0xff] }
 0x303   :  { %v2666_v20 = vsel %vm2581_vm9, %v11086_v41, %v11085_v42  ;;  %v3296_v34 = vmul.u32 %v9175_v29, %v3280_v11  ;;  %v2892_v48 = vsub.s32 4, %v11087_v3  ;;  %v9265_v51 = vsub.s32 %v9158_v12, %v3077_v4 }
 0x304   :  { %v4588_v59 = vmin.u32 %v3203_v32, %v9218_v44  ;;  %v3300_v33 = vsel %vm3298_vm7, %v3299_v7, %v9204_v49  ;;  %v11089_v10 = vxor.u32 2147483648, %v11088_v6  ;;  %v2685_v21 = vmul.f32 %v11092_v38, %v2474_v26  ;;  %v11096_v26 = vld [vmem:[#allocation18_spill] sm:$0xff]  ;;  %v11103_v32 = vld [vmem:[#allocation41_spill] sm:$0xff] }
 0x305   :  { %v2990_v0 = vand.u32 2147483647, %v2989_v37  ;;  %v2992_v29 = vcvt.s32.f32 %v2985_v46  ;;  %v2663_v24 = vxor.u32 2147483648, %v2662_v9  ;;  %v2668_v12 = vsel %vm9222_vm10, 0, %v2666_v20  ;;  %v11097_v46 = vld [vmem:[#allocation42_spill] sm:$0xff] }
 0x306   :  { %v9274_v31 = vsel %vm2240_vm6, %v11090_v17, %v11089_v10  ;;  %v11093_v4 = vand.u32 2147483647, %v11083_v60  ;;  %vm3356_vm13 = vcmp.gt.s32.totalorder %v3355_v43, 0  ;;  %v2577_v49 = vsel %vm2570_vm12, %v2573_v16, %v2576_v36 }
 0x307   :  { %11091 = vst [vmem:[#allocation36_spill] sm:$0xff] %v9274_v31  ;;  %v2796_v11 = vand.u32 3, %v2795_v27  ;;  %v2891_v7 = vsel %vm2808_vm8, %v2890_v55, %v2889_v62  ;;  %v9289_v56 = vadd.s32 %v3300_v33, %v3296_v34  ;;  %v9293_v37 = vadd.f32 %v11097_v46, %v11096_v26 }
 0x308   :  { %vm9281_vm11 = vcmp.le.f32.partialorder %v11093_v4, 0.7853982  ;;  %v2893_v42 = vsel %vm2808_vm8, %v2892_v48, %v11087_v3  ;;  %v3080_v41 = vsub.s32 0, %v9265_v51  ;;  %v3205_v20 = vclz %v4588_v59  ;;  %v11101_v3 = vld [vmem:[#allocation37_spill] sm:$0xff] }
 0x309   :  { %v9299_v6 = vadd.s32 3, %v2668_v12  ;;  %v9302_v36 = vadd.f32 %v2685_v21, %v11099_v18  ;;  %v2993_v16 = vmul.f32 %v2992_v29, %v2990_v0  ;;  %v3357_v62 = vsel %vm3356_vm13, %v3355_v43, 0 }
 0x30a   :  { %v2578_v27 = vsel %vm2567_vm3, nan, %v2577_v49  ;;  %v2664_v55 = vsel %vm2581_vm9, %v2663_v24, %v2662_v9  ;;  %v2894_v34 = vsel %vm9281_vm11, %v11083_v60, %v2891_v7  ;;  %vm2912_vm0 = vcmp.lt.s32.totalorder %v11101_v3, 0  ;;  %v11102_v24 = vld [vmem:[#allocation14_spill] sm:$0xff] }
 0x30b   :  { %11098 = vst [vmem:[#allocation15_spill] sm:$0xff] %v9299_v6  ;;  %11100 = vst [vmem:[#allocation13_spill] sm:$0xff] %v9302_v36  ;;  %vm2801_vm2 = vcmp.eq.s32.totalorder %v2796_v11, 2  ;;  %v2802_v48 = vxor.u32 2147483648, %v9184_v25  ;;  %v2895_v43 = vsel %vm9281_vm11, 0, %v2893_v42  ;;  %v3302_v59 = vadd.s32 536870912, %v9289_v56 }
 0x30c   :  { %v2799_v39 = vxor.u32 2147483648, %v9244_v23  ;;  %v4584_v33 = vmin.u32 %v3080_v41, %v9265_v51  ;;  %v4589_v10 = vadd.s32 4294967294, %v3205_v20  ;;  %v3359_v9 = vand.u32 31, %v3357_v62  ;;  %v11104_v42 = vld [vmem:[#allocation32_spill] sm:$0xff] }
 0x30d   :  { %v2686_v17 = vmul.f32 %v11092_v38, %v2578_v27  ;;  %vm2794_vm15 = vweird.f32 %v11068_v22  ;;  %vm2798_vm5 = vcmp.eq.s32.totalorder %v2796_v11, 0  ;;  %4900 = vcosq.f32 %v2894_v34 }
 0x30e   :  { %v2994_v21 = vxor.u32 2147483648, %v2993_v16  ;;  %v2667_v0 = vsel %vm9222_vm10, %v11079_v19, %v2664_v55  ;;  %4902 = vsinq.f32 %v2894_v34  ;;  %v2899_v29 = vadd.s32 3, %v2895_v43 }
 0x30f   :  { %v3131_v12 = vmul.f32 %v11102_v24, %v8885_v47  ;;  %vm2797_vm1 = vcmp.lt.s32.totalorder %v2796_v11, 2  ;;  %v2803_v4 = vsel %vm2801_vm2, %v2802_v48, %v9244_v23  ;;  %v2996_v49 = vsub.s32 4, %v11103_v32 }
 0x310   :  { %v9330_v7 = vshrl.u32 %v3302_v59, 30  ;;  %v2800_v26 = vsel %vm2798_vm5, %v9184_v25, %v2799_v39  ;;  %v3082_v46 = vclz %v4584_v33  ;;  %vm4590_vm4 = vcmp.lt.s32.totalorder %v4589_v10, 0 }
 0x311   :  { %v9333_v1 = vsub.s32 32, %v3359_v9  ;;  %4904 = vcosq.f32 %v2667_v0  ;;  %v9336_v41 = vadd.f32 %v2686_v17, %v11104_v42  ;;  %v11106_v47 = vand.u32 2147483647, %v11101_v3 }
 0x312   :  { %v2995_v23 = vsel %vm2912_vm0, %v2994_v21, %v2993_v16  ;;  %4906 = vsinq.f32 %v2667_v0  ;;  %v9346_v18 = vand.u32 3, %v2899_v29  ;;  %v9349_v25 = vstv %s9304_s24 }
 0x313   :  { %11105 = vst [vmem:[#allocation25_spill] sm:$0xff] %v9336_v41  ;;  %vm9340_vm14 = vcmp.le.f32.partialorder %v11106_v47, 0.7853982  ;;  %11109 = vst [vmem:[#allocation40_spill] sm:$0xff] %v9349_v25  ;;  %v9352_v27 = vadd.f32 %v8914_v35, %v3131_v12  ;;  %v2804_v55 = vsel %vm2797_vm1, %v2800_v26, %v2803_v4  ;;  %v2997_v34 = vsel %vm2912_vm0, %v2996_v49, %v11103_v32 }
 0x314   :  { %v9358_v48 = vsel %vm4590_vm4, 0, %v4589_v10  ;;  %v3304_v43 = vshll.u32 %v9330_v7, 30  ;;  %v2998_v16 = vsel %vm9340_vm14, %v11101_v3, %v2995_v23  ;;  %v4585_v59 = vadd.s32 4294967294, %v3082_v46 }
 0x315   :  { %11110 = vst [vmem:[#allocation23_spill] sm:$0xff] %v9352_v27  ;;  %v3371_v39 = vshll.u32 %v10863_v52, %v3359_v9  ;;  %v3372_v35 = vshrl.u32 %v10864_v8, %v9333_v1  ;;  %v10807_v11 = vand.u32 2147483647, %v9169_v63  ;;  %v9368_v33 = vshrl.u32 %v3357_v62, 5 }
 0x316   :  { %v3374_v17 = vshll.u32 %v10864_v8, %v3359_v9  ;;  %v3375_v10 = vshrl.u32 %v10865_v14, %v9333_v1  ;;  %v3213_v21 = vsub.s32 4294967266, %v9358_v48  ;;  %v3362_v0 = vshll.u32 %v10870_v57, %v3359_v9 }
 0x317   :  { %v3365_v29 = vshll.u32 %v11000_v53, %v3359_v9  ;;  %v3368_v24 = vshll.u32 %v11001_v40, %v3359_v9  ;;  %v9378_v12 = vsub.s32 %v9289_v56, %v3304_v43  ;;  %v3363_v62 = vshrl.u32 %v11000_v53, %v9333_v1 }
 0x318   :  { %v3366_v4 = vshrl.u32 %v11001_v40, %v9333_v1  ;;  %v3369_v32 = vshrl.u32 %v10863_v52, %v9333_v1  ;;  %v2805_v49 = vsel %vm2794_vm15, nan, %v2804_v55  ;;  %4908 = vcosq.f32 %v2998_v16 }
 0x319   :  { %v3193_v26 = vadd.s32 %v9056_v45, %v9071_v28  ;;  %v3373_v9 = vor.u32 %v3372_v35, %v3371_v39  ;;  %v3209_v56 = vsub.s32 32, %v9358_v48  ;;  %v3352_v46 = vand.u32 8388607, %v10807_v11 }
 0x31a   :  { %v3376_v42 = vor.u32 %v3375_v10, %v3374_v17  ;;  %vm3380_vm9 = vcmp.lt.s32.totalorder %v9368_v33, 4  ;;  %v4901_v47 = vpop.eup %4900  ;;  %v2999_v23 = vsel %vm9340_vm14, 0, %v2997_v34  ;;  %4910 = vsinq.f32 %v2998_v16 }
 0x31b   :  { %vm4586_vm6 = vcmp.lt.s32.totalorder %v4585_v59, 0  ;;  %v3214_v22 = vadd.s32 127, %v3213_v21  ;;  %v4903_v55 = vpop.eup %4902  ;;  %v3307_v43 = vsub.s32 0, %v9378_v12  ;;  %v9397_v45 = vor.u32 %v3363_v62, %v3362_v0 }
 0x31c   :  { %v9399_v28 = vor.u32 %v3366_v4, %v3365_v29  ;;  %v3370_v39 = vor.u32 %v3369_v32, %v3368_v24  ;;  %vm3377_vm12 = vcmp.lt.s32.totalorder %v9368_v33, 1  ;;  %vm3379_vm10 = vcmp.lt.s32.totalorder %v9368_v33, 3 }
 0x31d   :  { %v3386_v35 = vsel %vm3380_vm9, %v3373_v9, 920167782  ;;  %v3452_v20 = vand.u32 2139095040, %v9352_v27  ;;  %v3210_v34 = vshll.u32 %v9218_v44, %v9358_v48  ;;  %v3211_v16 = vshrl.u32 %v3193_v26, %v3209_v56 }
 0x31e   :  { %v3353_v17 = vor.u32 8388608, %v3352_v46  ;;  %v3390_v10 = vsel %vm3380_vm9, %v3376_v42, 1326507024  ;;  %v9410_v21 = vpop.eup %4904  ;;  %v2903_v0 = vxor.u32 2147483648, %v4903_v55  ;;  %v2906_v29 = vxor.u32 2147483648, %v4901_v47 }
 0x31f   :  { %11111 = vst [vmem:[#allocation38_spill] sm:$0xff] %v9410_v21  ;;  %v3003_v24 = vadd.s32 3, %v2999_v23  ;;  %v3215_v62 = vshll.u32 %v3214_v22, 23  ;;  %v9412_v4 = vpop.eup %4906  ;;  %v4592_v32 = vmin.u32 %v3307_v43, %v9378_v12  ;;  %vm3378_vm3 = vcmp.lt.s32.totalorder %v9368_v33, 2 }
 0x320   :  { %11112 = vst [vmem:[#allocation18_spill] sm:$0xff] %v9412_v4  ;;  %v3385_v44 = vsel %vm3377_vm12, %v9397_v45, %v9399_v28  ;;  %v3387_v48 = vsel %vm3379_vm10, %v3370_v39, %v3386_v35  ;;  %vm2898_vm8 = vweird.f32 %v11083_v60  ;;  %v3085_v26 = vsel %vm4586_vm6, 0, %v4585_v59 }
 0x321   :  { %v3389_v56 = vsel %vm3377_vm12, %v9399_v28, %v3370_v39  ;;  %v3391_v46 = vsel %vm3379_vm10, %v3373_v9, %v3390_v10  ;;  %v3453_v42 = vshrl.u32 %v3452_v20, 23  ;;  %vm2902_vm7 = vcmp.eq.s32.totalorder %v9346_v18, 0 }
 0x322   :  { %vm2905_vm11 = vcmp.eq.s32.totalorder %v9346_v18, 2  ;;  %v3212_v23 = vor.u32 %v3211_v16, %v3210_v34  ;;  %v9433_v22 = vshll.u32 %v3353_v17, 8  ;;  %vm2901_vm13 = vcmp.lt.s32.totalorder %v9346_v18, 2 }
 0x323   :  { %v9436_v43 = vand.u32 3, %v3003_v24  ;;  %v3216_v59 = vor.u32 4788187, %v3215_v62  ;;  %v3388_v35 = vsel %vm3378_vm3, %v3385_v44, %v3387_v48  ;;  %v3090_v11 = vsub.s32 4294967266, %v3085_v26 }
 0x324   :  { %v3119_v61 = vmul.f32 %v9349_v25, %v2805_v49  ;;  %v3309_v9 = vclz %v4592_v32  ;;  %v3392_v20 = vsel %vm3378_vm3, %v3389_v56, %v3391_v46  ;;  %v2904_v10 = vsel %vm2902_vm7, %v4901_v47, %v2903_v0  ;;  %v11113_v0 = vld [vmem:[#allocation26_spill] sm:$0xff]  ;;  %v11114_v46 = vld [vmem:[#allocation29_spill] sm:$0xff] }
 0x325   :  { %v2907_v38 = vsel %vm2905_vm11, %v2906_v29, %v4903_v55  ;;  %v3070_v34 = vadd.s32 %v9065_v50, %v9062_v58  ;;  %v4599_v16 = vadd.s32 4294967169, %v3453_v42  ;;  %v4909_v17 = vpop.eup %4908  ;;  %v3086_v24 = vsub.s32 32, %v3085_v26 }
 0x326   :  { %v3219_v19 = vcvt.s32.f32 %v3212_v23  ;;  %v9446_v62 = vmul.u32.u64.low %v9433_v22, %v3388_v35  ;;  %v9447_v44 = vmul.u32.u64.high %v9433_v22, %v3388_v35, %v9446_v62  ;;  %vm3006_vm0 = vcmp.eq.s32.totalorder %v9436_v43, 0 }
 0x327   :  { %v3217_v49 = vand.u32 2147483647, %v3216_v59  ;;  %v3361_v47 = vshrl.u32 %v10870_v57, %v9333_v1  ;;  %v9456_v58 = vmul.u32.u64.low %v9433_v22, %v3392_v20  ;;  %v9457_v50 = vmul.u32.u64.high %v9433_v22, %v3392_v20, %v9456_v58  ;;  %v4911_v55 = vpop.eup %4910  ;;  %v11116_v20 = vld [vmem:[#allocation34_spill] sm:$0xff] }
 0x328   :  { %vm3009_vm2 = vcmp.eq.s32.totalorder %v9436_v43, 2  ;;  %vm3016_vm15 = vcmp.lt.s32.totalorder %v11113_v0, 0  ;;  %v3091_v29 = vadd.s32 127, %v3090_v11  ;;  %v4593_v32 = vadd.s32 4294967294, %v3309_v9  ;;  %v11120_v9 = vld [vmem:[#allocation33_spill] sm:$0xff] }
 0x329   :  { %v3382_v48 = vsel %vm3380_vm9, %v3370_v39, 2102212464  ;;  %v2908_v56 = vsel %vm2901_vm13, %v2904_v10, %v2907_v38  ;;  %v9466_v42 = vadd.f32 %v3119_v61, %v11114_v46  ;;  %v3459_v1 = vadd.s32 1, %v4599_v16 }
 0x32a   :  { %v9469_v23 = vstv %s9422_s25  ;;  %v3087_v59 = vshll.u32 %v9265_v51, %v3085_v26  ;;  %v3088_v35 = vshrl.u32 %v3070_v34, %v3086_v24  ;;  %v11117_v58 = vand.u32 2147483647, %v11116_v20 }
 0x32b   :  { %11115 = vst [vmem:[#allocation42_spill] sm:$0xff] %v9466_v42  ;;  %v3223_v39 = vsub.s32 4, %v9160_v54  ;;  %vm3139_vm1 = vcmp.lt.s32.totalorder %v11116_v20, 0  ;;  %v3220_v38 = vmul.f32 %v3219_v19, %v3217_v49  ;;  %v3381_v61 = vsel %vm3377_vm12, %v3361_v47, %v9397_v45 }
 0x32c   :  { %vm9474_vm5 = vcmp.le.f32.partialorder %v11117_v58, 0.7853982  ;;  %v3383_v51 = vsel %vm3379_vm10, %v9399_v28, %v3382_v48  ;;  %v2909_v18 = vsel %vm2898_vm8, nan, %v2908_v56  ;;  %vm3005_vm4 = vcmp.lt.s32.totalorder %v9436_v43, 2 }
 0x32d   :  { %v3092_v26 = vshll.u32 %v3091_v29, 23  ;;  %vm4594_vm14 = vcmp.lt.s32.totalorder %v4593_v32, 0  ;;  %v3563_v10 = vmul.f32 %v11120_v9, %v9469_v23  ;;  %v3007_v19 = vxor.u32 2147483648, %v4911_v55 }
 0x32e   :  { %v3010_v34 = vxor.u32 2147483648, %v4909_v17  ;;  %v3100_v16 = vsub.s32 4, %v9215_v30  ;;  %vm3460_vm9 = vcmp.gt.s32.totalorder %v3459_v1, 0  ;;  %v11121_v45 = vand.u32 2147483647, %v11113_v0 }
 0x32f   :  { %v11122_v28 = vmov 0  ;;  %v3089_v60 = vor.u32 %v3088_v35, %v3087_v59  ;;  %v3224_v24 = vsel %vm3139_vm1, %v3223_v39, %v9160_v54  ;;  %v3384_v49 = vsel %vm3378_vm3, %v3381_v61, %v3383_v51 }
 0x330   :  { %vm9494_vm6 = vcmp.le.f32.partialorder %v11121_v45, 0.7853982  ;;  %v3403_v47 = vadd.s32 1, %v9447_v44  ;;  %v3221_v29 = vxor.u32 2147483648, %v3220_v38  ;;  %v3312_v48 = vsel %vm4594_vm14, 0, %v4593_v32 }
 0x331   :  { %v11123_v28 = vsel %vm9494_vm6, 4294967295, %v11122_v28  ;;  %vm3402_vm12 = vc.u32 %v9457_v50, %v9446_v62  ;;  %v9507_v56 = vstv %s9450_s26  ;;  %v3093_v46 = vor.u32 4788187, %v3092_v26 }
 0x332   :  { %11124 = vst [vmem:[#allocation21_spill] sm:$0xff] %v11123_v28  ;;  %v10811_v58 = vand.u32 2147483647, %v9352_v27  ;;  %v3461_v59 = vsel %vm3460_vm9, %v3459_v1, 0  ;;  %v9511_v35 = vadd.f32 %v9507_v56, %v3563_v10  ;;  %v9516_v54 = vsel %vm3016_vm15, %v3100_v16, %v9215_v30 }
 0x333   :  { %11125 = vst [vmem:[#allocation37_spill] sm:$0xff] %v9516_v54  ;;  %v3120_v33 = vmul.f32 %v9349_v25, %v2909_v18  ;;  %v3226_v32 = vsel %vm9474_vm5, 0, %v3224_v24  ;;  %v3400_v39 = vmul.u32 %v9433_v22, %v3384_v49  ;;  %v3008_v61 = vsel %vm3006_vm0, %v4909_v17, %v3007_v19  ;;  %v11126_v19 = vld [vmem:[#allocation16_spill] sm:$0xff] }
 0x334   :  { %v3011_v1 = vsel %vm3009_vm2, %v3010_v34, %v4911_v55  ;;  %v3317_v51 = vsub.s32 4294967266, %v3312_v48  ;;  %v3404_v26 = vsel %vm3402_vm12, %v3403_v47, %v9447_v44  ;;  %v3096_v9 = vcvt.s32.f32 %v3089_v60 }
 0x335   :  { %v3222_v30 = vsel %vm3139_vm1, %v3221_v29, %v3220_v38  ;;  %v3463_v10 = vand.u32 31, %v3461_v59  ;;  %v3575_v18 = vand.u32 2139095040, %v9511_v35  ;;  %v3094_v16 = vand.u32 2147483647, %v3093_v46 }
 0x336   :  { %v3230_v45 = vadd.s32 3, %v3226_v32  ;;  %v3327_v22 = vsub.s32 4, %v9330_v7  ;;  %v9533_v17 = vand.u32 8388607, %v10811_v58  ;;  %v9536_v55 = vadd.f32 %v3120_v33, %v11126_v19 }
 0x337   :  { %vm3243_vm10 = vcmp.lt.s32.totalorder %v8970_v5, 0  ;;  %v9539_v44 = vadd.s32 %v3404_v26, %v3400_v39  ;;  %v3576_v34 = vshrl.u32 %v3575_v18, 23  ;;  %v9544_v38 = vsel %vm9474_vm5, %v11116_v20, %v3222_v30  ;;  %v9572_v39 = vld [vmem:[%s10684_s3 + $0x8] sm:$0xff] }
 0x338   :  { %11127 = vst [vmem:[#allocation14_spill] sm:$0xff] %v9536_v55  ;;  %v3297_v60 = vadd.s32 %v9203_v2, %v9210_v15  ;;  %v3313_v24 = vsub.s32 32, %v3312_v48  ;;  %v3318_v49 = vadd.s32 127, %v3317_v51  ;;  %v9550_v47 = vsel %vm3005_vm4, %v3008_v61, %v3011_v1  ;;  %11128 = vst [vmem:[#allocation41_spill] sm:$0xff] %v9572_v39 }
 0x339   :  { %v9555_v46 = vsub.s32 32, %v3463_v10  ;;  %v4603_v33 = vadd.s32 4294967169, %v3576_v34  ;;  %v9557_v32 = vmul.f32 %v3096_v9, %v3094_v16  ;;  %v9559_v11 = vand.u32 3, %v3230_v45 }
 0x33a   :  { %v9564_v2 = vsel %vm3243_vm10, %v3327_v22, %v9330_v7  ;;  %4912 = vcosq.f32 %v9544_v38  ;;  %v3406_v43 = vadd.s32 536870912, %v9539_v44  ;;  %v3564_v61 = vmul.f32 %v9572_v39, %v9469_v23 }
 0x33b   :  { %v3582_v1 = vadd.s32 1, %v4603_v33  ;;  %v3314_v51 = vshll.u32 %v9378_v12, %v3312_v48  ;;  %v3315_v26 = vshrl.u32 %v3297_v60, %v3313_v24  ;;  %v3319_v7 = vshll.u32 %v3318_v49, 23 }
 0x33c   :  { %v3466_v9 = vshll.u32 %v10870_v57, %v3463_v10  ;;  %v3467_v30 = vshrl.u32 %v11000_v53, %v9555_v46  ;;  %v3469_v18 = vshll.u32 %v11000_v53, %v3463_v10  ;;  %v3470_v16 = vshrl.u32 %v11001_v40, %v9555_v46 }
 0x33d   :  { %vm3583_vm3 = vcmp.gt.s32.totalorder %v3582_v1, 0  ;;  %v3472_v45 = vshll.u32 %v11001_v40, %v3463_v10  ;;  %v3473_v22 = vshrl.u32 %v10863_v52, %v9555_v46  ;;  %v9587_v19 = vshrl.u32 %v3406_v43, 30 }
 0x33e   :  { %v3584_v48 = vsel %vm3583_vm3, %v3582_v1, 0  ;;  %v3475_v34 = vshll.u32 %v10863_v52, %v3463_v10  ;;  %v3476_v60 = vshrl.u32 %v10864_v8, %v9555_v46  ;;  %v9593_v24 = vadd.f32 %v9507_v56, %v3564_v61 }
 0x33f   :  { %v9595_v49 = vor.u32 %v3315_v26, %v3314_v51  ;;  %v9597_v33 = vor.u32 4788187, %v3319_v7  ;;  %v9599_v29 = vshrl.u32 %v3461_v59, 5  ;;  %v3586_v58 = vand.u32 31, %v3584_v48 }
 0x340   :  { %11129 = vst [vmem:[#allocation32_spill] sm:$0xff] %v9593_v24  ;;  %v9601_v15 = vor.u32 %v3467_v30, %v3466_v9  ;;  %v9603_v1 = vor.u32 %v3470_v16, %v3469_v18  ;;  %v3478_v43 = vshll.u32 %v10864_v8, %v3463_v10  ;;  %v3479_v12 = vshrl.u32 %v10865_v14, %v9555_v46 }
 0x341   :  { %v9608_v4 = vor.u32 %v3473_v22, %v3472_v45  ;;  %v11130_v61 = vand.u32 2147483647, %v9511_v35  ;;  %v3587_v26 = vsub.s32 32, %v3586_v58  ;;  %v3589_v7 = vshll.u32 %v10870_v57, %v3586_v58 }
 0x342   :  { %v3408_v59 = vshll.u32 %v9587_v19, 30  ;;  %v3477_v21 = vor.u32 %v3476_v60, %v3475_v34  ;;  %v3592_v9 = vshll.u32 %v11000_v53, %v3586_v58  ;;  %v3679_v30 = vand.u32 2139095040, %v9593_v24 }
 0x343   :  { %v3579_v51 = vand.u32 8388607, %v11130_v61  ;;  %v3585_v18 = vshrl.u32 %v3584_v48, 5  ;;  %v3590_v10 = vshrl.u32 %v11000_v53, %v3587_v26  ;;  %v3593_v16 = vshrl.u32 %v11001_v40, %v3587_v26 }
 0x344   :  { %v3595_v45 = vshll.u32 %v11001_v40, %v3586_v58  ;;  %v3480_v22 = vor.u32 %v3479_v12, %v3478_v43  ;;  %vm3481_vm8 = vcmp.lt.s32.totalorder %v9599_v29, 1  ;;  %vm3482_vm7 = vcmp.lt.s32.totalorder %v9599_v29, 2 }
 0x345   :  { %vm3483_vm11 = vcmp.lt.s32.totalorder %v9599_v29, 3  ;;  %vm3484_vm13 = vcmp.lt.s32.totalorder %v9599_v29, 4  ;;  %v3580_v34 = vor.u32 8388608, %v3579_v51  ;;  %v3591_v60 = vor.u32 %v3590_v10, %v3589_v7 }
 0x346   :  { %v3596_v61 = vshrl.u32 %v10863_v52, %v3587_v26  ;;  %v3594_v48 = vor.u32 %v3593_v16, %v3592_v9  ;;  %v3598_v31 = vshll.u32 %v10863_v52, %v3586_v58  ;;  %v3599_v54 = vshrl.u32 %v10864_v8, %v3587_v26 }
 0x347   :  { %v3601_v41 = vshll.u32 %v10864_v8, %v3586_v58  ;;  %v9627_v12 = vpop.eup %4912  ;;  %v3602_v6 = vshrl.u32 %v10865_v14, %v3587_v26  ;;  %vm3604_vm0 = vcmp.lt.s32.totalorder %v3585_v18, 1  ;;  %v3680_v13 = vshrl.u32 %v3679_v30, 23 }
 0x348   :  { %v3597_v43 = vor.u32 %v3596_v61, %v3595_v45  ;;  %v3490_v51 = vsel %vm3484_vm13, %v3477_v21, 920167782  ;;  %v3588_v7 = vshrl.u32 %v10870_v57, %v3587_v26  ;;  %v3600_v10 = vor.u32 %v3599_v54, %v3598_v31 }
 0x349   :  { %vm3607_vm2 = vcmp.lt.s32.totalorder %v3585_v18, 4  ;;  %v3489_v9 = vsel %vm3481_vm8, %v9601_v15, %v9603_v1  ;;  %v3603_v58 = vor.u32 %v3602_v6, %v3601_v41  ;;  %vm3606_vm5 = vcmp.lt.s32.totalorder %v3585_v18, 3 }
 0x34a   :  { %v3609_v16 = vsel %vm3607_vm2, %v3597_v43, 2102212464  ;;  %vm3605_vm1 = vcmp.lt.s32.totalorder %v3585_v18, 2  ;;  %v3612_v45 = vsel %vm3604_vm0, %v3591_v60, %v3594_v48  ;;  %v3616_v30 = vsel %vm3604_vm0, %v3594_v48, %v3597_v43 }
 0x34b   :  { %v3620_v61 = vshll.u32 %v3580_v34, 8  ;;  %v11131_v27 = vand.u32 2147483647, %v8970_v5  ;;  %v3491_v31 = vsel %vm3483_vm11, %v9608_v4, %v3490_v51  ;;  %v3613_v54 = vsel %vm3607_vm2, %v3600_v10, 920167782 }
 0x34c   :  { %v3617_v6 = vsel %vm3607_vm2, %v3603_v58, 1326507024  ;;  %v4607_v41 = vadd.s32 4294967169, %v3680_v13  ;;  %v3608_v25 = vsel %vm3604_vm0, %v3588_v7, %v3591_v60  ;;  %v3610_v28 = vsel %vm3606_vm5, %v3594_v48, %v3609_v16 }
 0x34d   :  { %vm9641_vm4 = vcmp.le.f32.partialorder %v11131_v27, 0.7853982  ;;  %v3614_v55 = vsel %vm3606_vm5, %v3597_v43, %v3613_v54  ;;  %v3618_v42 = vsel %vm3606_vm5, %v3600_v10, %v3617_v6  ;;  %v9650_v34 = vsub.s32 %v9539_v44, %v3408_v59 }
 0x34e   :  { %v3494_v27 = vsel %vm3484_vm13, %v3480_v22, 1326507024  ;;  %v3615_v39 = vsel %vm3605_vm1, %v3612_v45, %v3614_v55  ;;  %v3619_v36 = vsel %vm3605_vm1, %v3616_v30, %v3618_v42  ;;  %v3492_v51 = vsel %vm3482_vm7, %v3489_v9, %v3491_v31  ;;  %v9702_v9 = vld [vmem:[%s10684_s3 + $0x10] sm:$0xff] }
 0x34f   :  { %v11134_v13 = vor.u32 8388608, %v9533_v17  ;;  %v9662_v60 = vmul.u32.u64.low %v3620_v61, %v3619_v36  ;;  %v9663_v48 = vmul.u32.u64.high %v3620_v61, %v3619_v36, %v9662_v60  ;;  %v3611_v44 = vsel %vm3605_vm1, %v3608_v25, %v3610_v28  ;;  %11135 = vst [vmem:[#allocation26_spill] sm:$0xff] %v9702_v9 }
 0x350   :  { %v9666_v59 = vmul.u32.u64.low %v3620_v61, %v3615_v39  ;;  %v9667_v43 = vmul.u32.u64.high %v3620_v61, %v3615_v39, %v9666_v59  ;;  %v3686_v22 = vadd.s32 1, %v4607_v41  ;;  %v3323_v55 = vcvt.s32.f32 %v9595_v49 }
 0x351   :  { %v9660_v58 = vshll.u32 %v11134_v13, 8  ;;  %v3465_v42 = vshrl.u32 %v10870_v57, %v9555_v46  ;;  %v3493_v17 = vsel %vm3481_vm8, %v9603_v1, %v9608_v4  ;;  %v3495_v36 = vsel %vm3483_vm11, %v3477_v21, %v3494_v27 }
 0x352   :  { %v3321_v25 = vand.u32 2147483647, %v9597_v33  ;;  %v3411_v28 = vsub.s32 0, %v9650_v34  ;;  %v3486_v39 = vsel %vm3484_vm13, %v9608_v4, 2102212464  ;;  %vm3687_vm14 = vcmp.gt.s32.totalorder %v3686_v22, 0 }
 0x353   :  { %v9685_v49 = vmul.u32.u64.low %v9660_v58, %v3492_v51  ;;  %v9686_v46 = vmul.u32.u64.high %v9660_v58, %v3492_v51, %v9685_v49  ;;  %v3627_v18 = vmul.u32 %v3620_v61, %v3611_v44  ;;  %vm3629_vm9 = vc.u32 %v9663_v48, %v9666_v59 }
 0x354   :  { %v3496_v21 = vsel %vm3482_vm7, %v3493_v17, %v3495_v36  ;;  %v3630_v33 = vadd.s32 1, %v9667_v43  ;;  %v10824_v7 = vand.u32 2147483647, %v9593_v24  ;;  %v3688_v10 = vsel %vm3687_vm14, %v3686_v22, 0 }
 0x355   :  { %4914 = vsinq.f32 %v9544_v38  ;;  %v3565_v16 = vmul.f32 %v9702_v9, %v9469_v23  ;;  %v3690_v45 = vand.u32 31, %v3688_v10  ;;  %v9707_v30 = vmin.u32 %v3411_v28, %v9650_v34 }
 0x356   :  { %v3485_v38 = vsel %vm3481_vm8, %v3465_v42, %v9601_v15  ;;  %v3487_v61 = vsel %vm3483_vm11, %v9603_v1, %v3486_v39  ;;  %v3631_v31 = vsel %vm3629_vm9, %v3630_v33, %v9667_v43  ;;  %v9720_v51 = vmul.f32 %v3323_v55, %v3321_v25 }
 0x357   :  { %v9717_v54 = vmul.u32.u64.low %v9660_v58, %v3496_v21  ;;  %v9718_v6 = vmul.u32.u64.high %v9660_v58, %v3496_v21, %v9717_v54  ;;  %v3632_v41 = vadd.s32 %v3631_v31, %v3627_v18  ;;  %v3691_v27 = vsub.s32 32, %v3690_v45 }
 0x358   :  { %v3683_v13 = vand.u32 8388607, %v10824_v7  ;;  %v3693_v60 = vshll.u32 %v10870_v57, %v3690_v45  ;;  %v3696_v15 = vshll.u32 %v11000_v53, %v3690_v45  ;;  %v9728_v1 = vsel %vm3482_vm7, %v3485_v38, %v3487_v61 }
 0x359   :  { %v9731_v44 = vadd.f32 %v9507_v56, %v3565_v16  ;;  %v3633_v43 = vadd.s32 536870912, %v3632_v41  ;;  %v3694_v22 = vshrl.u32 %v11000_v53, %v3691_v27  ;;  %v3689_v42 = vshrl.u32 %v3688_v10, 5 }
 0x35a   :  { %v3697_v55 = vshrl.u32 %v11001_v40, %v3691_v27  ;;  %v3699_v17 = vshll.u32 %v11001_v40, %v3690_v45  ;;  %v3700_v36 = vshrl.u32 %v10863_v52, %v3691_v27  ;;  %v3413_v25 = vclz %v9707_v30 }
 0x35b   :  { %v3507_v28 = vadd.s32 1, %v9686_v46  ;;  %v9739_v29 = vshrl.u32 %v3633_v43, 30  ;;  %v3702_v39 = vshll.u32 %v10863_v52, %v3690_v45  ;;  %v3684_v18 = vor.u32 8388608, %v3683_v13 }
 0x35c   :  { %v3695_v21 = vor.u32 %v3694_v22, %v3693_v60  ;;  %v3698_v33 = vor.u32 %v3697_v55, %v3696_v15  ;;  %v3703_v16 = vshrl.u32 %v10864_v8, %v3691_v27  ;;  %v3705_v38 = vshll.u32 %v10864_v8, %v3690_v45 }
 0x35d   :  { %v3635_v10 = vshll.u32 %v9739_v29, 30  ;;  %v3706_v61 = vshrl.u32 %v10865_v14, %v3691_v27  ;;  %v3783_v31 = vand.u32 2139095040, %v9731_v44  ;;  %v3692_v30 = vshrl.u32 %v10870_v57, %v3691_v27 }
 0x35e   :  { %v3701_v54 = vor.u32 %v3700_v36, %v3699_v17  ;;  %v3704_v43 = vor.u32 %v3703_v16, %v3702_v39  ;;  %vm3708_vm12 = vcmp.lt.s32.totalorder %v3689_v42, 1  ;;  %vm3710_vm3 = vcmp.lt.s32.totalorder %v3689_v42, 3 }
 0x35f   :  { %v9748_v7 = vsub.s32 %v3632_v41, %v3635_v10  ;;  %v3707_v13 = vor.u32 %v3706_v61, %v3705_v38  ;;  %vm3711_vm8 = vcmp.lt.s32.totalorder %v3689_v42, 4  ;;  %vm3709_vm7 = vcmp.lt.s32.totalorder %v3689_v42, 2 }
 0x360   :  { %v3713_v60 = vsel %vm3711_vm8, %v3701_v54, 2102212464  ;;  %v3716_v15 = vsel %vm3708_vm12, %v3695_v21, %v3698_v33  ;;  %v3724_v22 = vshll.u32 %v3684_v18, 8  ;;  %vm3506_vm11 = vc.u32 %v9718_v6, %v9685_v49 }
 0x361   :  { %v3638_v45 = vsub.s32 0, %v9748_v7  ;;  %v3717_v55 = vsel %vm3711_vm8, %v3704_v43, 920167782  ;;  %v3784_v27 = vshrl.u32 %v3783_v31, 23  ;;  %v3712_v36 = vsel %vm3708_vm12, %v3692_v30, %v3695_v21  ;;  %v9776_v30 = vld [vmem:[%s10684_s3 + $0x18] sm:$0xff] }
 0x362   :  { %v4915_v17 = vpop.eup %4914  ;;  %v3718_v41 = vsel %vm3710_vm3, %v3701_v54, %v3717_v55  ;;  %v3720_v39 = vsel %vm3708_vm12, %v3698_v33, %v3701_v54  ;;  %v3721_v16 = vsel %vm3711_vm8, %v3707_v13, 1326507024  ;;  %v3714_v38 = vsel %vm3710_vm3, %v3698_v33, %v3713_v60  ;;  %11136 = vst [vmem:[#allocation29_spill] sm:$0xff] %v9776_v30 }
 0x363   :  { %v4604_v10 = vmin.u32 %v3638_v45, %v9748_v7  ;;  %v3719_v18 = vsel %vm3709_vm7, %v3716_v15, %v3718_v41  ;;  %v3722_v61 = vsel %vm3710_vm3, %v3704_v43, %v3721_v16  ;;  %v3325_v4 = vxor.u32 2147483648, %v9720_v51 }
 0x364   :  { %v3723_v31 = vsel %vm3709_vm7, %v3720_v39, %v3722_v61  ;;  %v9763_v9 = vmul.u32.u64.low %v3724_v22, %v3719_v18  ;;  %v9764_v24 = vmul.u32.u64.high %v3724_v22, %v3719_v18, %v9763_v9  ;;  %v3504_v21 = vmul.u32 %v9660_v58, %v9728_v1 }
 0x365   :  { %v3508_v33 = vsel %vm3506_vm11, %v3507_v28, %v9686_v46  ;;  %v3566_v54 = vmul.f32 %v9776_v30, %v9469_v23  ;;  %v3640_v43 = vclz %v4604_v10  ;;  %v3715_v13 = vsel %vm3709_vm7, %v3712_v36, %v3714_v38 }
 0x366   :  { %v9781_v60 = vmul.u32.u64.low %v3724_v22, %v3723_v31  ;;  %v9782_v15 = vmul.u32.u64.high %v3724_v22, %v3723_v31, %v9781_v60  ;;  %v4611_v58 = vadd.s32 4294967169, %v3784_v27  ;;  %vm3236_vm13 = vcmp.eq.s32.totalorder %v9559_v11, 2 }
 0x367   :  { %v11137_v46 = vsel %vm9641_vm4, 0, %v9564_v2  ;;  %v4597_v28 = vadd.s32 4294967294, %v3413_v25  ;;  %v4605_v45 = vadd.s32 4294967294, %v3640_v43  ;;  %v3234_v55 = vxor.u32 2147483648, %v4915_v17 }
 0x368   :  { %v3334_v1 = vadd.s32 3, %v11137_v46  ;;  %v3237_v41 = vxor.u32 2147483648, %v9627_v12  ;;  %v3734_v23 = vadd.s32 1, %v9764_v24  ;;  %v3790_v42 = vadd.s32 1, %v4611_v58 }
 0x369   :  { %v3326_v36 = vsel %vm3243_vm10, %v3325_v4, %v9720_v51  ;;  %v9794_v27 = vadd.s32 %v3508_v33, %v3504_v21  ;;  %vm4606_vm0 = vcmp.lt.s32.totalorder %v4605_v45, 0  ;;  %v3731_v39 = vmul.u32 %v3724_v22, %v3715_v13 }
 0x36a   :  { %vm3233_vm2 = vcmp.eq.s32.totalorder %v9559_v11, 0  ;;  %v9799_v2 = vadd.f32 %v9507_v56, %v3566_v54  ;;  %vm3733_vm5 = vc.u32 %v9782_v15, %v9763_v9  ;;  %v9803_v25 = vand.u32 3, %v3334_v1 }
 0x36b   :  { %v3401_v10 = vadd.s32 %v9446_v62, %v9457_v50  ;;  %vm4598_vm10 = vcmp.lt.s32.totalorder %v4597_v28, 0  ;;  %v3643_v4 = vsel %vm4606_vm0, 0, %v4605_v45  ;;  %v9809_v51 = vsel %vm3236_vm13, %v3237_v41, %v4915_v17 }
 0x36c   :  { %11138 = vst [vmem:[#allocation34_spill] sm:$0xff] %v9799_v2  ;;  %v3329_v22 = vsel %vm9641_vm4, %v8970_v5, %v3326_v36  ;;  %v3735_v56 = vsel %vm3733_vm5, %v3734_v23, %v9764_v24  ;;  %vm3791_vm1 = vcmp.gt.s32.totalorder %v3790_v42, 0  ;;  %v9816_v38 = vsel %vm3233_vm2, %v9627_v12, %v3234_v55 }
 0x36d   :  { %v3510_v18 = vadd.s32 536870912, %v9794_v27  ;;  %v3736_v61 = vadd.s32 %v3735_v56, %v3731_v39  ;;  %v10828_v62 = vand.u32 2147483647, %v9731_v44  ;;  %v9820_v50 = vsel %vm4598_vm10, 0, %v4597_v28 }
 0x36e   :  { %v3648_v31 = vsub.s32 4294967266, %v3643_v4  ;;  %v3792_v17 = vsel %vm3791_vm1, %v3790_v42, 0  ;;  %v3887_v21 = vand.u32 2139095040, %v9799_v2  ;;  %4916 = vcosq.f32 %v3329_v22 }
 0x36f   :  { %v3628_v26 = vadd.s32 %v9666_v59, %v9663_v48  ;;  %v3644_v24 = vsub.s32 32, %v3643_v4  ;;  %v3737_v33 = vadd.s32 536870912, %v3736_v61  ;;  %4918 = vsinq.f32 %v3329_v22 }
 0x370   :  { %v3417_v12 = vsub.s32 32, %v9820_v50  ;;  %v3794_v43 = vand.u32 31, %v3792_v17  ;;  %v3421_v13 = vsub.s32 4294967266, %v9820_v50  ;;  %v9828_v60 = vshrl.u32 %v3510_v18, 30 }
 0x371   :  { %v9830_v58 = vshrl.u32 %v3737_v33, 30  ;;  %v3787_v46 = vand.u32 8388607, %v10828_v62  ;;  %v3645_v1 = vshll.u32 %v9748_v7, %v3643_v4  ;;  %v3649_v48 = vadd.s32 127, %v3648_v31 }
 0x372   :  { %11139 = vst [vmem:[#allocation33_spill] sm:$0xff] %v9828_v60  ;;  %v3795_v59 = vsub.s32 32, %v3794_v43  ;;  %v3888_v28 = vshrl.u32 %v3887_v21, 23  ;;  %v3646_v45 = vshrl.u32 %v3628_v26, %v3644_v24  ;;  %v9836_v41 = vshrl.u32 %v3792_v17, 5 }
 0x373   :  { %v3739_v55 = vshll.u32 %v9830_v58, 30  ;;  %v3797_v23 = vshll.u32 %v10870_v57, %v3794_v43  ;;  %v3800_v36 = vshll.u32 %v11000_v53, %v3794_v43  ;;  %v3803_v22 = vshll.u32 %v11001_v40, %v3794_v43 }
 0x374   :  { %v3798_v42 = vshrl.u32 %v11000_v53, %v3795_v59  ;;  %v3801_v39 = vshrl.u32 %v11001_v40, %v3795_v59  ;;  %v3804_v7 = vshrl.u32 %v10863_v52, %v3795_v59  ;;  %v3806_v4 = vshll.u32 %v10863_v52, %v3794_v43 }
 0x375   :  { %v9843_v56 = vsub.s32 %v3736_v61, %v3739_v55  ;;  %v3807_v18 = vshrl.u32 %v10864_v8, %v3795_v59  ;;  %vm3232_vm4 = vcmp.lt.s32.totalorder %v9559_v11, 2  ;;  %v3418_v31 = vshll.u32 %v9650_v34, %v9820_v50 }
 0x376   :  { %v3422_v17 = vadd.s32 127, %v3421_v13  ;;  %v3512_v21 = vshll.u32 %v9828_v60, 30  ;;  %v3650_v26 = vshll.u32 %v3649_v48, 23  ;;  %v3647_v24 = vor.u32 %v3646_v45, %v3645_v1 }
 0x377   :  { %v3742_v33 = vsub.s32 0, %v9843_v56  ;;  %v3788_v61 = vor.u32 8388608, %v3787_v46  ;;  %v4615_v55 = vadd.s32 4294967169, %v3888_v28  ;;  %vm3347_vm14 = vcmp.lt.s32.totalorder %v9169_v63, 0 }
 0x378   :  { %v3799_v62 = vor.u32 %v3798_v42, %v3797_v23  ;;  %v3802_v16 = vor.u32 %v3801_v39, %v3800_v36  ;;  %v3809_v54 = vshll.u32 %v10864_v8, %v3794_v43  ;;  %v3810_v30 = vshrl.u32 %v10865_v14, %v3795_v59 }
 0x379   :  { %vm3229_vm9 = vweird.f32 %v11116_v20  ;;  %v4608_v34 = vmin.u32 %v3742_v33, %v9843_v56  ;;  %v3805_v50 = vor.u32 %v3804_v7, %v3803_v22  ;;  %v3808_v13 = vor.u32 %v3807_v18, %v3806_v4 }
 0x37a   :  { %vm3812_vm12 = vcmp.lt.s32.totalorder %v9836_v41, 1  ;;  %v3419_v1 = vshrl.u32 %v3401_v10, %v3417_v12  ;;  %v3651_v48 = vor.u32 4788187, %v3650_v26  ;;  %v3811_v46 = vor.u32 %v3810_v30, %v3809_v54 }
 0x37b   :  { %vm3815_vm3 = vcmp.lt.s32.totalorder %v9836_v41, 4  ;;  %v11140_v28 = vand.u32 2147483647, %v9169_v63  ;;  %v3423_v45 = vshll.u32 %v3422_v17, 23  ;;  %v9869_v23 = vsub.s32 %v9794_v27, %v3512_v21  ;;  %v9872_v10 = vpop.eup %4916 }
 0x37c   :  { %v3744_v42 = vclz %v4608_v34  ;;  %vm3814_vm7 = vcmp.lt.s32.totalorder %v9836_v41, 3  ;;  %vm3813_vm11 = vcmp.lt.s32.totalorder %v9836_v41, 2  ;;  %v3820_v30 = vsel %vm3812_vm12, %v3799_v62, %v3802_v16  ;;  %v4919_v36 = vpop.eup %4918 }
 0x37d   :  { %vm9864_vm8 = vcmp.le.f32.partialorder %v11140_v28, 0.7853982  ;;  %v9877_v12 = vshll.u32 %v3788_v61, 8  ;;  %v3894_v54 = vadd.s32 1, %v4615_v55  ;;  %v3654_v39 = vcvt.s32.f32 %v3647_v24 }
 0x37e   :  { %v4609_v22 = vadd.s32 4294967294, %v3744_v42  ;;  %v3821_v27 = vsel %vm3815_vm3, %v3808_v13, 920167782  ;;  %v3824_v7 = vsel %vm3812_vm12, %v3802_v16, %v3805_v50  ;;  %v3652_v4 = vand.u32 2147483647, %v3651_v48 }
 0x37f   :  { %v3796_v18 = vshrl.u32 %v10870_v57, %v3795_v59  ;;  %v3822_v17 = vsel %vm3814_vm7, %v3805_v50, %v3821_v27  ;;  %v3825_v21 = vsel %vm3815_vm3, %v3811_v46, 1326507024  ;;  %vm3337_vm13 = vcmp.eq.s32.totalorder %v9803_v25, 0 }
 0x380   :  { %vm4610_vm0 = vcmp.lt.s32.totalorder %v4609_v22, 0  ;;  %v3817_v26 = vsel %vm3815_vm3, %v3805_v50, 2102212464  ;;  %v3823_v24 = vsel %vm3813_vm11, %v3820_v30, %v3822_v17  ;;  %v3826_v33 = vsel %vm3814_vm7, %v3808_v13, %v3825_v21 }
 0x381   :  { %v9895_v59 = vsel %vm4610_vm0, 0, %v4609_v22  ;;  %v3827_v61 = vsel %vm3813_vm11, %v3824_v7, %v3826_v33  ;;  %v9900_v55 = vmul.u32.u64.low %v9877_v12, %v3823_v24  ;;  %v9901_v34 = vmul.u32.u64.high %v9877_v12, %v3823_v24, %v9900_v55 }
 0x382   :  { %vm3002_vm2 = vweird.f32 %v11101_v3  ;;  %v3239_v50 = vsel %vm3232_vm4, %v9816_v38, %v9809_v51  ;;  %v3420_v48 = vor.u32 %v3419_v1, %v3418_v31  ;;  %v3424_v46 = vor.u32 4788187, %v3423_v45 }
 0x383   :  { %v11143_v13 = vsub.s32 4, %v9587_v19  ;;  %vm3340_vm5 = vcmp.eq.s32.totalorder %v9803_v25, 2  ;;  %v3655_v42 = vmul.f32 %v3654_v39, %v3652_v4  ;;  %v9920_v27 = vstv %s9860_s6 }
 0x384   :  { %v9916_v30 = vmul.u32.u64.low %v9877_v12, %v3827_v61  ;;  %v9917_v22 = vmul.u32.u64.high %v9877_v12, %v3827_v61, %v9916_v30  ;;  %11144 = vst [vmem:[#allocation16_spill] sm:$0xff] %v9920_v27  ;;  %v3752_v11 = vsub.s32 4294967266, %v9895_v59  ;;  %v3816_v51 = vsel %vm3812_vm12, %v3796_v18, %v3799_v62 }
 0x385   :  { %v3432_v28 = vsel %vm3347_vm14, %v11143_v13, %v9587_v19  ;;  %v3818_v38 = vsel %vm3814_vm7, %v3802_v16, %v3817_v26  ;;  %v3240_v19 = vsel %vm3229_vm9, nan, %v3239_v50  ;;  %v3515_v1 = vsub.s32 0, %v9869_v23 }
 0x386   :  { %v3434_v31 = vsel %vm9864_vm8, 0, %v3432_v28  ;;  %vm3895_vm10 = vcmp.gt.s32.totalorder %v3894_v54, 0  ;;  %vm3333_vm1 = vweird.f32 %v8970_v5  ;;  %v3341_v45 = vxor.u32 2147483648, %v9872_v10 }
 0x387   :  { %v3425_v39 = vand.u32 2147483647, %v3424_v46  ;;  %v3427_v62 = vcvt.s32.f32 %v3420_v48  ;;  %vm3574_vm4 = vcmp.lt.s32.totalorder %v9511_v35, 0  ;;  %v3338_v16 = vxor.u32 2147483648, %v4919_v36 }
 0x388   :  { %v3656_v7 = vxor.u32 2147483648, %v3655_v42  ;;  %v3732_v20 = vadd.s32 %v9763_v9, %v9782_v15  ;;  %v3819_v4 = vsel %vm3813_vm11, %v3816_v51, %v3818_v38  ;;  %v3748_v18 = vsub.s32 32, %v9895_v59 }
 0x389   :  { %v3753_v17 = vadd.s32 127, %v3752_v11  ;;  %v3838_v21 = vadd.s32 1, %v9901_v34  ;;  %v3896_v26 = vsel %vm3895_vm10, %v3894_v54, 0  ;;  %vm3336_vm9 = vcmp.lt.s32.totalorder %v9803_v25, 2  ;;  %v4979_v25 = vld [vmem:[%s10684_s3] sm:$0xff]  ;;  %s10141_s3 = sld [smem:[#allocation6 + $0x8]] }
 0x38a   :  { %v3438_v24 = vadd.s32 3, %v3434_v31  ;;  %v4600_v33 = vmin.u32 %v3515_v1, %v9869_v23  ;;  %vm3837_vm12 = vc.u32 %v9917_v22, %v9900_v55  ;;  %v3342_v9 = vsel %vm3340_vm5, %v3341_v45, %v4919_v36 }
 0x38b   :  { %v3428_v15 = vmul.f32 %v3427_v62, %v3425_v39  ;;  %v3554_v41 = vmul.f32 %v9920_v27, %v3240_v19  ;;  %v11145_v61 = vand.u32 2147483647, %v9511_v35  ;;  %v3339_v54 = vsel %vm3337_vm13, %v9872_v10, %v3338_v16 }
 0x38c   :  { %v3657_v48 = vsel %vm3574_vm4, %v3656_v7, %v3655_v42  ;;  %v3835_v46 = vmul.u32 %v9877_v12, %v3819_v4  ;;  %v3898_v13 = vand.u32 31, %v3896_v26  ;;  %v3749_v36 = vshll.u32 %v9843_v56, %v9895_v59 }
 0x38d   :  { %vm9954_vm3 = vcmp.le.f32.partialorder %v11145_v61, 0.7853982  ;;  %v3750_v28 = vshrl.u32 %v3732_v20, %v3748_v18  ;;  %v3754_v30 = vshll.u32 %v3753_v17, 23  ;;  %v3839_v11 = vsel %vm3837_vm12, %v3838_v21, %v9901_v34 }
 0x38e   :  { %v9970_v51 = vsel %vm3002_vm2, nan, %v9550_v47  ;;  %v11148_v10 = vxor.u32 2147483648, %v9557_v32  ;;  %v3517_v42 = vclz %v4600_v33  ;;  %v9980_v38 = vstv %s9927_s7 }
 0x38f   :  { %v3343_v56 = vsel %vm3336_vm9, %v3339_v54, %v3342_v9  ;;  %v3429_v59 = vxor.u32 2147483648, %v3428_v15  ;;  %v3658_v34 = vsub.s32 4, %v9739_v29  ;;  %v3660_v3 = vsel %vm9954_vm3, %v9511_v35, %v3657_v48 }
 0x390   :  { %v9977_v12 = vsel %vm3016_vm15, %v11148_v10, %v9557_v32  ;;  %v9988_v47 = vand.u32 3, %v3438_v24  ;;  %v9991_v19 = vadd.f32 %v3554_v41, %v9293_v37  ;;  %v9993_v32 = vadd.s32 %v3839_v11, %v3835_v46 }
 0x391   :  { %v9995_v31 = vsub.s32 32, %v3898_v13  ;;  %v3751_v1 = vor.u32 %v3750_v28, %v3749_v36  ;;  %v3755_v45 = vor.u32 4788187, %v3754_v30  ;;  %v3998_v39 = vmul.f32 %v4979_v25, %v9980_v38  ;;  %v11149_v36 = vld [vmem:[#allocation32_spill] sm:$0xff] }
 0x392   :  { %v10002_v62 = vstv %s9941_s8  ;;  %v3344_v16 = vsel %vm3333_vm1, nan, %v3343_v56  ;;  %v10008_v37 = vadd.s32 %v9685_v49, %v9718_v6  ;;  %v4601_v7 = vadd.s32 4294967294, %v3517_v42 }
 0x393   :  { %4920 = vcosq.f32 %v3660_v3  ;;  %v3430_v20 = vsel %vm3347_vm14, %v3429_v59, %v3428_v15  ;;  %v3659_v4 = vsel %vm3574_vm4, %v3658_v34, %v9739_v29  ;;  %v10830_v18 = vand.u32 2147483647, %v9799_v2 }
 0x394   :  { %4922 = vsinq.f32 %v3660_v3  ;;  %v3841_v17 = vadd.s32 536870912, %v9993_v32  ;;  %v10017_v5 = vshrl.u32 %v3896_v26, 5  ;;  %v3910_v21 = vshll.u32 %v10863_v52, %v3898_v13 }
 0x395   :  { %v3911_v49 = vshrl.u32 %v10864_v8, %v9995_v31  ;;  %v3756_v6 = vand.u32 2147483647, %v3755_v45  ;;  %v3758_v24 = vcvt.s32.f32 %v3751_v1  ;;  %v3913_v33 = vshll.u32 %v10864_v8, %v3898_v13 }
 0x396   :  { %v3914_v9 = vshrl.u32 %v10865_v14, %v9995_v31  ;;  %vm4602_vm15 = vcmp.lt.s32.totalorder %v4601_v7, 0  ;;  %v3661_v29 = vsel %vm9954_vm3, 0, %v3659_v4  ;;  %v3901_v15 = vshll.u32 %v10870_v57, %v3898_v13 }
 0x397   :  { %v3904_v26 = vshll.u32 %v11000_v53, %v3898_v13  ;;  %v3902_v41 = vshrl.u32 %v11000_v53, %v9995_v31  ;;  %v3905_v61 = vshrl.u32 %v11001_v40, %v9995_v31  ;;  %v3907_v54 = vshll.u32 %v11001_v40, %v3898_v13 }
 0x398   :  { %v3908_v48 = vshrl.u32 %v10863_v52, %v9995_v31  ;;  %v3555_v46 = vmul.f32 %v9920_v27, %v3344_v16  ;;  %vm3678_vm14 = vcmp.lt.s32.totalorder %v11149_v36, 0  ;;  %v10038_v50 = vshrl.u32 %v3841_v17, 30 }
 0x399   :  { %v3912_v28 = vor.u32 %v3911_v49, %v3910_v21  ;;  %v11150_v30 = vand.u32 2147483647, %v11149_v36  ;;  %v3759_v10 = vmul.f32 %v3758_v24, %v3756_v6  ;;  %v3891_v13 = vand.u32 8388607, %v10830_v18  ;;  %v11153_v49 = vld [vmem:[#allocation13_spill] sm:$0xff] }
 0x39a   :  { %v3915_v42 = vor.u32 %v3914_v9, %v3913_v33  ;;  %vm3919_vm11 = vcmp.lt.s32.totalorder %v10017_v5, 4  ;;  %v3433_v56 = vsel %vm9864_vm8, %v9169_v63, %v3430_v20  ;;  %v3520_v59 = vsel %vm4602_vm15, 0, %v4601_v7 }
 0x39b   :  { %vm10042_vm7 = vcmp.le.f32.partialorder %v11150_v30, 0.7853982  ;;  %v3665_v34 = vadd.s32 3, %v3661_v29  ;;  %v10054_v3 = vadd.f32 %v10002_v62, %v3998_v39  ;;  %v3521_v1 = vsub.s32 32, %v3520_v59 }
 0x39c   :  { %v3903_v45 = vor.u32 %v3902_v41, %v3901_v15  ;;  %v3906_v25 = vor.u32 %v3905_v61, %v3904_v26  ;;  %v3909_v16 = vor.u32 %v3908_v48, %v3907_v54  ;;  %v3843_v4 = vshll.u32 %v10038_v50, 30 }
 0x39d   :  { %vm3916_vm13 = vcmp.lt.s32.totalorder %v10017_v5, 1  ;;  %vm3918_vm0 = vcmp.lt.s32.totalorder %v10017_v5, 3  ;;  %v3925_v43 = vsel %vm3919_vm11, %v3912_v28, 920167782  ;;  %v3760_v20 = vxor.u32 2147483648, %v3759_v10 }
 0x39e   :  { %v3892_v17 = vor.u32 8388608, %v3891_v13  ;;  %v3929_v7 = vsel %vm3919_vm11, %v3915_v42, 1326507024  ;;  %v4010_v39 = vand.u32 2139095040, %v10054_v3  ;;  %4924 = vcosq.f32 %v3433_v56 }
 0x39f   :  { %v3522_v21 = vshll.u32 %v9869_v23, %v3520_v59  ;;  %v10066_v6 = vadd.f32 %v3555_v46, %v11153_v49  ;;  %v3666_v24 = vand.u32 3, %v3665_v34  ;;  %vm3917_vm8 = vcmp.lt.s32.totalorder %v10017_v5, 2 }
 0x3a0   :  { %v4921_v33 = vpop.eup %4920  ;;  %v3924_v9 = vsel %vm3916_vm13, %v3903_v45, %v3906_v25  ;;  %v3926_v29 = vsel %vm3918_vm0, %v3909_v16, %v3925_v43  ;;  %v4011_v15 = vshrl.u32 %v4010_v39, 23  ;;  %v3525_v41 = vsub.s32 4294967266, %v3520_v59 }
 0x3a1   :  { %v4923_v26 = vpop.eup %4922  ;;  %v10074_v61 = vsub.s32 %v9993_v32, %v3843_v4  ;;  %v3928_v23 = vsel %vm3916_vm13, %v3906_v25, %v3909_v16  ;;  %v3930_v54 = vsel %vm3918_vm0, %v3912_v28, %v3929_v7  ;;  %v3523_v48 = vshrl.u32 %v10008_v37, %v3521_v1 }
 0x3a2   :  { %v3761_v46 = vsel %vm3678_vm14, %v3760_v20, %v3759_v10  ;;  %v10083_v30 = vshll.u32 %v3892_v17, 8  ;;  %v4619_v13 = vadd.s32 4294967169, %v4011_v15  ;;  %vm3668_vm2 = vcmp.eq.s32.totalorder %v3666_v24, 0 }
 0x3a3   :  { %vm3671_vm5 = vcmp.eq.s32.totalorder %v3666_v24, 2  ;;  %v3762_v42 = vsub.s32 4, %v9830_v58  ;;  %v3927_v32 = vsel %vm3917_vm8, %v3924_v9, %v3926_v29  ;;  %v3672_v59 = vxor.u32 2147483648, %v4921_v33 }
 0x3a4   :  { %v3900_v34 = vshrl.u32 %v10870_v57, %v9995_v31  ;;  %v3931_v37 = vsel %vm3917_vm8, %v3928_v23, %v3930_v54  ;;  %v4017_v28 = vadd.s32 1, %v4619_v13  ;;  %v3669_v1 = vxor.u32 2147483648, %v4923_v26  ;;  %v11154_v31 = vld [vmem:[#allocation41_spill] sm:$0xff] }
 0x3a5   :  { %v3764_v10 = vsel %vm10042_vm7, %v11149_v36, %v3761_v46  ;;  %v3846_v4 = vsub.s32 0, %v10074_v61  ;;  %v3921_v43 = vsel %vm3919_vm11, %v3909_v16, 2102212464  ;;  %v3999_v7 = vmul.f32 %v11154_v31, %v9980_v38 }
 0x3a6   :  { %v10099_v20 = vmul.u32.u64.low %v10083_v30, %v3927_v32  ;;  %v10100_v17 = vmul.u32.u64.high %v10083_v30, %v3927_v32, %v10099_v20  ;;  %vm4018_vm10 = vcmp.gt.s32.totalorder %v4017_v28, 0  ;;  %v10832_v9 = vand.u32 2147483647, %v10054_v3 }
 0x3a7   :  { %v10106_v39 = vmul.u32.u64.low %v10083_v30, %v3931_v37  ;;  %v10107_v49 = vmul.u32.u64.high %v10083_v30, %v3931_v37, %v10106_v39  ;;  %v4019_v29 = vsel %vm4018_vm10, %v4017_v28, 0  ;;  %4926 = vsinq.f32 %v3433_v56 }
 0x3a8   :  { %vm3667_vm1 = vcmp.lt.s32.totalorder %v3666_v24, 2  ;;  %v3920_v16 = vsel %vm3916_vm13, %v3900_v34, %v3903_v45  ;;  %v3922_v15 = vsel %vm3918_vm0, %v3906_v25, %v3921_v43  ;;  %v3670_v23 = vsel %vm3668_vm2, %v4921_v33, %v3669_v1 }
 0x3a9   :  { %v3673_v54 = vsel %vm3671_vm5, %v3672_v59, %v4923_v26  ;;  %v4612_v46 = vmin.u32 %v3846_v4, %v10074_v61  ;;  %v4021_v13 = vand.u32 31, %v4019_v29  ;;  %v10117_v32 = vor.u32 %v3523_v48, %v3522_v21 }
 0x3aa   :  { %v10119_v37 = vadd.s32 127, %v3525_v41  ;;  %v10124_v56 = vsel %vm3678_vm14, %v3762_v42, %v9830_v58  ;;  %4928 = vcosq.f32 %v3764_v10  ;;  %v3923_v45 = vsel %vm3917_vm8, %v3920_v16, %v3922_v15 }
 0x3ab   :  { %v10129_v25 = vadd.f32 %v10002_v62, %v3999_v7  ;;  %v4014_v33 = vand.u32 8388607, %v10832_v9  ;;  %v4022_v26 = vsub.s32 32, %v4021_v13  ;;  %v10133_v21 = vpop.eup %4924  ;;  %v3674_v41 = vsel %vm3667_vm1, %v3670_v23, %v3673_v54 }
 0x3ac   :  { %11155 = vst [vmem:[#allocation32_spill] sm:$0xff] %v10133_v21  ;;  %4930 = vsinq.f32 %v3764_v10  ;;  %v4024_v48 = vshll.u32 %v10870_v57, %v4021_v13  ;;  %v4027_v58 = vshll.u32 %v11000_v53, %v4021_v13  ;;  %vm3664_vm4 = vweird.f32 %v9511_v35  ;;  %v11156_v35 = vld [vmem:[#allocation26_spill] sm:$0xff] }
 0x3ad   :  { %v3848_v5 = vclz %v4612_v46  ;;  %v4020_v42 = vshrl.u32 %v4019_v29, 5  ;;  %v4025_v59 = vshrl.u32 %v11000_v53, %v4022_v26  ;;  %v4028_v34 = vshrl.u32 %v11001_v40, %v4022_v26 }
 0x3ae   :  { %v3939_v28 = vmul.u32 %v10083_v30, %v3923_v45  ;;  %v3942_v24 = vadd.s32 1, %v10100_v17  ;;  %v4030_v1 = vshll.u32 %v11001_v40, %v4021_v13  ;;  %v4033_v10 = vshll.u32 %v10863_v52, %v4021_v13 }
 0x3af   :  { %vm3941_vm9 = vc.u32 %v10107_v49, %v10099_v20  ;;  %v4015_v4 = vor.u32 8388608, %v4014_v33  ;;  %v4023_v43 = vshrl.u32 %v10870_v57, %v4022_v26  ;;  %v4114_v31 = vand.u32 2139095040, %v10129_v25 }
 0x3b0   :  { %v4026_v7 = vor.u32 %v4025_v59, %v4024_v48  ;;  %v4029_v39 = vor.u32 %v4028_v34, %v4027_v58  ;;  %v4031_v29 = vshrl.u32 %v10863_v52, %v4022_v26  ;;  %v4034_v30 = vshrl.u32 %v10864_v8, %v4022_v26 }
 0x3b1   :  { %v4613_v16 = vadd.s32 4294967294, %v3848_v5  ;;  %v4036_v15 = vshll.u32 %v10864_v8, %v4021_v13  ;;  %v4037_v23 = vshrl.u32 %v10865_v14, %v4022_v26  ;;  %vm4039_vm12 = vcmp.lt.s32.totalorder %v4020_v42, 1 }
 0x3b2   :  { %v3943_v54 = vsel %vm3941_vm9, %v3942_v24, %v10100_v17  ;;  %v4032_v46 = vor.u32 %v4031_v29, %v4030_v1  ;;  %v4035_v45 = vor.u32 %v4034_v30, %v4033_v10  ;;  %vm4042_vm3 = vcmp.lt.s32.totalorder %v4020_v42, 4 }
 0x3b3   :  { %v4038_v33 = vor.u32 %v4037_v23, %v4036_v15  ;;  %vm4041_vm15 = vcmp.lt.s32.totalorder %v4020_v42, 3  ;;  %v4055_v48 = vshll.u32 %v4015_v4, 8  ;;  %v4115_v58 = vshrl.u32 %v4114_v31, 23 }
 0x3b4   :  { %vm4040_vm14 = vcmp.lt.s32.totalorder %v4020_v42, 2  ;;  %v4043_v59 = vsel %vm4039_vm12, %v4023_v43, %v4026_v7  ;;  %v4044_v34 = vsel %vm4042_vm3, %v4032_v46, 2102212464  ;;  %v4047_v5 = vsel %vm4039_vm12, %v4026_v7, %v4029_v39  ;;  %v10158_v13 = vpop.eup %4926 }
 0x3b5   :  { %v4045_v26 = vsel %vm4041_vm15, %v4029_v39, %v4044_v34  ;;  %v4048_v18 = vsel %vm4042_vm3, %v4035_v45, 920167782  ;;  %v4051_v17 = vsel %vm4039_vm12, %v4029_v39, %v4032_v46  ;;  %v4052_v24 = vsel %vm4042_vm3, %v4038_v33, 1326507024 }
 0x3b6   :  { %v3527_v1 = vshll.u32 %v10119_v37, 23  ;;  %v3765_v10 = vsel %vm10042_vm7, 0, %v10124_v56  ;;  %v10167_v4 = vstv %s10141_s3  ;;  %v4049_v43 = vsel %vm4041_vm15, %v4032_v46, %v4048_v18 }
 0x3b7   :  { %v10170_v31 = vpop.eup %4928  ;;  %vm4614_vm11 = vcmp.lt.s32.totalorder %v4613_v16, 0  ;;  %v4050_v7 = vsel %vm4040_vm14, %v4047_v5, %v4049_v43  ;;  %v4053_v29 = vsel %vm4041_vm15, %v4035_v45, %v4052_v24  ;;  %v4623_v30 = vadd.s32 4294967169, %v4115_v58 }
 0x3b8   :  { %v3675_v39 = vsel %vm3664_vm4, nan, %v3674_v41  ;;  %v10176_v37 = vadd.s32 %v3943_v54, %v3939_v28  ;;  %v4046_v11 = vsel %vm4040_vm14, %v4043_v59, %v4045_v26  ;;  %v4054_v56 = vsel %vm4040_vm14, %v4051_v17, %v4053_v29 }
 0x3b9   :  { %v10180_v15 = vpop.eup %4930  ;;  %v10182_v18 = vmul.u32.u64.low %v4055_v48, %v4054_v56  ;;  %v10183_v23 = vmul.u32.u64.high %v4055_v48, %v4054_v56, %v10182_v18  ;;  %v10185_v46 = vmul.u32.u64.low %v4055_v48, %v4050_v7  ;;  %v10186_v33 = vmul.u32.u64.high %v4055_v48, %v4050_v7, %v10185_v46 }
 0x3ba   :  { %v10189_v45 = vor.u32 4788187, %v3527_v1  ;;  %v3851_v58 = vsel %vm4614_vm11, 0, %v4613_v16  ;;  %v4000_v41 = vmul.f32 %v11156_v35, %v9980_v38  ;;  %v4121_v28 = vadd.s32 1, %v4623_v30 }
 0x3bb   :  { %v3769_v42 = vadd.s32 3, %v3765_v10  ;;  %v3836_v59 = vadd.s32 %v9900_v55, %v9917_v22  ;;  %v3866_v34 = vsub.s32 4, %v10038_v50  ;;  %v3852_v5 = vsub.s32 32, %v3851_v58 }
 0x3bc   :  { %v3989_v26 = vmul.f32 %v10167_v4, %v3675_v39  ;;  %v4062_v17 = vmul.u32 %v4055_v48, %v4046_v11  ;;  %vm4122_vm7 = vcmp.gt.s32.totalorder %v4121_v28, 0  ;;  %v3856_v24 = vsub.s32 4294967266, %v3851_v58  ;;  %v11157_v11 = vld [vmem:[#allocation42_spill] sm:$0xff] }
 0x3bd   :  { %v3945_v16 = vadd.s32 536870912, %v10176_v37  ;;  %vm4064_vm13 = vc.u32 %v10183_v23, %v10185_v46  ;;  %v4065_v1 = vadd.s32 1, %v10186_v33  ;;  %vm3782_vm0 = vcmp.lt.s32.totalorder %v9731_v44, 0 }
 0x3be   :  { %v10204_v10 = vadd.f32 %v10002_v62, %v4000_v41  ;;  %v10831_v55 = vand.u32 2147483647, %v10129_v25  ;;  %v4123_v22 = vsel %vm4122_vm7, %v4121_v28, 0  ;;  %v10207_v43 = vand.u32 3, %v3769_v42 }
 0x3bf   :  { %v10212_v48 = vsel %vm3782_vm0, %v3866_v34, %v10038_v50  ;;  %v4066_v7 = vsel %vm4064_vm13, %v4065_v1, %v10186_v33  ;;  %v4125_v29 = vand.u32 31, %v4123_v22  ;;  %v3853_v30 = vshll.u32 %v10074_v61, %v3851_v58 }
 0x3c0   :  { %v3854_v39 = vshrl.u32 %v3836_v59, %v3852_v5  ;;  %v10217_v56 = vadd.f32 %v3989_v26, %v11157_v11  ;;  %v4067_v18 = vadd.s32 %v4066_v7, %v4062_v17  ;;  %v3857_v41 = vadd.s32 127, %v3856_v24 }
 0x3c1   :  { %v10220_v28 = vshrl.u32 %v3945_v16, 30  ;;  %v4126_v42 = vsub.s32 32, %v4125_v29  ;;  %v4118_v50 = vand.u32 8388607, %v10831_v55  ;;  %v4128_v33 = vshll.u32 %v10870_v57, %v4125_v29 }
 0x3c2   :  { %v4068_v54 = vadd.s32 536870912, %v4067_v18  ;;  %v4218_v34 = vand.u32 2139095040, %v10204_v10  ;;  %v3773_v61 = vxor.u32 2147483648, %v10180_v15  ;;  %v4124_v58 = vshrl.u32 %v4123_v22, 5 }
 0x3c3   :  { %11158 = vst [vmem:[#allocation13_spill] sm:$0xff] %v10220_v28  ;;  %v4129_v59 = vshrl.u32 %v11000_v53, %v4126_v42  ;;  %v4131_v5 = vshll.u32 %v11000_v53, %v4125_v29  ;;  %v4132_v17 = vshrl.u32 %v11001_v40, %v4126_v42  ;;  %v4134_v24 = vshll.u32 %v11001_v40, %v4125_v29 }
 0x3c4   :  { %v10229_v26 = vshrl.u32 %v4068_v54, 30  ;;  %v4135_v16 = vshrl.u32 %v10863_v52, %v4126_v42  ;;  %v3855_v1 = vor.u32 %v3854_v39, %v3853_v30  ;;  %v3858_v7 = vshll.u32 %v3857_v41, 23 }
 0x3c5   :  { %v3947_v11 = vshll.u32 %v10220_v28, 30  ;;  %v4137_v55 = vshll.u32 %v10863_v52, %v4125_v29  ;;  %vm3772_vm8 = vcmp.eq.s32.totalorder %v10207_v43, 0  ;;  %vm3775_vm2 = vcmp.eq.s32.totalorder %v10207_v43, 2 }
 0x3c6   :  { %v4070_v22 = vshll.u32 %v10229_v26, 30  ;;  %v4119_v54 = vor.u32 8388608, %v4118_v50  ;;  %v4130_v9 = vor.u32 %v4129_v59, %v4128_v33  ;;  %v4219_v35 = vshrl.u32 %v4218_v34, 23 }
 0x3c7   :  { %v4133_v27 = vor.u32 %v4132_v17, %v4131_v5  ;;  %v4138_v60 = vshrl.u32 %v10864_v8, %v4126_v42  ;;  %v4140_v63 = vshll.u32 %v10864_v8, %v4125_v29  ;;  %v4141_v30 = vshrl.u32 %v10865_v14, %v4126_v42 }
 0x3c8   :  { %v10242_v39 = vsub.s32 %v4067_v18, %v4070_v22  ;;  %v4127_v41 = vshrl.u32 %v10870_v57, %v4126_v42  ;;  %v4136_v28 = vor.u32 %v4135_v16, %v4134_v24  ;;  %vm4143_vm5 = vcmp.lt.s32.totalorder %v4124_v58, 1  ;;  %v11159_v22 = vld [vmem:[#allocation29_spill] sm:$0xff] }
 0x3c9   :  { %v4139_v2 = vor.u32 %v4138_v60, %v4137_v55  ;;  %v4142_v21 = vor.u32 %v4141_v30, %v4140_v63  ;;  %vm4145_vm10 = vcmp.lt.s32.totalorder %v4124_v58, 3  ;;  %vm4146_vm1 = vcmp.lt.s32.totalorder %v4124_v58, 4 }
 0x3ca   :  { %v3859_v50 = vor.u32 4788187, %v3858_v7  ;;  %v4073_v33 = vsub.s32 0, %v10242_v39  ;;  %vm4144_vm4 = vcmp.lt.s32.totalorder %v4124_v58, 2  ;;  %v4148_v34 = vsel %vm4146_vm1, %v4136_v28, 2102212464 }
 0x3cb   :  { %v10248_v29 = vsub.s32 %v10176_v37, %v3947_v11  ;;  %v4151_v18 = vsel %vm4143_vm5, %v4130_v9, %v4133_v27  ;;  %v4152_v59 = vsel %vm4146_vm1, %v4139_v2, 920167782  ;;  %v4159_v42 = vshll.u32 %v4119_v54, 8 }
 0x3cc   :  { %vm3771_vm9 = vcmp.lt.s32.totalorder %v10207_v43, 2  ;;  %v4620_v63 = vmin.u32 %v4073_v33, %v10242_v39  ;;  %v4147_v60 = vsel %vm4143_vm5, %v4127_v41, %v4130_v9  ;;  %v4149_v55 = vsel %vm4145_vm10, %v4133_v27, %v4148_v34 }
 0x3cd   :  { %v4153_v5 = vsel %vm4145_vm10, %v4136_v28, %v4152_v59  ;;  %v4155_v37 = vsel %vm4143_vm5, %v4133_v27, %v4136_v28  ;;  %v4156_v24 = vsel %vm4146_vm1, %v4142_v21, 1326507024  ;;  %v4627_v16 = vadd.s32 4294967169, %v4219_v35 }
 0x3ce   :  { %v4154_v17 = vsel %vm4144_vm4, %v4151_v18, %v4153_v5  ;;  %v3860_v7 = vand.u32 2147483647, %v3859_v50  ;;  %v3862_v11 = vcvt.s32.f32 %v3855_v1  ;;  %v4001_v54 = vmul.f32 %v11159_v22, %v9980_v38 }
 0x3cf   :  { %v4075_v30 = vclz %v4620_v63  ;;  %v3950_v33 = vsub.s32 0, %v10248_v29  ;;  %v4157_v9 = vsel %vm4145_vm10, %v4139_v2, %v4156_v24  ;;  %v4150_v27 = vsel %vm4144_vm4, %v4147_v60, %v4149_v55 }
 0x3d0   :  { %v10264_v41 = vmul.u32.u64.low %v4159_v42, %v4154_v17  ;;  %v10265_v34 = vmul.u32.u64.high %v4159_v42, %v4154_v17, %v10264_v41  ;;  %v4158_v21 = vsel %vm4144_vm4, %v4155_v37, %v4157_v9  ;;  %v4225_v35 = vadd.s32 1, %v4627_v16 }
 0x3d1   :  { %v4621_v18 = vadd.s32 4294967294, %v4075_v30  ;;  %v3774_v28 = vsel %vm3772_vm8, %v10170_v31, %v3773_v61  ;;  %v11160_v38 = vxor.u32 2147483648, %v10170_v31  ;;  %v10281_v59 = vmul.f32 %v3862_v11, %v3860_v7 }
 0x3d2   :  { %v10278_v1 = vmul.u32.u64.low %v4159_v42, %v4158_v21  ;;  %v10279_v50 = vmul.u32.u64.high %v4159_v42, %v4158_v21, %v10278_v1  ;;  %v4063_v58 = vadd.s32 %v10185_v46, %v10183_v23  ;;  %vm4226_vm3 = vcmp.gt.s32.totalorder %v4225_v35, 0 }
 0x3d3   :  { %v3777_v2 = vsel %vm3775_vm2, %v11160_v38, %v10180_v15  ;;  %vm4622_vm12 = vcmp.lt.s32.totalorder %v4621_v18, 0  ;;  %v4616_v63 = vmin.u32 %v3950_v33, %v10248_v29  ;;  %v4166_v61 = vmul.u32 %v4159_v42, %v4150_v27 }
 0x3d4   :  { %v4078_v60 = vsel %vm4622_vm12, 0, %v4621_v18  ;;  %v4169_v55 = vadd.s32 1, %v10265_v34  ;;  %v4227_v17 = vsel %vm4226_vm3, %v4225_v35, 0  ;;  %v10289_v37 = vadd.f32 %v10002_v62, %v4001_v54 }
 0x3d5   :  { %v4079_v31 = vsub.s32 32, %v4078_v60  ;;  %v4080_v5 = vshll.u32 %v10242_v39, %v4078_v60  ;;  %v4083_v15 = vsub.s32 4294967266, %v4078_v60  ;;  %vm4009_vm15 = vcmp.lt.s32.totalorder %v10054_v3, 0 }
 0x3d6   :  { %vm4168_vm14 = vc.u32 %v10279_v50, %v10264_v41  ;;  %v10844_v23 = vand.u32 2147483647, %v10204_v10  ;;  %v10297_v46 = vadd.s32 %v10099_v20, %v10107_v49  ;;  %v10302_v16 = vsel %vm3771_vm9, %v3774_v28, %v3777_v2 }
 0x3d7   :  { %v4081_v42 = vshrl.u32 %v4063_v58, %v4079_v31  ;;  %v4084_v24 = vadd.s32 127, %v4083_v15  ;;  %v4170_v39 = vsel %vm4168_vm14, %v4169_v55, %v10265_v34  ;;  %v3864_v62 = vxor.u32 2147483648, %v10281_v59 }
 0x3d8   :  { %v4171_v7 = vadd.s32 %v4170_v39, %v4166_v61  ;;  %v4229_v11 = vand.u32 31, %v4227_v17  ;;  %v3952_v22 = vclz %v4616_v63  ;;  %v11161_v54 = vand.u32 2147483647, %v10054_v3 }
 0x3d9   :  { %v4082_v20 = vor.u32 %v4081_v42, %v4080_v5  ;;  %v4085_v49 = vshll.u32 %v4084_v24, 23  ;;  %v4093_v33 = vsub.s32 4, %v10229_v26  ;;  %v4222_v43 = vand.u32 8388607, %v10844_v23 }
 0x3da   :  { %vm10307_vm11 = vcmp.le.f32.partialorder %v11161_v54, 0.7853982  ;;  %v4172_v9 = vadd.s32 536870912, %v4171_v7  ;;  %v4228_v34 = vshrl.u32 %v4227_v17, 5  ;;  %v4230_v18 = vsub.s32 32, %v4229_v11 }
 0x3db   :  { %v4086_v27 = vor.u32 4788187, %v4085_v49  ;;  %v4089_v21 = vcvt.s32.f32 %v4082_v20  ;;  %v4232_v35 = vshll.u32 %v10870_v57, %v4229_v11  ;;  %v4235_v28 = vshll.u32 %v11000_v53, %v4229_v11 }
 0x3dc   :  { %v10316_v38 = vshrl.u32 %v4172_v9, 30  ;;  %v4233_v2 = vshrl.u32 %v11000_v53, %v4230_v18  ;;  %v4236_v1 = vshrl.u32 %v11001_v40, %v4230_v18  ;;  %v4238_v58 = vshll.u32 %v11001_v40, %v4229_v11 }
 0x3dd   :  { %v4087_v63 = vand.u32 2147483647, %v4086_v27  ;;  %v4239_v60 = vshrl.u32 %v10863_v52, %v4230_v18  ;;  %v4241_v61 = vshll.u32 %v10863_v52, %v4229_v11  ;;  %v4242_v55 = vshrl.u32 %v10864_v8, %v4230_v18 }
 0x3de   :  { %v4617_v31 = vadd.s32 4294967294, %v3952_v22  ;;  %v4094_v5 = vsel %vm4009_vm15, %v4093_v33, %v10229_v26  ;;  %v4174_v15 = vshll.u32 %v10316_v38, 30  ;;  %v4231_v17 = vshrl.u32 %v10870_v57, %v4230_v18 }
 0x3df   :  { %v4090_v42 = vmul.f32 %v4089_v21, %v4087_v63  ;;  %v4234_v24 = vor.u32 %v4233_v2, %v4232_v35  ;;  %v4243_v39 = vor.u32 %v4242_v55, %v4241_v61  ;;  %v4244_v54 = vshll.u32 %v10864_v8, %v4229_v11 }
 0x3e0   :  { %v10330_v20 = vsub.s32 %v4171_v7, %v4174_v15  ;;  %v4237_v49 = vor.u32 %v4236_v1, %v4235_v28  ;;  %v4240_v9 = vor.u32 %v4239_v60, %v4238_v58  ;;  %v4245_v27 = vshrl.u32 %v10865_v14, %v4230_v18 }
 0x3e1   :  { %v4091_v22 = vxor.u32 2147483648, %v4090_v42  ;;  %v4223_v23 = vor.u32 8388608, %v4222_v43  ;;  %vm4247_vm7 = vcmp.lt.s32.totalorder %v4228_v34, 1  ;;  %vm4250_vm13 = vcmp.lt.s32.totalorder %v4228_v34, 4 }
 0x3e2   :  { %v11164_v26 = vand.u32 2147483647, %v9731_v44  ;;  %v4177_v21 = vsub.s32 0, %v10330_v20  ;;  %v4246_v35 = vor.u32 %v4245_v27, %v4244_v54  ;;  %vm4249_vm2 = vcmp.lt.s32.totalorder %v4228_v34, 3 }
 0x3e3   :  { %v4252_v7 = vsel %vm4250_vm13, %v4240_v9, 2102212464  ;;  %v4092_v11 = vsel %vm4009_vm15, %v4091_v22, %v4090_v42  ;;  %vm4248_vm5 = vcmp.lt.s32.totalorder %v4228_v34, 2  ;;  %v4251_v43 = vsel %vm4247_vm7, %v4231_v17, %v4234_v24 }
 0x3e4   :  { %vm10335_vm8 = vcmp.le.f32.partialorder %v11164_v26, 0.7853982  ;;  %v4256_v18 = vsel %vm4250_vm13, %v4243_v39, 920167782  ;;  %v4095_v28 = vsel %vm10307_vm11, %v10054_v3, %v4092_v11  ;;  %v4624_v2 = vmin.u32 %v4177_v21, %v10330_v20 }
 0x3e5   :  { %v4253_v1 = vsel %vm4249_vm2, %v4237_v49, %v4252_v7  ;;  %v4255_v58 = vsel %vm4247_vm7, %v4234_v24, %v4237_v49  ;;  %4932 = vcosq.f32 %v4095_v28  ;;  %v4257_v63 = vsel %vm4249_vm2, %v4240_v9, %v4256_v18 }
 0x3e6   :  { %v4259_v60 = vsel %vm4247_vm7, %v4237_v49, %v4240_v9  ;;  %v4260_v61 = vsel %vm4250_vm13, %v4246_v35, 1326507024  ;;  %v3865_v55 = vsel %vm3782_vm0, %v3864_v62, %v10281_v59  ;;  %vm4618_vm10 = vcmp.lt.s32.totalorder %v4617_v31, 0 }
 0x3e7   :  { %4934 = vsinq.f32 %v4095_v28  ;;  %vm4113_vm1 = vcmp.lt.s32.totalorder %v10129_v25, 0  ;;  %v4179_v15 = vclz %v4624_v2  ;;  %v4096_v17 = vsel %vm10307_vm11, 0, %v4094_v5 }
 0x3e8   :  { %v4258_v42 = vsel %vm4248_vm5, %v4255_v58, %v4257_v63  ;;  %v4261_v24 = vsel %vm4249_vm2, %v4243_v39, %v4260_v61  ;;  %v4263_v54 = vshll.u32 %v4223_v23, 8  ;;  %v4254_v9 = vsel %vm4248_vm5, %v4251_v43, %v4253_v1 }
 0x3e9   :  { %v4625_v49 = vadd.s32 4294967294, %v4179_v15  ;;  %v4262_v27 = vsel %vm4248_vm5, %v4259_v60, %v4261_v24  ;;  %v4322_v59 = vand.u32 2139095040, %v10289_v37  ;;  %v10371_v30 = vsel %vm4618_vm10, 0, %v4617_v31 }
 0x3ea   :  { %v10365_v62 = vmul.u32.u64.low %v4263_v54, %v4262_v27  ;;  %v10366_v22 = vmul.u32.u64.high %v4263_v54, %v4262_v27, %v10365_v62  ;;  %v10368_v26 = vmul.u32.u64.low %v4263_v54, %v4258_v42  ;;  %v10369_v21 = vmul.u32.u64.high %v4263_v54, %v4258_v42, %v10368_v26 }
 0x3eb   :  { %v11167_v5 = vand.u32 2147483647, %v10129_v25  ;;  %v4167_v23 = vadd.s32 %v10264_v41, %v10279_v50  ;;  %vm4626_vm4 = vcmp.lt.s32.totalorder %v4625_v49, 0  ;;  %v4323_v34 = vshrl.u32 %v4322_v59, 23 }
 0x3ec   :  { %v4100_v35 = vadd.s32 3, %v4096_v17  ;;  %v4182_v7 = vsel %vm4626_vm4, 0, %v4625_v49  ;;  %v4197_v11 = vsub.s32 4, %v10316_v38  ;;  %v4270_v43 = vmul.u32 %v4263_v54, %v4254_v9 }
 0x3ed   :  { %vm10375_vm0 = vcmp.le.f32.partialorder %v11167_v5, 0.7853982  ;;  %v4183_v18 = vsub.s32 32, %v4182_v7  ;;  %v4184_v31 = vshll.u32 %v10330_v20, %v4182_v7  ;;  %v4187_v28 = vsub.s32 4294967266, %v4182_v7 }
 0x3ee   :  { %v4631_v2 = vadd.s32 4294967169, %v4323_v34  ;;  %v10386_v1 = vsel %vm10335_vm8, %v9731_v44, %v3865_v55  ;;  %v3956_v58 = vsub.s32 32, %v10371_v30  ;;  %vm4272_vm9 = vc.u32 %v10366_v22, %v10368_v26 }
 0x3ef   :  { %v4273_v41 = vadd.s32 1, %v10369_v21  ;;  %v4185_v50 = vshrl.u32 %v4167_v23, %v4183_v18  ;;  %v4188_v63 = vadd.s32 127, %v4187_v28  ;;  %v4319_v60 = vand.u32 2147483647, %v10289_v37 }
 0x3f0   :  { %v4329_v61 = vadd.s32 1, %v4631_v2  ;;  %v3960_v20 = vsub.s32 4294967266, %v10371_v30  ;;  %v10395_v15 = vand.u32 3, %v4100_v35  ;;  %v4198_v55 = vsel %vm4113_vm1, %v4197_v11, %v10316_v38 }
 0x3f1   :  { %v4274_v17 = vsel %vm4272_vm9, %v4273_v41, %v10369_v21  ;;  %v4186_v42 = vor.u32 %v4185_v50, %v4184_v31  ;;  %v4189_v24 = vshll.u32 %v4188_v63, 23  ;;  %4936 = vcosq.f32 %v10386_v1 }
 0x3f2   :  { %v4275_v54 = vadd.s32 %v4274_v17, %v4270_v43  ;;  %vm4330_vm12 = vcmp.gt.s32.totalorder %v4329_v61, 0  ;;  %v3957_v49 = vshll.u32 %v10248_v29, %v10371_v30  ;;  %v10405_v9 = vshrl.u32 %v10297_v46, %v3956_v58  ;;  %v4933_v59 = vpop.eup %4932 }
 0x3f3   :  { %v4331_v27 = vsel %vm4330_vm12, %v4329_v61, 0  ;;  %v4190_v62 = vor.u32 4788187, %v4189_v24  ;;  %v4193_v5 = vcvt.s32.f32 %v4186_v42  ;;  %v4326_v38 = vand.u32 8388607, %v4319_v60 }
 0x3f4   :  { %v4276_v23 = vadd.s32 536870912, %v4275_v54  ;;  %v4935_v21 = vpop.eup %4934  ;;  %v10409_v34 = vadd.s32 127, %v3960_v20  ;;  %vm4102_vm3 = vcmp.lt.s32.totalorder %v10395_v15, 2  ;;  %v4200_v35 = vsel %vm10375_vm0, 0, %v4198_v55 }
 0x3f5   :  { %v4333_v7 = vand.u32 31, %v4331_v27  ;;  %vm4103_vm15 = vcmp.eq.s32.totalorder %v10395_v15, 0  ;;  %vm4106_vm14 = vcmp.eq.s32.totalorder %v10395_v15, 2  ;;  %v4191_v46 = vand.u32 2147483647, %v4190_v62 }
 0x3f6   :  { %v10416_v11 = vshrl.u32 %v4276_v23, 30  ;;  %v4104_v43 = vxor.u32 2147483648, %v4935_v21  ;;  %v4107_v18 = vxor.u32 2147483648, %v4933_v59  ;;  %v10418_v31 = vshrl.u32 %v4331_v27, 5 }
 0x3f7   :  { %v4334_v28 = vsub.s32 32, %v4333_v7  ;;  %v4194_v2 = vmul.f32 %v4193_v5, %v4191_v46  ;;  %v4204_v58 = vadd.s32 3, %v4200_v35  ;;  %v4327_v50 = vor.u32 8388608, %v4326_v38 }
 0x3f8   :  { %v4278_v41 = vshll.u32 %v10416_v11, 30  ;;  %vm4099_vm11 = vweird.f32 %v10054_v3  ;;  %v10423_v63 = vadd.s32 %v10368_v26, %v10366_v22  ;;  %v4336_v61 = vshll.u32 %v10870_v57, %v4333_v7 }
 0x3f9   :  { %v4339_v20 = vshll.u32 %v11000_v53, %v4333_v7  ;;  %v10428_v55 = vstv %s10392_s11  ;;  %v4195_v17 = vxor.u32 2147483648, %v4194_v2  ;;  %v4337_v24 = vshrl.u32 %v11000_v53, %v4334_v28 }
 0x3fa   :  { %v10430_v42 = vsub.s32 %v4275_v54, %v4278_v41  ;;  %v4340_v27 = vshrl.u32 %v11001_v40, %v4334_v28  ;;  %v4105_v62 = vsel %vm4103_vm15, %v4933_v59, %v4104_v43  ;;  %v4108_v22 = vsel %vm4106_vm14, %v4107_v18, %v4935_v21 }
 0x3fb   :  { %v4342_v26 = vshll.u32 %v11001_v40, %v4333_v7  ;;  %vm4351_vm7 = vcmp.lt.s32.totalorder %v10418_v31, 1  ;;  %v4196_v5 = vsel %vm4113_vm1, %v4195_v17, %v4194_v2  ;;  %v4335_v23 = vshrl.u32 %v10870_v57, %v4334_v28 }
 0x3fc   :  { %v4281_v54 = vsub.s32 0, %v10430_v42  ;;  %v4343_v53 = vshrl.u32 %v10863_v52, %v4334_v28  ;;  %v4199_v59 = vsel %vm10375_vm0, %v10129_v25, %v4196_v5  ;;  %v4345_v38 = vshll.u32 %v10863_v52, %v4333_v7 }
 0x3fd   :  { %v4346_v21 = vshrl.u32 %v10864_v8, %v4334_v28  ;;  %v4348_v40 = vshll.u32 %v10864_v8, %v4333_v7  ;;  %4938 = vcosq.f32 %v4199_v59  ;;  %v4338_v46 = vor.u32 %v4337_v24, %v4336_v61 }
 0x3fe   :  { %v4628_v35 = vmin.u32 %v4281_v54, %v10430_v42  ;;  %v4341_v43 = vor.u32 %v4340_v27, %v4339_v20  ;;  %vm3768_vm13 = vweird.f32 %v11149_v36  ;;  %4940 = vsinq.f32 %v4199_v59  ;;  %v10454_v39 = vpop.eup %4936 }
 0x3ff   :  { %v4344_v57 = vor.u32 %v4343_v53, %v4342_v26  ;;  %v4347_v18 = vor.u32 %v4346_v21, %v4345_v38  ;;  %v4349_v2 = vshrl.u32 %v10865_v14, %v4334_v28  ;;  %v4109_v52 = vsel %vm4102_vm3, %v4105_v62, %v4108_v22 }
 0x400   :  { %v4283_v41 = vclz %v4628_v35  ;;  %vm4352_vm2 = vcmp.lt.s32.totalorder %v10418_v31, 2  ;;  %v4367_v8 = vshll.u32 %v4327_v50, 8  ;;  %vm4353_vm5 = vcmp.lt.s32.totalorder %v10418_v31, 3 }
 0x401   :  { %v4350_v7 = vor.u32 %v4349_v2, %v4348_v40  ;;  %vm4354_vm10 = vcmp.lt.s32.totalorder %v10418_v31, 4  ;;  %v4355_v61 = vsel %vm4351_vm7, %v4335_v23, %v4338_v46  ;;  %v4359_v14 = vsel %vm4351_vm7, %v4338_v46, %v4341_v43 }
 0x402   :  { %v4629_v20 = vadd.s32 4294967294, %v4283_v41  ;;  %v4356_v17 = vsel %vm4354_vm10, %v4344_v57, 2102212464  ;;  %v4360_v28 = vsel %vm4354_vm10, %v4347_v18, 920167782  ;;  %v4363_v27 = vsel %vm4351_vm7, %v4341_v43, %v4344_v57 }
 0x403   :  { %v4357_v15 = vsel %vm4353_vm5, %v4341_v43, %v4356_v17  ;;  %v4361_v24 = vsel %vm4353_vm5, %v4344_v57, %v4360_v28  ;;  %v4364_v50 = vsel %vm4354_vm10, %v4350_v7, 1326507024  ;;  %v4110_v62 = vsel %vm4099_vm11, nan, %v4109_v52 }
 0x404   :  { %vm4630_vm1 = vcmp.lt.s32.totalorder %v4629_v20, 0  ;;  %v4362_v22 = vsel %vm4352_vm2, %v4359_v14, %v4361_v24  ;;  %v4365_v26 = vsel %vm4353_vm5, %v4347_v18, %v4364_v50  ;;  %v4358_v3 = vsel %vm4352_vm2, %v4355_v61, %v4357_v15 }
 0x405   :  { %v4286_v5 = vsel %vm4630_vm1, 0, %v4629_v20  ;;  %v4366_v54 = vsel %vm4352_vm2, %v4363_v27, %v4365_v26  ;;  %v10473_v23 = vmul.u32.u64.low %v4367_v8, %v4362_v22  ;;  %v10474_v53 = vmul.u32.u64.high %v4367_v8, %v4362_v22, %v10473_v23 }
 0x406   :  { %v4287_v59 = vsub.s32 32, %v4286_v5  ;;  %v4288_v38 = vshll.u32 %v10430_v42, %v4286_v5  ;;  %v4291_v21 = vsub.s32 4294967266, %v4286_v5  ;;  %v4205_v40 = vand.u32 3, %v4204_v58 }
 0x407   :  { %v10480_v35 = vmul.u32.u64.low %v4367_v8, %v4366_v54  ;;  %v10481_v46 = vmul.u32.u64.high %v4367_v8, %v4366_v54, %v10480_v35  ;;  %v4424_v43 = vmul.f32 %v10428_v55, %v4110_v62  ;;  %v3869_v57 = vsel %vm10335_vm8, 0, %v10212_v48 }
 0x408   :  { %4942 = vsinq.f32 %v10386_v1  ;;  %v4289_v18 = vshrl.u32 %v10423_v63, %v4287_v59  ;;  %v4292_v2 = vadd.s32 127, %v4291_v21  ;;  %v3962_v42 = vshll.u32 %v10409_v34, 23 }
 0x409   :  { %v4374_v52 = vmul.u32 %v4367_v8, %v4358_v3  ;;  %v4377_v31 = vadd.s32 1, %v10474_v53  ;;  %v4428_v58 = vadd.f32 %v4424_v43, %v9991_v19  ;;  %v3779_v41 = vsel %vm3768_vm13, nan, %v10302_v16  ;;  %v11175_v3 = vld [vmem:[#allocation40_spill] sm:$0xff] }
 0x40a   :  { %v3959_v48 = vor.u32 %v10405_v9, %v3957_v49  ;;  %v4290_v33 = vor.u32 %v4289_v18, %v4288_v38  ;;  %v4293_v1 = vshll.u32 %v4292_v2, 23  ;;  %v4939_v63 = vpop.eup %4938  ;;  %vm4207_vm8 = vcmp.eq.s32.totalorder %v4205_v40, 0  ;;  %v11201_v38 = vld [vmem:[#allocation38_spill] sm:$0xff] }
 0x40b   :  { %vm4210_vm0 = vcmp.eq.s32.totalorder %v4205_v40, 2  ;;  %vm4376_vm4 = vc.u32 %v10481_v46, %v10473_v23  ;;  %v4432_v34 = vadd.f32 %v4428_v58, %v10217_v56  ;;  %v4941_v19 = vpop.eup %4940  ;;  %v4211_v8 = vxor.u32 2147483648, %v4939_v63 }
 0x40c   :  { %v4294_v7 = vor.u32 4788187, %v4293_v1  ;;  %v4297_v36 = vcvt.s32.f32 %v4290_v33  ;;  %v4378_v16 = vsel %vm4376_vm4, %v4377_v31, %v10474_v53  ;;  %v3963_v61 = vor.u32 4788187, %v3962_v42 }
 0x40d   :  { %vm4206_vm9 = vcmp.lt.s32.totalorder %v4205_v40, 2  ;;  %v4208_v29 = vxor.u32 2147483648, %v4941_v19  ;;  %v4379_v30 = vadd.s32 %v4378_v16, %v4374_v52  ;;  %4438 = vst [vmem:[%s10685_s4] sm:$0xff] %v4432_v34  ;;  %v3990_v49 = vmul.f32 %v10167_v4, %v3779_v41  ;;  %v11177_v41 = vld [vmem:[#allocation32_spill] sm:$0xff] }
 0x40e   :  { %vm4203_vm12 = vweird.f32 %v10129_v25  ;;  %v4212_v9 = vsel %vm4210_vm0, %v4211_v8, %v4941_v19  ;;  %v4295_v56 = vand.u32 2147483647, %v4294_v7  ;;  %v3529_v20 = vand.u32 2147483647, %v10189_v45  ;;  %v11170_v25 = vld [vmem:[#allocation14_spill] sm:$0xff] }
 0x40f   :  { %v3873_v17 = vadd.s32 3, %v3869_v57  ;;  %v4209_v14 = vsel %vm4207_vm8, %v4939_v63, %v4208_v29  ;;  %v4380_v28 = vadd.s32 536870912, %v4379_v30  ;;  %v3966_v15 = vcvt.s32.f32 %v3959_v48  ;;  %v11178_v63 = vld [vmem:[#allocation23_spill] sm:$0xff] }
 0x410   :  { %v4213_v24 = vsel %vm4206_vm9, %v4209_v14, %v4212_v9  ;;  %vm4217_vm3 = vcmp.lt.s32.totalorder %v10204_v10, 0  ;;  %v4298_v27 = vmul.f32 %v4297_v36, %v4295_v56  ;;  %v3964_v50 = vand.u32 2147483647, %v3963_v61  ;;  %v11179_v61 = vld [vmem:[#allocation34_spill] sm:$0xff] }
 0x411   :  { %v4214_v62 = vsel %vm4203_vm12, nan, %v4213_v24  ;;  %v4301_v22 = vsub.s32 4, %v10416_v11  ;;  %v10512_v26 = vshrl.u32 %v4380_v28, 30  ;;  %v3994_v5 = vadd.f32 %v3990_v49, %v11170_v25 }
 0x412   :  { %v11171_v54 = vand.u32 2147483647, %v10204_v10  ;;  %v4299_v53 = vxor.u32 2147483648, %v4298_v27  ;;  %v4425_v59 = vmul.f32 %v10428_v55, %v4214_v62  ;;  %v3102_v21 = vsel %vm9494_vm6, %v11113_v0, %v9977_v12 }
 0x413   :  { %v10528_v40 = vmul.f32 %v11175_v3, %v9970_v51  ;;  %v11176_v35 = vcvt.s32.f32 %v10117_v32  ;;  %v4382_v57 = vshll.u32 %v10512_v26, 30  ;;  %vm3441_vm14 = vcmp.eq.s32.totalorder %v9988_v47, 0 }
 0x414   :  { %vm10517_vm15 = vcmp.le.f32.partialorder %v11171_v54, 0.7853982  ;;  %v3874_v18 = vand.u32 3, %v3873_v17  ;;  %v4300_v2 = vsel %vm4217_vm3, %v4299_v53, %v4298_v27  ;;  %v4429_v42 = vadd.f32 %v4425_v59, %v10066_v6  ;;  %v11187_v27 = vld [vmem:[#allocation20_spill] sm:$0xff]  ;;  %v11189_v54 = vld [vmem:[#allocation39_spill] sm:$0xff] }
 0x415   :  { %v3532_v43 = vmul.f32 %v11176_v35, %v3529_v20  ;;  %v4943_v52 = vpop.eup %4942  ;;  %v3967_v31 = vmul.f32 %v3966_v15, %v3964_v50  ;;  %v4302_v51 = vsel %vm4217_vm3, %v4301_v22, %v10416_v11  ;;  %v4303_v12 = vsel %vm10517_vm15, %v10204_v10, %v4300_v2  ;;  %v11183_v20 = vld [vmem:[#allocation9_spill] sm:$0xff] }
 0x416   :  { %v10543_v32 = vsub.s32 %v4379_v30, %v4382_v57  ;;  %v3442_v58 = vxor.u32 2147483648, %v10158_v13  ;;  %v3445_v48 = vxor.u32 2147483648, %v11177_v41  ;;  %4944 = vcosq.f32 %v4303_v12  ;;  %v11188_v50 = vld [vmem:[#allocation33_spill] sm:$0xff] }
 0x417   :  { %v4433_v33 = vadd.f32 %v4429_v42, %v3994_v5  ;;  %vm3444_vm11 = vcmp.eq.s32.totalorder %v9988_v47, 2  ;;  %v3533_v6 = vxor.u32 2147483648, %v3532_v43  ;;  %4946 = vsinq.f32 %v4303_v12 }
 0x418   :  { %v4385_v1 = vsub.s32 0, %v10543_v32  ;;  %vm3451_vm7 = vcmp.lt.s32.totalorder %v11178_v63, 0  ;;  %v3877_v11 = vxor.u32 2147483648, %v4943_v52  ;;  %v3880_v34 = vxor.u32 2147483648, %v10454_v39 }
 0x419   :  { %v4304_v19 = vsel %vm10517_vm15, 0, %v4302_v51  ;;  %4439 = vst [vmem:[%s10685_s4 + $0x8] sm:$0xff] %v4433_v33  ;;  %vm3876_vm13 = vcmp.eq.s32.totalorder %v3874_v18, 0  ;;  %vm3879_vm2 = vcmp.eq.s32.totalorder %v3874_v18, 2  ;;  %v3968_v8 = vxor.u32 2147483648, %v3967_v31  ;;  %v11191_v51 = vld [vmem:[#allocation16_spill] sm:$0xff] }
 0x41a   :  { %v4632_v7 = vmin.u32 %v4385_v1, %v10543_v32  ;;  %vm3440_vm5 = vcmp.lt.s32.totalorder %v9988_v47, 2  ;;  %v3443_v36 = vsel %vm3441_vm14, %v11177_v41, %v3442_v58  ;;  %v3446_v16 = vsel %vm3444_vm11, %v3445_v48, %v10158_v13  ;;  %v11192_v33 = vld [vmem:[#allocation12_spill] sm:$0xff] }
 0x41b   :  { %vm3886_vm10 = vcmp.lt.s32.totalorder %v11179_v61, 0  ;;  %v11180_v29 = vand.u32 2147483647, %v11178_v63  ;;  %v3534_v49 = vsel %vm3451_vm7, %v3533_v6, %v3532_v43  ;;  %v4308_v9 = vadd.s32 3, %v4304_v19 }
 0x41c   :  { %v4387_v56 = vclz %v4632_v7  ;;  %vm3437_vm8 = vweird.f32 %v11183_v20  ;;  %vm3875_vm0 = vcmp.lt.s32.totalorder %v3874_v18, 2  ;;  %v3878_v47 = vsel %vm3876_vm13, %v10454_v39, %v3877_v11  ;;  %v11193_v7 = vld [vmem:[#allocation15_spill] sm:$0xff] }
 0x41d   :  { %vm10565_vm1 = vcmp.le.f32.partialorder %v11180_v29, 0.7853982  ;;  %v3881_v17 = vsel %vm3879_vm2, %v3880_v34, %v4943_v52  ;;  %v3447_v13 = vsel %vm3440_vm5, %v3443_v36, %v3446_v16  ;;  %v11184_v14 = vand.u32 2147483647, %v11179_v61  ;;  %v11194_v29 = vld [vmem:[#allocation25_spill] sm:$0xff] }
 0x41e   :  { %v3969_v15 = vsel %vm3886_vm10, %v3968_v8, %v3967_v31  ;;  %v4633_v24 = vadd.s32 4294967294, %v4387_v56  ;;  %vm1801_vm9 = vweird.f32 %v11187_v27  ;;  %4948 = vcosq.f32 %v3102_v21  ;;  %v11196_v56 = vld [vmem:[#allocation37_spill] sm:$0xff]  ;;  %v11200_v27 = vld [vmem:[#allocation36_spill] sm:$0xff] }
 0x41f   :  { %vm10575_vm4 = vcmp.le.f32.partialorder %v11184_v14, 0.7853982  ;;  %v3535_v62 = vsub.s32 4, %v11188_v50  ;;  %v3537_v39 = vsel %vm10565_vm1, %v11178_v63, %v3534_v49  ;;  %vm3872_vm12 = vweird.f32 %v9731_v44  ;;  %v11198_v14 = vld [vmem:[#allocation27_spill] sm:$0xff] }
 0x420   :  { %v3882_v22 = vsel %vm3875_vm0, %v3878_v47, %v3881_v17  ;;  %v4309_v25 = vand.u32 3, %v4308_v9  ;;  %v4375_v5 = vadd.s32 %v10473_v23, %v10481_v46  ;;  %vm4634_vm3 = vcmp.lt.s32.totalorder %v4633_v24, 0  ;;  %v11195_v9 = vld [vmem:[#allocation31_spill] sm:$0xff] }
 0x421   :  { %vm2239_vm15 = vcmp.lt.s32.totalorder %v11189_v54, 2  ;;  %4950 = vsinq.f32 %v3102_v21  ;;  %v3448_v45 = vsel %vm3437_vm8, nan, %v3447_v13  ;;  %v3972_v53 = vsel %vm10575_vm4, %v11179_v61, %v3969_v15  ;;  %v11190_v21 = vld [vmem:[#allocation13_spill] sm:$0xff] }
 0x422   :  { %v4390_v59 = vsel %vm4634_vm3, 0, %v4633_v24  ;;  %4952 = vcosq.f32 %v3537_v39  ;;  %v3536_v23 = vsel %vm3451_vm7, %v3535_v62, %v11188_v50  ;;  %v3883_v46 = vsel %vm3872_vm12, nan, %v3882_v22  ;;  %v11199_v62 = vld [vmem:[#allocation28_spill] sm:$0xff] }
 0x423   :  { %v4391_v35 = vsub.s32 32, %v4390_v59  ;;  %v4392_v43 = vshll.u32 %v10543_v32, %v4390_v59  ;;  %v4395_v57 = vsub.s32 4294967266, %v4390_v59  ;;  %4954 = vsinq.f32 %v3537_v39  ;;  %v4945_v2 = vpop.eup %4944 }
 0x424   :  { %v3970_v18 = vsub.s32 4, %v11190_v21  ;;  %4956 = vcosq.f32 %v3972_v53  ;;  %vm4314_vm14 = vcmp.eq.s32.totalorder %v4309_v25, 2  ;;  %v4947_v31 = vpop.eup %4946  ;;  %v3556_v12 = vmul.f32 %v11191_v51, %v3448_v45 }
 0x425   :  { %v4393_v42 = vshrl.u32 %v4375_v5, %v4391_v35  ;;  %v4396_v52 = vadd.s32 127, %v4395_v57  ;;  %4958 = vsinq.f32 %v3972_v53  ;;  %vm4311_vm11 = vcmp.eq.s32.totalorder %v4309_v25, 0 }
 0x426   :  { %v4315_v32 = vxor.u32 2147483648, %v4945_v2  ;;  %vm4310_vm13 = vcmp.lt.s32.totalorder %v4309_v25, 2  ;;  %v4312_v58 = vxor.u32 2147483648, %v4947_v31  ;;  %v3125_v44 = vadd.f32 %v10528_v40, %v11192_v33 }
 0x427   :  { %v4394_v41 = vor.u32 %v4393_v42, %v4392_v43  ;;  %v4397_v48 = vshll.u32 %v4396_v52, 23  ;;  %v3991_v6 = vmul.f32 %v10167_v4, %v3883_v46  ;;  %vm4307_vm7 = vweird.f32 %v10204_v10  ;;  %v11204_v46 = vld [vmem:[#allocation18_spill] sm:$0xff] }
 0x428   :  { %v4316_v1 = vsel %vm4314_vm14, %v4315_v32, %v4947_v31  ;;  %v3971_v11 = vsel %vm3886_vm10, %v3970_v18, %v11190_v21  ;;  %v4313_v34 = vsel %vm4311_vm11, %v4945_v2, %v4312_v58  ;;  %v2673_v36 = vand.u32 3, %v11193_v7  ;;  %v11205_v7 = vld [vmem:[#allocation24_spill] sm:$0xff] }
 0x429   :  { %v4398_v19 = vor.u32 4788187, %v4397_v48  ;;  %v4401_v8 = vcvt.s32.f32 %v4394_v41  ;;  %v3538_v16 = vsel %vm10565_vm1, 0, %v3536_v23  ;;  %v3560_v49 = vadd.f32 %v3556_v12, %v11194_v29 }
 0x42a   :  { %v4317_v40 = vsel %vm4310_vm13, %v4313_v34, %v4316_v1  ;;  %v10617_v10 = vsel %vm1801_vm9, nan, %v11195_v9  ;;  %v11197_v20 = vsel %vm9494_vm6, 0, %v11196_v56  ;;  %vm2236_vm2 = vweird.f32 %v11198_v14  ;;  %v11206_v9 = vld [vmem:[#allocation17_spill] sm:$0xff]  ;;  %v11207_v56 = vld [vmem:[#allocation22_spill] sm:$0xff] }
 0x42b   :  { %v3107_v47 = vadd.s32 3, %v11197_v20  ;;  %v4318_v17 = vsel %vm4307_vm7, nan, %v4317_v40  ;;  %v4399_v13 = vand.u32 2147483647, %v4398_v19  ;;  %v3973_v30 = vsel %vm10575_vm4, 0, %v3971_v11  ;;  %v4949_v50 = vpop.eup %4948 }
 0x42c   :  { %v3995_v15 = vadd.f32 %v3991_v6, %v3125_v44  ;;  %v4426_v24 = vmul.f32 %v10428_v55, %v4318_v17  ;;  %v2246_v39 = vsel %vm2239_vm15, %v11200_v27, %v11199_v62  ;;  %v2679_v22 = vxor.u32 2147483648, %v11201_v38  ;;  %v11211_v62 = vld [vmem:[#allocation11_spill] sm:$0xff] }
 0x42d   :  { %v3542_v25 = vadd.s32 3, %v3538_v16  ;;  %v4402_v5 = vmul.f32 %v4401_v8, %v4399_v13  ;;  %vm2678_vm6 = vcmp.eq.s32.totalorder %v2673_v36, 2  ;;  %vm4321_vm5 = vcmp.lt.s32.totalorder %v10289_v37, 0 }
 0x42e   :  { %v4405_v45 = vsub.s32 4, %v10512_v26  ;;  %v4430_v28 = vadd.f32 %v4426_v24, %v3560_v49  ;;  %v4951_v53 = vpop.eup %4950  ;;  %v3108_v59 = vand.u32 3, %v3107_v47  ;;  %v3977_v35 = vadd.s32 3, %v3973_v30  ;;  %v11208_v47 = vld [vmem:[#allocation30_spill] sm:$0xff]  ;;  %v11210_v24 = vld [vmem:[#allocation19_spill] sm:$0xff] }
 0x42f   :  { %vm10636_vm10 = vcmp.le.f32.partialorder %v4319_v60, 0.7853982  ;;  %v4403_v54 = vxor.u32 2147483648, %v4402_v5  ;;  %v4953_v57 = vpop.eup %4952  ;;  %v2247_v23 = vsel %vm2236_vm2, nan, %v2246_v39  ;;  %vm2674_vm1 = vcmp.lt.s32.totalorder %v2673_v36, 2 }
 0x430   :  { %v2676_v21 = vxor.u32 2147483648, %v11204_v46  ;;  %v4434_v18 = vadd.f32 %v4430_v28, %v3995_v15  ;;  %v4955_v2 = vpop.eup %4954  ;;  %vm2675_vm8 = vcmp.eq.s32.totalorder %v2673_v36, 0  ;;  %v2680_v42 = vsel %vm2678_vm6, %v2679_v22, %v11204_v46  ;;  %v11209_v15 = vld [vmem:[#allocation10_spill] sm:$0xff] }
 0x431   :  { %v3543_v52 = vand.u32 3, %v3542_v25  ;;  %v4404_v60 = vsel %vm4321_vm5, %v4403_v54, %v4402_v5  ;;  %v4957_v31 = vpop.eup %4956  ;;  %v3111_v12 = vxor.u32 2147483648, %v4951_v53  ;;  %v3114_v32 = vxor.u32 2147483648, %v4949_v50 }
 0x432   :  { %v4406_v58 = vsel %vm4321_vm5, %v4405_v45, %v10512_v26  ;;  %v4407_v41 = vsel %vm10636_vm10, %v10289_v37, %v4404_v60  ;;  %4440 = vst [vmem:[%s10685_s4 + $0x10] sm:$0xff] %v4434_v18  ;;  %v4959_v48 = vpop.eup %4958  ;;  %vm3110_vm0 = vcmp.eq.s32.totalorder %v3108_v59, 0  ;;  %vm3113_vm4 = vcmp.eq.s32.totalorder %v3108_v59, 2 }
 0x433   :  { %v3978_v33 = vand.u32 3, %v3977_v35  ;;  %4960 = vcosq.f32 %v4407_v41  ;;  %v2677_v44 = vsel %vm2675_vm8, %v11201_v38, %v2676_v21  ;;  %v3546_v6 = vxor.u32 2147483648, %v4955_v2 }
 0x434   :  { %v3549_v1 = vxor.u32 2147483648, %v4953_v57  ;;  %4962 = vsinq.f32 %v4407_v41  ;;  %vm3109_vm9 = vcmp.lt.s32.totalorder %v3108_v59, 2  ;;  %vm3545_vm12 = vcmp.eq.s32.totalorder %v3543_v52, 0 }
 0x435   :  { %vm3548_vm3 = vcmp.eq.s32.totalorder %v3543_v52, 2  ;;  %v4408_v26 = vsel %vm10636_vm10, 0, %v4406_v58  ;;  %v3112_v11 = vsel %vm3110_vm0, %v4949_v50, %v3111_v12  ;;  %v3115_v34 = vsel %vm3113_vm4, %v3114_v32, %v4951_v53 }
 0x436   :  { %v3981_v19 = vxor.u32 2147483648, %v4959_v48  ;;  %v3984_v8 = vxor.u32 2147483648, %v4957_v31  ;;  %vm2671_vm15 = vweird.f32 %v11205_v7  ;;  %v2681_v16 = vsel %vm2674_vm1, %v2677_v44, %v2680_v42 }
 0x437   :  { %vm3980_vm14 = vcmp.eq.s32.totalorder %v3978_v33, 0  ;;  %vm3983_vm11 = vcmp.eq.s32.totalorder %v3978_v33, 2  ;;  %vm3544_vm13 = vcmp.lt.s32.totalorder %v3543_v52, 2  ;;  %v3547_v29 = vsel %vm3545_vm12, %v4953_v57, %v3546_v6 }
 0x438   :  { %v3550_v49 = vsel %vm3548_vm3, %v3549_v1, %v4955_v2  ;;  %v4412_v40 = vadd.s32 3, %v4408_v26  ;;  %v951_v20 = vmul.f32 %v11207_v56, %v11206_v9  ;;  %v1817_v17 = vmul.f32 %v11208_v47, %v10617_v10  ;;  %v11212_v10 = vld [vmem:[#allocation35_spill] sm:$0xff] }
 0x439   :  { %vm3106_vm7 = vweird.f32 %v11113_v0  ;;  %v3116_v13 = vsel %vm3109_vm9, %v3112_v11, %v3115_v34  ;;  %v2682_v14 = vsel %vm2671_vm15, nan, %v2681_v16  ;;  %vm3979_vm2 = vcmp.lt.s32.totalorder %v3978_v33, 2 }
 0x43a   :  { %v3982_v36 = vsel %vm3980_vm14, %v4957_v31, %v3981_v19  ;;  %v3985_v30 = vsel %vm3983_vm11, %v3984_v8, %v4959_v48  ;;  %v1386_v50 = vadd.f32 %v11210_v24, %v11209_v15  ;;  %v2252_v27 = vmul.f32 %v11211_v62, %v2247_v23 }
 0x43b   :  { %vm3541_vm6 = vweird.f32 %v11178_v63  ;;  %v3551_v39 = vsel %vm3544_vm13, %v3547_v29, %v3550_v49  ;;  %v3117_v38 = vsel %vm3106_vm7, nan, %v3116_v13  ;;  %v4413_v22 = vand.u32 3, %v4412_v40 }
 0x43c   :  { %v1821_v25 = vadd.f32 %v1817_v17, %v951_v20  ;;  %v2687_v5 = vmul.f32 %v11212_v10, %v2682_v14  ;;  %vm3976_vm5 = vweird.f32 %v11179_v61  ;;  %v3986_v0 = vsel %vm3979_vm2, %v3982_v36, %v3985_v30 }
 0x43d   :  { %v3552_v45 = vsel %vm3541_vm6, nan, %v3551_v39  ;;  %v2256_v28 = vadd.f32 %v2252_v27, %v1386_v50  ;;  %v3122_v53 = vmul.f32 %v11175_v3, %v3117_v38  ;;  %v3987_v35 = vsel %vm3976_vm5, nan, %v3986_v0 }
 0x43e   :  { %vm4418_vm10 = vcmp.eq.s32.totalorder %v4413_v22, 2  ;;  %v2691_v54 = vadd.f32 %v2687_v5, %v1821_v25  ;;  %v3557_v63 = vmul.f32 %v11191_v51, %v3552_v45  ;;  %vm4415_vm1 = vcmp.eq.s32.totalorder %v4413_v22, 0 }
 0x43f   :  { %vm4414_vm8 = vcmp.lt.s32.totalorder %v4413_v22, 2  ;;  %v3126_v46 = vadd.f32 %v3122_v53, %v2256_v28  ;;  %v3992_v21 = vmul.f32 %v10167_v4, %v3987_v35  ;;  %vm4411_vm0 = vweird.f32 %v10289_v37 }
 0x440   :  { %v4961_v59 = vpop.eup %4960  ;;  %v3561_v2 = vadd.f32 %v3557_v63, %v2691_v54 }
 0x441   :  { %v4963_v43 = vpop.eup %4962  ;;  %v4419_v57 = vxor.u32 2147483648, %v4961_v59  ;;  %v3996_v52 = vadd.f32 %v3992_v21, %v3126_v46 }
 0x442   :  { %v4416_v23 = vxor.u32 2147483648, %v4963_v43 }
 0x443   :  { %v4420_v61 = vsel %vm4418_vm10, %v4419_v57, %v4963_v43 }
 0x444   :  { %v4417_v18 = vsel %vm4415_vm1, %v4961_v59, %v4416_v23 }
 0x445   :  { %v4421_v3 = vsel %vm4414_vm8, %v4417_v18, %v4420_v61 }
 0x446   :  { %v4422_v42 = vsel %vm4411_vm0, nan, %v4421_v3 }
 0x447   :  { %v4427_v60 = vmul.f32 %v10428_v55, %v4422_v42 }
 0x449   :  { %v4431_v31 = vadd.f32 %v4427_v60, %v3561_v2 }
 0x44b   :  { %v4435_v12 = vadd.f32 %v4431_v31, %v3996_v52 }
 0x44d   :  { %4441 = vst [vmem:[%s10685_s4 + $0x18] sm:$0xff] %v4435_v12 }
 0x44e   :  { %4446 = vsyncpa [#allocation3], 1 }
 0x44f   :  { %4447 = vsyncpa [#allocation5], 1 }

</bundles_post_ra>
